<compile_context>
chip_gen: v6e
topology: v6e:2x2x1
jax: 0.10.0
libtpu: 0.0.40
codegen_flags: <defaults>
</compile_context>

<pallas_src>
import math

import jax
import jax.numpy as jnp
from jax.experimental import pallas as pl
from jax.experimental.pallas import tpu as pltpu

_IN_F = 784       # true input features
_IN_PAD = 896     # 7 * 128 (lane-aligned K for fc1)
_H = 1600         # hidden width
_OUT_F = 10       # true logits
_OUT_PAD = 128    # lane-aligned output width


def _round_up(x, m):
    return ((x + m - 1) // m) * m


# ----------------------------------------------------------------------------
# Kernel: one batch tile through the whole 3-layer MLP.
# Weights arrive as bf16 VMEM-resident blocks; MXU accumulates in f32.
# ----------------------------------------------------------------------------
def _mlp_kernel(x_ref, w1_ref, b1_ref, w2_ref, b2_ref, w3_ref, b3_ref, o_ref):
    # fc1 + ReLU
    h1 = jnp.dot(x_ref[...], w1_ref[...], preferred_element_type=jnp.float32)
    h1 = jnp.maximum(h1 + b1_ref[...], 0.0).astype(jnp.bfloat16)
    # fc2 + ReLU
    h2 = jnp.dot(h1, w2_ref[...], preferred_element_type=jnp.float32)
    h2 = jnp.maximum(h2 + b2_ref[...], 0.0).astype(jnp.bfloat16)
    # fc3 (lane-padded to 128 output columns; extra columns are exact zeros)
    out = jnp.dot(h2, w3_ref[...], preferred_element_type=jnp.float32)
    o_ref[...] = (out + b3_ref[...]).astype(o_ref.dtype)


def _prepare_padded_params(params):
    """Cast weights to bf16 and zero-pad to lane-friendly shapes."""
    w1 = jnp.pad(params["w1"].astype(jnp.bfloat16),
                 ((0, _IN_PAD - _IN_F), (0, 0)))                 # (896, 1600)
    w2 = params["w2"].astype(jnp.bfloat16)                       # (1600, 1600)
    w3 = jnp.pad(params["w3"].astype(jnp.bfloat16),
                 ((0, 0), (0, _OUT_PAD - _OUT_F)))               # (1600, 128)
    b1 = params["b1"].astype(jnp.float32)                        # (1, 1600)
    b2 = params["b2"].astype(jnp.float32)                        # (1, 1600)
    b3 = jnp.pad(params["b3"].astype(jnp.float32),
                 ((0, 0), (0, _OUT_PAD - _OUT_F)))               # (1, 128)
    return w1, b1, w2, b2, w3, b3


def fc_net3_forward(x_nchw, params, *, tile_b=256):
    """Forward pass matching FC_Net3.forward.

    x_nchw: (B, C, H, W) with C*H*W == 784
    params: dict with w1 (784,1600), b1 (1,1600), w2 (1600,1600), b2 (1,1600),
            w3 (1600,10), b3 (1,10)  (float32; cast/padded internally)
    tile_b: batch tile (256 default works on v5e/v6e/v7x; v6e can use 512+).
    """
    B = x_nchw.shape[0]
    x = x_nchw.reshape(B, -1)  # torch.flatten(x, 1)
    assert x.shape[1] == _IN_F, f"expected {_IN_F} features, got {x.shape[1]}"

    # Keep the tile a multiple of 8 sublanes and no larger than needed.
    tile_b = min(tile_b, _round_up(B, 8))
    b_pad = _round_up(B, tile_b)

    # Zero-pad batch rows and feature lanes (784 -> 896); cast to bf16.
    x = jnp.pad(x, ((0, b_pad - B), (0, _IN_PAD - _IN_F))).astype(jnp.bfloat16)

    w1, b1, w2, b2, w3, b3 = _prepare_padded_params(params)

    grid = (b_pad // tile_b,)
    out = pl.pallas_call(
        _mlp_kernel,
        out_shape=jax.ShapeDtypeStruct((b_pad, _OUT_PAD), jnp.float32),
        grid_spec=pltpu.PrefetchScalarGridSpec(
            num_scalar_prefetch=0,
            grid=grid,
            in_specs=[
                pl.BlockSpec((tile_b, _IN_PAD), lambda i: (i, 0)),   # x tile
                pl.BlockSpec((_IN_PAD, _H), lambda i: (0, 0)),       # w1 (resident)
                pl.BlockSpec((1, _H), lambda i: (0, 0)),             # b1 (resident)
                pl.BlockSpec((_H, _H), lambda i: (0, 0)),            # w2 (resident)
                pl.BlockSpec((1, _H), lambda i: (0, 0)),             # b2 (resident)
                pl.BlockSpec((_H, _OUT_PAD), lambda i: (0, 0)),      # w3 (resident)
                pl.BlockSpec((1, _OUT_PAD), lambda i: (0, 0)),       # b3 (resident)
            ],
            out_specs=pl.BlockSpec((tile_b, _OUT_PAD), lambda i: (i, 0)),
        ),
        compiler_params=pltpu.CompilerParams(
            dimension_semantics=("parallel",),       # shards tiles across v7x's 2 TCs
            vmem_limit_bytes=48 * 1024 * 1024,       # fits v7x's 64 MiB physical VMEM
        ),
    )(x, w1, b1, w2, b2, w3, b3)

    # Drop batch/lane padding.
    return out[:B, :_OUT_F]


# ----------------------------------------------------------------------------
# Deterministic parameter init matching nn.Linear's default:
# U(-1/sqrt(fan_in), 1/sqrt(fan_in)) for both weight and bias.
# Weights are created as (in, out) directly (transpose of nn.Linear.weight).
# ----------------------------------------------------------------------------
def init_params(key):
    def linear_init(key, fan_in, fan_out):
        kw, kb = jax.random.split(key)
        bound = 1.0 / math.sqrt(fan_in)
        w = jax.random.uniform(kw, (fan_in, fan_out), jnp.float32, -bound, bound)
        b = jax.random.uniform(kb, (1, fan_out), jnp.float32, -bound, bound)
        return w, b

    k1, k2, k3 = jax.random.split(key, 3)
    w1, b1 = linear_init(k1, _IN_F, _H)
    w2, b2 = linear_init(k2, _H, _H)
    w3, b3 = linear_init(k3, _H, _OUT_F)
    return {"w1": w1, "b1": b1, "w2": w2, "b2": b2, "w3": w3, "b3": b3}


def _reference_forward(x_nchw, params):
    """Matched-precision plain-JAX reference (bf16 operands, f32 accumulation)."""
    x = x_nchw.reshape(x_nchw.shape[0], -1).astype(jnp.bfloat16)
    w1 = params["w1"].astype(jnp.bfloat16)
    w2 = params["w2"].astype(jnp.bfloat16)
    w3 = params["w3"].astype(jnp.bfloat16)
    h = jnp.dot(x, w1, preferred_element_type=jnp.float32) + params["b1"]
    h = jnp.maximum(h, 0.0).astype(jnp.bfloat16)
    h = jnp.dot(h, w2, preferred_element_type=jnp.float32) + params["b2"]
    h = jnp.maximum(h, 0.0).astype(jnp.bfloat16)
    return jnp.dot(h, w3, preferred_element_type=jnp.float32) + params["b3"]


if __name__ == "__main__":
    key = jax.random.PRNGKey(0)
    k_params, k_x = jax.random.split(key)

    params = init_params(k_params)

    # Small MNIST-shaped batch: (B, C, H, W) = (2, 1, 28, 28) -> 784 features.
    x = jax.random.normal(k_x, (2, 1, 28, 28), dtype=jnp.float32)

    out = fc_net3_forward(x, params)
    out = jax.block_until_ready(out)

    ref = _reference_forward(x, params)
    assert out.shape == (2, 10), out.shape
    assert jnp.allclose(out, ref, atol=2e-3, rtol=2e-3), "mismatch vs reference"

    print("KERNEL_OK")
</pallas_src>

<mosaic_0001>
module attributes {stable_mosaic.version = 11 : i64} {
  func.func @_mlp_kernel(%arg0: i32, %arg1: memref<8x896xbf16, #tpu.memory_space<vmem>>, %arg2: memref<896x1600xbf16, #tpu.memory_space<vmem>>, %arg3: memref<1x1600xf32, #tpu.memory_space<vmem>>, %arg4: memref<1600x1600xbf16, #tpu.memory_space<vmem>>, %arg5: memref<1x1600xf32, #tpu.memory_space<vmem>>, %arg6: memref<1600x128xbf16, #tpu.memory_space<vmem>>, %arg7: memref<1x128xf32, #tpu.memory_space<vmem>>, %arg8: memref<8x128xf32, #tpu.memory_space<vmem>>) attributes {dimension_semantics = [#tpu.dimension_semantics<parallel>], iteration_bounds = array<i64: 1>, scalar_prefetch = 0 : i64, scratch_operands = 0 : i64, tpu.core_type = #tpu.core_type<tc>, window_params = [{transform_indices = @transform_0, window_bounds = array<i64: 8, 896>}, {pipeline_mode = #tpu.pipeline_mode<synchronous>, transform_indices = @transform_1, window_bounds = array<i64: 896, 1600>}, {pipeline_mode = #tpu.pipeline_mode<synchronous>, transform_indices = @transform_2, window_bounds = array<i64: 1, 1600>}, {pipeline_mode = #tpu.pipeline_mode<synchronous>, transform_indices = @transform_3, window_bounds = array<i64: 1600, 1600>}, {pipeline_mode = #tpu.pipeline_mode<synchronous>, transform_indices = @transform_4, window_bounds = array<i64: 1, 1600>}, {pipeline_mode = #tpu.pipeline_mode<synchronous>, transform_indices = @transform_5, window_bounds = array<i64: 1600, 128>}, {pipeline_mode = #tpu.pipeline_mode<synchronous>, transform_indices = @transform_6, window_bounds = array<i64: 1, 128>}, {transform_indices = @transform_7, window_bounds = array<i64: 8, 128>}]} {
    %c0 = arith.constant 0 : index
    %c0_0 = arith.constant 0 : index
    %0 = vector.load %arg1[%c0, %c0_0] : memref<8x896xbf16, #tpu.memory_space<vmem>>, vector<8x896xbf16>
    %c0_1 = arith.constant 0 : index
    %c0_2 = arith.constant 0 : index
    %1 = vector.load %arg2[%c0_1, %c0_2] : memref<896x1600xbf16, #tpu.memory_space<vmem>>, vector<896x1600xbf16>
    %cst = arith.constant dense<0.000000e+00> : vector<8x1600xf32>
    %2 = tpu.matmul %0, %1, %cst {dimension_numbers = #tpu.dot_dimension_numbers<[1], [0], [0], [1], [0, 0, 1, 1], [], []>} : vector<8x896xbf16>, vector<896x1600xbf16>, vector<8x1600xf32> -> vector<8x1600xf32>
    %c0_3 = arith.constant 0 : index
    %c0_4 = arith.constant 0 : index
    %3 = vector.load %arg3[%c0_3, %c0_4] : memref<1x1600xf32, #tpu.memory_space<vmem>>, vector<1x1600xf32>
    %4 = vector.broadcast %3 : vector<1x1600xf32> to vector<8x1600xf32>
    %5 = arith.addf %2, %4 : vector<8x1600xf32>
    %cst_5 = arith.constant 0.000000e+00 : f32
    %6 = vector.broadcast %cst_5 : f32 to vector<8x1600xf32>
    %7 = arith.maximumf %5, %6 : vector<8x1600xf32>
    %8 = arith.truncf %7 : vector<8x1600xf32> to vector<8x1600xbf16>
    %c0_6 = arith.constant 0 : index
    %c0_7 = arith.constant 0 : index
    %9 = vector.load %arg4[%c0_6, %c0_7] : memref<1600x1600xbf16, #tpu.memory_space<vmem>>, vector<1600x1600xbf16>
    %cst_8 = arith.constant dense<0.000000e+00> : vector<8x1600xf32>
    %10 = tpu.matmul %8, %9, %cst_8 {dimension_numbers = #tpu.dot_dimension_numbers<[1], [0], [0], [1], [0, 0, 1, 1], [], []>} : vector<8x1600xbf16>, vector<1600x1600xbf16>, vector<8x1600xf32> -> vector<8x1600xf32>
    %c0_9 = arith.constant 0 : index
    %c0_10 = arith.constant 0 : index
    %11 = vector.load %arg5[%c0_9, %c0_10] : memref<1x1600xf32, #tpu.memory_space<vmem>>, vector<1x1600xf32>
    %12 = vector.broadcast %11 : vector<1x1600xf32> to vector<8x1600xf32>
    %13 = arith.addf %10, %12 : vector<8x1600xf32>
    %cst_11 = arith.constant 0.000000e+00 : f32
    %14 = vector.broadcast %cst_11 : f32 to vector<8x1600xf32>
    %15 = arith.maximumf %13, %14 : vector<8x1600xf32>
    %16 = arith.truncf %15 : vector<8x1600xf32> to vector<8x1600xbf16>
    %c0_12 = arith.constant 0 : index
    %c0_13 = arith.constant 0 : index
    %17 = vector.load %arg6[%c0_12, %c0_13] : memref<1600x128xbf16, #tpu.memory_space<vmem>>, vector<1600x128xbf16>
    %cst_14 = arith.constant dense<0.000000e+00> : vector<8x128xf32>
    %18 = tpu.matmul %16, %17, %cst_14 {dimension_numbers = #tpu.dot_dimension_numbers<[1], [0], [0], [1], [0, 0, 1, 1], [], []>} : vector<8x1600xbf16>, vector<1600x128xbf16>, vector<8x128xf32> -> vector<8x128xf32>
    %c0_15 = arith.constant 0 : index
    %c0_16 = arith.constant 0 : index
    %19 = vector.load %arg7[%c0_15, %c0_16] : memref<1x128xf32, #tpu.memory_space<vmem>>, vector<1x128xf32>
    %20 = vector.broadcast %19 : vector<1x128xf32> to vector<8x128xf32>
    %21 = arith.addf %18, %20 : vector<8x128xf32>
    %c0_17 = arith.constant 0 : index
    %c0_18 = arith.constant 0 : index
    %22 = vector.load %arg8[%c0_17, %c0_18] : memref<8x128xf32, #tpu.memory_space<vmem>>, vector<8x128xf32>
    tpu.vector_store %arg8[%c0_17, %c0_18], %21 {strides = array<i32>} : memref<8x128xf32, #tpu.memory_space<vmem>>, vector<8x128xf32>,
    return
  }
  func.func @transform_0(%arg0: i32) -> (i32, i32) {
    %c0_i32 = arith.constant 0 : i32
    %c0_i32_0 = arith.constant 0 : i32
    return %arg0, %c0_i32 : i32, i32
  }
  func.func @transform_1(%arg0: i32) -> (i32, i32) {
    %c0_i32 = arith.constant 0 : i32
    %c0_i32_0 = arith.constant 0 : i32
    %c0_i32_1 = arith.constant 0 : i32
    return %c0_i32, %c0_i32_0 : i32, i32
  }
  func.func @transform_2(%arg0: i32) -> (i32, i32) {
    %c0_i32 = arith.constant 0 : i32
    %c0_i32_0 = arith.constant 0 : i32
    %c0_i32_1 = arith.constant 0 : i32
    return %c0_i32, %c0_i32_0 : i32, i32
  }
  func.func @transform_3(%arg0: i32) -> (i32, i32) {
    %c0_i32 = arith.constant 0 : i32
    %c0_i32_0 = arith.constant 0 : i32
    %c0_i32_1 = arith.constant 0 : i32
    return %c0_i32, %c0_i32_0 : i32, i32
  }
  func.func @transform_4(%arg0: i32) -> (i32, i32) {
    %c0_i32 = arith.constant 0 : i32
    %c0_i32_0 = arith.constant 0 : i32
    %c0_i32_1 = arith.constant 0 : i32
    return %c0_i32, %c0_i32_0 : i32, i32
  }
  func.func @transform_5(%arg0: i32) -> (i32, i32) {
    %c0_i32 = arith.constant 0 : i32
    %c0_i32_0 = arith.constant 0 : i32
    %c0_i32_1 = arith.constant 0 : i32
    return %c0_i32, %c0_i32_0 : i32, i32
  }
  func.func @transform_6(%arg0: i32) -> (i32, i32) {
    %c0_i32 = arith.constant 0 : i32
    %c0_i32_0 = arith.constant 0 : i32
    %c0_i32_1 = arith.constant 0 : i32
    return %c0_i32, %c0_i32_0 : i32, i32
  }
  func.func @transform_7(%arg0: i32) -> (i32, i32) {
    %c0_i32 = arith.constant 0 : i32
    %c0_i32_0 = arith.constant 0 : i32
    return %arg0, %c0_i32 : i32, i32
  }
}

</mosaic_0001>

<bundles_post_ra>
// kernel: tpu_custom_call.1
= control target key start
LH: loop header
LB: loop body
LE: loop exit
PB: predicated region body
PF: predicated region fallthrough
CT: control target
= control target key end

     0   :  { %vm22627_vm0 = vmmov 0   ;;  %vm13845_vm1 = vcmask 523264   ;;  %s29638_s0 = inlined_call_operand.vmem [shape: bf16[8,896], index: 0, kind: input, shape index: {}]   ;;  %s29639_s1 = inlined_call_operand.vmem [shape: bf16[896,1600], index: 1, kind: input, shape index: {}]   ;;  %s29640_s2 = inlined_call_operand.vmem [shape: f32[1,1600], index: 2, kind: input, shape index: {}]   ;;  %s29641_s3 = inlined_call_operand.vmem [shape: bf16[1600,1600], index: 3, kind: input, shape index: {}]   ;;  %s29642_s4 = inlined_call_operand.vmem [shape: f32[1,1600], index: 4, kind: input, shape index: {}]   ;;  %s29643_s5 = inlined_call_operand.vmem [shape: bf16[1600,128], index: 5, kind: input, shape index: {}]   ;;  %s29644_s6 = inlined_call_operand.vmem [shape: f32[1,128], index: 6, kind: input, shape index: {}]   ;;  %s29645_s7 = inlined_call_operand.hbm [shape: f32[8,128], index: 7, kind: output, shape index: {}]  }
   0x1   :  { %v19523_v0 = vld [vmem:[%s29639_s1 + $0x2dc] ss:$52 sps:$4 sm:$0xff]   ;;  %v19527_v2 = vld [vmem:[%s29639_s1 + $0x2d8] ss:$52 sps:$4 sm:$0xff]   ;;  %v19529_v4 = vld [vmem:[%s29639_s1 + $0x274] ss:$52 sps:$4 sm:$0xff]  }
   0x2   :  { %v19525_v1 = vld [vmem:[%s29639_s1 + $0x95c] ss:$52 sps:$4 sm:$0xff]   ;;  %4606 = vmatprep.subr.bf16.mxu0 %v19523_v0  ;;  %v19528_v3 = vld [vmem:[%s29639_s1 + $0x958] ss:$52 sps:$4 sm:$0xff]   ;;  %v19531_v5 = vld [vmem:[%s29639_s1 + $0x8f4] ss:$52 sps:$4 sm:$0xff]  }
   0x3   :  { %4647 = vmatprep.subr.bf16.mxu1 %v19525_v1  ;;  %4607 = vmatpush1.bf16.msra.mxu0 %v19527_v2  ;;  %v19533_v6 = vld [vmem:[%s29639_s1 + $0x270] ss:$52 sps:$4 sm:$0xff]   ;;  %v19535_v8 = vld [vmem:[%s29639_s1 + $0x20c] ss:$52 sps:$4 sm:$0xff]   ;;  %v19539_v10 = vld [vmem:[%s29639_s1 + $0x208] ss:$52 sps:$4 sm:$0xff]  }
   0x4   :  { %4648 = vmatpush1.bf16.msra.mxu1 %v19528_v3  ;;  %4608 = vmatprep.subr.bf16.mxu0 %v19529_v4  ;;  %v19534_v7 = vld [vmem:[%s29639_s1 + $0x8f0] ss:$52 sps:$4 sm:$0xff]   ;;  %v19537_v9 = vld [vmem:[%s29639_s1 + $0x88c] ss:$52 sps:$4 sm:$0xff]   ;;  %v19540_v11 = vld [vmem:[%s29639_s1 + $0x888] ss:$52 sps:$4 sm:$0xff]  }
   0x5   :  { %4649 = vmatprep.subr.bf16.mxu1 %v19531_v5  ;;  %v19541_v12 = vld [vmem:[%s29639_s1 + $0x1a4] ss:$52 sps:$4 sm:$0xff]   ;;  %v19545_v14 = vld [vmem:[%s29639_s1 + $0x1a0] ss:$52 sps:$4 sm:$0xff]   ;;  %v19547_v16 = vld [vmem:[%s29639_s1 + $0x13c] ss:$52 sps:$4 sm:$0xff]  }
   0x6   :  { %v19543_v13 = vld [vmem:[%s29639_s1 + $0x824] ss:$52 sps:$4 sm:$0xff]   ;;  %v19546_v15 = vld [vmem:[%s29639_s1 + $0x820] ss:$52 sps:$4 sm:$0xff]   ;;  %v19549_v17 = vld [vmem:[%s29639_s1 + $0x7bc] ss:$52 sps:$4 sm:$0xff]  }
   0x7   :  { %4609 = vmatpush1.bf16.msra.mxu0 %v19533_v6  ;;  %v19551_v18 = vld [vmem:[%s29639_s1 + $0x138] ss:$52 sps:$4 sm:$0xff]   ;;  %v19553_v20 = vld [vmem:[%s29639_s1 + $0xd4] ss:$52 sps:$4 sm:$0xff]   ;;  %v19557_v22 = vld [vmem:[%s29639_s1 + $0xd0] ss:$52 sps:$4 sm:$0xff]  }
   0x8   :  { %4650 = vmatpush1.bf16.msra.mxu1 %v19534_v7  ;;  %4610 = vmatprep.subr.bf16.mxu0 %v19535_v8  ;;  %v19552_v19 = vld [vmem:[%s29639_s1 + $0x7b8] ss:$52 sps:$4 sm:$0xff]   ;;  %v19555_v21 = vld [vmem:[%s29639_s1 + $0x754] ss:$52 sps:$4 sm:$0xff]   ;;  %v19558_v23 = vld [vmem:[%s29639_s1 + $0x750] ss:$52 sps:$4 sm:$0xff]  }
   0x9   :  { %4651 = vmatprep.subr.bf16.mxu1 %v19537_v9  ;;  %v19559_v24 = vld [vmem:[%s29639_s1 + $0x6c] ss:$52 sps:$4 sm:$0xff]   ;;  %v19563_v26 = vld [vmem:[%s29639_s1 + $0x68] ss:$52 sps:$4 sm:$0xff]   ;;  %v19565_v28 = vld [vmem:[%s29639_s1 + $0x4] ss:$52 sps:$4 sm:$0xff]  }
   0xa   :  { %v19561_v25 = vld [vmem:[%s29639_s1 + $0x6ec] ss:$52 sps:$4 sm:$0xff]   ;;  %v19564_v27 = vld [vmem:[%s29639_s1 + $0x6e8] ss:$52 sps:$4 sm:$0xff]   ;;  %v19567_v29 = vld [vmem:[%s29639_s1 + $0x684] ss:$52 sps:$4 sm:$0xff]  }
   0xb   :  { %4611 = vmatpush1.bf16.msra.mxu0 %v19539_v10  ;;  %v19569_v30 = vld [vmem:[%s29639_s1] ss:$52 sps:$4 sm:$0xff]   ;;  %v19571_v32 = vld [vmem:[%s29639_s1 + $0x61c] ss:$52 sps:$4 sm:$0xff]   ;;  %v19575_v34 = vld [vmem:[%s29639_s1 + $0x618] ss:$52 sps:$4 sm:$0xff]  }
   0xc   :  { %4652 = vmatpush1.bf16.msra.mxu1 %v19540_v11  ;;  %4612 = vmatprep.subr.bf16.mxu0 %v19541_v12  ;;  %v19570_v31 = vld [vmem:[%s29639_s1 + $0x680] ss:$52 sps:$4 sm:$0xff]   ;;  %v19573_v33 = vld [vmem:[%s29639_s1 + $0xc9c] ss:$52 sps:$4 sm:$0xff]   ;;  %v19576_v35 = vld [vmem:[%s29639_s1 + $0xc98] ss:$52 sps:$4 sm:$0xff]  }
   0xd   :  { %4653 = vmatprep.subr.bf16.mxu1 %v19543_v13  ;;  %v19577_v36 = vld [vmem:[%s29639_s1 + $0x5b4] ss:$52 sps:$4 sm:$0xff]   ;;  %v19581_v38 = vld [vmem:[%s29639_s1 + $0x5b0] ss:$52 sps:$4 sm:$0xff]   ;;  %v19583_v40 = vld [vmem:[%s29639_s1 + $0x54c] ss:$52 sps:$4 sm:$0xff]  }
   0xe   :  { %v19579_v37 = vld [vmem:[%s29639_s1 + $0xc34] ss:$52 sps:$4 sm:$0xff]   ;;  %v19582_v39 = vld [vmem:[%s29639_s1 + $0xc30] ss:$52 sps:$4 sm:$0xff]   ;;  %v19585_v41 = vld [vmem:[%s29639_s1 + $0xbcc] ss:$52 sps:$4 sm:$0xff]  }
   0xf   :  { %4613 = vmatpush1.bf16.msra.mxu0 %v19545_v14  ;;  %v19587_v42 = vld [vmem:[%s29639_s1 + $0x548] ss:$52 sps:$4 sm:$0xff]   ;;  %v19589_v44 = vld [vmem:[%s29639_s1 + $0x4e4] ss:$52 sps:$4 sm:$0xff]   ;;  %v19593_v49 = vld [vmem:[%s29639_s1 + $0x4e0] ss:$52 sps:$4 sm:$0xff]  }
  0x10   :  { %4654 = vmatpush1.bf16.msra.mxu1 %v19546_v15  ;;  %4614 = vmatprep.subr.bf16.mxu0 %v19547_v16  ;;  %v19588_v43 = vld [vmem:[%s29639_s1 + $0xbc8] ss:$52 sps:$4 sm:$0xff]   ;;  %v19591_v45 = vld [vmem:[%s29639_s1 + $0xb64] ss:$52 sps:$4 sm:$0xff]   ;;  %v19594_v50 = vld [vmem:[%s29639_s1 + $0xb60] ss:$52 sps:$4 sm:$0xff]  }
  0x11   :  { %4655 = vmatprep.subr.bf16.mxu1 %v19549_v17  ;;  %v28_v46 = vld [vmem:[%s29638_s0] sm:$0xff]  ;;  %v29_v48 = vld [vmem:[%s29638_s0 + $0x8] sm:$0xff]  ;;  %v19595_v52 = vld [vmem:[%s29639_s1 + $0x47c] ss:$52 sps:$4 sm:$0xff]   ;;  %v22625_v16 = vmov 0  }
  0x12   :  { %v22810_v47 = vcombine.high %v28_v46, %v28_v46  ;;  %v22821_v51 = vcombine.high %v29_v48, %v29_v48  ;;  %v19597_v53 = vld [vmem:[%s29639_s1 + $0xafc] ss:$52 sps:$4 sm:$0xff]   ;;  %v19599_v54 = vld [vmem:[%s29639_s1 + $0x478] ss:$52 sps:$4 sm:$0xff]   ;;  %v19601_v56 = vld [vmem:[%s29639_s1 + $0x414] ss:$52 sps:$4 sm:$0xff]   ;;  %v22879_v6 = vcombine.low %v28_v46, %v28_v46  ;;  %v22881_v7 = vcombine.low %v29_v48, %v29_v48 }
  0x13   :  { %4615 = vmatpush1.bf16.msra.mxu0 %v19551_v18  ;;  %v19600_v55 = vld [vmem:[%s29639_s1 + $0xaf8] ss:$52 sps:$4 sm:$0xff]   ;;  %v19603_v57 = vld [vmem:[%s29639_s1 + $0xa94] ss:$52 sps:$4 sm:$0xff]   ;;  %v19605_v58 = vld [vmem:[%s29639_s1 + $0x410] ss:$52 sps:$4 sm:$0xff]  }
  0x14   :  { %4656 = vmatpush1.bf16.msra.mxu1 %v19552_v19  ;;  %4616 = vmatprep.subr.bf16.mxu0 %v19553_v20  ;;  %v19606_v59 = vld [vmem:[%s29639_s1 + $0xa90] ss:$52 sps:$4 sm:$0xff]   ;;  %v19607_v60 = vld [vmem:[%s29639_s1 + $0x3ac] ss:$52 sps:$4 sm:$0xff]   ;;  %v19611_v62 = vld [vmem:[%s29639_s1 + $0x3a8] ss:$52 sps:$4 sm:$0xff]  }
  0x15   :  { %4657 = vmatprep.subr.bf16.mxu1 %v19555_v21  ;;  %4638 = vmatprep.mubr.bf16.mxu0 %v22810_v47  ;;  %v19609_v61 = vld [vmem:[%s29639_s1 + $0xa2c] ss:$52 sps:$4 sm:$0xff]   ;;  %v19612_v63 = vld [vmem:[%s29639_s1 + $0xa28] ss:$52 sps:$4 sm:$0xff]   ;;  %v19613_v0 = vld [vmem:[%s29639_s1 + $0x344] ss:$52 sps:$4 sm:$0xff]  }
  0x16   :  { %4679 = vmatprep.mubr.bf16.mxu1 %v22821_v51  ;;  %v19615_v1 = vld [vmem:[%s29639_s1 + $0x9c4] ss:$52 sps:$4 sm:$0xff]   ;;  %v19617_v2 = vld [vmem:[%s29639_s1 + $0x340] ss:$52 sps:$4 sm:$0xff]   ;;  %v19624_v4 = vld [vmem:[%s29639_s1 + $0xfdc] ss:$52 sps:$4 sm:$0xff]  }
  0x17   :  { %4617 = vmatpush1.bf16.msra.mxu0 %v19557_v22  ;;  %v19618_v3 = vld [vmem:[%s29639_s1 + $0x9c0] ss:$52 sps:$4 sm:$0xff]   ;;  %v19627_v5 = vld [vmem:[%s29639_s1 + $0x165c] ss:$52 sps:$4 sm:$0xff]   ;;  %v19622_v8 = vld [vmem:[%s29639_s1 + $0xfd8] ss:$52 sps:$4 sm:$0xff]  }
  0x18   :  { %4658 = vmatpush1.bf16.msra.mxu1 %v19558_v23  ;;  %4618 = vmatprep.subr.bf16.mxu0 %v19559_v24  ;;  %v19625_v9 = vld [vmem:[%s29639_s1 + $0x1658] ss:$52 sps:$4 sm:$0xff]   ;;  %v19631_v10 = vld [vmem:[%s29639_s1 + $0xf74] ss:$52 sps:$4 sm:$0xff]   ;;  %v19629_v12 = vld [vmem:[%s29639_s1 + $0xf70] ss:$52 sps:$4 sm:$0xff]  }
  0x19   :  { %4659 = vmatprep.subr.bf16.mxu1 %v19561_v25  ;;  %v19634_v11 = vld [vmem:[%s29639_s1 + $0x15f4] ss:$52 sps:$4 sm:$0xff]   ;;  %v19632_v13 = vld [vmem:[%s29639_s1 + $0x15f0] ss:$52 sps:$4 sm:$0xff]   ;;  %v19637_v14 = vld [vmem:[%s29639_s1 + $0xf0c] ss:$52 sps:$4 sm:$0xff]  }
  0x1a   :  { %v19640_v15 = vld [vmem:[%s29639_s1 + $0x158c] ss:$52 sps:$4 sm:$0xff]   ;;  %v19635_v17 = vld [vmem:[%s29639_s1 + $0xf08] ss:$52 sps:$4 sm:$0xff]   ;;  %v19643_v19 = vld [vmem:[%s29639_s1 + $0xea4] ss:$52 sps:$4 sm:$0xff]  }
  0x1b   :  { %4619 = vmatpush1.bf16.msra.mxu0 %v19563_v26  ;;  %v19638_v18 = vld [vmem:[%s29639_s1 + $0x1588] ss:$52 sps:$4 sm:$0xff]   ;;  %v19646_v20 = vld [vmem:[%s29639_s1 + $0x1524] ss:$52 sps:$4 sm:$0xff]   ;;  %v19641_v21 = vld [vmem:[%s29639_s1 + $0xea0] ss:$52 sps:$4 sm:$0xff]  }
  0x1c   :  { %4660 = vmatpush1.bf16.msra.mxu1 %v19564_v27  ;;  %4620 = vmatprep.subr.bf16.mxu0 %v19565_v28  ;;  %v19644_v22 = vld [vmem:[%s29639_s1 + $0x1520] ss:$52 sps:$4 sm:$0xff]   ;;  %v19649_v23 = vld [vmem:[%s29639_s1 + $0xe3c] ss:$52 sps:$4 sm:$0xff]   ;;  %v19647_v25 = vld [vmem:[%s29639_s1 + $0xe38] ss:$52 sps:$4 sm:$0xff]  }
  0x1d   :  { %4661 = vmatprep.subr.bf16.mxu1 %v19567_v29  ;;  %v19652_v24 = vld [vmem:[%s29639_s1 + $0x14bc] ss:$52 sps:$4 sm:$0xff]   ;;  %v19650_v26 = vld [vmem:[%s29639_s1 + $0x14b8] ss:$52 sps:$4 sm:$0xff]   ;;  %v19655_v27 = vld [vmem:[%s29639_s1 + $0xdd4] ss:$52 sps:$4 sm:$0xff]  }
  0x1e   :  { %v19658_v28 = vld [vmem:[%s29639_s1 + $0x1454] ss:$52 sps:$4 sm:$0xff]   ;;  %v19653_v29 = vld [vmem:[%s29639_s1 + $0xdd0] ss:$52 sps:$4 sm:$0xff]  }
  0x1f   :  { %4621 = vmatpush1.bf16.msra.mxu0 %v19569_v30  ;;  %v19656_v30 = vld [vmem:[%s29639_s1 + $0x1450] ss:$52 sps:$4 sm:$0xff]   ;;  %v19680_v46 = vld [vmem:[%s29639_s1 + $0x12b4] ss:$52 sps:$4 sm:$0xff]  }
  0x20   :  { %4662 = vmatpush1.bf16.msra.mxu1 %v19570_v31  ;;  %4622 = vmatprep.subr.bf16.mxu0 %v19571_v32  ;;  %v19661_v31 = vld [vmem:[%s29639_s1 + $0xd6c] ss:$52 sps:$4 sm:$0xff]   ;;  %v19683_v48 = vld [vmem:[%s29639_s1 + $0x27c] ss:$52 sps:$4 sm:$0xff]  }
  0x21   :  { %4663 = vmatprep.subr.bf16.mxu1 %v19573_v33  ;;  %v19664_v32 = vld [vmem:[%s29639_s1 + $0x13ec] ss:$52 sps:$4 sm:$0xff]   ;;  %v22961_v33 = vld [vmem:[%s29638_s0 + $0x10] sm:$0xff] }
  0x23   :  { %4623 = vmatpush2.bf16.msra.mxu0 %v19575_v34  ;;  %v19659_v34 = vld [vmem:[%s29639_s1 + $0xd68] ss:$52 sps:$4 sm:$0xff]  }
  0x24   :  { %4664 = vmatpush2.bf16.msra.mxu1 %v19576_v35  ;;  %4624 = vmatprep.subr.bf16.mxu0 %v19577_v36  ;;  %v22968_v35 = vcombine.high %v22961_v33, %v22961_v33  ;;  %v19662_v36 = vld [vmem:[%s29639_s1 + $0x13e8] ss:$52 sps:$4 sm:$0xff]  }
  0x25   :  { %4665 = vmatprep.subr.bf16.mxu1 %v19579_v37  ;;  %v19667_v37 = vld [vmem:[%s29639_s1 + $0xd04] ss:$52 sps:$4 sm:$0xff]  }
  0x27   :  { %4625 = vmatpush2.bf16.msra.mxu0 %v19581_v38  ;;  %v19670_v38 = vld [vmem:[%s29639_s1 + $0x1384] ss:$52 sps:$4 sm:$0xff]  }
  0x28   :  { %4666 = vmatpush2.bf16.msra.mxu1 %v19582_v39  ;;  %4626 = vmatprep.subr.bf16.mxu0 %v19583_v40  ;;  %v19665_v39 = vld [vmem:[%s29639_s1 + $0xd00] ss:$52 sps:$4 sm:$0xff]  }
  0x29   :  { %4667 = vmatprep.subr.bf16.mxu1 %v19585_v41  ;;  %v19668_v40 = vld [vmem:[%s29639_s1 + $0x1380] ss:$52 sps:$4 sm:$0xff]   ;;  %v19673_v41 = vld [vmem:[%s29639_s1 + $0x131c] ss:$52 sps:$4 sm:$0xff]  }
  0x2b   :  { %4627 = vmatpush2.bf16.msra.mxu0 %v19587_v42  ;;  %v19676_v42 = vld [vmem:[%s29639_s1 + $0x2e4] ss:$52 sps:$4 sm:$0xff]  }
  0x2c   :  { %4668 = vmatpush2.bf16.msra.mxu1 %v19588_v43  ;;  %4628 = vmatprep.subr.bf16.mxu0 %v19589_v44  ;;  %v19671_v43 = vld [vmem:[%s29639_s1 + $0x1318] ss:$52 sps:$4 sm:$0xff]  }
  0x2d   :  { %4669 = vmatprep.subr.bf16.mxu1 %v19591_v45  ;;  %v22998_v44 = vld [vmem:[%s29638_s0 + $0x18] ss:$0 sps:$4 sm:$0xff]   ;;  %v19674_v45 = vld [vmem:[%s29639_s1 + $0x2e0] ss:$52 sps:$4 sm:$0xff]  }
  0x2f   :  { %4629 = vmatpush2.bf16.msra.mxu0 %v19593_v49  ;;  %v19678_v49 = vld [vmem:[%s29639_s1 + $0x12b0] ss:$52 sps:$4 sm:$0xff]  }
  0x30   :  { %4670 = vmatpush2.bf16.msra.mxu1 %v19594_v50  ;;  %4630 = vmatprep.subr.bf16.mxu0 %v19595_v52  ;;  %v19681_v50 = vld [vmem:[%s29639_s1 + $0x278] ss:$52 sps:$4 sm:$0xff]  }
  0x31   :  { %4671 = vmatprep.subr.bf16.mxu1 %v19597_v53  ;;  %v19686_v52 = vld [vmem:[%s29639_s1 + $0x124c] ss:$52 sps:$4 sm:$0xff]   ;;  %v19689_v53 = vld [vmem:[%s29639_s1 + $0x214] ss:$52 sps:$4 sm:$0xff]  }
  0x33   :  { %4631 = vmatpush2.bf16.msra.mxu0 %v19599_v54  ;;  %v19684_v54 = vld [vmem:[%s29639_s1 + $0x1248] ss:$52 sps:$4 sm:$0xff]  }
  0x34   :  { %4672 = vmatpush2.bf16.msra.mxu1 %v19600_v55  ;;  %4632 = vmatprep.subr.bf16.mxu0 %v19601_v56  ;;  %v19687_v55 = vld [vmem:[%s29639_s1 + $0x210] ss:$52 sps:$4 sm:$0xff]  }
  0x35   :  { %4673 = vmatprep.subr.bf16.mxu1 %v19603_v57  ;;  %v19692_v56 = vld [vmem:[%s29639_s1 + $0x11e4] ss:$52 sps:$4 sm:$0xff]   ;;  %v19695_v57 = vld [vmem:[%s29639_s1 + $0x1ac] ss:$52 sps:$4 sm:$0xff]  }
  0x37   :  { %4633 = vmatpush2.bf16.msra.mxu0 %v19605_v58  ;;  %v19690_v58 = vld [vmem:[%s29639_s1 + $0x11e0] ss:$52 sps:$4 sm:$0xff]  }
  0x38   :  { %4674 = vmatpush2.bf16.msra.mxu1 %v19606_v59  ;;  %4634 = vmatprep.subr.bf16.mxu0 %v19607_v60  ;;  %v19693_v59 = vld [vmem:[%s29639_s1 + $0x1a8] ss:$52 sps:$4 sm:$0xff]  }
  0x39   :  { %4675 = vmatprep.subr.bf16.mxu1 %v19609_v61  ;;  %v19698_v60 = vld [vmem:[%s29639_s1 + $0x117c] ss:$52 sps:$4 sm:$0xff]   ;;  %v19701_v61 = vld [vmem:[%s29639_s1 + $0x144] ss:$52 sps:$4 sm:$0xff]  }
  0x3b   :  { %4635 = vmatpush2.bf16.msra.mxu0 %v19611_v62  ;;  %v19696_v62 = vld [vmem:[%s29639_s1 + $0x1178] ss:$52 sps:$4 sm:$0xff]  }
  0x3c   :  { %4676 = vmatpush2.bf16.msra.mxu1 %v19612_v63  ;;  %4636 = vmatprep.subr.bf16.mxu0 %v19613_v0  ;;  %v19699_v63 = vld [vmem:[%s29639_s1 + $0x140] ss:$52 sps:$4 sm:$0xff]  }
  0x3d   :  { %4677 = vmatprep.subr.bf16.mxu1 %v19615_v1  ;;  %v19704_v0 = vld [vmem:[%s29639_s1 + $0x1114] ss:$52 sps:$4 sm:$0xff]   ;;  %v19707_v1 = vld [vmem:[%s29639_s1 + $0xdc] ss:$52 sps:$4 sm:$0xff]  }
  0x3f   :  { %4637 = vmatpush2.bf16.msra.mxu0 %v19617_v2  ;;  %v19702_v2 = vld [vmem:[%s29639_s1 + $0x1110] ss:$52 sps:$4 sm:$0xff]  }
  0x40   :  { %4678 = vmatpush2.bf16.msra.mxu1 %v19618_v3  ;;  %4688 = vmatprep.subr.bf16.mxu0 %v19624_v4  ;;  %v19705_v3 = vld [vmem:[%s29639_s1 + $0xd8] ss:$52 sps:$4 sm:$0xff]  }
  0x41   :  { %4729 = vmatprep.subr.bf16.mxu1 %v19627_v5  ;;  %v19710_v4 = vld [vmem:[%s29639_s1 + $0x10ac] ss:$52 sps:$4 sm:$0xff]   ;;  %v19713_v5 = vld [vmem:[%s29639_s1 + $0x74] ss:$52 sps:$4 sm:$0xff]  }
  0x42   :  { %4639 = vmatmul.mubr.bf16.vlgmr.msra.gmra.mxu0 %v22879_v6 }
  0x43   :  { %4680 = vmatmul.mubr.bf16.vlgmr.msra.gmra.mxu1 %v22881_v7  ;;  %4689 = vmatpush1.bf16.msra.mxu0 %v19622_v8  ;;  %v19708_v8 = vld [vmem:[%s29639_s1 + $0x10a8] ss:$52 sps:$4 sm:$0xff]  }
  0x44   :  { %4730 = vmatpush1.bf16.msra.mxu1 %v19625_v9  ;;  %4690 = vmatprep.subr.bf16.mxu0 %v19631_v10  ;;  %v19711_v9 = vld [vmem:[%s29639_s1 + $0x70] ss:$52 sps:$4 sm:$0xff]  }
  0x45   :  { %4731 = vmatprep.subr.bf16.mxu1 %v19634_v11  ;;  %4761 = vmatprep.mubr.bf16.mxu1 %v22625_v16  ;;  %v19716_v10 = vld [vmem:[%s29639_s1 + $0x1044] ss:$52 sps:$4 sm:$0xff]   ;;  %v19719_v11 = vld [vmem:[%s29639_s1 + $0xc] ss:$52 sps:$4 sm:$0xff]  }
  0x46   :  { %4720 = vmatprep.mubr.bf16.mxu0 %v22968_v35 }
  0x47   :  { %4691 = vmatpush1.bf16.msra.mxu0 %v19629_v12  ;;  %v19714_v12 = vld [vmem:[%s29639_s1 + $0x1040] ss:$52 sps:$4 sm:$0xff]  }
  0x48   :  { %4732 = vmatpush1.bf16.msra.mxu1 %v19632_v13  ;;  %4692 = vmatprep.subr.bf16.mxu0 %v19637_v14  ;;  %v19717_v13 = vld [vmem:[%s29639_s1 + $0x8] ss:$52 sps:$4 sm:$0xff]   ;;  %v19724_v14 = vld [vmem:[%s29639_s1 + $0x624] ss:$52 sps:$4 sm:$0xff]  }
  0x49   :  { %4733 = vmatprep.subr.bf16.mxu1 %v19640_v15  ;;  %v19727_v15 = vld [vmem:[%s29639_s1 + $0x964] ss:$52 sps:$4 sm:$0xff]  }
  0x4b   :  { %4693 = vmatpush1.bf16.msra.mxu0 %v19635_v17  ;;  %v23097_v17 = vcombine.low %v22961_v33, %v22961_v33  ;;  %v19751_v33 = vld [vmem:[%s29639_s1 + $0x7c4] ss:$52 sps:$4 sm:$0xff]  }
  0x4c   :  { %4734 = vmatpush1.bf16.msra.mxu1 %v19638_v18  ;;  %4694 = vmatprep.subr.bf16.mxu0 %v19643_v19  ;;  %v19722_v18 = vld [vmem:[%s29639_s1 + $0x620] ss:$52 sps:$4 sm:$0xff]  }
  0x4d   :  { %4735 = vmatprep.subr.bf16.mxu1 %v19646_v20  ;;  %v19725_v19 = vld [vmem:[%s29639_s1 + $0x960] ss:$52 sps:$4 sm:$0xff]   ;;  %v19730_v20 = vld [vmem:[%s29639_s1 + $0x5bc] ss:$52 sps:$4 sm:$0xff]  }
  0x4f   :  { %4695 = vmatpush1.bf16.msra.mxu0 %v19641_v21  ;;  %v19733_v21 = vld [vmem:[%s29639_s1 + $0x8fc] ss:$52 sps:$4 sm:$0xff]  }
  0x50   :  { %4736 = vmatpush1.bf16.msra.mxu1 %v19644_v22  ;;  %4696 = vmatprep.subr.bf16.mxu0 %v19649_v23  ;;  %v19728_v22 = vld [vmem:[%s29639_s1 + $0x5b8] ss:$52 sps:$4 sm:$0xff]  }
  0x51   :  { %4737 = vmatprep.subr.bf16.mxu1 %v19652_v24  ;;  %v19731_v23 = vld [vmem:[%s29639_s1 + $0x8f8] ss:$52 sps:$4 sm:$0xff]   ;;  %v19736_v24 = vld [vmem:[%s29639_s1 + $0x554] ss:$52 sps:$4 sm:$0xff]  }
  0x53   :  { %4697 = vmatpush1.bf16.msra.mxu0 %v19647_v25  ;;  %v19739_v25 = vld [vmem:[%s29639_s1 + $0x894] ss:$52 sps:$4 sm:$0xff]  }
  0x54   :  { %4738 = vmatpush1.bf16.msra.mxu1 %v19650_v26  ;;  %4698 = vmatprep.subr.bf16.mxu0 %v19655_v27  ;;  %v19734_v26 = vld [vmem:[%s29639_s1 + $0x550] ss:$52 sps:$4 sm:$0xff]  }
  0x55   :  { %4739 = vmatprep.subr.bf16.mxu1 %v19658_v28  ;;  %v19737_v27 = vld [vmem:[%s29639_s1 + $0x890] ss:$52 sps:$4 sm:$0xff]   ;;  %v19742_v28 = vld [vmem:[%s29639_s1 + $0x4ec] ss:$52 sps:$4 sm:$0xff]  }
  0x57   :  { %4699 = vmatpush1.bf16.msra.mxu0 %v19653_v29  ;;  %v19745_v29 = vld [vmem:[%s29639_s1 + $0x82c] ss:$52 sps:$4 sm:$0xff]  }
  0x58   :  { %4740 = vmatpush1.bf16.msra.mxu1 %v19656_v30  ;;  %4700 = vmatprep.subr.bf16.mxu0 %v19661_v31  ;;  %v19740_v30 = vld [vmem:[%s29639_s1 + $0x4e8] ss:$52 sps:$4 sm:$0xff]  }
  0x59   :  { %4741 = vmatprep.subr.bf16.mxu1 %v19664_v32  ;;  %v19743_v31 = vld [vmem:[%s29639_s1 + $0x828] ss:$52 sps:$4 sm:$0xff]   ;;  %v19748_v32 = vld [vmem:[%s29639_s1 + $0x484] ss:$52 sps:$4 sm:$0xff]  }
  0x5b   :  { %4701 = vmatpush1.bf16.msra.mxu0 %v19659_v34  ;;  %v19746_v34 = vld [vmem:[%s29639_s1 + $0x480] ss:$52 sps:$4 sm:$0xff]  }
  0x5c   :  { %4742 = vmatpush1.bf16.msra.mxu1 %v19662_v36  ;;  %4702 = vmatprep.subr.bf16.mxu0 %v19667_v37  ;;  %v19749_v36 = vld [vmem:[%s29639_s1 + $0x7c0] ss:$52 sps:$4 sm:$0xff]   ;;  %v19754_v37 = vld [vmem:[%s29639_s1 + $0x41c] ss:$52 sps:$4 sm:$0xff]  }
  0x5d   :  { %4743 = vmatprep.subr.bf16.mxu1 %v19670_v38  ;;  %v19757_v38 = vld [vmem:[%s29639_s1 + $0x75c] ss:$52 sps:$4 sm:$0xff]  }
  0x5f   :  { %4703 = vmatpush1.bf16.msra.mxu0 %v19665_v39  ;;  %v19752_v39 = vld [vmem:[%s29639_s1 + $0x418] ss:$52 sps:$4 sm:$0xff]  }
  0x60   :  { %4744 = vmatpush1.bf16.msra.mxu1 %v19668_v40  ;;  %4704 = vmatprep.subr.bf16.mxu0 %v19673_v41  ;;  %v19755_v40 = vld [vmem:[%s29639_s1 + $0x758] ss:$52 sps:$4 sm:$0xff]   ;;  %v19760_v41 = vld [vmem:[%s29639_s1 + $0x3b4] ss:$52 sps:$4 sm:$0xff]  }
  0x61   :  { %4770 = vmatprep.subr.bf16.mxu1 %v19676_v42  ;;  %v19763_v42 = vld [vmem:[%s29639_s1 + $0x6f4] ss:$52 sps:$4 sm:$0xff]  }
  0x63   :  { %4762 = vmatmul.mubr.bf16.vlgmr.msra.gmra.mxu1 %v22998_v44  ;;  %4705 = vmatpush2.bf16.msra.mxu0 %v19671_v43  ;;  %v19758_v43 = vld [vmem:[%s29639_s1 + $0x3b0] ss:$52 sps:$4 sm:$0xff]  }
  0x64   :  { %4771 = vmatpush1.bf16.msra.mxu1 %v19674_v45  ;;  %4706 = vmatprep.subr.bf16.mxu0 %v19680_v46  ;;  %v19761_v45 = vld [vmem:[%s29639_s1 + $0x6f0] ss:$52 sps:$4 sm:$0xff]   ;;  %v19766_v46 = vld [vmem:[%s29639_s1 + $0x34c] ss:$52 sps:$4 sm:$0xff]  }
  0x65   :  { %4772 = vmatprep.subr.bf16.mxu1 %v19683_v48  ;;  %4802 = vmatprep.mubr.bf16.mxu1 %v22810_v47  ;;  %v19769_v48 = vld [vmem:[%s29639_s1 + $0x68c] ss:$52 sps:$4 sm:$0xff]  }
  0x67   :  { %4707 = vmatpush2.bf16.msra.mxu0 %v19678_v49  ;;  %v19764_v49 = vld [vmem:[%s29639_s1 + $0x348] ss:$52 sps:$4 sm:$0xff]  }
  0x68   :  { %4773 = vmatpush1.bf16.msra.mxu1 %v19681_v50  ;;  %4708 = vmatprep.subr.bf16.mxu0 %v19686_v52  ;;  %v19767_v50 = vld [vmem:[%s29639_s1 + $0x688] ss:$52 sps:$4 sm:$0xff]   ;;  %v19772_v52 = vld [vmem:[%s29639_s1 + $0xca4] ss:$52 sps:$4 sm:$0xff]  }
  0x69   :  { %4774 = vmatprep.subr.bf16.mxu1 %v19689_v53  ;;  %v19775_v53 = vld [vmem:[%s29639_s1 + $0xfe4] ss:$52 sps:$4 sm:$0xff]  }
  0x6b   :  { %4709 = vmatpush2.bf16.msra.mxu0 %v19684_v54  ;;  %v19770_v54 = vld [vmem:[%s29639_s1 + $0xca0] ss:$52 sps:$4 sm:$0xff]  }
  0x6c   :  { %4775 = vmatpush1.bf16.msra.mxu1 %v19687_v55  ;;  %4710 = vmatprep.subr.bf16.mxu0 %v19692_v56  ;;  %v19773_v55 = vld [vmem:[%s29639_s1 + $0xfe0] ss:$52 sps:$4 sm:$0xff]   ;;  %v19778_v56 = vld [vmem:[%s29639_s1 + $0xc3c] ss:$52 sps:$4 sm:$0xff]  }
  0x6d   :  { %4776 = vmatprep.subr.bf16.mxu1 %v19695_v57  ;;  %v19781_v57 = vld [vmem:[%s29639_s1 + $0xf7c] ss:$52 sps:$4 sm:$0xff]  }
  0x6f   :  { %4711 = vmatpush2.bf16.msra.mxu0 %v19690_v58  ;;  %v19776_v58 = vld [vmem:[%s29639_s1 + $0xc38] ss:$52 sps:$4 sm:$0xff]  }
  0x70   :  { %4777 = vmatpush1.bf16.msra.mxu1 %v19693_v59  ;;  %4712 = vmatprep.subr.bf16.mxu0 %v19698_v60  ;;  %v19779_v59 = vld [vmem:[%s29639_s1 + $0xf78] ss:$52 sps:$4 sm:$0xff]   ;;  %v19784_v60 = vld [vmem:[%s29639_s1 + $0xbd4] ss:$52 sps:$4 sm:$0xff]  }
  0x71   :  { %4778 = vmatprep.subr.bf16.mxu1 %v19701_v61  ;;  %v19787_v61 = vld [vmem:[%s29639_s1 + $0xf14] ss:$52 sps:$4 sm:$0xff]  }
  0x73   :  { %4713 = vmatpush2.bf16.msra.mxu0 %v19696_v62  ;;  %v19782_v62 = vld [vmem:[%s29639_s1 + $0xbd0] ss:$52 sps:$4 sm:$0xff]  }
  0x74   :  { %4779 = vmatpush1.bf16.msra.mxu1 %v19699_v63  ;;  %4714 = vmatprep.subr.bf16.mxu0 %v19704_v0  ;;  %v19785_v63 = vld [vmem:[%s29639_s1 + $0xf10] ss:$52 sps:$4 sm:$0xff]   ;;  %v19790_v0 = vld [vmem:[%s29639_s1 + $0xb6c] ss:$52 sps:$4 sm:$0xff]  }
  0x75   :  { %4780 = vmatprep.subr.bf16.mxu1 %v19707_v1  ;;  %v19793_v1 = vld [vmem:[%s29639_s1 + $0xeac] ss:$52 sps:$4 sm:$0xff]  }
  0x77   :  { %4715 = vmatpush2.bf16.msra.mxu0 %v19702_v2  ;;  %v19788_v2 = vld [vmem:[%s29639_s1 + $0xb68] ss:$52 sps:$4 sm:$0xff]  }
  0x78   :  { %4781 = vmatpush1.bf16.msra.mxu1 %v19705_v3  ;;  %4716 = vmatprep.subr.bf16.mxu0 %v19710_v4  ;;  %v19791_v3 = vld [vmem:[%s29639_s1 + $0xea8] ss:$52 sps:$4 sm:$0xff]   ;;  %v19796_v4 = vld [vmem:[%s29639_s1 + $0xb04] ss:$52 sps:$4 sm:$0xff]  }
  0x79   :  { %4782 = vmatprep.subr.bf16.mxu1 %v19713_v5  ;;  %v19799_v5 = vld [vmem:[%s29639_s1 + $0xe44] ss:$52 sps:$4 sm:$0xff]  }
  0x7b   :  { %4717 = vmatpush2.bf16.msra.mxu0 %v19708_v8  ;;  %v19794_v8 = vld [vmem:[%s29639_s1 + $0xb00] ss:$52 sps:$4 sm:$0xff]  }
  0x7c   :  { %4783 = vmatpush1.bf16.msra.mxu1 %v19711_v9  ;;  %4718 = vmatprep.subr.bf16.mxu0 %v19716_v10  ;;  %v19797_v9 = vld [vmem:[%s29639_s1 + $0xe40] ss:$52 sps:$4 sm:$0xff]   ;;  %v19802_v10 = vld [vmem:[%s29639_s1 + $0xa9c] ss:$52 sps:$4 sm:$0xff]  }
  0x7d   :  { %4784 = vmatprep.subr.bf16.mxu1 %v19719_v11  ;;  %v19805_v11 = vld [vmem:[%s29639_s1 + $0xddc] ss:$52 sps:$4 sm:$0xff]  }
  0x7f   :  { %4719 = vmatpush2.bf16.msra.mxu0 %v19714_v12  ;;  %v19800_v12 = vld [vmem:[%s29639_s1 + $0xa98] ss:$52 sps:$4 sm:$0xff]  }
  0x80   :  { %4785 = vmatpush1.bf16.msra.mxu1 %v19717_v13  ;;  %4811 = vmatprep.subr.bf16.mxu0 %v19727_v15  ;;  %v19803_v13 = vld [vmem:[%s29639_s1 + $0xdd8] ss:$52 sps:$4 sm:$0xff]   ;;  %v19811_v15 = vld [vmem:[%s29639_s1 + $0xd74] ss:$52 sps:$4 sm:$0xff]  }
  0x81   :  { %4786 = vmatprep.subr.bf16.mxu1 %v19724_v14  ;;  %v19808_v14 = vld [vmem:[%s29639_s1 + $0xa34] ss:$52 sps:$4 sm:$0xff]  }
  0x82   :  { %4721 = vmatmul.mubr.bf16.vlgmr.msra.gmra.mxu0 %v23097_v17 }
  0x83   :  { %4812 = vmatpush1.bf16.msra.mxu0 %v19725_v19  ;;  %4843 = vmatprep.mubr.bf16.mxu0 %v22821_v51  ;;  %v19809_v19 = vld [vmem:[%s29639_s1 + $0xd70] ss:$52 sps:$4 sm:$0xff]  }
  0x84   :  { %4787 = vmatpush2.bf16.msra.mxu1 %v19722_v18  ;;  %4813 = vmatprep.subr.bf16.mxu0 %v19733_v21  ;;  %v19806_v18 = vld [vmem:[%s29639_s1 + $0xa30] ss:$52 sps:$4 sm:$0xff]   ;;  %v19817_v21 = vld [vmem:[%s29639_s1 + $0xd0c] ss:$52 sps:$4 sm:$0xff]  }
  0x85   :  { %4788 = vmatprep.subr.bf16.mxu1 %v19730_v20  ;;  %v19814_v20 = vld [vmem:[%s29639_s1 + $0x9cc] ss:$52 sps:$4 sm:$0xff]  }
  0x87   :  { %4814 = vmatpush1.bf16.msra.mxu0 %v19731_v23  ;;  %v19815_v23 = vld [vmem:[%s29639_s1 + $0xd08] ss:$52 sps:$4 sm:$0xff]  }
  0x88   :  { %4789 = vmatpush2.bf16.msra.mxu1 %v19728_v22  ;;  %4815 = vmatprep.subr.bf16.mxu0 %v19739_v25  ;;  %v19812_v22 = vld [vmem:[%s29639_s1 + $0x9c8] ss:$52 sps:$4 sm:$0xff]   ;;  %v19823_v25 = vld [vmem:[%s29639_s1 + $0x1664] ss:$52 sps:$4 sm:$0xff]  }
  0x89   :  { %4790 = vmatprep.subr.bf16.mxu1 %v19736_v24  ;;  %v19820_v24 = vld [vmem:[%s29639_s1 + $0x1324] ss:$52 sps:$4 sm:$0xff]  }
  0x8b   :  { %4816 = vmatpush1.bf16.msra.mxu0 %v19737_v27  ;;  %v19821_v27 = vld [vmem:[%s29639_s1 + $0x1660] ss:$52 sps:$4 sm:$0xff]  }
  0x8c   :  { %4791 = vmatpush2.bf16.msra.mxu1 %v19734_v26  ;;  %4817 = vmatprep.subr.bf16.mxu0 %v19745_v29  ;;  %v19818_v26 = vld [vmem:[%s29639_s1 + $0x1320] ss:$52 sps:$4 sm:$0xff]   ;;  %v19829_v29 = vld [vmem:[%s29639_s1 + $0x15fc] ss:$52 sps:$4 sm:$0xff]  }
  0x8d   :  { %4792 = vmatprep.subr.bf16.mxu1 %v19742_v28  ;;  %v19826_v28 = vld [vmem:[%s29639_s1 + $0x12bc] ss:$52 sps:$4 sm:$0xff]  }
  0x8f   :  { %4818 = vmatpush1.bf16.msra.mxu0 %v19743_v31  ;;  %v19827_v31 = vld [vmem:[%s29639_s1 + $0x15f8] ss:$52 sps:$4 sm:$0xff]  }
  0x90   :  { %4793 = vmatpush2.bf16.msra.mxu1 %v19740_v30  ;;  %4819 = vmatprep.subr.bf16.mxu0 %v19751_v33  ;;  %v19824_v30 = vld [vmem:[%s29639_s1 + $0x12b8] ss:$52 sps:$4 sm:$0xff]   ;;  %v19835_v33 = vld [vmem:[%s29639_s1 + $0x1594] ss:$52 sps:$4 sm:$0xff]  }
  0x91   :  { %4794 = vmatprep.subr.bf16.mxu1 %v19748_v32  ;;  %v19832_v32 = vld [vmem:[%s29639_s1 + $0x1254] ss:$52 sps:$4 sm:$0xff]  }
  0x93   :  { %4820 = vmatpush1.bf16.msra.mxu0 %v19749_v36  ;;  %v19833_v36 = vld [vmem:[%s29639_s1 + $0x1590] ss:$52 sps:$4 sm:$0xff]  }
  0x94   :  { %4795 = vmatpush2.bf16.msra.mxu1 %v19746_v34  ;;  %4821 = vmatprep.subr.bf16.mxu0 %v19757_v38  ;;  %v19830_v34 = vld [vmem:[%s29639_s1 + $0x1250] ss:$52 sps:$4 sm:$0xff]   ;;  %v19841_v38 = vld [vmem:[%s29639_s1 + $0x152c] ss:$52 sps:$4 sm:$0xff]  }
  0x95   :  { %4796 = vmatprep.subr.bf16.mxu1 %v19754_v37  ;;  %v19838_v37 = vld [vmem:[%s29639_s1 + $0x11ec] ss:$52 sps:$4 sm:$0xff]  }
  0x97   :  { %4822 = vmatpush1.bf16.msra.mxu0 %v19755_v40  ;;  %v19839_v40 = vld [vmem:[%s29639_s1 + $0x1528] ss:$52 sps:$4 sm:$0xff]  }
  0x98   :  { %4797 = vmatpush2.bf16.msra.mxu1 %v19752_v39  ;;  %4823 = vmatprep.subr.bf16.mxu0 %v19763_v42  ;;  %v19836_v39 = vld [vmem:[%s29639_s1 + $0x11e8] ss:$52 sps:$4 sm:$0xff]   ;;  %v19847_v42 = vld [vmem:[%s29639_s1 + $0x14c4] ss:$52 sps:$4 sm:$0xff]  }
  0x99   :  { %4798 = vmatprep.subr.bf16.mxu1 %v19760_v41  ;;  %v19844_v41 = vld [vmem:[%s29639_s1 + $0x1184] ss:$52 sps:$4 sm:$0xff]  }
  0x9b   :  { %4824 = vmatpush1.bf16.msra.mxu0 %v19761_v45  ;;  %v19845_v45 = vld [vmem:[%s29639_s1 + $0x14c0] ss:$52 sps:$4 sm:$0xff]  }
  0x9c   :  { %4799 = vmatpush2.bf16.msra.mxu1 %v19758_v43  ;;  %4825 = vmatprep.subr.bf16.mxu0 %v19769_v48  ;;  %v19842_v43 = vld [vmem:[%s29639_s1 + $0x1180] ss:$52 sps:$4 sm:$0xff]   ;;  %v19853_v48 = vld [vmem:[%s29639_s1 + $0x145c] ss:$52 sps:$4 sm:$0xff]  }
  0x9d   :  { %4800 = vmatprep.subr.bf16.mxu1 %v19766_v46  ;;  %v19850_v46 = vld [vmem:[%s29639_s1 + $0x111c] ss:$52 sps:$4 sm:$0xff]  }
  0x9f   :  { %4826 = vmatpush1.bf16.msra.mxu0 %v19767_v50  ;;  %v19851_v50 = vld [vmem:[%s29639_s1 + $0x1458] ss:$52 sps:$4 sm:$0xff]  }
  0xa0   :  { %4801 = vmatpush2.bf16.msra.mxu1 %v19764_v49  ;;  %4827 = vmatprep.subr.bf16.mxu0 %v19772_v52  ;;  %v19848_v49 = vld [vmem:[%s29639_s1 + $0x1118] ss:$52 sps:$4 sm:$0xff]   ;;  %v19856_v52 = vld [vmem:[%s29639_s1 + $0x10b4] ss:$52 sps:$4 sm:$0xff]  }
  0xa1   :  { %4852 = vmatprep.subr.bf16.mxu1 %v19775_v53  ;;  %v19859_v53 = vld [vmem:[%s29639_s1 + $0x13f4] ss:$52 sps:$4 sm:$0xff]  }
  0xa3   :  { %4803 = vmatmul.mubr.bf16.vlgmr.msra.gmra.mxu1 %v22879_v6  ;;  %4828 = vmatpush2.bf16.msra.mxu0 %v19770_v54  ;;  %v19854_v54 = vld [vmem:[%s29639_s1 + $0x10b0] ss:$52 sps:$4 sm:$0xff]  }
  0xa4   :  { %4853 = vmatpush1.bf16.msra.mxu1 %v19773_v55  ;;  %4829 = vmatprep.subr.bf16.mxu0 %v19778_v56  ;;  %v19857_v55 = vld [vmem:[%s29639_s1 + $0x13f0] ss:$52 sps:$4 sm:$0xff]   ;;  %v19862_v56 = vld [vmem:[%s29639_s1 + $0x104c] ss:$52 sps:$4 sm:$0xff]  }
  0xa5   :  { %4854 = vmatprep.subr.bf16.mxu1 %v19781_v57  ;;  %4884 = vmatprep.mubr.bf16.mxu1 %v22968_v35  ;;  %v19865_v57 = vld [vmem:[%s29639_s1 + $0x138c] ss:$52 sps:$4 sm:$0xff]  }
  0xa7   :  { %4830 = vmatpush2.bf16.msra.mxu0 %v19776_v58  ;;  %v19860_v58 = vld [vmem:[%s29639_s1 + $0x1048] ss:$52 sps:$4 sm:$0xff]  }
  0xa8   :  { %4855 = vmatpush1.bf16.msra.mxu1 %v19779_v59  ;;  %4831 = vmatprep.subr.bf16.mxu0 %v19784_v60  ;;  %v19863_v59 = vld [vmem:[%s29639_s1 + $0x1388] ss:$52 sps:$4 sm:$0xff]   ;;  %v19868_v60 = vld [vmem:[%s29639_s1 + $0x2ec] ss:$52 sps:$4 sm:$0xff]  }
  0xa9   :  { %4856 = vmatprep.subr.bf16.mxu1 %v19787_v61  ;;  %v19871_v61 = vld [vmem:[%s29639_s1 + $0x96c] ss:$52 sps:$4 sm:$0xff]  }
  0xab   :  { %4832 = vmatpush2.bf16.msra.mxu0 %v19782_v62  ;;  %v19866_v62 = vld [vmem:[%s29639_s1 + $0x2e8] ss:$52 sps:$4 sm:$0xff]  }
  0xac   :  { %4857 = vmatpush1.bf16.msra.mxu1 %v19785_v63  ;;  %4833 = vmatprep.subr.bf16.mxu0 %v19790_v0  ;;  %v19869_v63 = vld [vmem:[%s29639_s1 + $0x968] ss:$52 sps:$4 sm:$0xff]   ;;  %v19874_v0 = vld [vmem:[%s29639_s1 + $0x284] ss:$52 sps:$4 sm:$0xff]  }
  0xad   :  { %4858 = vmatprep.subr.bf16.mxu1 %v19793_v1  ;;  %v19877_v1 = vld [vmem:[%s29639_s1 + $0x904] ss:$52 sps:$4 sm:$0xff]  }
  0xaf   :  { %4834 = vmatpush2.bf16.msra.mxu0 %v19788_v2  ;;  %v19872_v2 = vld [vmem:[%s29639_s1 + $0x280] ss:$52 sps:$4 sm:$0xff]  }
  0xb0   :  { %4859 = vmatpush1.bf16.msra.mxu1 %v19791_v3  ;;  %4835 = vmatprep.subr.bf16.mxu0 %v19796_v4  ;;  %v19875_v3 = vld [vmem:[%s29639_s1 + $0x900] ss:$52 sps:$4 sm:$0xff]   ;;  %v19880_v4 = vld [vmem:[%s29639_s1 + $0x21c] ss:$52 sps:$4 sm:$0xff]  }
  0xb1   :  { %4860 = vmatprep.subr.bf16.mxu1 %v19799_v5  ;;  %v19878_v5 = vld [vmem:[%s29639_s1 + $0x218] ss:$52 sps:$4 sm:$0xff]  }
  0xb3   :  { %4836 = vmatpush2.bf16.msra.mxu0 %v19794_v8  ;;  %v19881_v8 = vld [vmem:[%s29639_s1 + $0x898] ss:$52 sps:$4 sm:$0xff]  }
  0xb4   :  { %4861 = vmatpush1.bf16.msra.mxu1 %v19797_v9  ;;  %4837 = vmatprep.subr.bf16.mxu0 %v19802_v10  ;;  %v19886_v9 = vld [vmem:[%s29639_s1 + $0x1b4] ss:$52 sps:$4 sm:$0xff]  }
  0xb5   :  { %4862 = vmatprep.subr.bf16.mxu1 %v19805_v11  ;;  %v19889_v10 = vld [vmem:[%s29639_s1 + $0x834] ss:$52 sps:$4 sm:$0xff]   ;;  %v19884_v11 = vld [vmem:[%s29639_s1 + $0x1b0] ss:$52 sps:$4 sm:$0xff]  }
  0xb7   :  { %4838 = vmatpush2.bf16.msra.mxu0 %v19800_v12  ;;  %v19887_v12 = vld [vmem:[%s29639_s1 + $0x830] ss:$52 sps:$4 sm:$0xff]  }
  0xb8   :  { %4863 = vmatpush1.bf16.msra.mxu1 %v19803_v13  ;;  %4839 = vmatprep.subr.bf16.mxu0 %v19808_v14  ;;  %v19892_v13 = vld [vmem:[%s29639_s1 + $0x14c] ss:$52 sps:$4 sm:$0xff]  }
  0xb9   :  { %4864 = vmatprep.subr.bf16.mxu1 %v19811_v15  ;;  %v19895_v14 = vld [vmem:[%s29639_s1 + $0x7cc] ss:$52 sps:$4 sm:$0xff]   ;;  %v19890_v15 = vld [vmem:[%s29639_s1 + $0x148] ss:$52 sps:$4 sm:$0xff]  }
  0xbb   :  { %4840 = vmatpush2.bf16.msra.mxu0 %v19806_v18  ;;  %v19893_v18 = vld [vmem:[%s29639_s1 + $0x7c8] ss:$52 sps:$4 sm:$0xff]  }
  0xbc   :  { %4865 = vmatpush1.bf16.msra.mxu1 %v19809_v19  ;;  %4841 = vmatprep.subr.bf16.mxu0 %v19814_v20  ;;  %v19898_v19 = vld [vmem:[%s29639_s1 + $0xe4] ss:$52 sps:$4 sm:$0xff]  }
  0xbd   :  { %4866 = vmatprep.subr.bf16.mxu1 %v19817_v21  ;;  %v19901_v20 = vld [vmem:[%s29639_s1 + $0x764] ss:$52 sps:$4 sm:$0xff]   ;;  %v19896_v21 = vld [vmem:[%s29639_s1 + $0xe0] ss:$52 sps:$4 sm:$0xff]  }
  0xbf   :  { %4842 = vmatpush2.bf16.msra.mxu0 %v19812_v22  ;;  %v19899_v22 = vld [vmem:[%s29639_s1 + $0x760] ss:$52 sps:$4 sm:$0xff]  }
  0xc0   :  { %4867 = vmatpush1.bf16.msra.mxu1 %v19815_v23  ;;  %4893 = vmatprep.subr.bf16.mxu0 %v19823_v25  ;;  %v820_v23 = vlaneseq  ;;  %v19907_v25 = vld [vmem:[%s29639_s1 + $0x6fc] ss:$52 sps:$4 sm:$0xff]  }
  0xc1   :  { %4868 = vmatprep.subr.bf16.mxu1 %v19820_v24  ;;  %v19904_v24 = vld [vmem:[%s29639_s1 + $0x7c] ss:$52 sps:$4 sm:$0xff]  }
  0xc2   :  { %4844 = vmatmul.mubr.bf16.vlgmr.msra.gmra.mxu0 %v22881_v7 }
  0xc3   :  { %4894 = vmatpush1.bf16.msra.mxu0 %v19821_v27  ;;  %4925 = vmatprep.mubr.bf16.mxu0 %v22625_v16  ;;  %v19905_v27 = vld [vmem:[%s29639_s1 + $0x6f8] ss:$52 sps:$4 sm:$0xff]  }
  0xc4   :  { %4869 = vmatpush2.bf16.msra.mxu1 %v19818_v26  ;;  %4895 = vmatprep.subr.bf16.mxu0 %v19829_v29  ;;  %v19902_v26 = vld [vmem:[%s29639_s1 + $0x78] ss:$52 sps:$4 sm:$0xff]   ;;  %v19910_v29 = vld [vmem:[%s29639_s1 + $0x14] ss:$52 sps:$4 sm:$0xff]  }
  0xc5   :  { %4870 = vmatprep.subr.bf16.mxu1 %v19826_v28  ;;  %v23475_v28 = vshrl.u32 %v820_v23, 7  ;;  %v19956_v23 = vld [vmem:[%s29639_s1 + $0x350] ss:$52 sps:$4 sm:$0xff]  }
  0xc7   :  { %4896 = vmatpush1.bf16.msra.mxu0 %v19827_v31  ;;  %v19908_v31 = vld [vmem:[%s29639_s1 + $0x10] ss:$52 sps:$4 sm:$0xff]  }
  0xc8   :  { %4871 = vmatpush2.bf16.msra.mxu1 %v19824_v30  ;;  %4897 = vmatprep.subr.bf16.mxu0 %v19835_v33  ;;  %v19913_v30 = vld [vmem:[%s29639_s1 + $0x694] ss:$52 sps:$4 sm:$0xff]   ;;  %v816_v33 = vld [vmem:[%s29640_s2] sm:$0xff] }
  0xc9   :  { %4872 = vmatprep.subr.bf16.mxu1 %v19832_v32  ;;  %v19911_v32 = vld [vmem:[%s29639_s1 + $0x690] ss:$52 sps:$4 sm:$0xff]  }
  0xcb   :  { %4898 = vmatpush1.bf16.msra.mxu0 %v19833_v36  ;;  %v19916_v36 = vld [vmem:[%s29639_s1 + $0x62c] ss:$52 sps:$4 sm:$0xff]  }
  0xcc   :  { %4873 = vmatpush2.bf16.msra.mxu1 %v19830_v34  ;;  %4899 = vmatprep.subr.bf16.mxu0 %v19841_v38  ;;  %v23493_v34 = vsub.s32 0, %v23475_v28  ;;  %v23502_v38 = vsub.s32 1, %v23475_v28 }
  0xcd   :  { %4874 = vmatprep.subr.bf16.mxu1 %v19838_v37  ;;  %v19919_v37 = vld [vmem:[%s29639_s1 + $0xcac] ss:$52 sps:$4 sm:$0xff]  }
  0xcf   :  { %4900 = vmatpush1.bf16.msra.mxu0 %v19839_v40  ;;  %v19914_v40 = vld [vmem:[%s29639_s1 + $0x628] ss:$52 sps:$4 sm:$0xff]  }
  0xd0   :  { %4875 = vmatpush2.bf16.msra.mxu1 %v19836_v39  ;;  %4901 = vmatprep.subr.bf16.mxu0 %v19847_v42  ;;  %v823_v39 = vrot.slane %v816_v33, %v23493_v34  ;;  %v19922_v42 = vld [vmem:[%s29639_s1 + $0x5c4] ss:$52 sps:$4 sm:$0xff]  }
  0xd1   :  { %4876 = vmatprep.subr.bf16.mxu1 %v19844_v41  ;;  %v19917_v41 = vld [vmem:[%s29639_s1 + $0xca8] ss:$52 sps:$4 sm:$0xff]  }
  0xd3   :  { %4902 = vmatpush1.bf16.msra.mxu0 %v19845_v45  ;;  %v827_v45 = vrot.slane %v816_v33, %v23502_v38  ;;  %v19971_v33 = vld [vmem:[%s29639_s1 + $0x1600] ss:$52 sps:$4 sm:$0xff]  }
  0xd4   :  { %4877 = vmatpush2.bf16.msra.mxu1 %v19842_v43  ;;  %4903 = vmatprep.subr.bf16.mxu0 %v19853_v48  ;;  %v19925_v43 = vld [vmem:[%s29639_s1 + $0xc44] ss:$52 sps:$4 sm:$0xff]  }
  0xd5   :  { %4878 = vmatprep.subr.bf16.mxu1 %v19850_v46 }
  0xd7   :  { %4904 = vmatpush1.bf16.msra.mxu0 %v19851_v50 }
  0xd8   :  { %4879 = vmatpush2.bf16.msra.mxu1 %v19848_v49  ;;  %4905 = vmatprep.subr.bf16.mxu0 %v19859_v53  ;;  %v19920_v49 = vld [vmem:[%s29639_s1 + $0x5c0] ss:$52 sps:$4 sm:$0xff]   ;;  %v19928_v53 = vld [vmem:[%s29639_s1 + $0x55c] ss:$52 sps:$4 sm:$0xff]  }
  0xd9   :  { %4880 = vmatprep.subr.bf16.mxu1 %v19856_v52  ;;  %v19923_v52 = vld [vmem:[%s29639_s1 + $0xc40] ss:$52 sps:$4 sm:$0xff]  }
  0xdb   :  { %4906 = vmatpush1.bf16.msra.mxu0 %v19857_v55 }
  0xdc   :  { %4881 = vmatpush2.bf16.msra.mxu1 %v19854_v54  ;;  %4907 = vmatprep.subr.bf16.mxu0 %v19865_v57 }
  0xdd   :  { %4882 = vmatprep.subr.bf16.mxu1 %v19862_v56  ;;  %v19931_v56 = vld [vmem:[%s29639_s1 + $0xbdc] ss:$52 sps:$4 sm:$0xff]  }
  0xdf   :  { %4908 = vmatpush1.bf16.msra.mxu0 %v19863_v59  ;;  %v19926_v59 = vld [vmem:[%s29639_s1 + $0x558] ss:$52 sps:$4 sm:$0xff]  }
  0xe0   :  { %4883 = vmatpush2.bf16.msra.mxu1 %v19860_v58  ;;  %4934 = vmatprep.subr.bf16.mxu0 %v19868_v60 }
  0xe1   :  { %4975 = vmatprep.subr.bf16.mxu1 %v19871_v61  ;;  %v19929_v61 = vld [vmem:[%s29639_s1 + $0xbd8] ss:$52 sps:$4 sm:$0xff]  }
  0xe2   :  { %4926 = vmatmul.mubr.bf16.vlgmr.msra.gmra.mxu0 %v22998_v44  ;;  %v19883_v44 = vld [vmem:[%s29639_s1 + $0x89c] ss:$52 sps:$4 sm:$0xff]  }
  0xe3   :  { %4885 = vmatmul.mubr.bf16.vlgmr.msra.gmra.mxu1 %v23097_v17  ;;  %4935 = vmatpush1.bf16.msra.mxu0 %v19866_v62 }
  0xe4   :  { %4976 = vmatpush1.bf16.msra.mxu1 %v19869_v63  ;;  %4936 = vmatprep.subr.bf16.mxu0 %v19874_v0 }
  0xe5   :  { %4977 = vmatprep.subr.bf16.mxu1 %v19877_v1  ;;  %4966 = vmatprep.mubr.bf16.mxu0 %v22810_v47 }
  0xe6   :  { %5007 = vmatprep.mubr.bf16.mxu1 %v22821_v51 }
  0xe7   :  { %4937 = vmatpush1.bf16.msra.mxu0 %v19872_v2  ;;  %v19934_v2 = vld [vmem:[%s29639_s1 + $0x4f4] ss:$52 sps:$4 sm:$0xff]  }
  0xe8   :  { %4978 = vmatpush1.bf16.msra.mxu1 %v19875_v3  ;;  %4938 = vmatprep.subr.bf16.mxu0 %v19880_v4  ;;  %v19937_v3 = vld [vmem:[%s29639_s1 + $0xb74] ss:$52 sps:$4 sm:$0xff]   ;;  %v19932_v4 = vld [vmem:[%s29639_s1 + $0x4f0] ss:$52 sps:$4 sm:$0xff]  }
  0xe9   :  { %4979 = vmatprep.subr.bf16.mxu1 %v19883_v44  ;;  %v19935_v44 = vld [vmem:[%s29639_s1 + $0xb70] ss:$52 sps:$4 sm:$0xff]  }
  0xeb   :  { %4939 = vmatpush1.bf16.msra.mxu0 %v19878_v5  ;;  %v19940_v5 = vld [vmem:[%s29639_s1 + $0x48c] ss:$52 sps:$4 sm:$0xff]  }
  0xec   :  { %4980 = vmatpush1.bf16.msra.mxu1 %v19881_v8  ;;  %4940 = vmatprep.subr.bf16.mxu0 %v19886_v9  ;;  %v19943_v8 = vld [vmem:[%s29639_s1 + $0xb0c] ss:$52 sps:$4 sm:$0xff]   ;;  %v19938_v9 = vld [vmem:[%s29639_s1 + $0x488] ss:$52 sps:$4 sm:$0xff]  }
  0xed   :  { %4981 = vmatprep.subr.bf16.mxu1 %v19889_v10  ;;  %v19941_v10 = vld [vmem:[%s29639_s1 + $0xb08] ss:$52 sps:$4 sm:$0xff]  }
  0xef   :  { %4941 = vmatpush1.bf16.msra.mxu0 %v19884_v11  ;;  %v19946_v11 = vld [vmem:[%s29639_s1 + $0x424] ss:$52 sps:$4 sm:$0xff]  }
  0xf0   :  { %4982 = vmatpush1.bf16.msra.mxu1 %v19887_v12  ;;  %4942 = vmatprep.subr.bf16.mxu0 %v19892_v13  ;;  %v19949_v12 = vld [vmem:[%s29639_s1 + $0xaa4] ss:$52 sps:$4 sm:$0xff]   ;;  %v19944_v13 = vld [vmem:[%s29639_s1 + $0x420] ss:$52 sps:$4 sm:$0xff]  }
  0xf1   :  { %4983 = vmatprep.subr.bf16.mxu1 %v19895_v14  ;;  %v19947_v14 = vld [vmem:[%s29639_s1 + $0xaa0] ss:$52 sps:$4 sm:$0xff]  }
  0xf3   :  { %4943 = vmatpush1.bf16.msra.mxu0 %v19890_v15  ;;  %v19952_v15 = vld [vmem:[%s29639_s1 + $0x3bc] ss:$52 sps:$4 sm:$0xff]  }
  0xf4   :  { %4984 = vmatpush1.bf16.msra.mxu1 %v19893_v18  ;;  %4944 = vmatprep.subr.bf16.mxu0 %v19898_v19  ;;  %v19955_v18 = vld [vmem:[%s29639_s1 + $0xa3c] ss:$52 sps:$4 sm:$0xff]   ;;  %v19950_v19 = vld [vmem:[%s29639_s1 + $0x3b8] ss:$52 sps:$4 sm:$0xff]  }
  0xf5   :  { %4985 = vmatprep.subr.bf16.mxu1 %v19901_v20  ;;  %v19953_v20 = vld [vmem:[%s29639_s1 + $0xa38] ss:$52 sps:$4 sm:$0xff]  }
  0xf7   :  { %4945 = vmatpush1.bf16.msra.mxu0 %v19896_v21  ;;  %v19958_v21 = vld [vmem:[%s29639_s1 + $0x354] ss:$52 sps:$4 sm:$0xff]  }
  0xf8   :  { %4986 = vmatpush1.bf16.msra.mxu1 %v19899_v22  ;;  %4946 = vmatprep.subr.bf16.mxu0 %v19904_v24  ;;  %v19961_v22 = vld [vmem:[%s29639_s1 + $0x9d4] ss:$52 sps:$4 sm:$0xff]   ;;  %v19959_v24 = vld [vmem:[%s29639_s1 + $0x9d0] ss:$52 sps:$4 sm:$0xff]  }
  0xf9   :  { %4987 = vmatprep.subr.bf16.mxu1 %v19907_v25  ;;  %v19964_v25 = vld [vmem:[%s29639_s1 + $0xfec] ss:$52 sps:$4 sm:$0xff]  }
  0xfb   :  { %4947 = vmatpush1.bf16.msra.mxu0 %v19902_v26  ;;  %v19967_v26 = vld [vmem:[%s29639_s1 + $0x166c] ss:$52 sps:$4 sm:$0xff]  }
  0xfc   :  { %4988 = vmatpush1.bf16.msra.mxu1 %v19905_v27  ;;  %4948 = vmatprep.subr.bf16.mxu0 %v19910_v29  ;;  %v19962_v27 = vld [vmem:[%s29639_s1 + $0xfe8] ss:$52 sps:$4 sm:$0xff]  }
  0xfd   :  { %4989 = vmatprep.subr.bf16.mxu1 %v19913_v30  ;;  %v19965_v29 = vld [vmem:[%s29639_s1 + $0x1668] ss:$52 sps:$4 sm:$0xff]   ;;  %v19970_v30 = vld [vmem:[%s29639_s1 + $0xf84] ss:$52 sps:$4 sm:$0xff]  }
  0xff   :  { %4949 = vmatpush1.bf16.msra.mxu0 %v19908_v31  ;;  %v19973_v31 = vld [vmem:[%s29639_s1 + $0x1604] ss:$52 sps:$4 sm:$0xff]  }
 0x100   :  { %4990 = vmatpush1.bf16.msra.mxu1 %v19911_v32  ;;  %4950 = vmatprep.subr.bf16.mxu0 %v19916_v36  ;;  %v19968_v32 = vld [vmem:[%s29639_s1 + $0xf80] ss:$52 sps:$4 sm:$0xff]  }
 0x101   :  { %4991 = vmatprep.subr.bf16.mxu1 %v19919_v37 }
 0x102   :  { %v4640_v46 = vpop.f32.mrf.mxu0 }
 0x103   :  { %v4681_v48 = vpop.f32.mrf.mxu1  ;;  %v4641_v50 = vadd.f32 %v4640_v46, %v823_v39  ;;  %4951 = vmatpush2.bf16.msra.mxu0 %v19914_v40  ;;  %v19976_v39 = vld [vmem:[%s29639_s1 + $0xf1c] ss:$52 sps:$4 sm:$0xff]   ;;  %v19982_v46 = vld [vmem:[%s29639_s1 + $0xeb4] ss:$52 sps:$4 sm:$0xff]  }
 0x104   :  { %4992 = vmatpush2.bf16.msra.mxu1 %v19917_v41  ;;  %v4642_v54 = vpop.f32.mrf.mxu0  ;;  %4952 = vmatprep.subr.bf16.mxu0 %v19922_v42  ;;  %v19979_v40 = vld [vmem:[%s29639_s1 + $0x159c] ss:$52 sps:$4 sm:$0xff]   ;;  %v19974_v41 = vld [vmem:[%s29639_s1 + $0xf18] ss:$52 sps:$4 sm:$0xff]  }
 0x105   :  { %v4683_v55 = vpop.f32.mrf.mxu1  ;;  %4993 = vmatprep.subr.bf16.mxu1 %v19925_v43  ;;  %v4643_v57 = vadd.f32 %v4642_v54, %v827_v45  ;;  %v23530_v58 = vadd.f32 %v4681_v48, %v4641_v50  ;;  %v19977_v42 = vld [vmem:[%s29639_s1 + $0x1598] ss:$52 sps:$4 sm:$0xff]   ;;  %v19985_v48 = vld [vmem:[%s29639_s1 + $0x1534] ss:$52 sps:$4 sm:$0xff]   ;;  %v19983_v50 = vld [vmem:[%s29639_s1 + $0x1530] ss:$52 sps:$4 sm:$0xff]  }
 0x106   :  { %v4644_v60 = vpop.f32.mrf.mxu0  ;;  %v19986_v54 = vld [vmem:[%s29639_s1 + $0xe48] ss:$52 sps:$4 sm:$0xff]  }
 0x107   :  { %v4685_v62 = vpop.f32.mrf.mxu1  ;;  %v23538_v63 = vadd.f32 %v4683_v55, %v4643_v57  ;;  %4953 = vmatpush2.bf16.msra.mxu0 %v19920_v49  ;;  %v19980_v49 = vld [vmem:[%s29639_s1 + $0xeb0] ss:$52 sps:$4 sm:$0xff]   ;;  %v19989_v55 = vld [vmem:[%s29639_s1 + $0x14c8] ss:$52 sps:$4 sm:$0xff]   ;;  %v19995_v60 = vld [vmem:[%s29639_s1 + $0x1460] ss:$52 sps:$4 sm:$0xff]  }
 0x108   :  { %4994 = vmatpush2.bf16.msra.mxu1 %v19923_v52  ;;  %v4645_v0 = vpop.f32.mrf.mxu0  ;;  %4954 = vmatprep.subr.bf16.mxu0 %v19928_v53  ;;  %v19988_v52 = vld [vmem:[%s29639_s1 + $0xe4c] ss:$52 sps:$4 sm:$0xff]   ;;  %v19997_v57 = vld [vmem:[%s29639_s1 + $0x1464] ss:$52 sps:$4 sm:$0xff]   ;;  %v20003_v62 = vld [vmem:[%s29639_s1 + $0x13fc] ss:$52 sps:$4 sm:$0xff]  }
 0x109   :  { %4995 = vmatprep.subr.bf16.mxu1 %v19931_v56  ;;  %v4686_v1 = vpop.f32.mrf.mxu1  ;;  %v19991_v53 = vld [vmem:[%s29639_s1 + $0x14cc] ss:$52 sps:$4 sm:$0xff]   ;;  %v19994_v56 = vld [vmem:[%s29639_s1 + $0xde4] ss:$52 sps:$4 sm:$0xff]  }
 0x10a   :  { %v19998_v0 = vld [vmem:[%s29639_s1 + $0xd78] ss:$52 sps:$4 sm:$0xff]  }
 0x10b   :  { %4955 = vmatpush2.bf16.msra.mxu0 %v19926_v59  ;;  %v19992_v59 = vld [vmem:[%s29639_s1 + $0xde0] ss:$52 sps:$4 sm:$0xff]   ;;  %v20001_v1 = vld [vmem:[%s29639_s1 + $0x13f8] ss:$52 sps:$4 sm:$0xff]  }
 0x10c   :  { %4996 = vmatpush2.bf16.msra.mxu1 %v19929_v61  ;;  %4956 = vmatprep.subr.bf16.mxu0 %v19934_v2  ;;  %v20000_v61 = vld [vmem:[%s29639_s1 + $0xd7c] ss:$52 sps:$4 sm:$0xff]   ;;  %v20006_v2 = vld [vmem:[%s29639_s1 + $0xd14] ss:$52 sps:$4 sm:$0xff]  }
 0x10d   :  { %4997 = vmatprep.subr.bf16.mxu1 %v19937_v3  ;;  %v20009_v3 = vld [vmem:[%s29639_s1 + $0x1394] ss:$52 sps:$4 sm:$0xff]  }
 0x10f   :  { %4957 = vmatpush2.bf16.msra.mxu0 %v19932_v4  ;;  %v20004_v4 = vld [vmem:[%s29639_s1 + $0xd10] ss:$52 sps:$4 sm:$0xff]  }
 0x110   :  { %4998 = vmatpush2.bf16.msra.mxu1 %v19935_v44  ;;  %4958 = vmatprep.subr.bf16.mxu0 %v19940_v5  ;;  %v20007_v44 = vld [vmem:[%s29639_s1 + $0x1390] ss:$52 sps:$4 sm:$0xff]   ;;  %v20012_v5 = vld [vmem:[%s29639_s1 + $0x132c] ss:$52 sps:$4 sm:$0xff]  }
 0x111   :  { %4999 = vmatprep.subr.bf16.mxu1 %v19943_v8  ;;  %v20015_v8 = vld [vmem:[%s29639_s1 + $0x2f4] ss:$52 sps:$4 sm:$0xff]  }
 0x113   :  { %4959 = vmatpush2.bf16.msra.mxu0 %v19938_v9  ;;  %v20010_v9 = vld [vmem:[%s29639_s1 + $0x1328] ss:$52 sps:$4 sm:$0xff]  }
 0x114   :  { %5000 = vmatpush2.bf16.msra.mxu1 %v19941_v10  ;;  %4960 = vmatprep.subr.bf16.mxu0 %v19946_v11  ;;  %v20013_v10 = vld [vmem:[%s29639_s1 + $0x2f0] ss:$52 sps:$4 sm:$0xff]  }
 0x115   :  { %5001 = vmatprep.subr.bf16.mxu1 %v19949_v12  ;;  %v20018_v11 = vld [vmem:[%s29639_s1 + $0x12c4] ss:$52 sps:$4 sm:$0xff]   ;;  %v20021_v12 = vld [vmem:[%s29639_s1 + $0x28c] ss:$52 sps:$4 sm:$0xff]  }
 0x117   :  { %4961 = vmatpush2.bf16.msra.mxu0 %v19944_v13 }
 0x118   :  { %5002 = vmatpush2.bf16.msra.mxu1 %v19947_v14  ;;  %4962 = vmatprep.subr.bf16.mxu0 %v19952_v15  ;;  %v22594_v14 = vld [vmem:[%s29638_s0 + $0x18] ss:$0 sps:$4 sm:$0xff]  }
 0x119   :  { %5003 = vmatprep.subr.bf16.mxu1 %v19955_v18  ;;  %v20016_v18 = vld [vmem:[%s29639_s1 + $0x12c0] ss:$52 sps:$4 sm:$0xff]  }
 0x11b   :  { %4963 = vmatpush2.bf16.msra.mxu0 %v19950_v19  ;;  %v20019_v19 = vld [vmem:[%s29639_s1 + $0x288] ss:$52 sps:$4 sm:$0xff]  }
 0x11c   :  { %5004 = vmatpush2.bf16.msra.mxu1 %v19953_v20  ;;  %4964 = vmatprep.subr.bf16.mxu0 %v19958_v21  ;;  %v20024_v21 = vld [vmem:[%s29639_s1 + $0x125c] ss:$52 sps:$4 sm:$0xff]  }
 0x11d   :  { %5005 = vmatprep.subr.bf16.mxu1 %v19961_v22 }
 0x11f   :  { %4965 = vmatpush2.bf16.msra.mxu0 %v19956_v23 }
 0x120   :  { %5006 = vmatpush2.bf16.msra.mxu1 %v19959_v24  ;;  %5016 = vmatprep.subr.bf16.mxu0 %v19964_v25 }
 0x121   :  { %5057 = vmatprep.subr.bf16.mxu1 %v19967_v26  ;;  %v20022_v26 = vld [vmem:[%s29639_s1 + $0x1258] ss:$52 sps:$4 sm:$0xff]  }
 0x122   :  { %4967 = vmatmul.mubr.bf16.vlgmr.msra.gmra.mxu0 %v22879_v6 }
 0x123   :  { %5008 = vmatmul.mubr.bf16.vlgmr.msra.gmra.mxu1 %v22881_v7  ;;  %v23626_v36 = vpop.f32.mrf.mxu1  ;;  %5017 = vmatpush1.bf16.msra.mxu0 %v19962_v27  ;;  %v20025_v27 = vld [vmem:[%s29639_s1 + $0x220] ss:$52 sps:$4 sm:$0xff]  }
 0x124   :  { %5058 = vmatpush1.bf16.msra.mxu1 %v19965_v29  ;;  %5018 = vmatprep.subr.bf16.mxu0 %v19970_v30  ;;  %v20033_v30 = vld [vmem:[%s29639_s1 + $0x1bc] ss:$52 sps:$4 sm:$0xff]  }
 0x125   :  { %5059 = vmatprep.subr.bf16.mxu1 %v19973_v31  ;;  %v23628_v37 = vpop.f32.mrf.mxu1  ;;  %5089 = vmatprep.mubr.bf16.mxu1 %v22625_v16  ;;  %v20028_v31 = vld [vmem:[%s29639_s1 + $0x11f0] ss:$52 sps:$4 sm:$0xff]  }
 0x126   :  { %5048 = vmatprep.mubr.bf16.mxu0 %v22968_v35 }
 0x127   :  { %v4767_v43 = vpop.f32.mrf.mxu1  ;;  %5019 = vmatpush1.bf16.msra.mxu0 %v19968_v32  ;;  %v20031_v32 = vld [vmem:[%s29639_s1 + $0x1b8] ss:$52 sps:$4 sm:$0xff]  }
 0x128   :  { %5060 = vmatpush1.bf16.msra.mxu1 %v19971_v33  ;;  %5020 = vmatprep.subr.bf16.mxu0 %v19976_v39  ;;  %v20036_v33 = vld [vmem:[%s29639_s1 + $0x118c] ss:$52 sps:$4 sm:$0xff]   ;;  %v20037_v39 = vld [vmem:[%s29639_s1 + $0x150] ss:$52 sps:$4 sm:$0xff]   ;;  %v20043_v43 = vld [vmem:[%s29639_s1 + $0xe8] ss:$52 sps:$4 sm:$0xff]  }
 0x129   :  { %5061 = vmatprep.subr.bf16.mxu1 %v19979_v40  ;;  %v4768_v45 = vpop.f32.mrf.mxu1  ;;  %v20042_v40 = vld [vmem:[%s29639_s1 + $0x1124] ss:$52 sps:$4 sm:$0xff]  }
 0x12a   :  { %v20048_v45 = vld [vmem:[%s29639_s1 + $0x10bc] ss:$52 sps:$4 sm:$0xff]  }
 0x12b   :  { %5021 = vmatpush1.bf16.msra.mxu0 %v19974_v41  ;;  %v20045_v41 = vld [vmem:[%s29639_s1 + $0xec] ss:$52 sps:$4 sm:$0xff]  }
 0x12c   :  { %5062 = vmatpush1.bf16.msra.mxu1 %v19977_v42  ;;  %5022 = vmatprep.subr.bf16.mxu0 %v19982_v46  ;;  %v20040_v42 = vld [vmem:[%s29639_s1 + $0x1120] ss:$52 sps:$4 sm:$0xff]   ;;  %v20051_v46 = vld [vmem:[%s29639_s1 + $0x84] ss:$52 sps:$4 sm:$0xff]  }
 0x12d   :  { %5063 = vmatprep.subr.bf16.mxu1 %v19985_v48  ;;  %v20046_v48 = vld [vmem:[%s29639_s1 + $0x10b8] ss:$52 sps:$4 sm:$0xff]  }
 0x12f   :  { %5023 = vmatpush1.bf16.msra.mxu0 %v19980_v49  ;;  %v20049_v49 = vld [vmem:[%s29639_s1 + $0x80] ss:$52 sps:$4 sm:$0xff]  }
 0x130   :  { %5064 = vmatpush1.bf16.msra.mxu1 %v19983_v50  ;;  %5024 = vmatprep.subr.bf16.mxu0 %v19988_v52  ;;  %v20054_v50 = vld [vmem:[%s29639_s1 + $0x1054] ss:$52 sps:$4 sm:$0xff]   ;;  %v20057_v52 = vld [vmem:[%s29639_s1 + $0x1c] ss:$52 sps:$4 sm:$0xff]  }
 0x131   :  { %5065 = vmatprep.subr.bf16.mxu1 %v19991_v53  ;;  %v20052_v53 = vld [vmem:[%s29639_s1 + $0x1050] ss:$52 sps:$4 sm:$0xff]  }
 0x133   :  { %5025 = vmatpush1.bf16.msra.mxu0 %v19986_v54  ;;  %v20055_v54 = vld [vmem:[%s29639_s1 + $0x18] ss:$52 sps:$4 sm:$0xff]  }
 0x134   :  { %5066 = vmatpush1.bf16.msra.mxu1 %v19989_v55  ;;  %5026 = vmatprep.subr.bf16.mxu0 %v19994_v56  ;;  %v20060_v55 = vld [vmem:[%s29639_s1 + $0x634] ss:$52 sps:$4 sm:$0xff]  }
 0x135   :  { %5067 = vmatprep.subr.bf16.mxu1 %v19997_v57  ;;  %v20063_v56 = vld [vmem:[%s29639_s1 + $0x974] ss:$52 sps:$4 sm:$0xff]   ;;  %v20058_v57 = vld [vmem:[%s29639_s1 + $0x630] ss:$52 sps:$4 sm:$0xff]  }
 0x137   :  { %5027 = vmatpush1.bf16.msra.mxu0 %v19992_v59  ;;  %v20061_v59 = vld [vmem:[%s29639_s1 + $0x970] ss:$52 sps:$4 sm:$0xff]  }
 0x138   :  { %5068 = vmatpush1.bf16.msra.mxu1 %v19995_v60  ;;  %5028 = vmatprep.subr.bf16.mxu0 %v20000_v61  ;;  %v20066_v60 = vld [vmem:[%s29639_s1 + $0x5cc] ss:$52 sps:$4 sm:$0xff]  }
 0x139   :  { %5069 = vmatprep.subr.bf16.mxu1 %v20003_v62  ;;  %v20069_v61 = vld [vmem:[%s29639_s1 + $0x90c] ss:$52 sps:$4 sm:$0xff]   ;;  %v20064_v62 = vld [vmem:[%s29639_s1 + $0x5c8] ss:$52 sps:$4 sm:$0xff]  }
 0x13b   :  { %5029 = vmatpush1.bf16.msra.mxu0 %v19998_v0  ;;  %v20067_v0 = vld [vmem:[%s29639_s1 + $0x908] ss:$52 sps:$4 sm:$0xff]  }
 0x13c   :  { %5070 = vmatpush1.bf16.msra.mxu1 %v20001_v1  ;;  %5030 = vmatprep.subr.bf16.mxu0 %v20006_v2 }
 0x13d   :  { %5071 = vmatprep.subr.bf16.mxu1 %v20009_v3  ;;  %v20072_v3 = vld [vmem:[%s29639_s1 + $0x564] ss:$52 sps:$4 sm:$0xff]  }
 0x13f   :  { %5031 = vmatpush1.bf16.msra.mxu0 %v20004_v4  ;;  %v20075_v4 = vld [vmem:[%s29639_s1 + $0x8a4] ss:$52 sps:$4 sm:$0xff]  }
 0x140   :  { %5072 = vmatpush1.bf16.msra.mxu1 %v20007_v44  ;;  %5032 = vmatprep.subr.bf16.mxu0 %v20012_v5  ;;  %v20070_v44 = vld [vmem:[%s29639_s1 + $0x560] ss:$52 sps:$4 sm:$0xff]  }
 0x141   :  { %5098 = vmatprep.subr.bf16.mxu1 %v20015_v8  ;;  %v20073_v5 = vld [vmem:[%s29639_s1 + $0x8a0] ss:$52 sps:$4 sm:$0xff]  }
 0x142   :  { %v4722_v13 = vpop.f32.mrf.mxu0 }
 0x143   :  { %5090 = vmatmul.mubr.bf16.vlgmr.msra.gmra.mxu1 %v22594_v14  ;;  %v4723_v15 = vadd.f32 %v4722_v13, %v23530_v58  ;;  %5033 = vmatpush2.bf16.msra.mxu0 %v20010_v9  ;;  %v20027_v58 = vld [vmem:[%s29639_s1 + $0x224] ss:$52 sps:$4 sm:$0xff]   ;;  %v20084_v14 = vld [vmem:[%s29639_s1 + $0x494] ss:$52 sps:$4 sm:$0xff]  }
 0x144   :  { %5099 = vmatpush1.bf16.msra.mxu1 %v20013_v10  ;;  %v4724_v20 = vpop.f32.mrf.mxu0  ;;  %5034 = vmatprep.subr.bf16.mxu0 %v20018_v11  ;;  %v20078_v10 = vld [vmem:[%s29639_s1 + $0x4fc] ss:$52 sps:$4 sm:$0xff]   ;;  %v20079_v13 = vld [vmem:[%s29639_s1 + $0x838] ss:$52 sps:$4 sm:$0xff]  }
 0x145   :  { %5100 = vmatprep.subr.bf16.mxu1 %v20021_v12  ;;  %v23739_v22 = vadd.f32 %v23626_v36, %v4723_v15  ;;  %v4725_v23 = vadd.f32 %v4724_v20, %v23538_v63  ;;  %5130 = vmatprep.mubr.bf16.mxu1 %v22810_v47  ;;  %v20030_v63 = vld [vmem:[%s29639_s1 + $0x11f4] ss:$52 sps:$4 sm:$0xff]   ;;  %v20081_v11 = vld [vmem:[%s29639_s1 + $0x83c] ss:$52 sps:$4 sm:$0xff]   ;;  %v20076_v12 = vld [vmem:[%s29639_s1 + $0x4f8] ss:$52 sps:$4 sm:$0xff]  }
 0x146   :  { %v4726_v24 = vpop.f32.mrf.mxu0  ;;  %v20039_v36 = vld [vmem:[%s29639_s1 + $0x154] ss:$52 sps:$4 sm:$0xff]   ;;  %v20090_v20 = vld [vmem:[%s29639_s1 + $0x42c] ss:$52 sps:$4 sm:$0xff]  }
 0x147   :  { %v23744_v25 = vadd.f32 %v23628_v37, %v4725_v23  ;;  %5035 = vmatpush2.bf16.msra.mxu0 %v20016_v18  ;;  %v20034_v37 = vld [vmem:[%s29639_s1 + $0x1188] ss:$52 sps:$4 sm:$0xff]   ;;  %v20082_v18 = vld [vmem:[%s29639_s1 + $0x490] ss:$52 sps:$4 sm:$0xff]  }
 0x148   :  { %5101 = vmatpush1.bf16.msra.mxu1 %v20019_v19  ;;  %v4727_v29 = vpop.f32.mrf.mxu0  ;;  %5036 = vmatprep.subr.bf16.mxu0 %v20024_v21  ;;  %v20087_v15 = vld [vmem:[%s29639_s1 + $0x7d4] ss:$52 sps:$4 sm:$0xff]   ;;  %v20085_v19 = vld [vmem:[%s29639_s1 + $0x7d0] ss:$52 sps:$4 sm:$0xff]   ;;  %v20093_v21 = vld [vmem:[%s29639_s1 + $0x76c] ss:$52 sps:$4 sm:$0xff]  }
 0x149   :  { %5102 = vmatprep.subr.bf16.mxu1 %v20027_v58  ;;  %v20088_v58 = vld [vmem:[%s29639_s1 + $0x428] ss:$52 sps:$4 sm:$0xff]   ;;  %v20096_v24 = vld [vmem:[%s29639_s1 + $0x3c4] ss:$52 sps:$4 sm:$0xff]   ;;  %v20097_v29 = vld [vmem:[%s29639_s1 + $0x700] ss:$52 sps:$4 sm:$0xff]  }
 0x14a   :  { %v20091_v23 = vld [vmem:[%s29639_s1 + $0x768] ss:$52 sps:$4 sm:$0xff]  }
 0x14b   :  { %5037 = vmatpush2.bf16.msra.mxu0 %v20022_v26  ;;  %v20099_v26 = vld [vmem:[%s29639_s1 + $0x704] ss:$52 sps:$4 sm:$0xff]  }
 0x14c   :  { %5103 = vmatpush1.bf16.msra.mxu1 %v20025_v27  ;;  %5038 = vmatprep.subr.bf16.mxu0 %v20030_v63  ;;  %v20094_v27 = vld [vmem:[%s29639_s1 + $0x3c0] ss:$52 sps:$4 sm:$0xff]   ;;  %v20102_v63 = vld [vmem:[%s29639_s1 + $0x35c] ss:$52 sps:$4 sm:$0xff]  }
 0x14d   :  { %5104 = vmatprep.subr.bf16.mxu1 %v20033_v30  ;;  %v20105_v30 = vld [vmem:[%s29639_s1 + $0x69c] ss:$52 sps:$4 sm:$0xff]  }
 0x14f   :  { %5039 = vmatpush2.bf16.msra.mxu0 %v20028_v31  ;;  %v23909_v31 = vsub.s32 2, %v23475_v28 }
 0x150   :  { %5105 = vmatpush1.bf16.msra.mxu1 %v20031_v32  ;;  %5040 = vmatprep.subr.bf16.mxu0 %v20036_v33  ;;  %v23912_v32 = vsub.s32 3, %v23475_v28  ;;  %v20100_v33 = vld [vmem:[%s29639_s1 + $0x358] ss:$52 sps:$4 sm:$0xff]  }
 0x151   :  { %5106 = vmatprep.subr.bf16.mxu1 %v20039_v36  ;;  %v20103_v36 = vld [vmem:[%s29639_s1 + $0x698] ss:$52 sps:$4 sm:$0xff]  }
 0x153   :  { %5041 = vmatpush2.bf16.msra.mxu0 %v20034_v37  ;;  %v20108_v37 = vld [vmem:[%s29639_s1 + $0xcb4] ss:$52 sps:$4 sm:$0xff]  }
 0x154   :  { %5107 = vmatpush1.bf16.msra.mxu1 %v20037_v39  ;;  %5042 = vmatprep.subr.bf16.mxu0 %v20042_v40  ;;  %v20111_v39 = vld [vmem:[%s29639_s1 + $0xff4] ss:$52 sps:$4 sm:$0xff]   ;;  %v23929_v40 = vld [vmem:[%s29640_s2] sm:$0xff] }
 0x155   :  { %5108 = vmatprep.subr.bf16.mxu1 %v20045_v41  ;;  %v831_v41 = vrot.slane %v23929_v40, %v23909_v31 }
 0x157   :  { %5043 = vmatpush2.bf16.msra.mxu0 %v20040_v42  ;;  %v20106_v42 = vld [vmem:[%s29639_s1 + $0xcb0] ss:$52 sps:$4 sm:$0xff]  }
 0x158   :  { %5109 = vmatpush1.bf16.msra.mxu1 %v20043_v43  ;;  %5044 = vmatprep.subr.bf16.mxu0 %v20048_v45  ;;  %v20109_v43 = vld [vmem:[%s29639_s1 + $0xff0] ss:$52 sps:$4 sm:$0xff]   ;;  %v835_v45 = vrot.slane %v23929_v40, %v23912_v32 }
 0x159   :  { %5110 = vmatprep.subr.bf16.mxu1 %v20051_v46  ;;  %v20114_v46 = vld [vmem:[%s29639_s1 + $0xc4c] ss:$52 sps:$4 sm:$0xff]  }
 0x15b   :  { %5045 = vmatpush2.bf16.msra.mxu0 %v20046_v48  ;;  %v20117_v48 = vld [vmem:[%s29639_s1 + $0xf8c] ss:$52 sps:$4 sm:$0xff]  }
 0x15c   :  { %5111 = vmatpush1.bf16.msra.mxu1 %v20049_v49  ;;  %5046 = vmatprep.subr.bf16.mxu0 %v20054_v50 }
 0x15d   :  { %5112 = vmatprep.subr.bf16.mxu1 %v20057_v52 }
 0x15f   :  { %5047 = vmatpush2.bf16.msra.mxu0 %v20052_v53 }
 0x160   :  { %5113 = vmatpush1.bf16.msra.mxu1 %v20055_v54  ;;  %5139 = vmatprep.subr.bf16.mxu0 %v20063_v56  ;;  %v20112_v54 = vld [vmem:[%s29639_s1 + $0xc48] ss:$52 sps:$4 sm:$0xff]  }
 0x161   :  { %5114 = vmatprep.subr.bf16.mxu1 %v20060_v55  ;;  %v20115_v55 = vld [vmem:[%s29639_s1 + $0xf88] ss:$52 sps:$4 sm:$0xff]  }
 0x162   :  { %5049 = vmatmul.mubr.bf16.vlgmr.msra.gmra.mxu0 %v23097_v17 }
 0x163   :  { %v23837_v1 = vpop.f32.mrf.mxu1  ;;  %5140 = vmatpush1.bf16.msra.mxu0 %v20061_v59  ;;  %5171 = vmatprep.mubr.bf16.mxu0 %v22821_v51  ;;  %v20123_v59 = vld [vmem:[%s29639_s1 + $0xf24] ss:$52 sps:$4 sm:$0xff]  }
 0x164   :  { %5115 = vmatpush2.bf16.msra.mxu1 %v20058_v57  ;;  %5141 = vmatprep.subr.bf16.mxu0 %v20069_v61  ;;  %v4805_v49 = vadd.f32 %v23837_v1, %v831_v41  ;;  %v20120_v57 = vld [vmem:[%s29639_s1 + $0xbe4] ss:$52 sps:$4 sm:$0xff]  }
 0x165   :  { %5116 = vmatprep.subr.bf16.mxu1 %v20066_v60  ;;  %v23839_v2 = vpop.f32.mrf.mxu1 }
 0x166   :  { %v4807_v52 = vadd.f32 %v23839_v2, %v835_v45  ;;  %v20126_v2 = vld [vmem:[%s29639_s1 + $0xb7c] ss:$52 sps:$4 sm:$0xff]  }
 0x167   :  { %v4808_v8 = vpop.f32.mrf.mxu1  ;;  %5142 = vmatpush1.bf16.msra.mxu0 %v20067_v0  ;;  %v20121_v0 = vld [vmem:[%s29639_s1 + $0xf20] ss:$52 sps:$4 sm:$0xff]  }
 0x168   :  { %5117 = vmatpush2.bf16.msra.mxu1 %v20064_v62  ;;  %5143 = vmatprep.subr.bf16.mxu0 %v20075_v4  ;;  %v20118_v62 = vld [vmem:[%s29639_s1 + $0xbe0] ss:$52 sps:$4 sm:$0xff]   ;;  %v20124_v4 = vld [vmem:[%s29639_s1 + $0xb78] ss:$52 sps:$4 sm:$0xff]  }
 0x169   :  { %5118 = vmatprep.subr.bf16.mxu1 %v20072_v3  ;;  %v4809_v9 = vpop.f32.mrf.mxu1  ;;  %v20129_v3 = vld [vmem:[%s29639_s1 + $0xebc] ss:$52 sps:$4 sm:$0xff]   ;;  %v20135_v8 = vld [vmem:[%s29639_s1 + $0xe54] ss:$52 sps:$4 sm:$0xff]  }
 0x16a   :  { %v20130_v9 = vld [vmem:[%s29639_s1 + $0xb10] ss:$52 sps:$4 sm:$0xff]  }
 0x16b   :  { %5144 = vmatpush1.bf16.msra.mxu0 %v20073_v5  ;;  %v20132_v5 = vld [vmem:[%s29639_s1 + $0xb14] ss:$52 sps:$4 sm:$0xff]  }
 0x16c   :  { %5119 = vmatpush2.bf16.msra.mxu1 %v20070_v44  ;;  %5145 = vmatprep.subr.bf16.mxu0 %v20081_v11  ;;  %v20127_v44 = vld [vmem:[%s29639_s1 + $0xeb8] ss:$52 sps:$4 sm:$0xff]  }
 0x16d   :  { %5120 = vmatprep.subr.bf16.mxu1 %v20078_v10  ;;  %v20133_v10 = vld [vmem:[%s29639_s1 + $0xe50] ss:$52 sps:$4 sm:$0xff]   ;;  %v20138_v11 = vld [vmem:[%s29639_s1 + $0xaac] ss:$52 sps:$4 sm:$0xff]  }
 0x16f   :  { %5146 = vmatpush1.bf16.msra.mxu0 %v20079_v13  ;;  %v20136_v13 = vld [vmem:[%s29639_s1 + $0xaa8] ss:$52 sps:$4 sm:$0xff]  }
 0x170   :  { %5121 = vmatpush2.bf16.msra.mxu1 %v20076_v12  ;;  %5147 = vmatprep.subr.bf16.mxu0 %v20087_v15  ;;  %v20141_v12 = vld [vmem:[%s29639_s1 + $0xdec] ss:$52 sps:$4 sm:$0xff]   ;;  %v20144_v15 = vld [vmem:[%s29639_s1 + $0xa44] ss:$52 sps:$4 sm:$0xff]  }
 0x171   :  { %5122 = vmatprep.subr.bf16.mxu1 %v20084_v14  ;;  %v20139_v14 = vld [vmem:[%s29639_s1 + $0xde8] ss:$52 sps:$4 sm:$0xff]  }
 0x173   :  { %5148 = vmatpush1.bf16.msra.mxu0 %v20085_v19  ;;  %v20142_v19 = vld [vmem:[%s29639_s1 + $0xa40] ss:$52 sps:$4 sm:$0xff]  }
 0x174   :  { %5123 = vmatpush2.bf16.msra.mxu1 %v20082_v18  ;;  %5149 = vmatprep.subr.bf16.mxu0 %v20093_v21  ;;  %v20147_v18 = vld [vmem:[%s29639_s1 + $0xd84] ss:$52 sps:$4 sm:$0xff]   ;;  %v20150_v21 = vld [vmem:[%s29639_s1 + $0x9dc] ss:$52 sps:$4 sm:$0xff]  }
 0x175   :  { %5124 = vmatprep.subr.bf16.mxu1 %v20090_v20  ;;  %v20145_v20 = vld [vmem:[%s29639_s1 + $0xd80] ss:$52 sps:$4 sm:$0xff]  }
 0x177   :  { %5150 = vmatpush1.bf16.msra.mxu0 %v20091_v23  ;;  %v20148_v23 = vld [vmem:[%s29639_s1 + $0x9d8] ss:$52 sps:$4 sm:$0xff]  }
 0x178   :  { %5125 = vmatpush2.bf16.msra.mxu1 %v20088_v58  ;;  %5151 = vmatprep.subr.bf16.mxu0 %v20099_v26  ;;  %v20153_v58 = vld [vmem:[%s29639_s1 + $0xd1c] ss:$52 sps:$4 sm:$0xff]   ;;  %v20156_v26 = vld [vmem:[%s29639_s1 + $0x1334] ss:$52 sps:$4 sm:$0xff]  }
 0x179   :  { %5126 = vmatprep.subr.bf16.mxu1 %v20096_v24  ;;  %v20151_v24 = vld [vmem:[%s29639_s1 + $0xd18] ss:$52 sps:$4 sm:$0xff]  }
 0x17b   :  { %5152 = vmatpush1.bf16.msra.mxu0 %v20097_v29  ;;  %v20154_v29 = vld [vmem:[%s29639_s1 + $0x1330] ss:$52 sps:$4 sm:$0xff]  }
 0x17c   :  { %5127 = vmatpush2.bf16.msra.mxu1 %v20094_v27  ;;  %5153 = vmatprep.subr.bf16.mxu0 %v20105_v30  ;;  %v20159_v27 = vld [vmem:[%s29639_s1 + $0x1674] ss:$52 sps:$4 sm:$0xff]   ;;  %v20162_v30 = vld [vmem:[%s29639_s1 + $0x12cc] ss:$52 sps:$4 sm:$0xff]  }
 0x17d   :  { %5128 = vmatprep.subr.bf16.mxu1 %v20102_v63  ;;  %v20157_v63 = vld [vmem:[%s29639_s1 + $0x1670] ss:$52 sps:$4 sm:$0xff]  }
 0x17f   :  { %5154 = vmatpush1.bf16.msra.mxu0 %v20103_v36  ;;  %v20160_v36 = vld [vmem:[%s29639_s1 + $0x12c8] ss:$52 sps:$4 sm:$0xff]  }
 0x180   :  { %5129 = vmatpush2.bf16.msra.mxu1 %v20100_v33  ;;  %5155 = vmatprep.subr.bf16.mxu0 %v20108_v37  ;;  %v20165_v33 = vld [vmem:[%s29639_s1 + $0x160c] ss:$52 sps:$4 sm:$0xff]   ;;  %v20163_v37 = vld [vmem:[%s29639_s1 + $0x1608] ss:$52 sps:$4 sm:$0xff]  }
 0x181   :  { %5180 = vmatprep.subr.bf16.mxu1 %v20111_v39 }
 0x182   :  { %v4845_v50 = vpop.f32.mrf.mxu0 }
 0x183   :  { %5131 = vmatmul.mubr.bf16.vlgmr.msra.gmra.mxu1 %v22879_v6  ;;  %v23950_v53 = vadd.f32 %v4845_v50, %v4805_v49  ;;  %5156 = vmatpush2.bf16.msra.mxu0 %v20106_v42 }
 0x184   :  { %5181 = vmatpush1.bf16.msra.mxu1 %v20109_v43  ;;  %v4847_v56 = vpop.f32.mrf.mxu0  ;;  %5157 = vmatprep.subr.bf16.mxu0 %v20114_v46  ;;  %v20168_v46 = vld [vmem:[%s29639_s1 + $0x1264] ss:$52 sps:$4 sm:$0xff]  }
 0x185   :  { %5182 = vmatprep.subr.bf16.mxu1 %v20117_v48  ;;  %v23964_v60 = vadd.f32 %v4847_v56, %v4807_v52  ;;  %5212 = vmatprep.mubr.bf16.mxu1 %v22968_v35  ;;  %v20171_v48 = vld [vmem:[%s29639_s1 + $0x15a4] ss:$52 sps:$4 sm:$0xff]   ;;  %v20166_v52 = vld [vmem:[%s29639_s1 + $0x1260] ss:$52 sps:$4 sm:$0xff]  }
 0x186   :  { %v4849_v61 = vpop.f32.mrf.mxu0 }
 0x187   :  { %5158 = vmatpush2.bf16.msra.mxu0 %v20112_v54  ;;  %v20177_v61 = vld [vmem:[%s29639_s1 + $0x153c] ss:$52 sps:$4 sm:$0xff]  }
 0x188   :  { %5183 = vmatpush1.bf16.msra.mxu1 %v20115_v55  ;;  %v4850_v1 = vpop.f32.mrf.mxu0  ;;  %5159 = vmatprep.subr.bf16.mxu0 %v20120_v57 }
 0x189   :  { %5184 = vmatprep.subr.bf16.mxu1 %v20123_v59  ;;  %v20180_v1 = vld [vmem:[%s29639_s1 + $0x1194] ss:$52 sps:$4 sm:$0xff]  }
 0x18b   :  { %5160 = vmatpush2.bf16.msra.mxu0 %v20118_v62  ;;  %v20172_v62 = vld [vmem:[%s29639_s1 + $0x11f8] ss:$52 sps:$4 sm:$0xff]  }
 0x18c   :  { %5185 = vmatpush1.bf16.msra.mxu1 %v20121_v0  ;;  %5161 = vmatprep.subr.bf16.mxu0 %v20126_v2  ;;  %v20175_v0 = vld [vmem:[%s29639_s1 + $0x1538] ss:$52 sps:$4 sm:$0xff]   ;;  %v20183_v2 = vld [vmem:[%s29639_s1 + $0x14d4] ss:$52 sps:$4 sm:$0xff]  }
 0x18d   :  { %5186 = vmatprep.subr.bf16.mxu1 %v20129_v3  ;;  %v20178_v3 = vld [vmem:[%s29639_s1 + $0x1190] ss:$52 sps:$4 sm:$0xff]  }
 0x18f   :  { %5162 = vmatpush2.bf16.msra.mxu0 %v20124_v4  ;;  %v20181_v4 = vld [vmem:[%s29639_s1 + $0x14d0] ss:$52 sps:$4 sm:$0xff]  }
 0x190   :  { %5187 = vmatpush1.bf16.msra.mxu1 %v20127_v44  ;;  %5163 = vmatprep.subr.bf16.mxu0 %v20132_v5  ;;  %v20186_v44 = vld [vmem:[%s29639_s1 + $0x112c] ss:$52 sps:$4 sm:$0xff]  }
 0x191   :  { %5188 = vmatprep.subr.bf16.mxu1 %v20135_v8  ;;  %v20189_v5 = vld [vmem:[%s29639_s1 + $0x146c] ss:$52 sps:$4 sm:$0xff]   ;;  %v20184_v8 = vld [vmem:[%s29639_s1 + $0x1128] ss:$52 sps:$4 sm:$0xff]  }
 0x193   :  { %5164 = vmatpush2.bf16.msra.mxu0 %v20130_v9  ;;  %v20187_v9 = vld [vmem:[%s29639_s1 + $0x1468] ss:$52 sps:$4 sm:$0xff]  }
 0x194   :  { %5189 = vmatpush1.bf16.msra.mxu1 %v20133_v10  ;;  %5165 = vmatprep.subr.bf16.mxu0 %v20138_v11  ;;  %v20192_v10 = vld [vmem:[%s29639_s1 + $0x10c4] ss:$52 sps:$4 sm:$0xff]  }
 0x195   :  { %5190 = vmatprep.subr.bf16.mxu1 %v20141_v12  ;;  %v20195_v11 = vld [vmem:[%s29639_s1 + $0x1404] ss:$52 sps:$4 sm:$0xff]   ;;  %v20190_v12 = vld [vmem:[%s29639_s1 + $0x10c0] ss:$52 sps:$4 sm:$0xff]  }
 0x197   :  { %5166 = vmatpush2.bf16.msra.mxu0 %v20136_v13  ;;  %v20193_v13 = vld [vmem:[%s29639_s1 + $0x1400] ss:$52 sps:$4 sm:$0xff]  }
 0x198   :  { %5191 = vmatpush1.bf16.msra.mxu1 %v20139_v14  ;;  %5167 = vmatprep.subr.bf16.mxu0 %v20144_v15  ;;  %v20198_v14 = vld [vmem:[%s29639_s1 + $0x105c] ss:$52 sps:$4 sm:$0xff]  }
 0x199   :  { %5192 = vmatprep.subr.bf16.mxu1 %v20147_v18  ;;  %v20201_v15 = vld [vmem:[%s29639_s1 + $0x139c] ss:$52 sps:$4 sm:$0xff]   ;;  %v20196_v18 = vld [vmem:[%s29639_s1 + $0x1058] ss:$52 sps:$4 sm:$0xff]  }
 0x19b   :  { %5168 = vmatpush2.bf16.msra.mxu0 %v20142_v19  ;;  %v20199_v19 = vld [vmem:[%s29639_s1 + $0x1398] ss:$52 sps:$4 sm:$0xff]  }
 0x19c   :  { %5193 = vmatpush1.bf16.msra.mxu1 %v20145_v20  ;;  %5169 = vmatprep.subr.bf16.mxu0 %v20150_v21  ;;  %v20204_v20 = vld [vmem:[%s29639_s1 + $0x2fc] ss:$52 sps:$4 sm:$0xff]  }
 0x19d   :  { %5194 = vmatprep.subr.bf16.mxu1 %v20153_v58  ;;  %v20207_v21 = vld [vmem:[%s29639_s1 + $0x97c] ss:$52 sps:$4 sm:$0xff]   ;;  %v20202_v58 = vld [vmem:[%s29639_s1 + $0x2f8] ss:$52 sps:$4 sm:$0xff]  }
 0x19f   :  { %5170 = vmatpush2.bf16.msra.mxu0 %v20148_v23  ;;  %v20205_v23 = vld [vmem:[%s29639_s1 + $0x978] ss:$52 sps:$4 sm:$0xff]  }
 0x1a0   :  { %5195 = vmatpush1.bf16.msra.mxu1 %v20151_v24  ;;  %5221 = vmatprep.subr.bf16.mxu0 %v20159_v27  ;;  %v20210_v24 = vld [vmem:[%s29639_s1 + $0x294] ss:$52 sps:$4 sm:$0xff]   ;;  %v24159_v27 = vld [vmem:[%s29638_s0 + $0x18] ss:$0 sps:$4 sm:$0xff]  }
 0x1a1   :  { %5196 = vmatprep.subr.bf16.mxu1 %v20156_v26  ;;  %v20213_v26 = vld [vmem:[%s29639_s1 + $0x914] ss:$52 sps:$4 sm:$0xff]  }
 0x1a2   :  { %v4927_v41 = vpop.f32.mrf.mxu0  ;;  %5172 = vmatmul.mubr.bf16.vlgmr.msra.gmra.mxu0 %v22881_v7 }
 0x1a3   :  { %v4886_v39 = vpop.f32.mrf.mxu1  ;;  %5222 = vmatpush1.bf16.msra.mxu0 %v20157_v63  ;;  %5253 = vmatprep.mubr.bf16.mxu0 %v22625_v16  ;;  %v20211_v63 = vld [vmem:[%s29639_s1 + $0x910] ss:$52 sps:$4 sm:$0xff]  }
 0x1a4   :  { %v4887_v42 = vadd.f32 %v4886_v39, %v23950_v53  ;;  %5197 = vmatpush2.bf16.msra.mxu1 %v20154_v29  ;;  %v4929_v45 = vpop.f32.mrf.mxu0  ;;  %5223 = vmatprep.subr.bf16.mxu0 %v20165_v33  ;;  %v20169_v53 = vld [vmem:[%s29639_s1 + $0x15a0] ss:$52 sps:$4 sm:$0xff]   ;;  %v20208_v29 = vld [vmem:[%s29639_s1 + $0x290] ss:$52 sps:$4 sm:$0xff]  }
 0x1a5   :  { %v4888_v43 = vpop.f32.mrf.mxu1  ;;  %5198 = vmatprep.subr.bf16.mxu1 %v20162_v30  ;;  %v20216_v30 = vld [vmem:[%s29639_s1 + $0x22c] ss:$52 sps:$4 sm:$0xff]   ;;  %v20222_v39 = vld [vmem:[%s29639_s1 + $0x1c4] ss:$52 sps:$4 sm:$0xff]  }
 0x1a6   :  { %v24065_v49 = vadd.f32 %v4927_v41, %v4887_v42  ;;  %v4889_v50 = vadd.f32 %v4888_v43, %v23964_v60  ;;  %v4931_v54 = vpop.f32.mrf.mxu0  ;;  %v20174_v60 = vld [vmem:[%s29639_s1 + $0x11fc] ss:$52 sps:$4 sm:$0xff]   ;;  %v20219_v33 = vld [vmem:[%s29639_s1 + $0x8ac] ss:$52 sps:$4 sm:$0xff]   ;;  %v20225_v41 = vld [vmem:[%s29639_s1 + $0x844] ss:$52 sps:$4 sm:$0xff]  }
 0x1a7   :  { %v4890_v55 = vpop.f32.mrf.mxu1  ;;  %5224 = vmatpush1.bf16.msra.mxu0 %v20163_v37  ;;  %v20217_v37 = vld [vmem:[%s29639_s1 + $0x8a8] ss:$52 sps:$4 sm:$0xff]   ;;  %v20220_v42 = vld [vmem:[%s29639_s1 + $0x1c0] ss:$52 sps:$4 sm:$0xff]   ;;  %v20232_v54 = vld [vmem:[%s29639_s1 + $0xf0] ss:$52 sps:$4 sm:$0xff]  }
 0x1a8   :  { %v24075_v56 = vadd.f32 %v4929_v45, %v4889_v50  ;;  %5199 = vmatpush2.bf16.msra.mxu1 %v20160_v36  ;;  %v4932_v57 = vpop.f32.mrf.mxu0  ;;  %5225 = vmatprep.subr.bf16.mxu0 %v20171_v48  ;;  %v20214_v36 = vld [vmem:[%s29639_s1 + $0x228] ss:$52 sps:$4 sm:$0xff]   ;;  %v20223_v43 = vld [vmem:[%s29639_s1 + $0x840] ss:$52 sps:$4 sm:$0xff]   ;;  %v20226_v48 = vld [vmem:[%s29639_s1 + $0x158] ss:$52 sps:$4 sm:$0xff]  }
 0x1a9   :  { %5200 = vmatprep.subr.bf16.mxu1 %v20168_v46  ;;  %v4891_v59 = vpop.f32.mrf.mxu1  ;;  %v20228_v45 = vld [vmem:[%s29639_s1 + $0x15c] ss:$52 sps:$4 sm:$0xff]   ;;  %v20229_v50 = vld [vmem:[%s29639_s1 + $0x7d8] ss:$52 sps:$4 sm:$0xff]  }
 0x1aa   :  { %v20231_v46 = vld [vmem:[%s29639_s1 + $0x7dc] ss:$52 sps:$4 sm:$0xff]   ;;  %v20240_v57 = vld [vmem:[%s29639_s1 + $0x8c] ss:$52 sps:$4 sm:$0xff]  }
 0x1ab   :  { %5226 = vmatpush1.bf16.msra.mxu0 %v20169_v53  ;;  %v20237_v53 = vld [vmem:[%s29639_s1 + $0x774] ss:$52 sps:$4 sm:$0xff]   ;;  %v20235_v55 = vld [vmem:[%s29639_s1 + $0x770] ss:$52 sps:$4 sm:$0xff]   ;;  %v20243_v59 = vld [vmem:[%s29639_s1 + $0x70c] ss:$52 sps:$4 sm:$0xff]  }
 0x1ac   :  { %5201 = vmatpush2.bf16.msra.mxu1 %v20166_v52  ;;  %5227 = vmatprep.subr.bf16.mxu0 %v20177_v61  ;;  %v20234_v52 = vld [vmem:[%s29639_s1 + $0xf4] ss:$52 sps:$4 sm:$0xff]  }
 0x1ad   :  { %5202 = vmatprep.subr.bf16.mxu1 %v20174_v60  ;;  %v20238_v60 = vld [vmem:[%s29639_s1 + $0x88] ss:$52 sps:$4 sm:$0xff]  }
 0x1ae   :  { %v20241_v61 = vld [vmem:[%s29639_s1 + $0x708] ss:$52 sps:$4 sm:$0xff]  }
 0x1af   :  { %5228 = vmatpush1.bf16.msra.mxu0 %v20175_v0  ;;  %v20249_v0 = vld [vmem:[%s29639_s1 + $0x6a4] ss:$52 sps:$4 sm:$0xff]  }
 0x1b0   :  { %5203 = vmatpush2.bf16.msra.mxu1 %v20172_v62  ;;  %5229 = vmatprep.subr.bf16.mxu0 %v20183_v2  ;;  %v20246_v62 = vld [vmem:[%s29639_s1 + $0x24] ss:$52 sps:$4 sm:$0xff]   ;;  %v20247_v2 = vld [vmem:[%s29639_s1 + $0x6a0] ss:$52 sps:$4 sm:$0xff]  }
 0x1b1   :  { %5204 = vmatprep.subr.bf16.mxu1 %v20180_v1  ;;  %v20244_v1 = vld [vmem:[%s29639_s1 + $0x20] ss:$52 sps:$4 sm:$0xff]  }
 0x1b3   :  { %5230 = vmatpush1.bf16.msra.mxu0 %v20181_v4  ;;  %v20252_v4 = vld [vmem:[%s29639_s1 + $0x63c] ss:$52 sps:$4 sm:$0xff]  }
 0x1b4   :  { %5205 = vmatpush2.bf16.msra.mxu1 %v20178_v3  ;;  %5231 = vmatprep.subr.bf16.mxu0 %v20189_v5  ;;  %v24243_v3 = vsub.s32 4, %v23475_v28  ;;  %v20250_v5 = vld [vmem:[%s29639_s1 + $0x638] ss:$52 sps:$4 sm:$0xff]  }
 0x1b5   :  { %5206 = vmatprep.subr.bf16.mxu1 %v20186_v44  ;;  %v20255_v44 = vld [vmem:[%s29639_s1 + $0xcbc] ss:$52 sps:$4 sm:$0xff]  }
 0x1b7   :  { %5232 = vmatpush1.bf16.msra.mxu0 %v20187_v9  ;;  %v842_v9 = vsub.s32 5, %v23475_v28 }
 0x1b8   :  { %5207 = vmatpush2.bf16.msra.mxu1 %v20184_v8  ;;  %5233 = vmatprep.subr.bf16.mxu0 %v20195_v11  ;;  %v20253_v8 = vld [vmem:[%s29639_s1 + $0xcb8] ss:$52 sps:$4 sm:$0xff]   ;;  %v20258_v11 = vld [vmem:[%s29639_s1 + $0x5d4] ss:$52 sps:$4 sm:$0xff]  }
 0x1b9   :  { %5208 = vmatprep.subr.bf16.mxu1 %v20192_v10  ;;  %v839_v10 = vrot.slane %v23929_v40, %v24243_v3 }
 0x1bb   :  { %5234 = vmatpush1.bf16.msra.mxu0 %v20193_v13  ;;  %v843_v13 = vrot.slane %v23929_v40, %v842_v9  ;;  %v20264_v40 = vld [vmem:[%s29639_s1 + $0x56c] ss:$52 sps:$4 sm:$0xff]  }
 0x1bc   :  { %5209 = vmatpush2.bf16.msra.mxu1 %v20190_v12  ;;  %5235 = vmatprep.subr.bf16.mxu0 %v20201_v15  ;;  %v20261_v12 = vld [vmem:[%s29639_s1 + $0xc54] ss:$52 sps:$4 sm:$0xff]   ;;  %v20259_v15 = vld [vmem:[%s29639_s1 + $0xc50] ss:$52 sps:$4 sm:$0xff]  }
 0x1bd   :  { %5210 = vmatprep.subr.bf16.mxu1 %v20198_v14  ;;  %v20256_v14 = vld [vmem:[%s29639_s1 + $0x5d0] ss:$52 sps:$4 sm:$0xff]  }
 0x1bf   :  { %5236 = vmatpush1.bf16.msra.mxu0 %v20199_v19 }
 0x1c0   :  { %5211 = vmatpush2.bf16.msra.mxu1 %v20196_v18  ;;  %5262 = vmatprep.subr.bf16.mxu0 %v20204_v20 }
 0x1c1   :  { %5303 = vmatprep.subr.bf16.mxu1 %v20207_v21 }
 0x1c2   :  { %5254 = vmatmul.mubr.bf16.vlgmr.msra.gmra.mxu0 %v24159_v27 }
 0x1c3   :  { %5213 = vmatmul.mubr.bf16.vlgmr.msra.gmra.mxu1 %v23097_v17  ;;  %5263 = vmatpush1.bf16.msra.mxu0 %v20202_v58 }
 0x1c4   :  { %5304 = vmatpush1.bf16.msra.mxu1 %v20205_v23  ;;  %5264 = vmatprep.subr.bf16.mxu0 %v20210_v24  ;;  %v20267_v23 = vld [vmem:[%s29639_s1 + $0xbec] ss:$52 sps:$4 sm:$0xff]  }
 0x1c5   :  { %5305 = vmatprep.subr.bf16.mxu1 %v20213_v26  ;;  %5294 = vmatprep.mubr.bf16.mxu0 %v22810_v47 }
 0x1c6   :  { %5335 = vmatprep.mubr.bf16.mxu1 %v22821_v51 }
 0x1c7   :  { %5265 = vmatpush1.bf16.msra.mxu0 %v20208_v29  ;;  %v20262_v29 = vld [vmem:[%s29639_s1 + $0x568] ss:$52 sps:$4 sm:$0xff]  }
 0x1c8   :  { %5306 = vmatpush1.bf16.msra.mxu1 %v20211_v63  ;;  %5266 = vmatprep.subr.bf16.mxu0 %v20216_v30  ;;  %v20265_v63 = vld [vmem:[%s29639_s1 + $0xbe8] ss:$52 sps:$4 sm:$0xff]  }
 0x1c9   :  { %5307 = vmatprep.subr.bf16.mxu1 %v20219_v33 }
 0x1cb   :  { %5267 = vmatpush1.bf16.msra.mxu0 %v20214_v36 }
 0x1cc   :  { %5308 = vmatpush1.bf16.msra.mxu1 %v20217_v37  ;;  %5268 = vmatprep.subr.bf16.mxu0 %v20222_v39 }
 0x1cd   :  { %5309 = vmatprep.subr.bf16.mxu1 %v20225_v41  ;;  %v20270_v41 = vld [vmem:[%s29639_s1 + $0x504] ss:$52 sps:$4 sm:$0xff]  }
 0x1cf   :  { %5269 = vmatpush1.bf16.msra.mxu0 %v20220_v42  ;;  %v20273_v42 = vld [vmem:[%s29639_s1 + $0xb84] ss:$52 sps:$4 sm:$0xff]  }
 0x1d0   :  { %5310 = vmatpush1.bf16.msra.mxu1 %v20223_v43  ;;  %5270 = vmatprep.subr.bf16.mxu0 %v20228_v45  ;;  %v20268_v43 = vld [vmem:[%s29639_s1 + $0x500] ss:$52 sps:$4 sm:$0xff]  }
 0x1d1   :  { %5311 = vmatprep.subr.bf16.mxu1 %v20231_v46  ;;  %v20271_v45 = vld [vmem:[%s29639_s1 + $0xb80] ss:$52 sps:$4 sm:$0xff]   ;;  %v20276_v46 = vld [vmem:[%s29639_s1 + $0x49c] ss:$52 sps:$4 sm:$0xff]  }
 0x1d3   :  { %5271 = vmatpush1.bf16.msra.mxu0 %v20226_v48  ;;  %v20279_v48 = vld [vmem:[%s29639_s1 + $0xb1c] ss:$52 sps:$4 sm:$0xff]  }
 0x1d4   :  { %5312 = vmatpush1.bf16.msra.mxu1 %v20229_v50  ;;  %5272 = vmatprep.subr.bf16.mxu0 %v20234_v52  ;;  %v20274_v50 = vld [vmem:[%s29639_s1 + $0x498] ss:$52 sps:$4 sm:$0xff]  }
 0x1d5   :  { %5313 = vmatprep.subr.bf16.mxu1 %v20237_v53  ;;  %v20277_v52 = vld [vmem:[%s29639_s1 + $0xb18] ss:$52 sps:$4 sm:$0xff]   ;;  %v20282_v53 = vld [vmem:[%s29639_s1 + $0x434] ss:$52 sps:$4 sm:$0xff]  }
 0x1d7   :  { %5273 = vmatpush1.bf16.msra.mxu0 %v20232_v54  ;;  %v20285_v54 = vld [vmem:[%s29639_s1 + $0xab4] ss:$52 sps:$4 sm:$0xff]  }
 0x1d8   :  { %5314 = vmatpush1.bf16.msra.mxu1 %v20235_v55  ;;  %5274 = vmatprep.subr.bf16.mxu0 %v20240_v57  ;;  %v20280_v55 = vld [vmem:[%s29639_s1 + $0x430] ss:$52 sps:$4 sm:$0xff]  }
 0x1d9   :  { %5315 = vmatprep.subr.bf16.mxu1 %v20243_v59  ;;  %v20283_v57 = vld [vmem:[%s29639_s1 + $0xab0] ss:$52 sps:$4 sm:$0xff]   ;;  %v20288_v59 = vld [vmem:[%s29639_s1 + $0x3cc] ss:$52 sps:$4 sm:$0xff]  }
 0x1db   :  { %5275 = vmatpush1.bf16.msra.mxu0 %v20238_v60  ;;  %v20291_v60 = vld [vmem:[%s29639_s1 + $0xa4c] ss:$52 sps:$4 sm:$0xff]  }
 0x1dc   :  { %5316 = vmatpush1.bf16.msra.mxu1 %v20241_v61  ;;  %5276 = vmatprep.subr.bf16.mxu0 %v20246_v62  ;;  %v20286_v61 = vld [vmem:[%s29639_s1 + $0x3c8] ss:$52 sps:$4 sm:$0xff]  }
 0x1dd   :  { %5317 = vmatprep.subr.bf16.mxu1 %v20249_v0  ;;  %v20289_v62 = vld [vmem:[%s29639_s1 + $0xa48] ss:$52 sps:$4 sm:$0xff]   ;;  %v20294_v0 = vld [vmem:[%s29639_s1 + $0x364] ss:$52 sps:$4 sm:$0xff]  }
 0x1df   :  { %5277 = vmatpush1.bf16.msra.mxu0 %v20244_v1  ;;  %v20297_v1 = vld [vmem:[%s29639_s1 + $0x9e4] ss:$52 sps:$4 sm:$0xff]  }
 0x1e0   :  { %5318 = vmatpush1.bf16.msra.mxu1 %v20247_v2  ;;  %5278 = vmatprep.subr.bf16.mxu0 %v20252_v4  ;;  %v20292_v2 = vld [vmem:[%s29639_s1 + $0x360] ss:$52 sps:$4 sm:$0xff]  }
 0x1e1   :  { %5319 = vmatprep.subr.bf16.mxu1 %v20255_v44  ;;  %v20295_v4 = vld [vmem:[%s29639_s1 + $0x9e0] ss:$52 sps:$4 sm:$0xff]   ;;  %v20300_v44 = vld [vmem:[%s29639_s1 + $0xffc] ss:$52 sps:$4 sm:$0xff]  }
 0x1e2   :  { %v4968_v18 = vpop.f32.mrf.mxu0 }
 0x1e3   :  { %v5009_v19 = vpop.f32.mrf.mxu1  ;;  %v4969_v20 = vadd.f32 %v4968_v18, %v839_v10  ;;  %5279 = vmatpush2.bf16.msra.mxu0 %v20250_v5  ;;  %v20303_v5 = vld [vmem:[%s29639_s1 + $0x167c] ss:$52 sps:$4 sm:$0xff]   ;;  %v20301_v10 = vld [vmem:[%s29639_s1 + $0x1678] ss:$52 sps:$4 sm:$0xff]  }
 0x1e4   :  { %5320 = vmatpush2.bf16.msra.mxu1 %v20253_v8  ;;  %v4970_v21 = vpop.f32.mrf.mxu0  ;;  %5280 = vmatprep.subr.bf16.mxu0 %v20258_v11  ;;  %v20298_v8 = vld [vmem:[%s29639_s1 + $0xff8] ss:$52 sps:$4 sm:$0xff]   ;;  %v20306_v11 = vld [vmem:[%s29639_s1 + $0xf94] ss:$52 sps:$4 sm:$0xff]  }
 0x1e5   :  { %v5011_v58 = vpop.f32.mrf.mxu1  ;;  %5321 = vmatprep.subr.bf16.mxu1 %v20261_v12  ;;  %v4971_v24 = vadd.f32 %v4970_v21, %v843_v13  ;;  %v24281_v26 = vadd.f32 %v5009_v19, %v4969_v20  ;;  %v20309_v12 = vld [vmem:[%s29639_s1 + $0x1614] ss:$52 sps:$4 sm:$0xff]   ;;  %v20304_v13 = vld [vmem:[%s29639_s1 + $0xf90] ss:$52 sps:$4 sm:$0xff]   ;;  %v20312_v19 = vld [vmem:[%s29639_s1 + $0xf2c] ss:$52 sps:$4 sm:$0xff]  }
 0x1e6   :  { %v4972_v30 = vpop.f32.mrf.mxu0  ;;  %v20315_v20 = vld [vmem:[%s29639_s1 + $0x15ac] ss:$52 sps:$4 sm:$0xff]   ;;  %v20310_v21 = vld [vmem:[%s29639_s1 + $0xf28] ss:$52 sps:$4 sm:$0xff]  }
 0x1e7   :  { %v5013_v33 = vpop.f32.mrf.mxu1  ;;  %v24289_v36 = vadd.f32 %v5011_v58, %v4971_v24  ;;  %5281 = vmatpush2.bf16.msra.mxu0 %v20256_v14  ;;  %v20307_v14 = vld [vmem:[%s29639_s1 + $0x1610] ss:$52 sps:$4 sm:$0xff]   ;;  %v20313_v58 = vld [vmem:[%s29639_s1 + $0x15a8] ss:$52 sps:$4 sm:$0xff]   ;;  %v20319_v30 = vld [vmem:[%s29639_s1 + $0x1540] ss:$52 sps:$4 sm:$0xff]  }
 0x1e8   :  { %5322 = vmatpush2.bf16.msra.mxu1 %v20259_v15  ;;  %v4973_v37 = vpop.f32.mrf.mxu0  ;;  %5282 = vmatprep.subr.bf16.mxu0 %v20264_v40  ;;  %v20318_v24 = vld [vmem:[%s29639_s1 + $0xec4] ss:$52 sps:$4 sm:$0xff]   ;;  %v20324_v33 = vld [vmem:[%s29639_s1 + $0xe5c] ss:$52 sps:$4 sm:$0xff]  }
 0x1e9   :  { %5323 = vmatprep.subr.bf16.mxu1 %v20267_v23  ;;  %v5014_v39 = vpop.f32.mrf.mxu1  ;;  %v20327_v37 = vld [vmem:[%s29639_s1 + $0x14dc] ss:$52 sps:$4 sm:$0xff]  }
 0x1ea   :  { %v20322_v39 = vld [vmem:[%s29639_s1 + $0xe58] ss:$52 sps:$4 sm:$0xff]  }
 0x1eb   :  { %5283 = vmatpush2.bf16.msra.mxu0 %v20262_v29  ;;  %v20321_v29 = vld [vmem:[%s29639_s1 + $0x1544] ss:$52 sps:$4 sm:$0xff]  }
 0x1ec   :  { %5324 = vmatpush2.bf16.msra.mxu1 %v20265_v63  ;;  %5284 = vmatprep.subr.bf16.mxu0 %v20270_v41  ;;  %v20316_v63 = vld [vmem:[%s29639_s1 + $0xec0] ss:$52 sps:$4 sm:$0xff]   ;;  %v20325_v41 = vld [vmem:[%s29639_s1 + $0x14d8] ss:$52 sps:$4 sm:$0xff]  }
 0x1ed   :  { %5325 = vmatprep.subr.bf16.mxu1 %v20273_v42  ;;  %v20330_v42 = vld [vmem:[%s29639_s1 + $0xdf4] ss:$52 sps:$4 sm:$0xff]  }
 0x1ef   :  { %5285 = vmatpush2.bf16.msra.mxu0 %v20268_v43  ;;  %v20333_v43 = vld [vmem:[%s29639_s1 + $0x1474] ss:$52 sps:$4 sm:$0xff]  }
 0x1f0   :  { %5326 = vmatpush2.bf16.msra.mxu1 %v20271_v45  ;;  %5286 = vmatprep.subr.bf16.mxu0 %v20276_v46  ;;  %v20328_v45 = vld [vmem:[%s29639_s1 + $0xdf0] ss:$52 sps:$4 sm:$0xff]  }
 0x1f1   :  { %5327 = vmatprep.subr.bf16.mxu1 %v20279_v48  ;;  %v20331_v46 = vld [vmem:[%s29639_s1 + $0x1470] ss:$52 sps:$4 sm:$0xff]   ;;  %v20336_v48 = vld [vmem:[%s29639_s1 + $0xd8c] ss:$52 sps:$4 sm:$0xff]  }
 0x1f3   :  { %5287 = vmatpush2.bf16.msra.mxu0 %v20274_v50  ;;  %v20339_v50 = vld [vmem:[%s29639_s1 + $0x140c] ss:$52 sps:$4 sm:$0xff]  }
 0x1f4   :  { %5328 = vmatpush2.bf16.msra.mxu1 %v20277_v52  ;;  %5288 = vmatprep.subr.bf16.mxu0 %v20282_v53  ;;  %v20334_v52 = vld [vmem:[%s29639_s1 + $0xd88] ss:$52 sps:$4 sm:$0xff]  }
 0x1f5   :  { %5329 = vmatprep.subr.bf16.mxu1 %v20285_v54  ;;  %v20337_v53 = vld [vmem:[%s29639_s1 + $0x1408] ss:$52 sps:$4 sm:$0xff]   ;;  %v20342_v54 = vld [vmem:[%s29639_s1 + $0xd24] ss:$52 sps:$4 sm:$0xff]  }
 0x1f7   :  { %5289 = vmatpush2.bf16.msra.mxu0 %v20280_v55  ;;  %v20345_v55 = vld [vmem:[%s29639_s1 + $0x13a4] ss:$52 sps:$4 sm:$0xff]  }
 0x1f8   :  { %5330 = vmatpush2.bf16.msra.mxu1 %v20283_v57  ;;  %5290 = vmatprep.subr.bf16.mxu0 %v20288_v59  ;;  %v20340_v57 = vld [vmem:[%s29639_s1 + $0xd20] ss:$52 sps:$4 sm:$0xff]  }
 0x1f9   :  { %5331 = vmatprep.subr.bf16.mxu1 %v20291_v60  ;;  %v20343_v59 = vld [vmem:[%s29639_s1 + $0x13a0] ss:$52 sps:$4 sm:$0xff]   ;;  %v20348_v60 = vld [vmem:[%s29639_s1 + $0x133c] ss:$52 sps:$4 sm:$0xff]  }
 0x1fb   :  { %5291 = vmatpush2.bf16.msra.mxu0 %v20286_v61  ;;  %v20351_v61 = vld [vmem:[%s29639_s1 + $0x304] ss:$52 sps:$4 sm:$0xff]  }
 0x1fc   :  { %5332 = vmatpush2.bf16.msra.mxu1 %v20289_v62  ;;  %5292 = vmatprep.subr.bf16.mxu0 %v20294_v0  ;;  %v20346_v62 = vld [vmem:[%s29639_s1 + $0x1338] ss:$52 sps:$4 sm:$0xff]   ;;  %v20349_v0 = vld [vmem:[%s29639_s1 + $0x300] ss:$52 sps:$4 sm:$0xff]  }
 0x1fd   :  { %5333 = vmatprep.subr.bf16.mxu1 %v20297_v1  ;;  %v20354_v1 = vld [vmem:[%s29639_s1 + $0x12d4] ss:$52 sps:$4 sm:$0xff]  }
 0x1ff   :  { %5293 = vmatpush2.bf16.msra.mxu0 %v20292_v2  ;;  %v20357_v2 = vld [vmem:[%s29639_s1 + $0x29c] ss:$52 sps:$4 sm:$0xff]  }
 0x200   :  { %5334 = vmatpush2.bf16.msra.mxu1 %v20295_v4  ;;  %5344 = vmatprep.subr.bf16.mxu0 %v20300_v44  ;;  %v20352_v4 = vld [vmem:[%s29639_s1 + $0x12d0] ss:$52 sps:$4 sm:$0xff]  }
 0x201   :  { %5385 = vmatprep.subr.bf16.mxu1 %v20303_v5 }
 0x202   :  { %5295 = vmatmul.mubr.bf16.vlgmr.msra.gmra.mxu0 %v22879_v6 }
 0x203   :  { %5336 = vmatmul.mubr.bf16.vlgmr.msra.gmra.mxu1 %v22881_v7  ;;  %v24377_v15 = vpop.f32.mrf.mxu1  ;;  %5345 = vmatpush1.bf16.msra.mxu0 %v20298_v8  ;;  %v20355_v8 = vld [vmem:[%s29639_s1 + $0x298] ss:$52 sps:$4 sm:$0xff]  }
 0x204   :  { %5386 = vmatpush1.bf16.msra.mxu1 %v20301_v10  ;;  %5346 = vmatprep.subr.bf16.mxu0 %v20306_v11  ;;  %v20360_v11 = vld [vmem:[%s29639_s1 + $0x126c] ss:$52 sps:$4 sm:$0xff]  }
 0x205   :  { %5387 = vmatprep.subr.bf16.mxu1 %v20309_v12  ;;  %v24379_v18 = vpop.f32.mrf.mxu1  ;;  %5417 = vmatprep.mubr.bf16.mxu1 %v22625_v16  ;;  %v20363_v12 = vld [vmem:[%s29639_s1 + $0x234] ss:$52 sps:$4 sm:$0xff]  }
 0x206   :  { %5376 = vmatprep.mubr.bf16.mxu0 %v22968_v35 }
 0x207   :  { %v5095_v40 = vpop.f32.mrf.mxu1  ;;  %5347 = vmatpush1.bf16.msra.mxu0 %v20304_v13  ;;  %v20358_v13 = vld [vmem:[%s29639_s1 + $0x1268] ss:$52 sps:$4 sm:$0xff]  }
 0x208   :  { %5388 = vmatpush1.bf16.msra.mxu1 %v20307_v14  ;;  %5348 = vmatprep.subr.bf16.mxu0 %v20312_v19  ;;  %v20372_v40 = vld [vmem:[%s29639_s1 + $0x119c] ss:$52 sps:$4 sm:$0xff]  }
 0x209   :  { %5389 = vmatprep.subr.bf16.mxu1 %v20315_v20  ;;  %v5096_v23 = vpop.f32.mrf.mxu1  ;;  %v20361_v20 = vld [vmem:[%s29639_s1 + $0x230] ss:$52 sps:$4 sm:$0xff]  }
 0x20a   :  { %v20375_v23 = vld [vmem:[%s29639_s1 + $0x164] ss:$52 sps:$4 sm:$0xff]  }
 0x20b   :  { %5349 = vmatpush1.bf16.msra.mxu0 %v20310_v21  ;;  %v20369_v21 = vld [vmem:[%s29639_s1 + $0x1cc] ss:$52 sps:$4 sm:$0xff]  }
 0x20c   :  { %5390 = vmatpush1.bf16.msra.mxu1 %v20313_v58  ;;  %5350 = vmatprep.subr.bf16.mxu0 %v20318_v24  ;;  %v20367_v58 = vld [vmem:[%s29639_s1 + $0x1c8] ss:$52 sps:$4 sm:$0xff]   ;;  %v20370_v24 = vld [vmem:[%s29639_s1 + $0x1198] ss:$52 sps:$4 sm:$0xff]  }
 0x20d   :  { %5391 = vmatprep.subr.bf16.mxu1 %v20321_v29  ;;  %v20373_v29 = vld [vmem:[%s29639_s1 + $0x160] ss:$52 sps:$4 sm:$0xff]  }
 0x20f   :  { %5351 = vmatpush1.bf16.msra.mxu0 %v20316_v63  ;;  %v20378_v63 = vld [vmem:[%s29639_s1 + $0x1134] ss:$52 sps:$4 sm:$0xff]  }
 0x210   :  { %5392 = vmatpush1.bf16.msra.mxu1 %v20319_v30  ;;  %5352 = vmatprep.subr.bf16.mxu0 %v20324_v33  ;;  %v20381_v30 = vld [vmem:[%s29639_s1 + $0xfc] ss:$52 sps:$4 sm:$0xff]  }
 0x211   :  { %5393 = vmatprep.subr.bf16.mxu1 %v20327_v37  ;;  %v20376_v33 = vld [vmem:[%s29639_s1 + $0x1130] ss:$52 sps:$4 sm:$0xff]   ;;  %v20379_v37 = vld [vmem:[%s29639_s1 + $0xf8] ss:$52 sps:$4 sm:$0xff]  }
 0x213   :  { %5353 = vmatpush1.bf16.msra.mxu0 %v20322_v39  ;;  %v20384_v39 = vld [vmem:[%s29639_s1 + $0x10cc] ss:$52 sps:$4 sm:$0xff]  }
 0x214   :  { %5394 = vmatpush1.bf16.msra.mxu1 %v20325_v41  ;;  %5354 = vmatprep.subr.bf16.mxu0 %v20330_v42  ;;  %v20387_v41 = vld [vmem:[%s29639_s1 + $0x94] ss:$52 sps:$4 sm:$0xff]  }
 0x215   :  { %5395 = vmatprep.subr.bf16.mxu1 %v20333_v43  ;;  %v20382_v42 = vld [vmem:[%s29639_s1 + $0x10c8] ss:$52 sps:$4 sm:$0xff]   ;;  %v20385_v43 = vld [vmem:[%s29639_s1 + $0x90] ss:$52 sps:$4 sm:$0xff]  }
 0x217   :  { %5355 = vmatpush1.bf16.msra.mxu0 %v20328_v45  ;;  %v20390_v45 = vld [vmem:[%s29639_s1 + $0x1064] ss:$52 sps:$4 sm:$0xff]  }
 0x218   :  { %5396 = vmatpush1.bf16.msra.mxu1 %v20331_v46  ;;  %5356 = vmatprep.subr.bf16.mxu0 %v20336_v48  ;;  %v20393_v46 = vld [vmem:[%s29639_s1 + $0x2c] ss:$52 sps:$4 sm:$0xff]  }
 0x219   :  { %5397 = vmatprep.subr.bf16.mxu1 %v20339_v50  ;;  %v20388_v48 = vld [vmem:[%s29639_s1 + $0x1060] ss:$52 sps:$4 sm:$0xff]   ;;  %v20391_v50 = vld [vmem:[%s29639_s1 + $0x28] ss:$52 sps:$4 sm:$0xff]  }
 0x21b   :  { %5357 = vmatpush1.bf16.msra.mxu0 %v20334_v52  ;;  %v20396_v52 = vld [vmem:[%s29639_s1 + $0x644] ss:$52 sps:$4 sm:$0xff]  }
 0x21c   :  { %5398 = vmatpush1.bf16.msra.mxu1 %v20337_v53  ;;  %5358 = vmatprep.subr.bf16.mxu0 %v20342_v54  ;;  %v20399_v53 = vld [vmem:[%s29639_s1 + $0x984] ss:$52 sps:$4 sm:$0xff]   ;;  %v20394_v54 = vld [vmem:[%s29639_s1 + $0x640] ss:$52 sps:$4 sm:$0xff]  }
 0x21d   :  { %5399 = vmatprep.subr.bf16.mxu1 %v20345_v55  ;;  %v20397_v55 = vld [vmem:[%s29639_s1 + $0x980] ss:$52 sps:$4 sm:$0xff]  }
 0x21f   :  { %5359 = vmatpush1.bf16.msra.mxu0 %v20340_v57  ;;  %v20402_v57 = vld [vmem:[%s29639_s1 + $0x5dc] ss:$52 sps:$4 sm:$0xff]  }
 0x220   :  { %5400 = vmatpush1.bf16.msra.mxu1 %v20343_v59  ;;  %5360 = vmatprep.subr.bf16.mxu0 %v20348_v60  ;;  %v20405_v59 = vld [vmem:[%s29639_s1 + $0x91c] ss:$52 sps:$4 sm:$0xff]   ;;  %v20400_v60 = vld [vmem:[%s29639_s1 + $0x5d8] ss:$52 sps:$4 sm:$0xff]  }
 0x221   :  { %5426 = vmatprep.subr.bf16.mxu1 %v20351_v61  ;;  %v20403_v61 = vld [vmem:[%s29639_s1 + $0x918] ss:$52 sps:$4 sm:$0xff]  }
 0x222   :  { %v5050_v44 = vpop.f32.mrf.mxu0 }
 0x223   :  { %5418 = vmatmul.mubr.bf16.vlgmr.msra.gmra.mxu1 %v24159_v27  ;;  %v5051_v5 = vadd.f32 %v5050_v44, %v24281_v26  ;;  %5361 = vmatpush2.bf16.msra.mxu0 %v20346_v62  ;;  %v20409_v44 = vld [vmem:[%s29639_s1 + $0x8b0] ss:$52 sps:$4 sm:$0xff]  }
 0x224   :  { %5427 = vmatpush1.bf16.msra.mxu1 %v20349_v0  ;;  %v5052_v10 = vpop.f32.mrf.mxu0  ;;  %5362 = vmatprep.subr.bf16.mxu0 %v20354_v1  ;;  %v20408_v0 = vld [vmem:[%s29639_s1 + $0x574] ss:$52 sps:$4 sm:$0xff]  }
 0x225   :  { %5428 = vmatprep.subr.bf16.mxu1 %v20357_v2  ;;  %v24488_v27 = vadd.f32 %v24377_v15, %v5051_v5  ;;  %v5053_v26 = vadd.f32 %v5052_v10, %v24289_v36  ;;  %5458 = vmatprep.mubr.bf16.mxu1 %v22810_v47  ;;  %v20366_v36 = vld [vmem:[%s29639_s1 + $0x1204] ss:$52 sps:$4 sm:$0xff]   ;;  %v20411_v2 = vld [vmem:[%s29639_s1 + $0x8b4] ss:$52 sps:$4 sm:$0xff]   ;;  %v20414_v10 = vld [vmem:[%s29639_s1 + $0x50c] ss:$52 sps:$4 sm:$0xff]  }
 0x226   :  { %v5054_v14 = vpop.f32.mrf.mxu0 }
 0x227   :  { %v24496_v19 = vadd.f32 %v24379_v18, %v5053_v26  ;;  %5363 = vmatpush2.bf16.msra.mxu0 %v20352_v4  ;;  %v20364_v18 = vld [vmem:[%s29639_s1 + $0x1200] ss:$52 sps:$4 sm:$0xff]   ;;  %v20406_v4 = vld [vmem:[%s29639_s1 + $0x570] ss:$52 sps:$4 sm:$0xff]   ;;  %v20415_v26 = vld [vmem:[%s29639_s1 + $0x848] ss:$52 sps:$4 sm:$0xff]  }
 0x228   :  { %5429 = vmatpush1.bf16.msra.mxu1 %v20355_v8  ;;  %v5055_v15 = vpop.f32.mrf.mxu0  ;;  %5364 = vmatprep.subr.bf16.mxu0 %v20360_v11  ;;  %v20417_v11 = vld [vmem:[%s29639_s1 + $0x84c] ss:$52 sps:$4 sm:$0xff]   ;;  %v20423_v14 = vld [vmem:[%s29639_s1 + $0x7e4] ss:$52 sps:$4 sm:$0xff]  }
 0x229   :  { %5430 = vmatprep.subr.bf16.mxu1 %v20363_v12  ;;  %v20412_v12 = vld [vmem:[%s29639_s1 + $0x508] ss:$52 sps:$4 sm:$0xff]   ;;  %v20421_v15 = vld [vmem:[%s29639_s1 + $0x7e0] ss:$52 sps:$4 sm:$0xff]  }
 0x22b   :  { %5365 = vmatpush2.bf16.msra.mxu0 %v20358_v13  ;;  %v20420_v13 = vld [vmem:[%s29639_s1 + $0x4a4] ss:$52 sps:$4 sm:$0xff]  }
 0x22c   :  { %5431 = vmatpush1.bf16.msra.mxu1 %v20361_v20  ;;  %5366 = vmatprep.subr.bf16.mxu0 %v20366_v36  ;;  %v20418_v20 = vld [vmem:[%s29639_s1 + $0x4a0] ss:$52 sps:$4 sm:$0xff]   ;;  %v20426_v36 = vld [vmem:[%s29639_s1 + $0x43c] ss:$52 sps:$4 sm:$0xff]  }
 0x22d   :  { %5432 = vmatprep.subr.bf16.mxu1 %v20369_v21  ;;  %v20429_v21 = vld [vmem:[%s29639_s1 + $0x77c] ss:$52 sps:$4 sm:$0xff]  }
 0x22f   :  { %5367 = vmatpush2.bf16.msra.mxu0 %v20364_v18  ;;  %v20424_v18 = vld [vmem:[%s29639_s1 + $0x438] ss:$52 sps:$4 sm:$0xff]  }
 0x230   :  { %5433 = vmatpush1.bf16.msra.mxu1 %v20367_v58  ;;  %5368 = vmatprep.subr.bf16.mxu0 %v20372_v40  ;;  %v20427_v58 = vld [vmem:[%s29639_s1 + $0x778] ss:$52 sps:$4 sm:$0xff]   ;;  %v20432_v40 = vld [vmem:[%s29639_s1 + $0x3d4] ss:$52 sps:$4 sm:$0xff]  }
 0x231   :  { %5434 = vmatprep.subr.bf16.mxu1 %v20375_v23  ;;  %v20435_v23 = vld [vmem:[%s29639_s1 + $0x714] ss:$52 sps:$4 sm:$0xff]  }
 0x233   :  { %5369 = vmatpush2.bf16.msra.mxu0 %v20370_v24  ;;  %v20430_v24 = vld [vmem:[%s29639_s1 + $0x3d0] ss:$52 sps:$4 sm:$0xff]  }
 0x234   :  { %5435 = vmatpush1.bf16.msra.mxu1 %v20373_v29  ;;  %5370 = vmatprep.subr.bf16.mxu0 %v20378_v63  ;;  %v20433_v29 = vld [vmem:[%s29639_s1 + $0x710] ss:$52 sps:$4 sm:$0xff]   ;;  %v20438_v63 = vld [vmem:[%s29639_s1 + $0x36c] ss:$52 sps:$4 sm:$0xff]  }
 0x235   :  { %5436 = vmatprep.subr.bf16.mxu1 %v20381_v30  ;;  %v20441_v30 = vld [vmem:[%s29639_s1 + $0x6ac] ss:$52 sps:$4 sm:$0xff]  }
 0x237   :  { %5371 = vmatpush2.bf16.msra.mxu0 %v20376_v33  ;;  %v846_v33 = vsub.s32 6, %v23475_v28 }
 0x238   :  { %5437 = vmatpush1.bf16.msra.mxu1 %v20379_v37  ;;  %5372 = vmatprep.subr.bf16.mxu0 %v20384_v39  ;;  %v20436_v37 = vld [vmem:[%s29639_s1 + $0x368] ss:$52 sps:$4 sm:$0xff]  }
 0x239   :  { %5438 = vmatprep.subr.bf16.mxu1 %v20387_v41  ;;  %v20439_v39 = vld [vmem:[%s29639_s1 + $0x6a8] ss:$52 sps:$4 sm:$0xff]   ;;  %v850_v41 = vsub.s32 7, %v23475_v28 }
 0x23b   :  { %5373 = vmatpush2.bf16.msra.mxu0 %v20382_v42  ;;  %v20444_v42 = vld [vmem:[%s29639_s1 + $0xcc4] ss:$52 sps:$4 sm:$0xff]  }
 0x23c   :  { %5439 = vmatpush1.bf16.msra.mxu1 %v20385_v43  ;;  %5374 = vmatprep.subr.bf16.mxu0 %v20390_v45  ;;  %v20447_v43 = vld [vmem:[%s29639_s1 + $0x1004] ss:$52 sps:$4 sm:$0xff]  }
 0x23d   :  { %5440 = vmatprep.subr.bf16.mxu1 %v20393_v46  ;;  %v22597_v45 = vld [vmem:[%s29640_s2] sm:$0xff] }
 0x23e   :  { %v847_v46 = vrot.slane %v22597_v45, %v846_v33 }
 0x23f   :  { %5375 = vmatpush2.bf16.msra.mxu0 %v20388_v48  ;;  %v20442_v48 = vld [vmem:[%s29639_s1 + $0xcc0] ss:$52 sps:$4 sm:$0xff]  }
 0x240   :  { %5441 = vmatpush1.bf16.msra.mxu1 %v20391_v50  ;;  %5467 = vmatprep.subr.bf16.mxu0 %v20399_v53  ;;  %v20445_v50 = vld [vmem:[%s29639_s1 + $0x1000] ss:$52 sps:$4 sm:$0xff]   ;;  %v20450_v53 = vld [vmem:[%s29639_s1 + $0xc5c] ss:$52 sps:$4 sm:$0xff]  }
 0x241   :  { %5442 = vmatprep.subr.bf16.mxu1 %v20396_v52  ;;  %v851_v52 = vrot.slane %v22597_v45, %v850_v41  ;;  %v20495_v45 = vld [vmem:[%s29639_s1 + $0x1684] ss:$52 sps:$4 sm:$0xff]  }
 0x242   :  { %5377 = vmatmul.mubr.bf16.vlgmr.msra.gmra.mxu0 %v23097_v17 }
 0x243   :  { %v24586_v62 = vpop.f32.mrf.mxu1  ;;  %5468 = vmatpush1.bf16.msra.mxu0 %v20397_v55  ;;  %5499 = vmatprep.mubr.bf16.mxu0 %v22821_v51 }
 0x244   :  { %5443 = vmatpush2.bf16.msra.mxu1 %v20394_v54  ;;  %5469 = vmatprep.subr.bf16.mxu0 %v20405_v59  ;;  %v20453_v54 = vld [vmem:[%s29639_s1 + $0xf9c] ss:$52 sps:$4 sm:$0xff]   ;;  %v5133_v55 = vadd.f32 %v24586_v62, %v847_v46  ;;  %v20451_v59 = vld [vmem:[%s29639_s1 + $0xf98] ss:$52 sps:$4 sm:$0xff]   ;;  %v20456_v62 = vld [vmem:[%s29639_s1 + $0xbf4] ss:$52 sps:$4 sm:$0xff]  }
 0x245   :  { %5444 = vmatprep.subr.bf16.mxu1 %v20402_v57  ;;  %v24591_v1 = vpop.f32.mrf.mxu1  ;;  %v20448_v57 = vld [vmem:[%s29639_s1 + $0xc58] ss:$52 sps:$4 sm:$0xff]   ;;  %v20490_v46 = vld [vmem:[%s29639_s1 + $0x1340] ss:$52 sps:$4 sm:$0xff]  }
 0x247   :  { %v5136_v5 = vpop.f32.mrf.mxu1  ;;  %5470 = vmatpush1.bf16.msra.mxu0 %v20403_v61  ;;  %v5135_v61 = vadd.f32 %v24591_v1, %v851_v52  ;;  %v20454_v1 = vld [vmem:[%s29639_s1 + $0xbf0] ss:$52 sps:$4 sm:$0xff]  }
 0x248   :  { %5445 = vmatpush2.bf16.msra.mxu1 %v20400_v60  ;;  %5471 = vmatprep.subr.bf16.mxu0 %v20411_v2  ;;  %v20457_v5 = vld [vmem:[%s29639_s1 + $0xf30] ss:$52 sps:$4 sm:$0xff]  }
 0x249   :  { %5446 = vmatprep.subr.bf16.mxu1 %v20408_v0  ;;  %v5137_v8 = vpop.f32.mrf.mxu1  ;;  %v20501_v52 = vld [vmem:[%s29639_s1 + $0x161c] ss:$52 sps:$4 sm:$0xff]  }
 0x24b   :  { %5472 = vmatpush1.bf16.msra.mxu0 %v20409_v44 }
 0x24c   :  { %5447 = vmatpush2.bf16.msra.mxu1 %v20406_v4  ;;  %5473 = vmatprep.subr.bf16.mxu0 %v20417_v11  ;;  %v20459_v4 = vld [vmem:[%s29639_s1 + $0xf34] ss:$52 sps:$4 sm:$0xff]   ;;  %v20462_v11 = vld [vmem:[%s29639_s1 + $0xb8c] ss:$52 sps:$4 sm:$0xff]  }
 0x24d   :  { %5448 = vmatprep.subr.bf16.mxu1 %v20414_v10 }
 0x24f   :  { %5474 = vmatpush1.bf16.msra.mxu0 %v20415_v26  ;;  %v20460_v26 = vld [vmem:[%s29639_s1 + $0xb88] ss:$52 sps:$4 sm:$0xff]  }
 0x250   :  { %5449 = vmatpush2.bf16.msra.mxu1 %v20412_v12  ;;  %5475 = vmatprep.subr.bf16.mxu0 %v20423_v14  ;;  %v20465_v12 = vld [vmem:[%s29639_s1 + $0xecc] ss:$52 sps:$4 sm:$0xff]   ;;  %v20468_v14 = vld [vmem:[%s29639_s1 + $0xb24] ss:$52 sps:$4 sm:$0xff]  }
 0x251   :  { %5450 = vmatprep.subr.bf16.mxu1 %v20420_v13  ;;  %v20463_v13 = vld [vmem:[%s29639_s1 + $0xec8] ss:$52 sps:$4 sm:$0xff]  }
 0x253   :  { %5476 = vmatpush1.bf16.msra.mxu0 %v20421_v15  ;;  %v20466_v15 = vld [vmem:[%s29639_s1 + $0xb20] ss:$52 sps:$4 sm:$0xff]  }
 0x254   :  { %5451 = vmatpush2.bf16.msra.mxu1 %v20418_v20  ;;  %5477 = vmatprep.subr.bf16.mxu0 %v20429_v21  ;;  %v20471_v20 = vld [vmem:[%s29639_s1 + $0xe64] ss:$52 sps:$4 sm:$0xff]   ;;  %v20474_v21 = vld [vmem:[%s29639_s1 + $0xabc] ss:$52 sps:$4 sm:$0xff]  }
 0x255   :  { %5452 = vmatprep.subr.bf16.mxu1 %v20426_v36  ;;  %v20469_v36 = vld [vmem:[%s29639_s1 + $0xe60] ss:$52 sps:$4 sm:$0xff]  }
 0x257   :  { %5478 = vmatpush1.bf16.msra.mxu0 %v20427_v58  ;;  %v20472_v58 = vld [vmem:[%s29639_s1 + $0xab8] ss:$52 sps:$4 sm:$0xff]  }
 0x258   :  { %5453 = vmatpush2.bf16.msra.mxu1 %v20424_v18  ;;  %5479 = vmatprep.subr.bf16.mxu0 %v20435_v23  ;;  %v20477_v18 = vld [vmem:[%s29639_s1 + $0xdfc] ss:$52 sps:$4 sm:$0xff]   ;;  %v20480_v23 = vld [vmem:[%s29639_s1 + $0xa54] ss:$52 sps:$4 sm:$0xff]  }
 0x259   :  { %5454 = vmatprep.subr.bf16.mxu1 %v20432_v40  ;;  %v20475_v40 = vld [vmem:[%s29639_s1 + $0xdf8] ss:$52 sps:$4 sm:$0xff]  }
 0x25b   :  { %5480 = vmatpush1.bf16.msra.mxu0 %v20433_v29  ;;  %v20478_v29 = vld [vmem:[%s29639_s1 + $0xa50] ss:$52 sps:$4 sm:$0xff]  }
 0x25c   :  { %5455 = vmatpush2.bf16.msra.mxu1 %v20430_v24  ;;  %5481 = vmatprep.subr.bf16.mxu0 %v20441_v30  ;;  %v20483_v24 = vld [vmem:[%s29639_s1 + $0xd94] ss:$52 sps:$4 sm:$0xff]   ;;  %v20486_v30 = vld [vmem:[%s29639_s1 + $0x9ec] ss:$52 sps:$4 sm:$0xff]  }
 0x25d   :  { %5456 = vmatprep.subr.bf16.mxu1 %v20438_v63  ;;  %v20481_v63 = vld [vmem:[%s29639_s1 + $0xd90] ss:$52 sps:$4 sm:$0xff]  }
 0x25f   :  { %5482 = vmatpush1.bf16.msra.mxu0 %v20439_v39  ;;  %v20484_v39 = vld [vmem:[%s29639_s1 + $0x9e8] ss:$52 sps:$4 sm:$0xff]  }
 0x260   :  { %5457 = vmatpush2.bf16.msra.mxu1 %v20436_v37  ;;  %5483 = vmatprep.subr.bf16.mxu0 %v20444_v42  ;;  %v20489_v37 = vld [vmem:[%s29639_s1 + $0xd2c] ss:$52 sps:$4 sm:$0xff]   ;;  %v20487_v42 = vld [vmem:[%s29639_s1 + $0xd28] ss:$52 sps:$4 sm:$0xff]  }
 0x261   :  { %5508 = vmatprep.subr.bf16.mxu1 %v20447_v43  ;;  %v20492_v43 = vld [vmem:[%s29639_s1 + $0x1344] ss:$52 sps:$4 sm:$0xff]  }
 0x262   :  { %v5173_v60 = vpop.f32.mrf.mxu0 }
 0x263   :  { %5459 = vmatmul.mubr.bf16.vlgmr.msra.gmra.mxu1 %v22879_v6  ;;  %v24699_v0 = vadd.f32 %v5173_v60, %v5133_v55  ;;  %5484 = vmatpush2.bf16.msra.mxu0 %v20442_v48  ;;  %v20493_v48 = vld [vmem:[%s29639_s1 + $0x1680] ss:$52 sps:$4 sm:$0xff]  }
 0x264   :  { %5509 = vmatpush1.bf16.msra.mxu1 %v20445_v50  ;;  %v5175_v2 = vpop.f32.mrf.mxu0  ;;  %5485 = vmatprep.subr.bf16.mxu0 %v20450_v53  ;;  %v20498_v50 = vld [vmem:[%s29639_s1 + $0x12dc] ss:$52 sps:$4 sm:$0xff]   ;;  %v20496_v53 = vld [vmem:[%s29639_s1 + $0x12d8] ss:$52 sps:$4 sm:$0xff]   ;;  %v20507_v60 = vld [vmem:[%s29639_s1 + $0x15b4] ss:$52 sps:$4 sm:$0xff]  }
 0x265   :  { %5510 = vmatprep.subr.bf16.mxu1 %v20453_v54  ;;  %v24707_v44 = vadd.f32 %v5175_v2, %v5135_v61  ;;  %5540 = vmatprep.mubr.bf16.mxu1 %v22968_v35  ;;  %v20499_v54 = vld [vmem:[%s29639_s1 + $0x1618] ss:$52 sps:$4 sm:$0xff]  }
 0x266   :  { %v5177_v8 = vpop.f32.mrf.mxu0 }
 0x267   :  { %5486 = vmatpush2.bf16.msra.mxu0 %v20448_v57  ;;  %v20505_v8 = vld [vmem:[%s29639_s1 + $0x15b0] ss:$52 sps:$4 sm:$0xff]  }
 0x268   :  { %5511 = vmatpush1.bf16.msra.mxu1 %v20451_v59  ;;  %v5178_v10 = vpop.f32.mrf.mxu0  ;;  %5487 = vmatprep.subr.bf16.mxu0 %v20456_v62  ;;  %v20504_v59 = vld [vmem:[%s29639_s1 + $0x1274] ss:$52 sps:$4 sm:$0xff]  }
 0x269   :  { %5512 = vmatprep.subr.bf16.mxu1 %v20459_v4 }
 0x26b   :  { %5488 = vmatpush2.bf16.msra.mxu0 %v20454_v1 }
 0x26c   :  { %5513 = vmatpush1.bf16.msra.mxu1 %v20457_v5  ;;  %5489 = vmatprep.subr.bf16.mxu0 %v20462_v11  ;;  %v20502_v5 = vld [vmem:[%s29639_s1 + $0x1270] ss:$52 sps:$4 sm:$0xff]   ;;  %v20510_v11 = vld [vmem:[%s29639_s1 + $0x120c] ss:$52 sps:$4 sm:$0xff]  }
 0x26d   :  { %5514 = vmatprep.subr.bf16.mxu1 %v20465_v12 }
 0x26f   :  { %5490 = vmatpush2.bf16.msra.mxu0 %v20460_v26 }
 0x270   :  { %5515 = vmatpush1.bf16.msra.mxu1 %v20463_v13  ;;  %5491 = vmatprep.subr.bf16.mxu0 %v20468_v14  ;;  %v20508_v14 = vld [vmem:[%s29639_s1 + $0x1208] ss:$52 sps:$4 sm:$0xff]  }
 0x271   :  { %5516 = vmatprep.subr.bf16.mxu1 %v20471_v20  ;;  %v20511_v20 = vld [vmem:[%s29639_s1 + $0x1548] ss:$52 sps:$4 sm:$0xff]  }
 0x273   :  { %5492 = vmatpush2.bf16.msra.mxu0 %v20466_v15  ;;  %v20516_v15 = vld [vmem:[%s29639_s1 + $0x11a4] ss:$52 sps:$4 sm:$0xff]  }
 0x274   :  { %5517 = vmatpush1.bf16.msra.mxu1 %v20469_v36  ;;  %5493 = vmatprep.subr.bf16.mxu0 %v20474_v21  ;;  %v20519_v36 = vld [vmem:[%s29639_s1 + $0x14e4] ss:$52 sps:$4 sm:$0xff]   ;;  %v20514_v21 = vld [vmem:[%s29639_s1 + $0x11a0] ss:$52 sps:$4 sm:$0xff]  }
 0x275   :  { %5518 = vmatprep.subr.bf16.mxu1 %v20477_v18  ;;  %v20517_v18 = vld [vmem:[%s29639_s1 + $0x14e0] ss:$52 sps:$4 sm:$0xff]  }
 0x277   :  { %5494 = vmatpush2.bf16.msra.mxu0 %v20472_v58  ;;  %v20522_v58 = vld [vmem:[%s29639_s1 + $0x113c] ss:$52 sps:$4 sm:$0xff]  }
 0x278   :  { %5519 = vmatpush1.bf16.msra.mxu1 %v20475_v40  ;;  %5495 = vmatprep.subr.bf16.mxu0 %v20480_v23  ;;  %v20525_v40 = vld [vmem:[%s29639_s1 + $0x147c] ss:$52 sps:$4 sm:$0xff]   ;;  %v20520_v23 = vld [vmem:[%s29639_s1 + $0x1138] ss:$52 sps:$4 sm:$0xff]  }
 0x279   :  { %5520 = vmatprep.subr.bf16.mxu1 %v20483_v24  ;;  %v20523_v24 = vld [vmem:[%s29639_s1 + $0x1478] ss:$52 sps:$4 sm:$0xff]  }
 0x27b   :  { %5496 = vmatpush2.bf16.msra.mxu0 %v20478_v29  ;;  %v20528_v29 = vld [vmem:[%s29639_s1 + $0x10d4] ss:$52 sps:$4 sm:$0xff]  }
 0x27c   :  { %5521 = vmatpush1.bf16.msra.mxu1 %v20481_v63  ;;  %5497 = vmatprep.subr.bf16.mxu0 %v20486_v30  ;;  %v20531_v63 = vld [vmem:[%s29639_s1 + $0x1414] ss:$52 sps:$4 sm:$0xff]   ;;  %v20526_v30 = vld [vmem:[%s29639_s1 + $0x10d0] ss:$52 sps:$4 sm:$0xff]  }
 0x27d   :  { %5522 = vmatprep.subr.bf16.mxu1 %v20489_v37  ;;  %v20529_v37 = vld [vmem:[%s29639_s1 + $0x1410] ss:$52 sps:$4 sm:$0xff]  }
 0x27f   :  { %5498 = vmatpush2.bf16.msra.mxu0 %v20484_v39  ;;  %v20534_v39 = vld [vmem:[%s29639_s1 + $0x106c] ss:$52 sps:$4 sm:$0xff]  }
 0x280   :  { %5523 = vmatpush1.bf16.msra.mxu1 %v20487_v42  ;;  %5549 = vmatprep.subr.bf16.mxu0 %v20495_v45  ;;  %v20537_v42 = vld [vmem:[%s29639_s1 + $0x13ac] ss:$52 sps:$4 sm:$0xff]   ;;  %v20535_v45 = vld [vmem:[%s29639_s1 + $0x13a8] ss:$52 sps:$4 sm:$0xff]  }
 0x281   :  { %5524 = vmatprep.subr.bf16.mxu1 %v20492_v43  ;;  %v20532_v43 = vld [vmem:[%s29639_s1 + $0x1068] ss:$52 sps:$4 sm:$0xff]  }
 0x282   :  { %v5255_v57 = vpop.f32.mrf.mxu0  ;;  %5500 = vmatmul.mubr.bf16.vlgmr.msra.gmra.mxu0 %v22881_v7 }
 0x283   :  { %v5214_v55 = vpop.f32.mrf.mxu1  ;;  %5550 = vmatpush1.bf16.msra.mxu0 %v20493_v48  ;;  %5581 = vmatprep.mubr.bf16.mxu0 %v22625_v16  ;;  %v20539_v48 = vld [vmem:[%s29639_s1 + $0xcc8] ss:$52 sps:$4 sm:$0xff]  }
 0x284   :  { %v5215_v61 = vadd.f32 %v5214_v55, %v24699_v0  ;;  %5525 = vmatpush2.bf16.msra.mxu1 %v20490_v46  ;;  %v5257_v62 = vpop.f32.mrf.mxu0  ;;  %5551 = vmatprep.subr.bf16.mxu0 %v20501_v52  ;;  %v20538_v46 = vld [vmem:[%s29639_s1 + $0x648] ss:$52 sps:$4 sm:$0xff]   ;;  %v20544_v55 = vld [vmem:[%s29639_s1 + $0x2a0] ss:$52 sps:$4 sm:$0xff]  }
 0x285   :  { %v5216_v2 = vpop.f32.mrf.mxu1  ;;  %5526 = vmatprep.subr.bf16.mxu1 %v20498_v50  ;;  %v20540_v50 = vld [vmem:[%s29639_s1 + $0x308] ss:$52 sps:$4 sm:$0xff]  }
 0x286   :  { %v24808_v4 = vadd.f32 %v5255_v57, %v5215_v61  ;;  %v5217_v1 = vadd.f32 %v5216_v2, %v24707_v44  ;;  %v5259_v0 = vpop.f32.mrf.mxu0  ;;  %v20513_v44 = vld [vmem:[%s29639_s1 + $0x154c] ss:$52 sps:$4 sm:$0xff]   ;;  %v20541_v52 = vld [vmem:[%s29639_s1 + $0x988] ss:$52 sps:$4 sm:$0xff]  }
 0x287   :  { %v5218_v10 = vpop.f32.mrf.mxu1  ;;  %5552 = vmatpush1.bf16.msra.mxu0 %v20499_v54  ;;  %v20543_v54 = vld [vmem:[%s29639_s1 + $0xc60] ss:$52 sps:$4 sm:$0xff]   ;;  %v20547_v61 = vld [vmem:[%s29639_s1 + $0xbf8] ss:$52 sps:$4 sm:$0xff]   ;;  %v20555_v0 = vld [vmem:[%s29639_s1 + $0xb28] ss:$52 sps:$4 sm:$0xff]  }
 0x288   :  { %v24824_v12 = vadd.f32 %v5257_v62, %v5217_v1  ;;  %5527 = vmatpush2.bf16.msra.mxu1 %v20496_v53  ;;  %v5260_v26 = vpop.f32.mrf.mxu0  ;;  %5553 = vmatprep.subr.bf16.mxu0 %v20507_v60  ;;  %v20542_v53 = vld [vmem:[%s29639_s1 + $0x5e0] ss:$52 sps:$4 sm:$0xff]   ;;  %v20546_v60 = vld [vmem:[%s29639_s1 + $0x578] ss:$52 sps:$4 sm:$0xff]   ;;  %v20550_v1 = vld [vmem:[%s29639_s1 + $0x510] ss:$52 sps:$4 sm:$0xff]  }
 0x289   :  { %5528 = vmatprep.subr.bf16.mxu1 %v20504_v59  ;;  %v5219_v13 = vpop.f32.mrf.mxu1  ;;  %v20545_v57 = vld [vmem:[%s29639_s1 + $0x920] ss:$52 sps:$4 sm:$0xff]   ;;  %v24908_v59 = vld [vmem:[%s29638_s0 + $0x18] ss:$0 sps:$4 sm:$0xff]   ;;  %v20556_v10 = vld [vmem:[%s29639_s1 + $0x168] ss:$52 sps:$4 sm:$0xff]  }
 0x28a   :  { %v20548_v2 = vld [vmem:[%s29639_s1 + $0x238] ss:$52 sps:$4 sm:$0xff]   ;;  %v20559_v26 = vld [vmem:[%s29639_s1 + $0xac0] ss:$52 sps:$4 sm:$0xff]  }
 0x28b   :  { %5554 = vmatpush1.bf16.msra.mxu0 %v20505_v8  ;;  %v20549_v62 = vld [vmem:[%s29639_s1 + $0x8b8] ss:$52 sps:$4 sm:$0xff]   ;;  %v20554_v8 = vld [vmem:[%s29639_s1 + $0x4a8] ss:$52 sps:$4 sm:$0xff]   ;;  %v20560_v13 = vld [vmem:[%s29639_s1 + $0x100] ss:$52 sps:$4 sm:$0xff]  }
 0x28c   :  { %5529 = vmatpush2.bf16.msra.mxu1 %v20502_v5  ;;  %5555 = vmatprep.subr.bf16.mxu0 %v20513_v44  ;;  %v20551_v5 = vld [vmem:[%s29639_s1 + $0xb90] ss:$52 sps:$4 sm:$0xff]   ;;  %v20558_v44 = vld [vmem:[%s29639_s1 + $0x440] ss:$52 sps:$4 sm:$0xff]  }
 0x28d   :  { %5530 = vmatprep.subr.bf16.mxu1 %v20510_v11  ;;  %v20557_v11 = vld [vmem:[%s29639_s1 + $0x7e8] ss:$52 sps:$4 sm:$0xff]  }
 0x28f   :  { %5556 = vmatpush1.bf16.msra.mxu0 %v20511_v20  ;;  %v20562_v20 = vld [vmem:[%s29639_s1 + $0x3d8] ss:$52 sps:$4 sm:$0xff]  }
 0x290   :  { %5531 = vmatpush2.bf16.msra.mxu1 %v20508_v14  ;;  %5557 = vmatprep.subr.bf16.mxu0 %v20519_v36  ;;  %v20561_v14 = vld [vmem:[%s29639_s1 + $0x780] ss:$52 sps:$4 sm:$0xff]   ;;  %v20564_v36 = vld [vmem:[%s29639_s1 + $0x98] ss:$52 sps:$4 sm:$0xff]  }
 0x291   :  { %5532 = vmatprep.subr.bf16.mxu1 %v20516_v15  ;;  %v20563_v15 = vld [vmem:[%s29639_s1 + $0xa58] ss:$52 sps:$4 sm:$0xff]  }
 0x293   :  { %5558 = vmatpush1.bf16.msra.mxu0 %v20517_v18  ;;  %v20566_v18 = vld [vmem:[%s29639_s1 + $0x370] ss:$52 sps:$4 sm:$0xff]  }
 0x294   :  { %5533 = vmatpush2.bf16.msra.mxu1 %v20514_v21  ;;  %5559 = vmatprep.subr.bf16.mxu0 %v20525_v40  ;;  %v20565_v21 = vld [vmem:[%s29639_s1 + $0x718] ss:$52 sps:$4 sm:$0xff]   ;;  %v20568_v40 = vld [vmem:[%s29639_s1 + $0x30] ss:$52 sps:$4 sm:$0xff]  }
 0x295   :  { %5534 = vmatprep.subr.bf16.mxu1 %v20522_v58  ;;  %v20567_v58 = vld [vmem:[%s29639_s1 + $0x9f0] ss:$52 sps:$4 sm:$0xff]  }
 0x297   :  { %5560 = vmatpush1.bf16.msra.mxu0 %v20523_v24  ;;  %v817_v24 = vld [vmem:[%s29640_s2 + $0x8] sm:$0x1f] }
 0x298   :  { %5535 = vmatpush2.bf16.msra.mxu1 %v20520_v23  ;;  %5561 = vmatprep.subr.bf16.mxu0 %v20531_v63  ;;  %v20569_v23 = vld [vmem:[%s29639_s1 + $0x6b0] ss:$52 sps:$4 sm:$0xff]   ;;  %v20571_v63 = vld [vmem:[%s29639_s1 + $0x1008] ss:$52 sps:$4 sm:$0xff]  }
 0x299   :  { %5536 = vmatprep.subr.bf16.mxu1 %v20528_v29  ;;  %v20570_v29 = vld [vmem:[%s29639_s1 + $0x1348] ss:$52 sps:$4 sm:$0xff]  }
 0x29b   :  { %5562 = vmatpush1.bf16.msra.mxu0 %v20529_v37  ;;  %v20573_v37 = vld [vmem:[%s29639_s1 + $0x12e0] ss:$52 sps:$4 sm:$0xff]  }
 0x29c   :  { %5537 = vmatpush2.bf16.msra.mxu1 %v20526_v30  ;;  %5563 = vmatprep.subr.bf16.mxu0 %v20537_v42  ;;  %v20572_v30 = vld [vmem:[%s29639_s1 + $0x1688] ss:$52 sps:$4 sm:$0xff]   ;;  %v22626_v42 = vmov 0.0  }
 0x29d   :  { %5538 = vmatprep.subr.bf16.mxu1 %v20534_v39  ;;  %v855_v39 = vrot.slane %v817_v24, %v23493_v34 }
 0x29f   :  { %5564 = vmatpush1.bf16.msra.mxu0 %v20535_v45 }
 0x2a0   :  { %5539 = vmatpush2.bf16.msra.mxu1 %v20532_v43  ;;  %19126 = vmatprep.subr.bf16.mxu0 %v20538_v46  ;;  %v859_v43 = vrot.slane %v817_v24, %v23502_v38  ;;  %v5753_v24 = vmax.f32 %v24075_v56, 0.0  ;;  %v20600_v56 = vld [vmem:[%s29641_s3 + $0x270] ss:$52 sps:$4 sm:$0xff]  }
 0x2a1   :  { %19148 = vmatprep.subr.bf16.mxu1 %v20539_v48  ;;  %v20574_v48 = vld [vmem:[%s29639_s1 + $0xfa0] ss:$52 sps:$4 sm:$0xff]  }
 0x2a2   :  { %5582 = vmatmul.mubr.bf16.vlgmr.msra.gmra.mxu0 %v24908_v59 }
 0x2a3   :  { %5541 = vmatmul.mubr.bf16.vlgmr.msra.gmra.mxu1 %v23097_v17  ;;  %19127 = vmatpush3.bf16.msra.mxu0 %v20540_v50 }
 0x2a4   :  { %19149 = vmatpush3.bf16.msra.mxu1 %v20541_v52  ;;  %19128 = vmatprep.subr.bf16.mxu0 %v20542_v53  ;;  %v20575_v52 = vld [vmem:[%s29639_s1 + $0x1620] ss:$52 sps:$4 sm:$0xff]   ;;  %v20576_v53 = vld [vmem:[%s29639_s1 + $0x1278] ss:$52 sps:$4 sm:$0xff]  }
 0x2a5   :  { %19150 = vmatprep.subr.bf16.mxu1 %v20543_v54  ;;  %5622 = vmatprep.mubr.bf16.mxu0 %v22810_v47  ;;  %v20552_v47 = vld [vmem:[%s29639_s1 + $0x1d0] ss:$52 sps:$4 sm:$0xff]  }
 0x2a6   :  { %5662 = vmatprep.mubr.bf16.mxu1 %v22821_v51  ;;  %v20553_v51 = vld [vmem:[%s29639_s1 + $0x850] ss:$52 sps:$4 sm:$0xff]  }
 0x2a7   :  { %19129 = vmatpush3.bf16.msra.mxu0 %v20544_v55 }
 0x2a8   :  { %19151 = vmatpush3.bf16.msra.mxu1 %v20545_v57  ;;  %19130 = vmatprep.subr.bf16.mxu0 %v20546_v60 }
 0x2a9   :  { %19152 = vmatprep.subr.bf16.mxu1 %v20547_v61  ;;  %v20577_v61 = vld [vmem:[%s29639_s1 + $0xf38] ss:$52 sps:$4 sm:$0xff]  }
 0x2ab   :  { %19131 = vmatpush3.bf16.msra.mxu0 %v20548_v2 }
 0x2ac   :  { %19153 = vmatpush3.bf16.msra.mxu1 %v20549_v62  ;;  %19132 = vmatprep.subr.bf16.mxu0 %v20550_v1  ;;  %v20578_v62 = vld [vmem:[%s29639_s1 + $0x15b8] ss:$52 sps:$4 sm:$0xff]  }
 0x2ad   :  { %19154 = vmatprep.subr.bf16.mxu1 %v20551_v5  ;;  %v20579_v5 = vld [vmem:[%s29639_s1 + $0x1210] ss:$52 sps:$4 sm:$0xff]  }
 0x2af   :  { %19133 = vmatpush3.bf16.msra.mxu0 %v20552_v47  ;;  %v20580_v47 = vld [vmem:[%s29639_s1 + $0xed0] ss:$52 sps:$4 sm:$0xff]  }
 0x2b0   :  { %19155 = vmatpush3.bf16.msra.mxu1 %v20553_v51  ;;  %19134 = vmatprep.subr.bf16.mxu0 %v20554_v8  ;;  %v20581_v51 = vld [vmem:[%s29639_s1 + $0x1550] ss:$52 sps:$4 sm:$0xff]   ;;  %v20582_v8 = vld [vmem:[%s29639_s1 + $0x11a8] ss:$52 sps:$4 sm:$0xff]  }
 0x2b1   :  { %19156 = vmatprep.subr.bf16.mxu1 %v20555_v0  ;;  %v20583_v0 = vld [vmem:[%s29639_s1 + $0xe68] ss:$52 sps:$4 sm:$0xff]  }
 0x2b3   :  { %19135 = vmatpush3.bf16.msra.mxu0 %v20556_v10  ;;  %v20584_v10 = vld [vmem:[%s29639_s1 + $0x14e8] ss:$52 sps:$4 sm:$0xff]  }
 0x2b4   :  { %19157 = vmatpush3.bf16.msra.mxu1 %v20557_v11  ;;  %19136 = vmatprep.subr.bf16.mxu0 %v20558_v44  ;;  %v20585_v11 = vld [vmem:[%s29639_s1 + $0x1140] ss:$52 sps:$4 sm:$0xff]  }
 0x2b5   :  { %19158 = vmatprep.subr.bf16.mxu1 %v20559_v26  ;;  %v20586_v44 = vld [vmem:[%s29639_s1 + $0xe00] ss:$52 sps:$4 sm:$0xff]  }
 0x2b6   :  { %v20587_v26 = vld [vmem:[%s29639_s1 + $0x1480] ss:$52 sps:$4 sm:$0xff]  }
 0x2b7   :  { %19137 = vmatpush3.bf16.msra.mxu0 %v20560_v13  ;;  %v20588_v13 = vld [vmem:[%s29639_s1 + $0x10d8] ss:$52 sps:$4 sm:$0xff]  }
 0x2b8   :  { %19159 = vmatpush3.bf16.msra.mxu1 %v20561_v14  ;;  %19138 = vmatprep.subr.bf16.mxu0 %v20562_v20  ;;  %v20589_v14 = vld [vmem:[%s29639_s1 + $0xd98] ss:$52 sps:$4 sm:$0xff]  }
 0x2b9   :  { %19160 = vmatprep.subr.bf16.mxu1 %v20563_v15  ;;  %v20590_v20 = vld [vmem:[%s29639_s1 + $0x1418] ss:$52 sps:$4 sm:$0xff]   ;;  %v20591_v15 = vld [vmem:[%s29639_s1 + $0x1070] ss:$52 sps:$4 sm:$0xff]  }
 0x2bb   :  { %19139 = vmatpush3.bf16.msra.mxu0 %v20564_v36  ;;  %v20592_v36 = vld [vmem:[%s29639_s1 + $0xd30] ss:$52 sps:$4 sm:$0xff]  }
 0x2bc   :  { %19161 = vmatpush3.bf16.msra.mxu1 %v20565_v21  ;;  %19140 = vmatprep.subr.bf16.mxu0 %v20566_v18  ;;  %v20593_v21 = vld [vmem:[%s29639_s1 + $0x13b0] ss:$52 sps:$4 sm:$0xff]  }
 0x2bd   :  { %19162 = vmatprep.subr.bf16.mxu1 %v20567_v58  ;;  %v20596_v18 = vld [vmem:[%s29641_s3 + $0x2dc] ss:$52 sps:$4 sm:$0xff]  }
 0x2be   :  { %v20599_v58 = vld [vmem:[%s29641_s3 + $0x95c] ss:$52 sps:$4 sm:$0xff]  }
 0x2bf   :  { %19141 = vmatpush3.bf16.msra.mxu0 %v20568_v40  ;;  %v5751_v40 = vmax.f32 %v23744_v25, 0.0  ;;  %v20605_v25 = vld [vmem:[%s29641_s3 + $0x8f4] ss:$52 sps:$4 sm:$0xff]  }
 0x2c0   :  { %19163 = vmatpush3.bf16.msra.mxu1 %v20569_v23  ;;  %19170 = vmatprep.subr.bf16.mxu0 %v20570_v29  ;;  %v20594_v23 = vld [vmem:[%s29641_s3 + $0x2d8] ss:$52 sps:$4 sm:$0xff]  }
 0x2c1   :  { %19475 = vmatprep.subr.bf16.mxu1 %v22626_v42  ;;  %v20597_v29 = vld [vmem:[%s29641_s3 + $0x958] ss:$52 sps:$4 sm:$0xff]  }
 0x2c2   :  { %v5296_v45 = vpop.f32.mrf.mxu0  ;;  %5623 = vmatmul.mubr.bf16.vlgmr.msra.gmra.mxu0 %v22879_v6 }
 0x2c3   :  { %5663 = vmatmul.mubr.bf16.vlgmr.msra.gmra.mxu1 %v22881_v7  ;;  %v5337_v46 = vpop.f32.mrf.mxu1  ;;  %v5297_v50 = vadd.f32 %v5296_v45, %v855_v39  ;;  %19171 = vmatpush3.bf16.msra.mxu0 %v20571_v63  ;;  %v20602_v63 = vld [vmem:[%s29641_s3 + $0x274] ss:$52 sps:$4 sm:$0xff]   ;;  %v20603_v39 = vld [vmem:[%s29641_s3 + $0x8f0] ss:$52 sps:$4 sm:$0xff]   ;;  %v20608_v45 = vld [vmem:[%s29641_s3 + $0x20c] ss:$52 sps:$4 sm:$0xff]  }
 0x2c4   :  { %19476 = vmatpush3.bf16.msra.mxu1 %v20572_v30  ;;  %v5298_v54 = vpop.f32.mrf.mxu0  ;;  %19172 = vmatprep.subr.bf16.mxu0 %v20573_v37  ;;  %v25099_v30 = vpack.c.bf16 %v5751_v40, %v5751_v40  ;;  %v25101_v37 = vpack.c.bf16 %v5753_v24, %v5753_v24  ;;  %v20648_v40 = vld [vmem:[%s29641_s3 + $0x5b0] ss:$52 sps:$4 sm:$0xff]   ;;  %v20656_v24 = vld [vmem:[%s29641_s3 + $0x54c] ss:$52 sps:$4 sm:$0xff]  }
 0x2c5   :  { %v5339_v6 = vpop.f32.mrf.mxu1  ;;  %19477 = vmatprep.subr.bf16.mxu1 %v22626_v42  ;;  %v5299_v7 = vadd.f32 %v5298_v54, %v859_v43  ;;  %v25015_v55 = vadd.f32 %v5337_v46, %v5297_v50  ;;  %5702 = vmatprep.mubr.bf16.mxu0 %v22968_v35  ;;  %v20606_v46 = vld [vmem:[%s29641_s3 + $0x208] ss:$52 sps:$4 sm:$0xff]  }
 0x2c6   :  { %19491 = vmatprep.mubr.msk.bf16.mxu1 %vm22627_vm0, %v22626_v42  ;;  %v5300_v57 = vpop.f32.mrf.mxu0 }
 0x2c7   :  { %v5341_v60 = vpop.f32.mrf.mxu1  ;;  %v25023_v2 = vadd.f32 %v5339_v6, %v5299_v7  ;;  %19173 = vmatpush3.bf16.msra.mxu0 %v20574_v48  ;;  %v20609_v48 = vld [vmem:[%s29641_s3 + $0x888] ss:$52 sps:$4 sm:$0xff]   ;;  %v20612_v6 = vld [vmem:[%s29641_s3 + $0x1a0] ss:$52 sps:$4 sm:$0xff]  }
 0x2c8   :  { %19478 = vmatpush3.bf16.msra.mxu1 %v20575_v52  ;;  %v5301_v1 = vpop.f32.mrf.mxu0  ;;  %19174 = vmatprep.subr.bf16.mxu0 %v20576_v53  ;;  %v20614_v52 = vld [vmem:[%s29641_s3 + $0x1a4] ss:$52 sps:$4 sm:$0xff]   ;;  %v20615_v7 = vld [vmem:[%s29641_s3 + $0x820] ss:$52 sps:$4 sm:$0xff]   ;;  %v20620_v57 = vld [vmem:[%s29641_s3 + $0x13c] ss:$52 sps:$4 sm:$0xff]  }
 0x2c9   :  { %19479 = vmatprep.subr.bf16.mxu1 %v22626_v42  ;;  %v5342_v35 = vpop.f32.mrf.mxu1  ;;  %v20617_v53 = vld [vmem:[%s29641_s3 + $0x824] ss:$52 sps:$4 sm:$0xff]   ;;  %v20623_v60 = vld [vmem:[%s29641_s3 + $0x7bc] ss:$52 sps:$4 sm:$0xff]   ;;  %v20626_v1 = vld [vmem:[%s29641_s3 + $0xd4] ss:$52 sps:$4 sm:$0xff]  }
 0x2ca   :  { %v20624_v35 = vld [vmem:[%s29641_s3 + $0xd0] ss:$52 sps:$4 sm:$0xff]  }
 0x2cb   :  { %19175 = vmatpush3.bf16.msra.mxu0 %v20577_v61  ;;  %v20618_v61 = vld [vmem:[%s29641_s3 + $0x138] ss:$52 sps:$4 sm:$0xff]  }
 0x2cc   :  { %19480 = vmatpush3.bf16.msra.mxu1 %v20578_v62  ;;  %19176 = vmatprep.subr.bf16.mxu0 %v20579_v5  ;;  %v20621_v62 = vld [vmem:[%s29641_s3 + $0x7b8] ss:$52 sps:$4 sm:$0xff]   ;;  %v20629_v5 = vld [vmem:[%s29641_s3 + $0x754] ss:$52 sps:$4 sm:$0xff]  }
 0x2cd   :  { %19481 = vmatprep.subr.bf16.mxu1 %v22626_v42 }
 0x2cf   :  { %19177 = vmatpush3.bf16.msra.mxu0 %v20580_v47  ;;  %v20627_v47 = vld [vmem:[%s29641_s3 + $0x750] ss:$52 sps:$4 sm:$0xff]  }
 0x2d0   :  { %19482 = vmatpush3.bf16.msra.mxu1 %v20581_v51  ;;  %19178 = vmatprep.subr.bf16.mxu0 %v20582_v8  ;;  %v20632_v51 = vld [vmem:[%s29641_s3 + $0x6c] ss:$52 sps:$4 sm:$0xff]   ;;  %v20630_v8 = vld [vmem:[%s29641_s3 + $0x68] ss:$52 sps:$4 sm:$0xff]  }
 0x2d1   :  { %19483 = vmatprep.subr.bf16.mxu1 %v22626_v42 }
 0x2d3   :  { %19179 = vmatpush3.bf16.msra.mxu0 %v20583_v0  ;;  %v20635_v0 = vld [vmem:[%s29641_s3 + $0x6ec] ss:$52 sps:$4 sm:$0xff]  }
 0x2d4   :  { %19484 = vmatpush3.bf16.msra.mxu1 %v20584_v10  ;;  %19180 = vmatprep.subr.bf16.mxu0 %v20585_v11  ;;  %v20633_v10 = vld [vmem:[%s29641_s3 + $0x6e8] ss:$52 sps:$4 sm:$0xff]   ;;  %v20638_v11 = vld [vmem:[%s29641_s3 + $0x4] ss:$52 sps:$4 sm:$0xff]  }
 0x2d5   :  { %19485 = vmatprep.subr.bf16.mxu1 %v22626_v42 }
 0x2d7   :  { %19181 = vmatpush3.bf16.msra.mxu0 %v20586_v44  ;;  %v20636_v44 = vld [vmem:[%s29641_s3] ss:$52 sps:$4 sm:$0xff]  }
 0x2d8   :  { %19486 = vmatpush3.bf16.msra.mxu1 %v20587_v26  ;;  %19182 = vmatprep.subr.bf16.mxu0 %v20588_v13  ;;  %v20641_v26 = vld [vmem:[%s29641_s3 + $0x684] ss:$52 sps:$4 sm:$0xff]   ;;  %v20639_v13 = vld [vmem:[%s29641_s3 + $0x680] ss:$52 sps:$4 sm:$0xff]  }
 0x2d9   :  { %19487 = vmatprep.subr.bf16.mxu1 %v22626_v42 }
 0x2db   :  { %19183 = vmatpush3.bf16.msra.mxu0 %v20589_v14  ;;  %v20644_v14 = vld [vmem:[%s29641_s3 + $0x61c] ss:$52 sps:$4 sm:$0xff]  }
 0x2dc   :  { %19488 = vmatpush3.bf16.msra.mxu1 %v20590_v20  ;;  %19184 = vmatprep.subr.bf16.mxu0 %v20591_v15  ;;  %v20647_v20 = vld [vmem:[%s29641_s3 + $0xc9c] ss:$52 sps:$4 sm:$0xff]   ;;  %v20642_v15 = vld [vmem:[%s29641_s3 + $0x618] ss:$52 sps:$4 sm:$0xff]  }
 0x2dd   :  { %19489 = vmatprep.subr.bf16.mxu1 %v22626_v42 }
 0x2df   :  { %19185 = vmatpush3.bf16.msra.mxu0 %v20592_v36  ;;  %v20645_v36 = vld [vmem:[%s29641_s3 + $0xc98] ss:$52 sps:$4 sm:$0xff]  }
 0x2e0   :  { %19490 = vmatpush3.bf16.msra.mxu1 %v20593_v21  ;;  %13849 = vmatprep.subr.bf16.mxu0 %v20596_v18  ;;  %v20650_v21 = vld [vmem:[%s29641_s3 + $0x5b4] ss:$52 sps:$4 sm:$0xff]  }
 0x2e1   :  { %13890 = vmatprep.subr.bf16.mxu1 %v20599_v58  ;;  %v20653_v18 = vld [vmem:[%s29641_s3 + $0xc34] ss:$52 sps:$4 sm:$0xff]  }
 0x2e2   :  { %5703 = vmatmul.mubr.bf16.vlgmr.msra.gmra.mxu0 %v23097_v17  ;;  %v20611_v17 = vld [vmem:[%s29641_s3 + $0x88c] ss:$52 sps:$4 sm:$0xff]  }
 0x2e3   :  { %19492 = vmatmul.mubr.bf16.vlgmr.msra.gmra.mxu1 %v24908_v59  ;;  %v25111_v43 = vpop.f32.mrf.mxu1  ;;  %13850 = vmatpush1.bf16.msra.mxu0 %v20594_v23  ;;  %v20651_v23 = vld [vmem:[%s29641_s3 + $0xc30] ss:$52 sps:$4 sm:$0xff]  }
 0x2e4   :  { %13881 = vmatprep.mubr.bf16.mxu0 %v25099_v30  ;;  %13891 = vmatpush1.bf16.msra.mxu1 %v20597_v29 }
 0x2e5   :  { %13922 = vmatprep.mubr.bf16.mxu1 %v25101_v37  ;;  %v25121_v59 = vpop.f32.mrf.mxu1  ;;  %13851 = vmatprep.subr.bf16.mxu0 %v20602_v63  ;;  %v20659_v63 = vld [vmem:[%s29641_s3 + $0xbcc] ss:$52 sps:$4 sm:$0xff]  }
 0x2e6   :  { %13892 = vmatprep.subr.bf16.mxu1 %v20605_v25 }
 0x2e7   :  { %v5423_v50 = vpop.f32.mrf.mxu1  ;;  %13852 = vmatpush1.bf16.msra.mxu0 %v20600_v56 }
 0x2e8   :  { %13893 = vmatpush1.bf16.msra.mxu1 %v20603_v39  ;;  %13853 = vmatprep.subr.bf16.mxu0 %v20608_v45  ;;  %v20663_v50 = vld [vmem:[%s29641_s3 + $0xb60] ss:$52 sps:$4 sm:$0xff]  }
 0x2e9   :  { %v5424_v54 = vpop.f32.mrf.mxu1  ;;  %13894 = vmatprep.subr.bf16.mxu1 %v20611_v17  ;;  %v20654_v17 = vld [vmem:[%s29641_s3 + $0x548] ss:$52 sps:$4 sm:$0xff]  }
 0x2ea   :  { %v20671_v54 = vld [vmem:[%s29641_s3 + $0xafc] ss:$52 sps:$4 sm:$0xff]  }
 0x2eb   :  { %13854 = vmatpush1.bf16.msra.mxu0 %v20606_v46  ;;  %v20657_v46 = vld [vmem:[%s29641_s3 + $0xbc8] ss:$52 sps:$4 sm:$0xff]  }
 0x2ec   :  { %13895 = vmatpush1.bf16.msra.mxu1 %v20609_v48  ;;  %13855 = vmatprep.subr.bf16.mxu0 %v20614_v52  ;;  %v20665_v48 = vld [vmem:[%s29641_s3 + $0xb64] ss:$52 sps:$4 sm:$0xff]   ;;  %v20668_v52 = vld [vmem:[%s29641_s3 + $0x47c] ss:$52 sps:$4 sm:$0xff]  }
 0x2ed   :  { %13896 = vmatprep.subr.bf16.mxu1 %v20617_v53  ;;  %v20666_v53 = vld [vmem:[%s29641_s3 + $0x478] ss:$52 sps:$4 sm:$0xff]  }
 0x2ef   :  { %13856 = vmatpush1.bf16.msra.mxu0 %v20612_v6  ;;  %v20669_v6 = vld [vmem:[%s29641_s3 + $0xaf8] ss:$52 sps:$4 sm:$0xff]  }
 0x2f0   :  { %13897 = vmatpush1.bf16.msra.mxu1 %v20615_v7  ;;  %13857 = vmatprep.subr.bf16.mxu0 %v20620_v57  ;;  %v20674_v7 = vld [vmem:[%s29641_s3 + $0x414] ss:$52 sps:$4 sm:$0xff]   ;;  %v20672_v57 = vld [vmem:[%s29641_s3 + $0x410] ss:$52 sps:$4 sm:$0xff]  }
 0x2f1   :  { %13898 = vmatprep.subr.bf16.mxu1 %v20623_v60  ;;  %v20677_v60 = vld [vmem:[%s29641_s3 + $0xa94] ss:$52 sps:$4 sm:$0xff]  }
 0x2f3   :  { %13858 = vmatpush1.bf16.msra.mxu0 %v20618_v61  ;;  %v20675_v61 = vld [vmem:[%s29641_s3 + $0xa90] ss:$52 sps:$4 sm:$0xff]  }
 0x2f4   :  { %13899 = vmatpush1.bf16.msra.mxu1 %v20621_v62  ;;  %13859 = vmatprep.subr.bf16.mxu0 %v20626_v1  ;;  %v20680_v62 = vld [vmem:[%s29641_s3 + $0x3ac] ss:$52 sps:$4 sm:$0xff]   ;;  %v20678_v1 = vld [vmem:[%s29641_s3 + $0x3a8] ss:$52 sps:$4 sm:$0xff]  }
 0x2f5   :  { %13900 = vmatprep.subr.bf16.mxu1 %v20629_v5  ;;  %v20681_v5 = vld [vmem:[%s29641_s3 + $0xa28] ss:$52 sps:$4 sm:$0xff]  }
 0x2f7   :  { %13860 = vmatpush1.bf16.msra.mxu0 %v20624_v35  ;;  %v20683_v35 = vld [vmem:[%s29641_s3 + $0xa2c] ss:$52 sps:$4 sm:$0xff]  }
 0x2f8   :  { %13901 = vmatpush1.bf16.msra.mxu1 %v20627_v47  ;;  %13861 = vmatprep.subr.bf16.mxu0 %v20632_v51  ;;  %v20686_v47 = vld [vmem:[%s29641_s3 + $0x344] ss:$52 sps:$4 sm:$0xff]   ;;  %v20684_v51 = vld [vmem:[%s29641_s3 + $0x340] ss:$52 sps:$4 sm:$0xff]  }
 0x2f9   :  { %13902 = vmatprep.subr.bf16.mxu1 %v20635_v0  ;;  %v5750_v0 = vmax.f32 %v23739_v22, 0.0  ;;  %v20690_v22 = vld [vmem:[%s29641_s3 + $0xfd8] ss:$52 sps:$4 sm:$0xff]  }
 0x2fb   :  { %13862 = vmatpush1.bf16.msra.mxu0 %v20630_v8  ;;  %v20689_v8 = vld [vmem:[%s29641_s3 + $0x9c4] ss:$52 sps:$4 sm:$0xff]  }
 0x2fc   :  { %13903 = vmatpush1.bf16.msra.mxu1 %v20633_v10  ;;  %13863 = vmatprep.subr.bf16.mxu0 %v20638_v11  ;;  %v20687_v10 = vld [vmem:[%s29641_s3 + $0x9c0] ss:$52 sps:$4 sm:$0xff]   ;;  %v20692_v11 = vld [vmem:[%s29641_s3 + $0xfdc] ss:$52 sps:$4 sm:$0xff]  }
 0x2fd   :  { %13904 = vmatprep.subr.bf16.mxu1 %v20641_v26  ;;  %v5752_v26 = vmax.f32 %v24065_v49, 0.0 }
 0x2ff   :  { %13864 = vmatpush1.bf16.msra.mxu0 %v20636_v44  ;;  %v20695_v44 = vld [vmem:[%s29641_s3 + $0x165c] ss:$52 sps:$4 sm:$0xff]   ;;  %v25314_v49 = vpack.c.bf16 %v5752_v26, %v5752_v26  ;;  %v20746_v26 = vld [vmem:[%s29641_s3 + $0x12b4] ss:$52 sps:$4 sm:$0xff]  }
 0x300   :  { %13905 = vmatpush1.bf16.msra.mxu1 %v20639_v13  ;;  %13865 = vmatprep.subr.bf16.mxu0 %v20644_v14  ;;  %v5755_v13 = vmax.f32 %v24496_v19, 0.0  ;;  %v20693_v14 = vld [vmem:[%s29641_s3 + $0x1658] ss:$52 sps:$4 sm:$0xff]   ;;  %v20696_v19 = vld [vmem:[%s29641_s3 + $0xf70] ss:$52 sps:$4 sm:$0xff]  }
 0x301   :  { %13906 = vmatprep.subr.bf16.mxu1 %v20647_v20  ;;  %v5757_v20 = vmax.f32 %v24824_v12, 0.0  ;;  %v20699_v12 = vld [vmem:[%s29641_s3 + $0x15f0] ss:$52 sps:$4 sm:$0xff]  }
 0x302   :  { %v5378_v58 = vpop.f32.mrf.mxu0 }
 0x303   :  { %v5379_v29 = vadd.f32 %v5378_v58, %v25015_v55  ;;  %13866 = vmatpush2.bf16.msra.mxu0 %v20642_v15  ;;  %v20698_v15 = vld [vmem:[%s29641_s3 + $0xf74] ss:$52 sps:$4 sm:$0xff]  }
 0x304   :  { %13907 = vmatpush2.bf16.msra.mxu1 %v20645_v36  ;;  %v5380_v25 = vpop.f32.mrf.mxu0  ;;  %13867 = vmatprep.subr.bf16.mxu0 %v20650_v21  ;;  %v25312_v36 = vpack.c.bf16 %v5750_v0, %v5750_v0  ;;  %v25319_v21 = vpack.c.bf16 %v5755_v13, %v5755_v13  ;;  %v20744_v13 = vld [vmem:[%s29641_s3 + $0x12b0] ss:$52 sps:$4 sm:$0xff]  }
 0x305   :  { %v25221_v56 = vadd.f32 %v25111_v43, %v5379_v29  ;;  %v5381_v39 = vadd.f32 %v5380_v25, %v25023_v2  ;;  %13908 = vmatprep.subr.bf16.mxu1 %v20653_v18  ;;  %v20662_v43 = vld [vmem:[%s29641_s3 + $0x4e4] ss:$52 sps:$4 sm:$0xff]   ;;  %v20701_v18 = vld [vmem:[%s29641_s3 + $0x15f4] ss:$52 sps:$4 sm:$0xff]  }
 0x306   :  { %v5382_v45 = vpop.f32.mrf.mxu0  ;;  %v20705_v25 = vld [vmem:[%s29641_s3 + $0x1588] ss:$52 sps:$4 sm:$0xff]  }
 0x307   :  { %v25228_v55 = vadd.f32 %v25121_v59, %v5381_v39  ;;  %13868 = vmatpush2.bf16.msra.mxu0 %v20648_v40  ;;  %v20660_v59 = vld [vmem:[%s29641_s3 + $0x4e0] ss:$52 sps:$4 sm:$0xff]   ;;  %v25330_v40 = vpack.c.bf16 %v5757_v20, %v5757_v20  ;;  %v20710_v45 = vld [vmem:[%s29641_s3 + $0xea4] ss:$52 sps:$4 sm:$0xff]  }
 0x308   :  { %13909 = vmatpush2.bf16.msra.mxu1 %v20651_v23  ;;  %v5383_v2 = vpop.f32.mrf.mxu0  ;;  %13869 = vmatprep.subr.bf16.mxu0 %v20656_v24  ;;  %v20704_v23 = vld [vmem:[%s29641_s3 + $0xf0c] ss:$52 sps:$4 sm:$0xff]  }
 0x309   :  { %13910 = vmatprep.subr.bf16.mxu1 %v20659_v63  ;;  %v20707_v24 = vld [vmem:[%s29641_s3 + $0x158c] ss:$52 sps:$4 sm:$0xff]   ;;  %v20702_v63 = vld [vmem:[%s29641_s3 + $0xf08] ss:$52 sps:$4 sm:$0xff]  }
 0x30a   :  { %v20711_v2 = vld [vmem:[%s29641_s3 + $0x1520] ss:$52 sps:$4 sm:$0xff]  }
 0x30b   :  { %13870 = vmatpush2.bf16.msra.mxu0 %v20654_v17  ;;  %v20713_v17 = vld [vmem:[%s29641_s3 + $0x1524] ss:$52 sps:$4 sm:$0xff]  }
 0x30c   :  { %13911 = vmatpush2.bf16.msra.mxu1 %v20657_v46  ;;  %13871 = vmatprep.subr.bf16.mxu0 %v20662_v43  ;;  %v20708_v43 = vld [vmem:[%s29641_s3 + $0xea0] ss:$52 sps:$4 sm:$0xff]  }
 0x30d   :  { %13912 = vmatprep.subr.bf16.mxu1 %v20665_v48  ;;  %v20716_v48 = vld [vmem:[%s29641_s3 + $0xe3c] ss:$52 sps:$4 sm:$0xff]  }
 0x30f   :  { %13872 = vmatpush2.bf16.msra.mxu0 %v20660_v59  ;;  %v20714_v59 = vld [vmem:[%s29641_s3 + $0xe38] ss:$52 sps:$4 sm:$0xff]  }
 0x310   :  { %13913 = vmatpush2.bf16.msra.mxu1 %v20663_v50  ;;  %13873 = vmatprep.subr.bf16.mxu0 %v20668_v52  ;;  %v20719_v50 = vld [vmem:[%s29641_s3 + $0x14bc] ss:$52 sps:$4 sm:$0xff]   ;;  %v20717_v52 = vld [vmem:[%s29641_s3 + $0x14b8] ss:$52 sps:$4 sm:$0xff]  }
 0x311   :  { %13914 = vmatprep.subr.bf16.mxu1 %v20671_v54  ;;  %v20725_v54 = vld [vmem:[%s29641_s3 + $0x1454] ss:$52 sps:$4 sm:$0xff]  }
 0x313   :  { %13874 = vmatpush2.bf16.msra.mxu0 %v20666_v53  ;;  %v20722_v53 = vld [vmem:[%s29641_s3 + $0xdd4] ss:$52 sps:$4 sm:$0xff]  }
 0x314   :  { %13915 = vmatpush2.bf16.msra.mxu1 %v20669_v6  ;;  %13875 = vmatprep.subr.bf16.mxu0 %v20674_v7  ;;  %v20720_v6 = vld [vmem:[%s29641_s3 + $0xdd0] ss:$52 sps:$4 sm:$0xff]  }
 0x315   :  { %13916 = vmatprep.subr.bf16.mxu1 %v20677_v60  ;;  %v20723_v7 = vld [vmem:[%s29641_s3 + $0x1450] ss:$52 sps:$4 sm:$0xff]   ;;  %v20726_v60 = vld [vmem:[%s29641_s3 + $0xd68] ss:$52 sps:$4 sm:$0xff]  }
 0x317   :  { %13876 = vmatpush2.bf16.msra.mxu0 %v20672_v57  ;;  %v20728_v57 = vld [vmem:[%s29641_s3 + $0xd6c] ss:$52 sps:$4 sm:$0xff]  }
 0x318   :  { %13917 = vmatpush2.bf16.msra.mxu1 %v20675_v61  ;;  %13877 = vmatprep.subr.bf16.mxu0 %v20680_v62  ;;  %v20731_v61 = vld [vmem:[%s29641_s3 + $0x13ec] ss:$52 sps:$4 sm:$0xff]   ;;  %v20729_v62 = vld [vmem:[%s29641_s3 + $0x13e8] ss:$52 sps:$4 sm:$0xff]  }
 0x319   :  { %13918 = vmatprep.subr.bf16.mxu1 %v20683_v35  ;;  %v20732_v35 = vld [vmem:[%s29641_s3 + $0xd00] ss:$52 sps:$4 sm:$0xff]  }
 0x31b   :  { %13878 = vmatpush2.bf16.msra.mxu0 %v20678_v1  ;;  %v20734_v1 = vld [vmem:[%s29641_s3 + $0xd04] ss:$52 sps:$4 sm:$0xff]  }
 0x31c   :  { %13919 = vmatpush2.bf16.msra.mxu1 %v20681_v5  ;;  %13879 = vmatprep.subr.bf16.mxu0 %v20686_v47  ;;  %v20737_v5 = vld [vmem:[%s29641_s3 + $0x1384] ss:$52 sps:$4 sm:$0xff]   ;;  %v20735_v47 = vld [vmem:[%s29641_s3 + $0x1380] ss:$52 sps:$4 sm:$0xff]  }
 0x31d   :  { %13920 = vmatprep.subr.bf16.mxu1 %v20689_v8  ;;  %v25415_v8 = vld [vmem:[%s29640_s2 + $0x8] sm:$0x1f] }
 0x31e   :  { %v863_v0 = vrot.slane %v25415_v8, %v23909_v31 }
 0x31f   :  { %13880 = vmatpush2.bf16.msra.mxu0 %v20684_v51  ;;  %v20740_v51 = vld [vmem:[%s29641_s3 + $0x131c] ss:$52 sps:$4 sm:$0xff]  }
 0x320   :  { %13921 = vmatpush2.bf16.msra.mxu1 %v20687_v10  ;;  %13931 = vmatprep.subr.bf16.mxu0 %v20692_v11  ;;  %v20738_v10 = vld [vmem:[%s29641_s3 + $0x1318] ss:$52 sps:$4 sm:$0xff]   ;;  %v20743_v11 = vld [vmem:[%s29641_s3 + $0x199c] ss:$52 sps:$4 sm:$0xff]  }
 0x321   :  { %13972 = vmatprep.subr.bf16.mxu1 %v20695_v44  ;;  %v20741_v44 = vld [vmem:[%s29641_s3 + $0x1998] ss:$52 sps:$4 sm:$0xff]  }
 0x322   :  { %13882 = vmatmul.mubr.bf16.vlgmr.msra.gmra.mxu0 %v25312_v36 }
 0x323   :  { %v25328_v58 = vpop.f32.mrf.mxu1  ;;  %13923 = vmatmul.mubr.bf16.vlgmr.msra.gmra.mxu1 %v25314_v49  ;;  %13932 = vmatpush1.bf16.msra.mxu0 %v20690_v22 }
 0x324   :  { %13963 = vmatprep.mubr.bf16.mxu0 %v25319_v21  ;;  %13973 = vmatpush1.bf16.msra.mxu1 %v20693_v14  ;;  %v5461_v22 = vadd.f32 %v25328_v58, %v863_v0  ;;  %v20749_v14 = vld [vmem:[%s29641_s3 + $0x1934] ss:$52 sps:$4 sm:$0xff]   ;;  %v867_v0 = vrot.slane %v25415_v8, %v23912_v32 }
 0x325   :  { %v25340_v29 = vpop.f32.mrf.mxu1  ;;  %14004 = vmatprep.mubr.bf16.mxu1 %v25330_v40  ;;  %13933 = vmatprep.subr.bf16.mxu0 %v20698_v15  ;;  %v20750_v58 = vld [vmem:[%s29641_s3 + $0x1248] ss:$52 sps:$4 sm:$0xff]  }
 0x326   :  { %13974 = vmatprep.subr.bf16.mxu1 %v20701_v18  ;;  %v20752_v18 = vld [vmem:[%s29641_s3 + $0x124c] ss:$52 sps:$4 sm:$0xff]  }
 0x327   :  { %v5464_v39 = vpop.f32.mrf.mxu1  ;;  %13934 = vmatpush1.bf16.msra.mxu0 %v20696_v19 }
 0x328   :  { %13975 = vmatpush1.bf16.msra.mxu1 %v20699_v12  ;;  %13935 = vmatprep.subr.bf16.mxu0 %v20704_v23  ;;  %v20747_v12 = vld [vmem:[%s29641_s3 + $0x1930] ss:$52 sps:$4 sm:$0xff]   ;;  %v20755_v23 = vld [vmem:[%s29641_s3 + $0x18cc] ss:$52 sps:$4 sm:$0xff]  }
 0x329   :  { %v5465_v46 = vpop.f32.mrf.mxu1  ;;  %13976 = vmatprep.subr.bf16.mxu1 %v20707_v24  ;;  %v20758_v39 = vld [vmem:[%s29641_s3 + $0x11e4] ss:$52 sps:$4 sm:$0xff]  }
 0x32a   :  { %v20759_v46 = vld [vmem:[%s29641_s3 + $0x1860] ss:$52 sps:$4 sm:$0xff]  }
 0x32b   :  { %13936 = vmatpush1.bf16.msra.mxu0 %v20702_v63 }
 0x32c   :  { %13977 = vmatpush1.bf16.msra.mxu1 %v20705_v25  ;;  %13937 = vmatprep.subr.bf16.mxu0 %v20710_v45  ;;  %v20753_v25 = vld [vmem:[%s29641_s3 + $0x18c8] ss:$52 sps:$4 sm:$0xff]   ;;  %v20756_v45 = vld [vmem:[%s29641_s3 + $0x11e0] ss:$52 sps:$4 sm:$0xff]  }
 0x32d   :  { %13978 = vmatprep.subr.bf16.mxu1 %v20713_v17  ;;  %v20761_v17 = vld [vmem:[%s29641_s3 + $0x1864] ss:$52 sps:$4 sm:$0xff]  }
 0x32f   :  { %13938 = vmatpush1.bf16.msra.mxu0 %v20708_v43  ;;  %v20764_v43 = vld [vmem:[%s29641_s3 + $0x117c] ss:$52 sps:$4 sm:$0xff]  }
 0x330   :  { %13979 = vmatpush1.bf16.msra.mxu1 %v20711_v2  ;;  %13939 = vmatprep.subr.bf16.mxu0 %v20716_v48  ;;  %v20762_v2 = vld [vmem:[%s29641_s3 + $0x1178] ss:$52 sps:$4 sm:$0xff]   ;;  %v20767_v48 = vld [vmem:[%s29641_s3 + $0x17fc] ss:$52 sps:$4 sm:$0xff]  }
 0x331   :  { %13980 = vmatprep.subr.bf16.mxu1 %v20719_v50  ;;  %v20770_v50 = vld [vmem:[%s29641_s3 + $0x1114] ss:$52 sps:$4 sm:$0xff]  }
 0x333   :  { %13940 = vmatpush1.bf16.msra.mxu0 %v20714_v59  ;;  %v20765_v59 = vld [vmem:[%s29641_s3 + $0x17f8] ss:$52 sps:$4 sm:$0xff]  }
 0x334   :  { %13981 = vmatpush1.bf16.msra.mxu1 %v20717_v52  ;;  %13941 = vmatprep.subr.bf16.mxu0 %v20722_v53  ;;  %v20768_v52 = vld [vmem:[%s29641_s3 + $0x1110] ss:$52 sps:$4 sm:$0xff]   ;;  %v20773_v53 = vld [vmem:[%s29641_s3 + $0x1794] ss:$52 sps:$4 sm:$0xff]  }
 0x335   :  { %13982 = vmatprep.subr.bf16.mxu1 %v20725_v54  ;;  %v20771_v54 = vld [vmem:[%s29641_s3 + $0x1790] ss:$52 sps:$4 sm:$0xff]  }
 0x337   :  { %13942 = vmatpush1.bf16.msra.mxu0 %v20720_v6  ;;  %v20776_v6 = vld [vmem:[%s29641_s3 + $0x10ac] ss:$52 sps:$4 sm:$0xff]  }
 0x338   :  { %13983 = vmatpush1.bf16.msra.mxu1 %v20723_v7  ;;  %13943 = vmatprep.subr.bf16.mxu0 %v20728_v57  ;;  %v20774_v7 = vld [vmem:[%s29641_s3 + $0x10a8] ss:$52 sps:$4 sm:$0xff]   ;;  %v20779_v57 = vld [vmem:[%s29641_s3 + $0x172c] ss:$52 sps:$4 sm:$0xff]  }
 0x339   :  { %13984 = vmatprep.subr.bf16.mxu1 %v20731_v61  ;;  %v20782_v61 = vld [vmem:[%s29641_s3 + $0x1044] ss:$52 sps:$4 sm:$0xff]  }
 0x33b   :  { %13944 = vmatpush1.bf16.msra.mxu0 %v20726_v60  ;;  %v20777_v60 = vld [vmem:[%s29641_s3 + $0x1728] ss:$52 sps:$4 sm:$0xff]  }
 0x33c   :  { %13985 = vmatpush1.bf16.msra.mxu1 %v20729_v62  ;;  %13945 = vmatprep.subr.bf16.mxu0 %v20734_v1  ;;  %v20780_v62 = vld [vmem:[%s29641_s3 + $0x1040] ss:$52 sps:$4 sm:$0xff]   ;;  %v20785_v1 = vld [vmem:[%s29641_s3 + $0x16c4] ss:$52 sps:$4 sm:$0xff]  }
 0x33d   :  { %13986 = vmatprep.subr.bf16.mxu1 %v20737_v5  ;;  %v20783_v5 = vld [vmem:[%s29641_s3 + $0x16c0] ss:$52 sps:$4 sm:$0xff]  }
 0x33f   :  { %13946 = vmatpush1.bf16.msra.mxu0 %v20732_v35  ;;  %v5754_v35 = vmax.f32 %v24488_v27, 0.0  ;;  %v20786_v27 = vld [vmem:[%s29641_s3 + $0x1cd8] ss:$52 sps:$4 sm:$0xff]  }
 0x340   :  { %13987 = vmatpush1.bf16.msra.mxu1 %v20735_v47  ;;  %13947 = vmatprep.subr.bf16.mxu0 %v20740_v51  ;;  %v20788_v47 = vld [vmem:[%s29641_s3 + $0x1cdc] ss:$52 sps:$4 sm:$0xff]   ;;  %v5756_v51 = vmax.f32 %v24808_v4, 0.0  ;;  %v20794_v4 = vld [vmem:[%s29641_s3 + $0x1c74] ss:$52 sps:$4 sm:$0xff]  }
 0x341   :  { %13988 = vmatprep.subr.bf16.mxu1 %v20743_v11  ;;  %v5759_v11 = vmax.f32 %v25228_v55, 0.0  ;;  %v5463_v55 = vadd.f32 %v25340_v29, %v867_v0  ;;  %v20800_v29 = vld [vmem:[%s29641_s3 + $0x1c0c] ss:$52 sps:$4 sm:$0xff]  }
 0x342   :  { %v5501_v20 = vpop.f32.mrf.mxu0  ;;  %v20827_v0 = vld [vmem:[%s29641_s3 + $0x20ec] ss:$52 sps:$4 sm:$0xff]  }
 0x343   :  { %v25438_v15 = vadd.f32 %v5501_v20, %v5461_v22  ;;  %13948 = vmatpush2.bf16.msra.mxu0 %v20738_v10  ;;  %v20791_v10 = vld [vmem:[%s29641_s3 + $0x235c] ss:$52 sps:$4 sm:$0xff]   ;;  %v20797_v22 = vld [vmem:[%s29641_s3 + $0x22f4] ss:$52 sps:$4 sm:$0xff]  }
 0x344   :  { %13989 = vmatpush2.bf16.msra.mxu1 %v20741_v44  ;;  %v25440_v19 = vpop.f32.mrf.mxu0  ;;  %13949 = vmatprep.subr.bf16.mxu0 %v20746_v26  ;;  %v20789_v44 = vld [vmem:[%s29641_s3 + $0x2358] ss:$52 sps:$4 sm:$0xff]   ;;  %v25537_v26 = vpack.c.bf16 %v5754_v35, %v5754_v35  ;;  %v20816_v35 = vld [vmem:[%s29641_s3 + $0x1ad0] ss:$52 sps:$4 sm:$0xff]  }
 0x345   :  { %13990 = vmatprep.subr.bf16.mxu1 %v20749_v14  ;;  %v25545_v14 = vpack.c.bf16 %v5759_v11, %v5759_v11  ;;  %v20828_v11 = vld [vmem:[%s29641_s3 + $0x1a00] ss:$52 sps:$4 sm:$0xff]  }
 0x346   :  { %v5505_v24 = vpop.f32.mrf.mxu0 }
 0x347   :  { %13950 = vmatpush2.bf16.msra.mxu0 %v20744_v13  ;;  %v25542_v13 = vpack.c.bf16 %v5756_v51, %v5756_v51  ;;  %v20803_v24 = vld [vmem:[%s29641_s3 + $0x228c] ss:$52 sps:$4 sm:$0xff]   ;;  %v20822_v51 = vld [vmem:[%s29641_s3 + $0x1a68] ss:$52 sps:$4 sm:$0xff]  }
 0x348   :  { %13991 = vmatpush2.bf16.msra.mxu1 %v20747_v12  ;;  %v5506_v63 = vpop.f32.mrf.mxu0  ;;  %13951 = vmatprep.subr.bf16.mxu0 %v20752_v18  ;;  %v20792_v18 = vld [vmem:[%s29641_s3 + $0x1c70] ss:$52 sps:$4 sm:$0xff]  }
 0x349   :  { %13992 = vmatprep.subr.bf16.mxu1 %v20755_v23  ;;  %v5504_v23 = vadd.f32 %v25440_v19, %v5463_v55  ;;  %v20834_v55 = vld [vmem:[%s29641_s3 + $0x2018] ss:$52 sps:$4 sm:$0xff]  }
 0x34b   :  { %13952 = vmatpush2.bf16.msra.mxu0 %v20750_v58  ;;  %v20795_v58 = vld [vmem:[%s29641_s3 + $0x22f0] ss:$52 sps:$4 sm:$0xff]  }
 0x34c   :  { %13993 = vmatpush2.bf16.msra.mxu1 %v20753_v25  ;;  %13953 = vmatprep.subr.bf16.mxu0 %v20758_v39 }
 0x34d   :  { %13994 = vmatprep.subr.bf16.mxu1 %v20761_v17 }
 0x34f   :  { %13954 = vmatpush2.bf16.msra.mxu0 %v20756_v45  ;;  %v20798_v45 = vld [vmem:[%s29641_s3 + $0x1c08] ss:$52 sps:$4 sm:$0xff]  }
 0x350   :  { %13995 = vmatpush2.bf16.msra.mxu1 %v20759_v46  ;;  %13955 = vmatprep.subr.bf16.mxu0 %v20764_v43  ;;  %v20801_v43 = vld [vmem:[%s29641_s3 + $0x2288] ss:$52 sps:$4 sm:$0xff]  }
 0x351   :  { %13996 = vmatprep.subr.bf16.mxu1 %v20767_v48 }
 0x353   :  { %13956 = vmatpush2.bf16.msra.mxu0 %v20762_v2  ;;  %v20806_v2 = vld [vmem:[%s29641_s3 + $0x1ba4] ss:$52 sps:$4 sm:$0xff]  }
 0x354   :  { %13997 = vmatpush2.bf16.msra.mxu1 %v20765_v59  ;;  %13957 = vmatprep.subr.bf16.mxu0 %v20770_v50 }
 0x355   :  { %13998 = vmatprep.subr.bf16.mxu1 %v20773_v53  ;;  %v20804_v53 = vld [vmem:[%s29641_s3 + $0x1ba0] ss:$52 sps:$4 sm:$0xff]  }
 0x357   :  { %13958 = vmatpush2.bf16.msra.mxu0 %v20768_v52  ;;  %v20809_v52 = vld [vmem:[%s29641_s3 + $0x2224] ss:$52 sps:$4 sm:$0xff]  }
 0x358   :  { %13999 = vmatpush2.bf16.msra.mxu1 %v20771_v54  ;;  %13959 = vmatprep.subr.bf16.mxu0 %v20776_v6  ;;  %v20807_v6 = vld [vmem:[%s29641_s3 + $0x2220] ss:$52 sps:$4 sm:$0xff]  }
 0x359   :  { %14000 = vmatprep.subr.bf16.mxu1 %v20779_v57  ;;  %v20810_v57 = vld [vmem:[%s29641_s3 + $0x1b38] ss:$52 sps:$4 sm:$0xff]  }
 0x35b   :  { %13960 = vmatpush2.bf16.msra.mxu0 %v20774_v7  ;;  %v20812_v7 = vld [vmem:[%s29641_s3 + $0x1b3c] ss:$52 sps:$4 sm:$0xff]  }
 0x35c   :  { %14001 = vmatpush2.bf16.msra.mxu1 %v20777_v60  ;;  %13961 = vmatprep.subr.bf16.mxu0 %v20782_v61  ;;  %v20815_v60 = vld [vmem:[%s29641_s3 + $0x21bc] ss:$52 sps:$4 sm:$0xff]   ;;  %v20813_v61 = vld [vmem:[%s29641_s3 + $0x21b8] ss:$52 sps:$4 sm:$0xff]  }
 0x35d   :  { %14002 = vmatprep.subr.bf16.mxu1 %v20785_v1  ;;  %v20821_v1 = vld [vmem:[%s29641_s3 + $0x2154] ss:$52 sps:$4 sm:$0xff]  }
 0x35f   :  { %13962 = vmatpush2.bf16.msra.mxu0 %v20780_v62  ;;  %v20818_v62 = vld [vmem:[%s29641_s3 + $0x1ad4] ss:$52 sps:$4 sm:$0xff]  }
 0x360   :  { %14003 = vmatpush2.bf16.msra.mxu1 %v20783_v5  ;;  %14013 = vmatprep.subr.bf16.mxu0 %v20788_v47  ;;  %v20819_v5 = vld [vmem:[%s29641_s3 + $0x2150] ss:$52 sps:$4 sm:$0xff]   ;;  %v20824_v47 = vld [vmem:[%s29641_s3 + $0x1a6c] ss:$52 sps:$4 sm:$0xff]  }
 0x361   :  { %14054 = vmatprep.subr.bf16.mxu1 %v20791_v10  ;;  %v20830_v10 = vld [vmem:[%s29641_s3 + $0x1a04] ss:$52 sps:$4 sm:$0xff]  }
 0x362   :  { %v25549_v12 = vpop.f32.mrf.mxu0  ;;  %13964 = vmatmul.mubr.bf16.vlgmr.msra.gmra.mxu0 %v25537_v26 }
 0x363   :  { %v25547_v20 = vpop.f32.mrf.mxu1  ;;  %14005 = vmatmul.mubr.bf16.vlgmr.msra.gmra.mxu1 %v25542_v13  ;;  %14014 = vmatpush1.bf16.msra.mxu0 %v20786_v27  ;;  %v20825_v27 = vld [vmem:[%s29641_s3 + $0x20e8] ss:$52 sps:$4 sm:$0xff]  }
 0x364   :  { %14045 = vmatprep.mubr.bf16.mxu0 %v25545_v14  ;;  %14055 = vmatpush1.bf16.msra.mxu1 %v20789_v44  ;;  %v5585_v25 = vpop.f32.mrf.mxu0  ;;  %v20833_v44 = vld [vmem:[%s29641_s3 + $0x2084] ss:$52 sps:$4 sm:$0xff]  }
 0x365   :  { %v5544_v63 = vpop.f32.mrf.mxu1  ;;  %14015 = vmatprep.subr.bf16.mxu0 %v20794_v4  ;;  %14056 = vmatprep.subr.bf16.mxu1 %v20797_v22  ;;  %v20831_v4 = vld [vmem:[%s29641_s3 + $0x2080] ss:$52 sps:$4 sm:$0xff]   ;;  %v20836_v22 = vld [vmem:[%s29641_s3 + $0x201c] ss:$52 sps:$4 sm:$0xff]  }
 0x366   :  { %v5545_v39 = vadd.f32 %v5544_v63, %v5504_v23  ;;  %v5587_v19 = vpop.f32.mrf.mxu0  ;;  %v20842_v23 = vld [vmem:[%s29641_s3 + $0x1fb4] ss:$52 sps:$4 sm:$0xff]  }
 0x367   :  { %v5546_v17 = vpop.f32.mrf.mxu1  ;;  %14016 = vmatpush1.bf16.msra.mxu0 %v20792_v18  ;;  %v20839_v18 = vld [vmem:[%s29641_s3 + $0x269c] ss:$52 sps:$4 sm:$0xff]  }
 0x368   :  { %v5586_v46 = vadd.f32 %v5585_v25, %v5545_v39  ;;  %14057 = vmatpush1.bf16.msra.mxu1 %v20795_v58  ;;  %v5588_v48 = vpop.f32.mrf.mxu0  ;;  %14017 = vmatprep.subr.bf16.mxu0 %v20800_v29  ;;  %v20837_v58 = vld [vmem:[%s29641_s3 + $0x2698] ss:$52 sps:$4 sm:$0xff]   ;;  %v20840_v29 = vld [vmem:[%s29641_s3 + $0x1fb0] ss:$52 sps:$4 sm:$0xff]  }
 0x369   :  { %v5547_v59 = vpop.f32.mrf.mxu1  ;;  %14058 = vmatprep.subr.bf16.mxu1 %v20803_v24  ;;  %v20845_v24 = vld [vmem:[%s29641_s3 + $0x2634] ss:$52 sps:$4 sm:$0xff]   ;;  %v20848_v17 = vld [vmem:[%s29641_s3 + $0x1f4c] ss:$52 sps:$4 sm:$0xff]  }
 0x36a   :  { %v5761_v50 = vmax.f32 %v5586_v46, 0.0  ;;  %v20846_v46 = vld [vmem:[%s29641_s3 + $0x1f48] ss:$52 sps:$4 sm:$0xff]  }
 0x36b   :  { %14018 = vmatpush1.bf16.msra.mxu0 %v20798_v45  ;;  %v20843_v45 = vld [vmem:[%s29641_s3 + $0x2630] ss:$52 sps:$4 sm:$0xff]  }
 0x36c   :  { %v25582_v54 = vpack.c.bf16 %v5761_v50, %v5761_v50  ;;  %14059 = vmatpush1.bf16.msra.mxu1 %v20801_v43  ;;  %14019 = vmatprep.subr.bf16.mxu0 %v20806_v2  ;;  %v20851_v43 = vld [vmem:[%s29641_s3 + $0x25cc] ss:$52 sps:$4 sm:$0xff]   ;;  %v20849_v50 = vld [vmem:[%s29641_s3 + $0x25c8] ss:$52 sps:$4 sm:$0xff]  }
 0x36d   :  { %14060 = vmatprep.subr.bf16.mxu1 %v20809_v52 }
 0x36e   :  { %14086 = vmatprep.mubr.bf16.mxu1 %v25582_v54 }
 0x36f   :  { %14020 = vmatpush1.bf16.msra.mxu0 %v20804_v53  ;;  %v20854_v53 = vld [vmem:[%s29641_s3 + $0x1ee4] ss:$52 sps:$4 sm:$0xff]  }
 0x370   :  { %14061 = vmatpush1.bf16.msra.mxu1 %v20807_v6  ;;  %14021 = vmatprep.subr.bf16.mxu0 %v20812_v7  ;;  %v20852_v6 = vld [vmem:[%s29641_s3 + $0x1ee0] ss:$52 sps:$4 sm:$0xff]   ;;  %v20857_v7 = vld [vmem:[%s29641_s3 + $0x2564] ss:$52 sps:$4 sm:$0xff]  }
 0x371   :  { %14062 = vmatprep.subr.bf16.mxu1 %v20815_v60  ;;  %v20860_v60 = vld [vmem:[%s29641_s3 + $0x1e7c] ss:$52 sps:$4 sm:$0xff]  }
 0x373   :  { %14022 = vmatpush1.bf16.msra.mxu0 %v20810_v57  ;;  %v20855_v57 = vld [vmem:[%s29641_s3 + $0x2560] ss:$52 sps:$4 sm:$0xff]  }
 0x374   :  { %14063 = vmatpush1.bf16.msra.mxu1 %v20813_v61  ;;  %14023 = vmatprep.subr.bf16.mxu0 %v20818_v62  ;;  %v20858_v61 = vld [vmem:[%s29641_s3 + $0x1e78] ss:$52 sps:$4 sm:$0xff]   ;;  %v20863_v62 = vld [vmem:[%s29641_s3 + $0x24fc] ss:$52 sps:$4 sm:$0xff]  }
 0x375   :  { %14064 = vmatprep.subr.bf16.mxu1 %v20821_v1  ;;  %v20861_v1 = vld [vmem:[%s29641_s3 + $0x24f8] ss:$52 sps:$4 sm:$0xff]  }
 0x377   :  { %14024 = vmatpush1.bf16.msra.mxu0 %v20816_v35  ;;  %v20866_v35 = vld [vmem:[%s29641_s3 + $0x1e14] ss:$52 sps:$4 sm:$0xff]  }
 0x378   :  { %14065 = vmatpush1.bf16.msra.mxu1 %v20819_v5  ;;  %14025 = vmatprep.subr.bf16.mxu0 %v20824_v47  ;;  %v20864_v5 = vld [vmem:[%s29641_s3 + $0x1e10] ss:$52 sps:$4 sm:$0xff]   ;;  %v20869_v47 = vld [vmem:[%s29641_s3 + $0x2494] ss:$52 sps:$4 sm:$0xff]  }
 0x379   :  { %14066 = vmatprep.subr.bf16.mxu1 %v20827_v0  ;;  %v20872_v0 = vld [vmem:[%s29641_s3 + $0x1dac] ss:$52 sps:$4 sm:$0xff]  }
 0x37b   :  { %14026 = vmatpush1.bf16.msra.mxu0 %v20822_v51  ;;  %v20867_v51 = vld [vmem:[%s29641_s3 + $0x2490] ss:$52 sps:$4 sm:$0xff]  }
 0x37c   :  { %14067 = vmatpush1.bf16.msra.mxu1 %v20825_v27  ;;  %14027 = vmatprep.subr.bf16.mxu0 %v20830_v10  ;;  %v5543_v27 = vadd.f32 %v25547_v20, %v25438_v15  ;;  %v20870_v10 = vld [vmem:[%s29641_s3 + $0x1da8] ss:$52 sps:$4 sm:$0xff]   ;;  %v20878_v15 = vld [vmem:[%s29641_s3 + $0x1d44] ss:$52 sps:$4 sm:$0xff]  }
 0x37d   :  { %14068 = vmatprep.subr.bf16.mxu1 %v20833_v44  ;;  %v20873_v44 = vld [vmem:[%s29641_s3 + $0x2428] ss:$52 sps:$4 sm:$0xff]  }
 0x37e   :  { %v5584_v20 = vadd.f32 %v25549_v12, %v5543_v27  ;;  %v20884_v12 = vld [vmem:[%s29641_s3 + $0x283c] ss:$52 sps:$4 sm:$0xff]   ;;  %v20905_v27 = vld [vmem:[%s29641_s3 + $0x1ac] ss:$52 sps:$4 sm:$0xff]  }
 0x37f   :  { %14028 = vmatpush1.bf16.msra.mxu0 %v20828_v11  ;;  %v20875_v11 = vld [vmem:[%s29641_s3 + $0x242c] ss:$52 sps:$4 sm:$0xff]  }
 0x380   :  { %14069 = vmatpush1.bf16.msra.mxu1 %v20831_v4  ;;  %14029 = vmatprep.subr.bf16.mxu0 %v20836_v22  ;;  %v20876_v4 = vld [vmem:[%s29641_s3 + $0x1d40] ss:$52 sps:$4 sm:$0xff]   ;;  %v20881_v22 = vld [vmem:[%s29641_s3 + $0x23c4] ss:$52 sps:$4 sm:$0xff]  }
 0x381   :  { %14070 = vmatprep.subr.bf16.mxu1 %v20839_v18  ;;  %v20879_v18 = vld [vmem:[%s29641_s3 + $0x23c0] ss:$52 sps:$4 sm:$0xff]  }
 0x382   :  { %v25657_v63 = vpop.f32.mrf.mxu0 }
 0x383   :  { %v25659_v25 = vpop.f32.mrf.mxu1  ;;  %14030 = vmatpush2.bf16.msra.mxu0 %v20834_v55  ;;  %v5758_v55 = vmax.f32 %v25221_v56, 0.0  ;;  %v20882_v56 = vld [vmem:[%s29641_s3 + $0x2838] ss:$52 sps:$4 sm:$0xff]  }
 0x384   :  { %14071 = vmatpush2.bf16.msra.mxu1 %v20837_v58  ;;  %v19143_v39 = vpop.f32.mrf.mxu0  ;;  %14031 = vmatprep.subr.bf16.mxu0 %v20842_v23  ;;  %v5760_v58 = vmax.f32 %v5584_v20, 0.0  ;;  %v871_v23 = vrot.slane %v25415_v8, %v24243_v3  ;;  %v20890_v8 = vld [vmem:[%s29641_s3 + $0x27d4] ss:$52 sps:$4 sm:$0xff]  }
 0x385   :  { %v25661_v19 = vpop.f32.mrf.mxu1  ;;  %14072 = vmatprep.subr.bf16.mxu1 %v20845_v24  ;;  %v20887_v24 = vld [vmem:[%s29641_s3 + $0x2e4] ss:$52 sps:$4 sm:$0xff]   ;;  %v20909_v20 = vld [vmem:[%s29641_s3 + $0x960] ss:$52 sps:$4 sm:$0xff]  }
 0x386   :  { %v19145_v2 = vpop.f32.mrf.mxu0 }
 0x387   :  { %v19167_v48 = vpop.f32.mrf.mxu1  ;;  %14032 = vmatpush2.bf16.msra.mxu0 %v20840_v29  ;;  %v19144_v29 = vadd.f32 %v19143_v39, %v25657_v63  ;;  %v20893_v63 = vld [vmem:[%s29641_s3 + $0x27c] ss:$52 sps:$4 sm:$0xff]   ;;  %v25763_v39 = vpack.c.bf16 %v5758_v55, %v5758_v55 }
 0x388   :  { %14073 = vmatpush2.bf16.msra.mxu1 %v20843_v45  ;;  %v19146_v59 = vpop.f32.mrf.mxu0  ;;  %14033 = vmatprep.subr.bf16.mxu0 %v20848_v17  ;;  %v20885_v45 = vld [vmem:[%s29641_s3 + $0x2e0] ss:$52 sps:$4 sm:$0xff]   ;;  %v25765_v17 = vpack.c.bf16 %v5760_v58, %v5760_v58  ;;  %v20914_v55 = vld [vmem:[%s29641_s3 + $0xdc] ss:$52 sps:$4 sm:$0xff]   ;;  %v20912_v58 = vld [vmem:[%s29641_s3 + $0xd8] ss:$52 sps:$4 sm:$0xff]  }
 0x389   :  { %v19168_v52 = vpop.f32.mrf.mxu1  ;;  %14074 = vmatprep.subr.bf16.mxu1 %v20851_v43  ;;  %v19166_v43 = vadd.f32 %v25661_v19, %v25659_v25  ;;  %v20888_v59 = vld [vmem:[%s29641_s3 + $0x27d0] ss:$52 sps:$4 sm:$0xff]   ;;  %v20896_v25 = vld [vmem:[%s29641_s3 + $0x276c] ss:$52 sps:$4 sm:$0xff]   ;;  %v20899_v19 = vld [vmem:[%s29641_s3 + $0x214] ss:$52 sps:$4 sm:$0xff]  }
 0x38b   :  { %14034 = vmatpush2.bf16.msra.mxu0 %v20846_v46  ;;  %v5625_v46 = vadd.f32 %v19144_v29, %v871_v23  ;;  %v20923_v23 = vld [vmem:[%s29641_s3 + $0x894] ss:$52 sps:$4 sm:$0xff]  }
 0x38c   :  { %14075 = vmatpush2.bf16.msra.mxu1 %v20849_v50  ;;  %14035 = vmatprep.subr.bf16.mxu0 %v20854_v53  ;;  %v20891_v50 = vld [vmem:[%s29641_s3 + $0x278] ss:$52 sps:$4 sm:$0xff]   ;;  %v20920_v29 = vld [vmem:[%s29641_s3 + $0x74] ss:$52 sps:$4 sm:$0xff]  }
 0x38d   :  { %14076 = vmatprep.subr.bf16.mxu1 %v20857_v7 }
 0x38f   :  { %14036 = vmatpush2.bf16.msra.mxu0 %v20852_v6  ;;  %v5665_v6 = vadd.f32 %v19166_v43, %v5625_v46  ;;  %v20924_v46 = vld [vmem:[%s29641_s3 + $0x8] ss:$52 sps:$4 sm:$0xff]   ;;  %v20935_v43 = vld [vmem:[%s29641_s3 + $0x7c4] ss:$52 sps:$4 sm:$0xff]  }
 0x390   :  { %14077 = vmatpush2.bf16.msra.mxu1 %v20855_v57  ;;  %14037 = vmatprep.subr.bf16.mxu0 %v20860_v60 }
 0x391   :  { %14078 = vmatprep.subr.bf16.mxu1 %v20863_v62 }
 0x393   :  { %14038 = vmatpush2.bf16.msra.mxu0 %v20858_v61  ;;  %v20894_v61 = vld [vmem:[%s29641_s3 + $0x2768] ss:$52 sps:$4 sm:$0xff]  }
 0x394   :  { %14079 = vmatpush2.bf16.msra.mxu1 %v20861_v1  ;;  %14039 = vmatprep.subr.bf16.mxu0 %v20866_v35  ;;  %v20897_v1 = vld [vmem:[%s29641_s3 + $0x210] ss:$52 sps:$4 sm:$0xff]  }
 0x395   :  { %14080 = vmatprep.subr.bf16.mxu1 %v20869_v47  ;;  %v20902_v35 = vld [vmem:[%s29641_s3 + $0x2704] ss:$52 sps:$4 sm:$0xff]  }
 0x397   :  { %14040 = vmatpush2.bf16.msra.mxu0 %v20864_v5 }
 0x398   :  { %14081 = vmatpush2.bf16.msra.mxu1 %v20867_v51  ;;  %14041 = vmatprep.subr.bf16.mxu0 %v20872_v0  ;;  %v20900_v0 = vld [vmem:[%s29641_s3 + $0x2700] ss:$52 sps:$4 sm:$0xff]  }
 0x399   :  { %14082 = vmatprep.subr.bf16.mxu1 %v20875_v11 }
 0x39b   :  { %14042 = vmatpush2.bf16.msra.mxu0 %v20870_v10  ;;  %v20903_v10 = vld [vmem:[%s29641_s3 + $0x1a8] ss:$52 sps:$4 sm:$0xff]  }
 0x39c   :  { %14083 = vmatpush2.bf16.msra.mxu1 %v20873_v44  ;;  %14043 = vmatprep.subr.bf16.mxu0 %v20878_v15  ;;  %v20908_v44 = vld [vmem:[%s29641_s3 + $0x144] ss:$52 sps:$4 sm:$0xff]  }
 0x39d   :  { %14084 = vmatprep.subr.bf16.mxu1 %v20881_v22  ;;  %v20911_v15 = vld [vmem:[%s29641_s3 + $0x964] ss:$52 sps:$4 sm:$0xff]   ;;  %v20917_v22 = vld [vmem:[%s29641_s3 + $0x8fc] ss:$52 sps:$4 sm:$0xff]  }
 0x39f   :  { %14044 = vmatpush2.bf16.msra.mxu0 %v20876_v4  ;;  %v20906_v4 = vld [vmem:[%s29641_s3 + $0x140] ss:$52 sps:$4 sm:$0xff]  }
 0x3a0   :  { %14085 = vmatpush2.bf16.msra.mxu1 %v20879_v18  ;;  %14103 = vmatprep.subr.bf16.mxu0 %v20884_v12  ;;  %v20915_v12 = vld [vmem:[%s29641_s3 + $0x8f8] ss:$52 sps:$4 sm:$0xff]  }
 0x3a1   :  { %14136 = vmatprep.subr.bf16.mxu1 %v20887_v24  ;;  %v20918_v24 = vld [vmem:[%s29641_s3 + $0x70] ss:$52 sps:$4 sm:$0xff]  }
 0x3a2   :  { %v19186_v2 = vpop.f32.mrf.mxu0  ;;  %14046 = vmatmul.mubr.bf16.vlgmr.msra.gmra.mxu0 %v25763_v39 }
 0x3a3   :  { %v5744_v48 = vpop.f32.mrf.mxu1  ;;  %14087 = vmatmul.mubr.bf16.vlgmr.msra.gmra.mxu1 %v25765_v17  ;;  %14104 = vmatpush1.bf16.msra.mxu0 %v20882_v56  ;;  %v20921_v56 = vld [vmem:[%s29641_s3 + $0x890] ss:$52 sps:$4 sm:$0xff]  }
 0x3a4   :  { %14137 = vmatpush1.bf16.msra.mxu1 %v20885_v45  ;;  %14168 = vmatprep.mubr.bf16.mxu1 %v25099_v30  ;;  %v19187_v52 = vpop.f32.mrf.mxu0  ;;  %v20929_v45 = vld [vmem:[%s29641_s3 + $0x82c] ss:$52 sps:$4 sm:$0xff]  }
 0x3a5   :  { %v19493_v53 = vpop.f32.mrf.mxu1  ;;  %v19188_v7 = vadd.f32 %v19187_v52, %v19186_v2  ;;  %14105 = vmatprep.subr.bf16.mxu0 %v20890_v8  ;;  %14138 = vmatprep.subr.bf16.mxu1 %v20893_v63  ;;  %v20926_v8 = vld [vmem:[%s29641_s3 + $0xc] ss:$52 sps:$4 sm:$0xff]   ;;  %v20927_v63 = vld [vmem:[%s29641_s3 + $0x828] ss:$52 sps:$4 sm:$0xff]   ;;  %v20932_v2 = vld [vmem:[%s29641_s3 + $0x624] ss:$52 sps:$4 sm:$0xff]  }
 0x3a6   :  { %v19189_v57 = vpop.f32.mrf.mxu0  ;;  %14127 = vmatprep.mubr.bf16.mxu0 %v22625_v16  ;;  %v20936_v52 = vld [vmem:[%s29641_s3 + $0x5b8] ss:$52 sps:$4 sm:$0xff]   ;;  %v20947_v53 = vld [vmem:[%s29641_s3 + $0x6f4] ss:$52 sps:$4 sm:$0xff]  }
 0x3a7   :  { %v5747_v60 = vpop.f32.mrf.mxu1  ;;  %v5705_v62 = vadd.f32 %v19188_v7, %v5665_v6  ;;  %14106 = vmatpush1.bf16.msra.mxu0 %v20888_v59  ;;  %v20930_v59 = vld [vmem:[%s29641_s3 + $0x620] ss:$52 sps:$4 sm:$0xff]   ;;  %v20945_v7 = vld [vmem:[%s29641_s3 + $0x6f0] ss:$52 sps:$4 sm:$0xff]  }
 0x3a8   :  { %14139 = vmatpush1.bf16.msra.mxu1 %v20891_v50  ;;  %v19190_v5 = vpop.f32.mrf.mxu0  ;;  %14107 = vmatprep.subr.bf16.mxu0 %v20896_v25  ;;  %v20941_v50 = vld [vmem:[%s29641_s3 + $0x75c] ss:$52 sps:$4 sm:$0xff]   ;;  %v20944_v6 = vld [vmem:[%s29641_s3 + $0x554] ss:$52 sps:$4 sm:$0xff]   ;;  %v20953_v60 = vld [vmem:[%s29641_s3 + $0x68c] ss:$52 sps:$4 sm:$0xff]  }
 0x3a9   :  { %v19494_v47 = vpop.f32.mrf.mxu1  ;;  %v5745_v51 = vadd.f32 %v5744_v48, %v5705_v62  ;;  %14140 = vmatprep.subr.bf16.mxu1 %v20899_v19  ;;  %v20933_v48 = vld [vmem:[%s29641_s3 + $0x7c0] ss:$52 sps:$4 sm:$0xff]   ;;  %v20938_v25 = vld [vmem:[%s29641_s3 + $0x5bc] ss:$52 sps:$4 sm:$0xff]   ;;  %v20939_v19 = vld [vmem:[%s29641_s3 + $0x758] ss:$52 sps:$4 sm:$0xff]  }
 0x3aa   :  { %v20942_v57 = vld [vmem:[%s29641_s3 + $0x550] ss:$52 sps:$4 sm:$0xff]   ;;  %v20951_v62 = vld [vmem:[%s29641_s3 + $0x688] ss:$52 sps:$4 sm:$0xff]   ;;  %v20957_v47 = vld [vmem:[%s29641_s3 + $0xca0] ss:$52 sps:$4 sm:$0xff]  }
 0x3ab   :  { %14108 = vmatpush1.bf16.msra.mxu0 %v20894_v61  ;;  %v5762_v11 = vmax.f32 %v5745_v51, 0.0  ;;  %v20950_v61 = vld [vmem:[%s29641_s3 + $0x4ec] ss:$52 sps:$4 sm:$0xff]   ;;  %v20956_v5 = vld [vmem:[%s29641_s3 + $0x484] ss:$52 sps:$4 sm:$0xff]  }
 0x3ac   :  { %14141 = vmatpush1.bf16.msra.mxu1 %v20897_v1  ;;  %14109 = vmatprep.subr.bf16.mxu0 %v20902_v35  ;;  %v20948_v1 = vld [vmem:[%s29641_s3 + $0x4e8] ss:$52 sps:$4 sm:$0xff]   ;;  %v20959_v35 = vld [vmem:[%s29641_s3 + $0xca4] ss:$52 sps:$4 sm:$0xff]   ;;  %v20954_v51 = vld [vmem:[%s29641_s3 + $0x480] ss:$52 sps:$4 sm:$0xff]  }
 0x3ad   :  { %14142 = vmatprep.subr.bf16.mxu1 %v20905_v27  ;;  %v25821_v18 = vpack.c.bf16 %v5762_v11, %v5762_v11  ;;  %v20962_v27 = vld [vmem:[%s29641_s3 + $0x41c] ss:$52 sps:$4 sm:$0xff]   ;;  %v20960_v11 = vld [vmem:[%s29641_s3 + $0x418] ss:$52 sps:$4 sm:$0xff]  }
 0x3af   :  { %14110 = vmatpush1.bf16.msra.mxu0 %v20900_v0  ;;  %v20965_v0 = vld [vmem:[%s29641_s3 + $0xc3c] ss:$52 sps:$4 sm:$0xff]  }
 0x3b0   :  { %14143 = vmatpush1.bf16.msra.mxu1 %v20903_v10  ;;  %14177 = vmatprep.subr.bf16.mxu0 %v20911_v15  ;;  %v20963_v10 = vld [vmem:[%s29641_s3 + $0xc38] ss:$52 sps:$4 sm:$0xff]   ;;  %v20968_v15 = vld [vmem:[%s29641_s3 + $0x3b4] ss:$52 sps:$4 sm:$0xff]  }
 0x3b1   :  { %14144 = vmatprep.subr.bf16.mxu1 %v20908_v44  ;;  %v20971_v44 = vld [vmem:[%s29641_s3 + $0xbd4] ss:$52 sps:$4 sm:$0xff]  }
 0x3b2   :  { %19017 = vmatmul.mubr.msk.bf16.vlgmr.msra.gmra.mxu0 %vm13845_vm1, %v25821_v18 }
 0x3b3   :  { %14178 = vmatpush1.bf16.msra.mxu0 %v20909_v20  ;;  %14209 = vmatprep.mubr.bf16.mxu0 %v25101_v37  ;;  %v20969_v20 = vld [vmem:[%s29641_s3 + $0xbd0] ss:$52 sps:$4 sm:$0xff]  }
 0x3b4   :  { %14145 = vmatpush1.bf16.msra.mxu1 %v20906_v4  ;;  %14179 = vmatprep.subr.bf16.mxu0 %v20917_v22  ;;  %v20966_v4 = vld [vmem:[%s29641_s3 + $0x3b0] ss:$52 sps:$4 sm:$0xff]   ;;  %v20977_v22 = vld [vmem:[%s29641_s3 + $0xb6c] ss:$52 sps:$4 sm:$0xff]  }
 0x3b5   :  { %14146 = vmatprep.subr.bf16.mxu1 %v20914_v55  ;;  %v20974_v55 = vld [vmem:[%s29641_s3 + $0x34c] ss:$52 sps:$4 sm:$0xff]  }
 0x3b7   :  { %14180 = vmatpush1.bf16.msra.mxu0 %v20915_v12  ;;  %v20975_v12 = vld [vmem:[%s29641_s3 + $0xb68] ss:$52 sps:$4 sm:$0xff]  }
 0x3b8   :  { %14147 = vmatpush1.bf16.msra.mxu1 %v20912_v58  ;;  %14181 = vmatprep.subr.bf16.mxu0 %v20923_v23  ;;  %v20972_v58 = vld [vmem:[%s29641_s3 + $0x348] ss:$52 sps:$4 sm:$0xff]   ;;  %v7176_v23 = vld [vmem:[%s29642_s4] sm:$0xff] }
 0x3b9   :  { %14148 = vmatprep.subr.bf16.mxu1 %v20920_v29  ;;  %v20980_v29 = vld [vmem:[%s29641_s3 + $0xb04] ss:$52 sps:$4 sm:$0xff]  }
 0x3bb   :  { %14182 = vmatpush1.bf16.msra.mxu0 %v20921_v56  ;;  %v20978_v56 = vld [vmem:[%s29641_s3 + $0xb00] ss:$52 sps:$4 sm:$0xff]  }
 0x3bc   :  { %14149 = vmatpush1.bf16.msra.mxu1 %v20918_v24  ;;  %14183 = vmatprep.subr.bf16.mxu0 %v20929_v45  ;;  %v20983_v24 = vld [vmem:[%s29641_s3 + $0xfe4] ss:$52 sps:$4 sm:$0xff]   ;;  %v20981_v45 = vld [vmem:[%s29641_s3 + $0xfe0] ss:$52 sps:$4 sm:$0xff]  }
 0x3bd   :  { %14150 = vmatprep.subr.bf16.mxu1 %v20926_v8  ;;  %v7183_v8 = vrot.slane %v7176_v23, %v23493_v34 }
 0x3bf   :  { %14184 = vmatpush1.bf16.msra.mxu0 %v20927_v63  ;;  %v20986_v63 = vld [vmem:[%s29641_s3 + $0xa9c] ss:$52 sps:$4 sm:$0xff]  }
 0x3c0   :  { %14151 = vmatpush1.bf16.msra.mxu1 %v20924_v46  ;;  %14185 = vmatprep.subr.bf16.mxu0 %v20935_v43  ;;  %v20989_v46 = vld [vmem:[%s29641_s3 + $0xf7c] ss:$52 sps:$4 sm:$0xff]   ;;  %v7187_v43 = vrot.slane %v7176_v23, %v23502_v38  ;;  %v21019_v23 = vld [vmem:[%s29641_s3 + $0x1594] ss:$52 sps:$4 sm:$0xff]  }
 0x3c1   :  { %14152 = vmatprep.subr.bf16.mxu1 %v20932_v2 }
 0x3c3   :  { %14186 = vmatpush1.bf16.msra.mxu0 %v20933_v48  ;;  %v20984_v48 = vld [vmem:[%s29641_s3 + $0xa98] ss:$52 sps:$4 sm:$0xff]  }
 0x3c4   :  { %14153 = vmatpush2.bf16.msra.mxu1 %v20930_v59  ;;  %14187 = vmatprep.subr.bf16.mxu0 %v20941_v50  ;;  %v20987_v59 = vld [vmem:[%s29641_s3 + $0xf78] ss:$52 sps:$4 sm:$0xff]  }
 0x3c5   :  { %14154 = vmatprep.subr.bf16.mxu1 %v20938_v25 }
 0x3c7   :  { %14188 = vmatpush1.bf16.msra.mxu0 %v20939_v19  ;;  %v20992_v19 = vld [vmem:[%s29641_s3 + $0xa34] ss:$52 sps:$4 sm:$0xff]  }
 0x3c8   :  { %14155 = vmatpush2.bf16.msra.mxu1 %v20936_v52  ;;  %14189 = vmatprep.subr.bf16.mxu0 %v20947_v53  ;;  %v20995_v52 = vld [vmem:[%s29641_s3 + $0xf14] ss:$52 sps:$4 sm:$0xff]  }
 0x3c9   :  { %14156 = vmatprep.subr.bf16.mxu1 %v20944_v6 }
 0x3cb   :  { %14190 = vmatpush1.bf16.msra.mxu0 %v20945_v7 }
 0x3cc   :  { %14157 = vmatpush2.bf16.msra.mxu1 %v20942_v57  ;;  %14191 = vmatprep.subr.bf16.mxu0 %v20953_v60 }
 0x3cd   :  { %14158 = vmatprep.subr.bf16.mxu1 %v20950_v61  ;;  %v20990_v61 = vld [vmem:[%s29641_s3 + $0xa30] ss:$52 sps:$4 sm:$0xff]  }
 0x3cf   :  { %14192 = vmatpush1.bf16.msra.mxu0 %v20951_v62 }
 0x3d0   :  { %14159 = vmatpush2.bf16.msra.mxu1 %v20948_v1  ;;  %14193 = vmatprep.subr.bf16.mxu0 %v20959_v35  ;;  %v20993_v35 = vld [vmem:[%s29641_s3 + $0xf10] ss:$52 sps:$4 sm:$0xff]  }
 0x3d1   :  { %14160 = vmatprep.subr.bf16.mxu1 %v20956_v5  ;;  %v20998_v5 = vld [vmem:[%s29641_s3 + $0x9cc] ss:$52 sps:$4 sm:$0xff]  }
 0x3d3   :  { %14194 = vmatpush2.bf16.msra.mxu0 %v20957_v47 }
 0x3d4   :  { %14161 = vmatpush2.bf16.msra.mxu1 %v20954_v51  ;;  %14195 = vmatprep.subr.bf16.mxu0 %v20965_v0  ;;  %v21001_v0 = vld [vmem:[%s29641_s3 + $0xeac] ss:$52 sps:$4 sm:$0xff]  }
 0x3d5   :  { %14162 = vmatprep.subr.bf16.mxu1 %v20962_v27  ;;  %v20996_v27 = vld [vmem:[%s29641_s3 + $0x9c8] ss:$52 sps:$4 sm:$0xff]  }
 0x3d7   :  { %14196 = vmatpush2.bf16.msra.mxu0 %v20963_v10  ;;  %v20999_v10 = vld [vmem:[%s29641_s3 + $0xea8] ss:$52 sps:$4 sm:$0xff]  }
 0x3d8   :  { %14163 = vmatpush2.bf16.msra.mxu1 %v20960_v11  ;;  %14197 = vmatprep.subr.bf16.mxu0 %v20971_v44  ;;  %v21004_v11 = vld [vmem:[%s29641_s3 + $0xe44] ss:$52 sps:$4 sm:$0xff]  }
 0x3d9   :  { %14164 = vmatprep.subr.bf16.mxu1 %v20968_v15  ;;  %v21007_v44 = vld [vmem:[%s29641_s3 + $0x1664] ss:$52 sps:$4 sm:$0xff]   ;;  %v21005_v15 = vld [vmem:[%s29641_s3 + $0x1660] ss:$52 sps:$4 sm:$0xff]  }
 0x3db   :  { %14198 = vmatpush2.bf16.msra.mxu0 %v20969_v20  ;;  %v21002_v20 = vld [vmem:[%s29641_s3 + $0xe40] ss:$52 sps:$4 sm:$0xff]  }
 0x3dc   :  { %14165 = vmatpush2.bf16.msra.mxu1 %v20966_v4  ;;  %14199 = vmatprep.subr.bf16.mxu0 %v20977_v22  ;;  %v21013_v4 = vld [vmem:[%s29641_s3 + $0x15fc] ss:$52 sps:$4 sm:$0xff]  }
 0x3dd   :  { %14166 = vmatprep.subr.bf16.mxu1 %v20974_v55  ;;  %v21010_v22 = vld [vmem:[%s29641_s3 + $0xddc] ss:$52 sps:$4 sm:$0xff]   ;;  %v21008_v55 = vld [vmem:[%s29641_s3 + $0xdd8] ss:$52 sps:$4 sm:$0xff]  }
 0x3df   :  { %14200 = vmatpush2.bf16.msra.mxu0 %v20975_v12  ;;  %v21011_v12 = vld [vmem:[%s29641_s3 + $0x15f8] ss:$52 sps:$4 sm:$0xff]  }
 0x3e0   :  { %14167 = vmatpush2.bf16.msra.mxu1 %v20972_v58  ;;  %14201 = vmatprep.subr.bf16.mxu0 %v20980_v29  ;;  %v21016_v58 = vld [vmem:[%s29641_s3 + $0xd74] ss:$52 sps:$4 sm:$0xff]   ;;  %v21014_v29 = vld [vmem:[%s29641_s3 + $0xd70] ss:$52 sps:$4 sm:$0xff]  }
 0x3e1   :  { %14218 = vmatprep.subr.bf16.mxu1 %v20983_v24  ;;  %v21025_v24 = vld [vmem:[%s29641_s3 + $0x152c] ss:$52 sps:$4 sm:$0xff]  }
 0x3e2   :  { %v13883_v2 = vpop.f32.mrf.mxu0 }
 0x3e3   :  { %v13884_v50 = vadd.f32 %v13883_v2, %v7183_v8  ;;  %v13924_v25 = vpop.f32.mrf.mxu1  ;;  %14169 = vmatmul.mubr.bf16.vlgmr.msra.gmra.mxu1 %v25312_v36  ;;  %14202 = vmatpush2.bf16.msra.mxu0 %v20978_v56  ;;  %v21017_v56 = vld [vmem:[%s29641_s3 + $0x1590] ss:$52 sps:$4 sm:$0xff]   ;;  %v21023_v8 = vld [vmem:[%s29641_s3 + $0x1528] ss:$52 sps:$4 sm:$0xff]   ;;  %v21029_v2 = vld [vmem:[%s29641_s3 + $0x14c0] ss:$52 sps:$4 sm:$0xff]  }
 0x3e4   :  { %14219 = vmatpush1.bf16.msra.mxu1 %v20981_v45  ;;  %14250 = vmatprep.mubr.bf16.mxu1 %v25319_v21  ;;  %v13885_v53 = vpop.f32.mrf.mxu0  ;;  %v21022_v45 = vld [vmem:[%s29641_s3 + $0xd0c] ss:$52 sps:$4 sm:$0xff]  }
 0x3e5   :  { %v25989_v6 = vadd.f32 %v13924_v25, %v13884_v50  ;;  %v13886_v7 = vadd.f32 %v13885_v53, %v7187_v43  ;;  %v13926_v57 = vpop.f32.mrf.mxu1  ;;  %14203 = vmatprep.subr.bf16.mxu0 %v20986_v63  ;;  %14220 = vmatprep.subr.bf16.mxu1 %v20989_v46  ;;  %v21020_v63 = vld [vmem:[%s29641_s3 + $0xd08] ss:$52 sps:$4 sm:$0xff]   ;;  %v21028_v46 = vld [vmem:[%s29641_s3 + $0x1324] ss:$52 sps:$4 sm:$0xff]  }
 0x3e6   :  { %v13887_v60 = vpop.f32.mrf.mxu0  ;;  %v21031_v43 = vld [vmem:[%s29641_s3 + $0x14c4] ss:$52 sps:$4 sm:$0xff]   ;;  %v21037_v50 = vld [vmem:[%s29641_s3 + $0x145c] ss:$52 sps:$4 sm:$0xff]   ;;  %v21043_v53 = vld [vmem:[%s29641_s3 + $0x13f4] ss:$52 sps:$4 sm:$0xff]  }
 0x3e7   :  { %v25994_v62 = vadd.f32 %v13926_v57, %v13886_v7  ;;  %v13928_v1 = vpop.f32.mrf.mxu1  ;;  %14204 = vmatpush2.bf16.msra.mxu0 %v20984_v48  ;;  %v21026_v48 = vld [vmem:[%s29641_s3 + $0x1320] ss:$52 sps:$4 sm:$0xff]   ;;  %v21035_v25 = vld [vmem:[%s29641_s3 + $0x1458] ss:$52 sps:$4 sm:$0xff]   ;;  %v21041_v7 = vld [vmem:[%s29641_s3 + $0x13f0] ss:$52 sps:$4 sm:$0xff]  }
 0x3e8   :  { %14221 = vmatpush1.bf16.msra.mxu1 %v20987_v59  ;;  %v13888_v47 = vpop.f32.mrf.mxu0  ;;  %14205 = vmatprep.subr.bf16.mxu0 %v20992_v19  ;;  %v21034_v59 = vld [vmem:[%s29641_s3 + $0x12bc] ss:$52 sps:$4 sm:$0xff]   ;;  %v21032_v19 = vld [vmem:[%s29641_s3 + $0x12b8] ss:$52 sps:$4 sm:$0xff]  }
 0x3e9   :  { %v13929_v51 = vpop.f32.mrf.mxu1  ;;  %14222 = vmatprep.subr.bf16.mxu1 %v20995_v52  ;;  %v21040_v52 = vld [vmem:[%s29641_s3 + $0x1254] ss:$52 sps:$4 sm:$0xff]   ;;  %v21038_v57 = vld [vmem:[%s29641_s3 + $0x1250] ss:$52 sps:$4 sm:$0xff]   ;;  %v21046_v60 = vld [vmem:[%s29641_s3 + $0x11ec] ss:$52 sps:$4 sm:$0xff]  }
 0x3ea   :  { %v21047_v1 = vld [vmem:[%s29641_s3 + $0x1388] ss:$52 sps:$4 sm:$0xff]   ;;  %v21055_v47 = vld [vmem:[%s29641_s3 + $0x19a4] ss:$52 sps:$4 sm:$0xff]   ;;  %v21053_v51 = vld [vmem:[%s29641_s3 + $0x19a0] ss:$52 sps:$4 sm:$0xff]  }
 0x3eb   :  { %14206 = vmatpush2.bf16.msra.mxu0 %v20990_v61  ;;  %v21049_v61 = vld [vmem:[%s29641_s3 + $0x138c] ss:$52 sps:$4 sm:$0xff]  }
 0x3ec   :  { %14223 = vmatpush1.bf16.msra.mxu1 %v20993_v35  ;;  %14207 = vmatprep.subr.bf16.mxu0 %v20998_v5  ;;  %v21044_v35 = vld [vmem:[%s29641_s3 + $0x11e8] ss:$52 sps:$4 sm:$0xff]   ;;  %v21052_v5 = vld [vmem:[%s29641_s3 + $0x1184] ss:$52 sps:$4 sm:$0xff]  }
 0x3ed   :  { %14224 = vmatprep.subr.bf16.mxu1 %v21001_v0  ;;  %v21050_v0 = vld [vmem:[%s29641_s3 + $0x1180] ss:$52 sps:$4 sm:$0xff]  }
 0x3ef   :  { %14208 = vmatpush2.bf16.msra.mxu0 %v20996_v27  ;;  %v21058_v27 = vld [vmem:[%s29641_s3 + $0x111c] ss:$52 sps:$4 sm:$0xff]  }
 0x3f0   :  { %14225 = vmatpush1.bf16.msra.mxu1 %v20999_v10  ;;  %14259 = vmatprep.subr.bf16.mxu0 %v21007_v44  ;;  %v21061_v10 = vld [vmem:[%s29641_s3 + $0x193c] ss:$52 sps:$4 sm:$0xff]   ;;  %v21056_v44 = vld [vmem:[%s29641_s3 + $0x1118] ss:$52 sps:$4 sm:$0xff]  }
 0x3f1   :  { %14226 = vmatprep.subr.bf16.mxu1 %v21004_v11  ;;  %v21059_v11 = vld [vmem:[%s29641_s3 + $0x1938] ss:$52 sps:$4 sm:$0xff]  }
 0x3f2   :  { %14210 = vmatmul.mubr.bf16.vlgmr.msra.gmra.mxu0 %v25314_v49 }
 0x3f3   :  { %14260 = vmatpush1.bf16.msra.mxu0 %v21005_v15  ;;  %14291 = vmatprep.mubr.bf16.mxu0 %v25330_v40  ;;  %v21064_v15 = vld [vmem:[%s29641_s3 + $0x10b4] ss:$52 sps:$4 sm:$0xff]  }
 0x3f4   :  { %14227 = vmatpush1.bf16.msra.mxu1 %v21002_v20  ;;  %14261 = vmatprep.subr.bf16.mxu0 %v21013_v4  ;;  %v21067_v20 = vld [vmem:[%s29641_s3 + $0x18d4] ss:$52 sps:$4 sm:$0xff]   ;;  %v21065_v4 = vld [vmem:[%s29641_s3 + $0x18d0] ss:$52 sps:$4 sm:$0xff]  }
 0x3f5   :  { %14228 = vmatprep.subr.bf16.mxu1 %v21010_v22  ;;  %v21062_v22 = vld [vmem:[%s29641_s3 + $0x10b0] ss:$52 sps:$4 sm:$0xff]  }
 0x3f7   :  { %14262 = vmatpush1.bf16.msra.mxu0 %v21011_v12  ;;  %v21073_v12 = vld [vmem:[%s29641_s3 + $0x186c] ss:$52 sps:$4 sm:$0xff]  }
 0x3f8   :  { %14229 = vmatpush1.bf16.msra.mxu1 %v21008_v55  ;;  %14263 = vmatprep.subr.bf16.mxu0 %v21019_v23  ;;  %v21070_v55 = vld [vmem:[%s29641_s3 + $0x104c] ss:$52 sps:$4 sm:$0xff]   ;;  %v21068_v23 = vld [vmem:[%s29641_s3 + $0x1048] ss:$52 sps:$4 sm:$0xff]  }
 0x3f9   :  { %14230 = vmatprep.subr.bf16.mxu1 %v21016_v58  ;;  %v21071_v58 = vld [vmem:[%s29641_s3 + $0x1868] ss:$52 sps:$4 sm:$0xff]  }
 0x3fb   :  { %14264 = vmatpush1.bf16.msra.mxu0 %v21017_v56  ;;  %v21079_v56 = vld [vmem:[%s29641_s3 + $0x1ce4] ss:$52 sps:$4 sm:$0xff]  }
 0x3fc   :  { %14231 = vmatpush1.bf16.msra.mxu1 %v21014_v29  ;;  %14265 = vmatprep.subr.bf16.mxu0 %v21025_v24  ;;  %v21076_v29 = vld [vmem:[%s29641_s3 + $0x1804] ss:$52 sps:$4 sm:$0xff]   ;;  %v21074_v24 = vld [vmem:[%s29641_s3 + $0x1800] ss:$52 sps:$4 sm:$0xff]  }
 0x3fd   :  { %14232 = vmatprep.subr.bf16.mxu1 %v21022_v45  ;;  %v21077_v45 = vld [vmem:[%s29641_s3 + $0x1ce0] ss:$52 sps:$4 sm:$0xff]  }
 0x3ff   :  { %14266 = vmatpush1.bf16.msra.mxu0 %v21023_v8  ;;  %v21082_v8 = vld [vmem:[%s29641_s3 + $0x179c] ss:$52 sps:$4 sm:$0xff]  }
 0x400   :  { %14233 = vmatpush1.bf16.msra.mxu1 %v21020_v63  ;;  %14267 = vmatprep.subr.bf16.mxu0 %v21031_v43  ;;  %v21085_v63 = vld [vmem:[%s29641_s3 + $0x1c7c] ss:$52 sps:$4 sm:$0xff]   ;;  %v21080_v43 = vld [vmem:[%s29641_s3 + $0x1798] ss:$52 sps:$4 sm:$0xff]  }
 0x401   :  { %14234 = vmatprep.subr.bf16.mxu1 %v21028_v46 }
 0x403   :  { %14268 = vmatpush1.bf16.msra.mxu0 %v21029_v2  ;;  %v21083_v2 = vld [vmem:[%s29641_s3 + $0x1c78] ss:$52 sps:$4 sm:$0xff]  }
 0x404   :  { %14235 = vmatpush2.bf16.msra.mxu1 %v21026_v48  ;;  %14269 = vmatprep.subr.bf16.mxu0 %v21037_v50  ;;  %v21088_v50 = vld [vmem:[%s29641_s3 + $0x1734] ss:$52 sps:$4 sm:$0xff]  }
 0x405   :  { %14236 = vmatprep.subr.bf16.mxu1 %v21034_v59 }
 0x407   :  { %14270 = vmatpush1.bf16.msra.mxu0 %v21035_v25  ;;  %v21091_v25 = vld [vmem:[%s29641_s3 + $0x1c14] ss:$52 sps:$4 sm:$0xff]  }
 0x408   :  { %14237 = vmatpush2.bf16.msra.mxu1 %v21032_v19  ;;  %14271 = vmatprep.subr.bf16.mxu0 %v21043_v53 }
 0x409   :  { %14238 = vmatprep.subr.bf16.mxu1 %v21040_v52 }
 0x40b   :  { %14272 = vmatpush1.bf16.msra.mxu0 %v21041_v7 }
 0x40c   :  { %14239 = vmatpush2.bf16.msra.mxu1 %v21038_v57  ;;  %14273 = vmatprep.subr.bf16.mxu0 %v21049_v61  ;;  %v21086_v57 = vld [vmem:[%s29641_s3 + $0x1730] ss:$52 sps:$4 sm:$0xff]  }
 0x40d   :  { %14240 = vmatprep.subr.bf16.mxu1 %v21046_v60 }
 0x40f   :  { %14274 = vmatpush1.bf16.msra.mxu0 %v21047_v1  ;;  %v21089_v1 = vld [vmem:[%s29641_s3 + $0x1c10] ss:$52 sps:$4 sm:$0xff]  }
 0x410   :  { %14241 = vmatpush2.bf16.msra.mxu1 %v21044_v35  ;;  %14275 = vmatprep.subr.bf16.mxu0 %v21055_v47  ;;  %v21097_v47 = vld [vmem:[%s29641_s3 + $0x1bac] ss:$52 sps:$4 sm:$0xff]  }
 0x411   :  { %14242 = vmatprep.subr.bf16.mxu1 %v21052_v5 }
 0x413   :  { %14276 = vmatpush2.bf16.msra.mxu0 %v21053_v51  ;;  %v21092_v51 = vld [vmem:[%s29641_s3 + $0x16c8] ss:$52 sps:$4 sm:$0xff]  }
 0x414   :  { %14243 = vmatpush2.bf16.msra.mxu1 %v21050_v0  ;;  %14277 = vmatprep.subr.bf16.mxu0 %v21061_v10  ;;  %v21095_v0 = vld [vmem:[%s29641_s3 + $0x1ba8] ss:$52 sps:$4 sm:$0xff]   ;;  %v21103_v10 = vld [vmem:[%s29641_s3 + $0x2364] ss:$52 sps:$4 sm:$0xff]  }
 0x415   :  { %14244 = vmatprep.subr.bf16.mxu1 %v21058_v27  ;;  %v21100_v27 = vld [vmem:[%s29641_s3 + $0x1b44] ss:$52 sps:$4 sm:$0xff]  }
 0x417   :  { %14278 = vmatpush2.bf16.msra.mxu0 %v21059_v11  ;;  %v21101_v11 = vld [vmem:[%s29641_s3 + $0x2360] ss:$52 sps:$4 sm:$0xff]  }
 0x418   :  { %14245 = vmatpush2.bf16.msra.mxu1 %v21056_v44  ;;  %14279 = vmatprep.subr.bf16.mxu0 %v21067_v20  ;;  %v21098_v44 = vld [vmem:[%s29641_s3 + $0x1b40] ss:$52 sps:$4 sm:$0xff]   ;;  %v21106_v20 = vld [vmem:[%s29641_s3 + $0x1adc] ss:$52 sps:$4 sm:$0xff]  }
 0x419   :  { %14246 = vmatprep.subr.bf16.mxu1 %v21064_v15  ;;  %v21109_v15 = vld [vmem:[%s29641_s3 + $0x22fc] ss:$52 sps:$4 sm:$0xff]  }
 0x41b   :  { %14280 = vmatpush2.bf16.msra.mxu0 %v21065_v4  ;;  %v21104_v4 = vld [vmem:[%s29641_s3 + $0x1ad8] ss:$52 sps:$4 sm:$0xff]  }
 0x41c   :  { %14247 = vmatpush2.bf16.msra.mxu1 %v21062_v22  ;;  %14281 = vmatprep.subr.bf16.mxu0 %v21073_v12  ;;  %v21107_v22 = vld [vmem:[%s29641_s3 + $0x22f8] ss:$52 sps:$4 sm:$0xff]   ;;  %v21115_v12 = vld [vmem:[%s29641_s3 + $0x2294] ss:$52 sps:$4 sm:$0xff]  }
 0x41d   :  { %14248 = vmatprep.subr.bf16.mxu1 %v21070_v55  ;;  %v21112_v55 = vld [vmem:[%s29641_s3 + $0x1a74] ss:$52 sps:$4 sm:$0xff]  }
 0x41f   :  { %14282 = vmatpush2.bf16.msra.mxu0 %v21071_v58  ;;  %v21113_v58 = vld [vmem:[%s29641_s3 + $0x2290] ss:$52 sps:$4 sm:$0xff]  }
 0x420   :  { %14249 = vmatpush2.bf16.msra.mxu1 %v21068_v23  ;;  %14283 = vmatprep.subr.bf16.mxu0 %v21076_v29  ;;  %v21110_v23 = vld [vmem:[%s29641_s3 + $0x1a70] ss:$52 sps:$4 sm:$0xff]   ;;  %v21118_v29 = vld [vmem:[%s29641_s3 + $0x1a0c] ss:$52 sps:$4 sm:$0xff]  }
 0x421   :  { %14300 = vmatprep.subr.bf16.mxu1 %v21079_v56  ;;  %v21121_v56 = vld [vmem:[%s29641_s3 + $0x222c] ss:$52 sps:$4 sm:$0xff]  }
 0x422   :  { %v13965_v46 = vpop.f32.mrf.mxu0 }
 0x423   :  { %v13966_v48 = vadd.f32 %v13965_v46, %v25989_v6  ;;  %v14006_v59 = vpop.f32.mrf.mxu1  ;;  %14251 = vmatmul.mubr.bf16.vlgmr.msra.gmra.mxu1 %v25537_v26  ;;  %14284 = vmatpush2.bf16.msra.mxu0 %v21074_v24  ;;  %v21119_v24 = vld [vmem:[%s29641_s3 + $0x2228] ss:$52 sps:$4 sm:$0xff]   ;;  %v21125_v46 = vld [vmem:[%s29641_s3 + $0x21c0] ss:$52 sps:$4 sm:$0xff]  }
 0x424   :  { %14301 = vmatpush1.bf16.msra.mxu1 %v21077_v45  ;;  %14332 = vmatprep.mubr.bf16.mxu1 %v25545_v14  ;;  %v13967_v19 = vpop.f32.mrf.mxu0  ;;  %v21116_v45 = vld [vmem:[%s29641_s3 + $0x1a08] ss:$52 sps:$4 sm:$0xff]  }
 0x425   :  { %v26190_v52 = vadd.f32 %v14006_v59, %v13966_v48  ;;  %v13968_v6 = vadd.f32 %v13967_v19, %v25994_v62  ;;  %v14008_v53 = vpop.f32.mrf.mxu1  ;;  %14285 = vmatprep.subr.bf16.mxu0 %v21082_v8  ;;  %14302 = vmatprep.subr.bf16.mxu1 %v21085_v63  ;;  %v21094_v62 = vld [vmem:[%s29641_s3 + $0x16cc] ss:$52 sps:$4 sm:$0xff]   ;;  %v21124_v8 = vld [vmem:[%s29641_s3 + $0x2024] ss:$52 sps:$4 sm:$0xff]   ;;  %v21133_v48 = vld [vmem:[%s29641_s3 + $0x215c] ss:$52 sps:$4 sm:$0xff]  }
 0x426   :  { %v13969_v7 = vpop.f32.mrf.mxu0  ;;  %v21127_v63 = vld [vmem:[%s29641_s3 + $0x21c4] ss:$52 sps:$4 sm:$0xff]   ;;  %v21139_v19 = vld [vmem:[%s29641_s3 + $0x20f4] ss:$52 sps:$4 sm:$0xff]  }
 0x427   :  { %v26196_v60 = vadd.f32 %v14008_v53, %v13968_v6  ;;  %v14010_v61 = vpop.f32.mrf.mxu1  ;;  %14286 = vmatpush2.bf16.msra.mxu0 %v21080_v43  ;;  %v21122_v43 = vld [vmem:[%s29641_s3 + $0x2020] ss:$52 sps:$4 sm:$0xff]   ;;  %v21131_v59 = vld [vmem:[%s29641_s3 + $0x2158] ss:$52 sps:$4 sm:$0xff]   ;;  %v21137_v6 = vld [vmem:[%s29641_s3 + $0x20f0] ss:$52 sps:$4 sm:$0xff]  }
 0x428   :  { %14303 = vmatpush1.bf16.msra.mxu1 %v21083_v2  ;;  %v13970_v35 = vpop.f32.mrf.mxu0  ;;  %14287 = vmatprep.subr.bf16.mxu0 %v21088_v50  ;;  %v21130_v2 = vld [vmem:[%s29641_s3 + $0x1fbc] ss:$52 sps:$4 sm:$0xff]   ;;  %v21128_v50 = vld [vmem:[%s29641_s3 + $0x1fb8] ss:$52 sps:$4 sm:$0xff]  }
 0x429   :  { %v14011_v5 = vpop.f32.mrf.mxu1  ;;  %14304 = vmatprep.subr.bf16.mxu1 %v21091_v25  ;;  %v21136_v25 = vld [vmem:[%s29641_s3 + $0x1f54] ss:$52 sps:$4 sm:$0xff]   ;;  %v21134_v53 = vld [vmem:[%s29641_s3 + $0x1f50] ss:$52 sps:$4 sm:$0xff]   ;;  %v21142_v7 = vld [vmem:[%s29641_s3 + $0x1eec] ss:$52 sps:$4 sm:$0xff]  }
 0x42a   :  { %v21143_v61 = vld [vmem:[%s29641_s3 + $0x2088] ss:$52 sps:$4 sm:$0xff]   ;;  %v21151_v35 = vld [vmem:[%s29641_s3 + $0x26a4] ss:$52 sps:$4 sm:$0xff]   ;;  %v21149_v5 = vld [vmem:[%s29641_s3 + $0x26a0] ss:$52 sps:$4 sm:$0xff]  }
 0x42b   :  { %14288 = vmatpush2.bf16.msra.mxu0 %v21086_v57  ;;  %v21145_v57 = vld [vmem:[%s29641_s3 + $0x208c] ss:$52 sps:$4 sm:$0xff]  }
 0x42c   :  { %14305 = vmatpush1.bf16.msra.mxu1 %v21089_v1  ;;  %14289 = vmatprep.subr.bf16.mxu0 %v21094_v62  ;;  %v21140_v1 = vld [vmem:[%s29641_s3 + $0x1ee8] ss:$52 sps:$4 sm:$0xff]   ;;  %v21148_v62 = vld [vmem:[%s29641_s3 + $0x1e84] ss:$52 sps:$4 sm:$0xff]  }
 0x42d   :  { %14306 = vmatprep.subr.bf16.mxu1 %v21097_v47  ;;  %v21146_v47 = vld [vmem:[%s29641_s3 + $0x1e80] ss:$52 sps:$4 sm:$0xff]  }
 0x42f   :  { %14290 = vmatpush2.bf16.msra.mxu0 %v21092_v51  ;;  %v21154_v51 = vld [vmem:[%s29641_s3 + $0x1e1c] ss:$52 sps:$4 sm:$0xff]  }
 0x430   :  { %14307 = vmatpush1.bf16.msra.mxu1 %v21095_v0  ;;  %14341 = vmatprep.subr.bf16.mxu0 %v21103_v10  ;;  %v21157_v0 = vld [vmem:[%s29641_s3 + $0x263c] ss:$52 sps:$4 sm:$0xff]   ;;  %v21152_v10 = vld [vmem:[%s29641_s3 + $0x1e18] ss:$52 sps:$4 sm:$0xff]  }
 0x431   :  { %14308 = vmatprep.subr.bf16.mxu1 %v21100_v27  ;;  %v21155_v27 = vld [vmem:[%s29641_s3 + $0x2638] ss:$52 sps:$4 sm:$0xff]  }
 0x432   :  { %14292 = vmatmul.mubr.bf16.vlgmr.msra.gmra.mxu0 %v25542_v13 }
 0x433   :  { %14342 = vmatpush1.bf16.msra.mxu0 %v21101_v11  ;;  %14373 = vmatprep.mubr.bf16.mxu0 %v25582_v54  ;;  %v21160_v11 = vld [vmem:[%s29641_s3 + $0x1db4] ss:$52 sps:$4 sm:$0xff]  }
 0x434   :  { %14309 = vmatpush1.bf16.msra.mxu1 %v21098_v44  ;;  %14343 = vmatprep.subr.bf16.mxu0 %v21109_v15  ;;  %v21163_v44 = vld [vmem:[%s29641_s3 + $0x25d4] ss:$52 sps:$4 sm:$0xff]   ;;  %v21161_v15 = vld [vmem:[%s29641_s3 + $0x25d0] ss:$52 sps:$4 sm:$0xff]  }
 0x435   :  { %14310 = vmatprep.subr.bf16.mxu1 %v21106_v20  ;;  %v21158_v20 = vld [vmem:[%s29641_s3 + $0x1db0] ss:$52 sps:$4 sm:$0xff]  }
 0x437   :  { %14344 = vmatpush1.bf16.msra.mxu0 %v21107_v22  ;;  %v21169_v22 = vld [vmem:[%s29641_s3 + $0x256c] ss:$52 sps:$4 sm:$0xff]  }
 0x438   :  { %14311 = vmatpush1.bf16.msra.mxu1 %v21104_v4  ;;  %14345 = vmatprep.subr.bf16.mxu0 %v21115_v12  ;;  %v21166_v4 = vld [vmem:[%s29641_s3 + $0x1d4c] ss:$52 sps:$4 sm:$0xff]   ;;  %v21164_v12 = vld [vmem:[%s29641_s3 + $0x1d48] ss:$52 sps:$4 sm:$0xff]  }
 0x439   :  { %14312 = vmatprep.subr.bf16.mxu1 %v21112_v55  ;;  %v21167_v55 = vld [vmem:[%s29641_s3 + $0x2568] ss:$52 sps:$4 sm:$0xff]  }
 0x43b   :  { %14346 = vmatpush1.bf16.msra.mxu0 %v21113_v58  ;;  %v21172_v58 = vld [vmem:[%s29641_s3 + $0x2504] ss:$52 sps:$4 sm:$0xff]  }
 0x43c   :  { %14313 = vmatpush1.bf16.msra.mxu1 %v21110_v23  ;;  %14347 = vmatprep.subr.bf16.mxu0 %v21121_v56  ;;  %v21175_v23 = vld [vmem:[%s29641_s3 + $0x2844] ss:$52 sps:$4 sm:$0xff]   ;;  %v21173_v56 = vld [vmem:[%s29641_s3 + $0x2840] ss:$52 sps:$4 sm:$0xff]  }
 0x43d   :  { %14314 = vmatprep.subr.bf16.mxu1 %v21118_v29  ;;  %v21170_v29 = vld [vmem:[%s29641_s3 + $0x2500] ss:$52 sps:$4 sm:$0xff]  }
 0x43f   :  { %14348 = vmatpush1.bf16.msra.mxu0 %v21119_v24  ;;  %v21178_v24 = vld [vmem:[%s29641_s3 + $0x249c] ss:$52 sps:$4 sm:$0xff]  }
 0x440   :  { %14315 = vmatpush1.bf16.msra.mxu1 %v21116_v45  ;;  %14349 = vmatprep.subr.bf16.mxu0 %v21127_v63  ;;  %v21181_v45 = vld [vmem:[%s29641_s3 + $0x27dc] ss:$52 sps:$4 sm:$0xff]   ;;  %v21176_v63 = vld [vmem:[%s29641_s3 + $0x2498] ss:$52 sps:$4 sm:$0xff]  }
 0x441   :  { %14316 = vmatprep.subr.bf16.mxu1 %v21124_v8 }
 0x443   :  { %14350 = vmatpush1.bf16.msra.mxu0 %v21125_v46  ;;  %v21179_v46 = vld [vmem:[%s29641_s3 + $0x27d8] ss:$52 sps:$4 sm:$0xff]  }
 0x444   :  { %14317 = vmatpush2.bf16.msra.mxu1 %v21122_v43  ;;  %14351 = vmatprep.subr.bf16.mxu0 %v21133_v48  ;;  %v21184_v48 = vld [vmem:[%s29641_s3 + $0x2434] ss:$52 sps:$4 sm:$0xff]  }
 0x445   :  { %14318 = vmatprep.subr.bf16.mxu1 %v21130_v2 }
 0x447   :  { %14352 = vmatpush1.bf16.msra.mxu0 %v21131_v59  ;;  %v21187_v59 = vld [vmem:[%s29641_s3 + $0x2774] ss:$52 sps:$4 sm:$0xff]  }
 0x448   :  { %14319 = vmatpush2.bf16.msra.mxu1 %v21128_v50  ;;  %14353 = vmatprep.subr.bf16.mxu0 %v21139_v19 }
 0x449   :  { %14320 = vmatprep.subr.bf16.mxu1 %v21136_v25 }
 0x44b   :  { %14354 = vmatpush1.bf16.msra.mxu0 %v21137_v6 }
 0x44c   :  { %14321 = vmatpush2.bf16.msra.mxu1 %v21134_v53  ;;  %14355 = vmatprep.subr.bf16.mxu0 %v21145_v57  ;;  %v21182_v53 = vld [vmem:[%s29641_s3 + $0x2430] ss:$52 sps:$4 sm:$0xff]  }
 0x44d   :  { %14322 = vmatprep.subr.bf16.mxu1 %v21142_v7 }
 0x44f   :  { %14356 = vmatpush1.bf16.msra.mxu0 %v21143_v61  ;;  %v21185_v61 = vld [vmem:[%s29641_s3 + $0x2770] ss:$52 sps:$4 sm:$0xff]  }
 0x450   :  { %14323 = vmatpush2.bf16.msra.mxu1 %v21140_v1  ;;  %14357 = vmatprep.subr.bf16.mxu0 %v21151_v35  ;;  %v21193_v35 = vld [vmem:[%s29641_s3 + $0x270c] ss:$52 sps:$4 sm:$0xff]  }
 0x451   :  { %14324 = vmatprep.subr.bf16.mxu1 %v21148_v62 }
 0x453   :  { %14358 = vmatpush2.bf16.msra.mxu0 %v21149_v5  ;;  %v21188_v5 = vld [vmem:[%s29641_s3 + $0x23c8] ss:$52 sps:$4 sm:$0xff]  }
 0x454   :  { %14325 = vmatpush2.bf16.msra.mxu1 %v21146_v47  ;;  %14359 = vmatprep.subr.bf16.mxu0 %v21157_v0  ;;  %v21191_v47 = vld [vmem:[%s29641_s3 + $0x2708] ss:$52 sps:$4 sm:$0xff]   ;;  %v21199_v0 = vld [vmem:[%s29641_s3 + $0x96c] ss:$52 sps:$4 sm:$0xff]  }
 0x455   :  { %14326 = vmatprep.subr.bf16.mxu1 %v21154_v51  ;;  %v21196_v51 = vld [vmem:[%s29641_s3 + $0x2ec] ss:$52 sps:$4 sm:$0xff]  }
 0x457   :  { %14360 = vmatpush2.bf16.msra.mxu0 %v21155_v27  ;;  %v21194_v27 = vld [vmem:[%s29641_s3 + $0x2e8] ss:$52 sps:$4 sm:$0xff]  }
 0x458   :  { %14327 = vmatpush2.bf16.msra.mxu1 %v21152_v10  ;;  %14361 = vmatprep.subr.bf16.mxu0 %v21163_v44  ;;  %v21197_v10 = vld [vmem:[%s29641_s3 + $0x968] ss:$52 sps:$4 sm:$0xff]  }
 0x459   :  { %14328 = vmatprep.subr.bf16.mxu1 %v21160_v11  ;;  %v21202_v11 = vld [vmem:[%s29641_s3 + $0x284] ss:$52 sps:$4 sm:$0xff]  }
 0x45b   :  { %14362 = vmatpush2.bf16.msra.mxu0 %v21161_v15  ;;  %v21200_v15 = vld [vmem:[%s29641_s3 + $0x280] ss:$52 sps:$4 sm:$0xff]  }
 0x45c   :  { %14329 = vmatpush2.bf16.msra.mxu1 %v21158_v20  ;;  %14363 = vmatprep.subr.bf16.mxu0 %v21169_v22  ;;  %v21205_v20 = vld [vmem:[%s29641_s3 + $0x904] ss:$52 sps:$4 sm:$0xff]   ;;  %v21203_v22 = vld [vmem:[%s29641_s3 + $0x900] ss:$52 sps:$4 sm:$0xff]  }
 0x45d   :  { %14330 = vmatprep.subr.bf16.mxu1 %v21166_v4 }
 0x45f   :  { %14364 = vmatpush2.bf16.msra.mxu0 %v21167_v55  ;;  %v21208_v55 = vld [vmem:[%s29641_s3 + $0x21c] ss:$52 sps:$4 sm:$0xff]  }
 0x460   :  { %14331 = vmatpush2.bf16.msra.mxu1 %v21164_v12  ;;  %14365 = vmatprep.subr.bf16.mxu0 %v21172_v58 }
 0x461   :  { %14390 = vmatprep.subr.bf16.mxu1 %v21175_v23  ;;  %v21211_v23 = vld [vmem:[%s29641_s3 + $0x89c] ss:$52 sps:$4 sm:$0xff]  }
 0x462   :  { %v14047_v8 = vpop.f32.mrf.mxu0 }
 0x463   :  { %v14048_v43 = vadd.f32 %v14047_v8, %v26190_v52  ;;  %v14088_v2 = vpop.f32.mrf.mxu1  ;;  %14333 = vmatmul.mubr.bf16.vlgmr.msra.gmra.mxu1 %v25763_v39  ;;  %14366 = vmatpush2.bf16.msra.mxu0 %v21170_v29  ;;  %v21214_v8 = vld [vmem:[%s29641_s3 + $0x1b4] ss:$52 sps:$4 sm:$0xff]  }
 0x464   :  { %14391 = vmatpush1.bf16.msra.mxu1 %v21173_v56  ;;  %v14049_v50 = vpop.f32.mrf.mxu0  ;;  %14367 = vmatprep.subr.bf16.mxu0 %v21178_v24  ;;  %v21206_v56 = vld [vmem:[%s29641_s3 + $0x218] ss:$52 sps:$4 sm:$0xff]  }
 0x465   :  { %v14089_v25 = vadd.f32 %v14088_v2, %v14048_v43  ;;  %v14050_v19 = vadd.f32 %v14049_v50, %v26196_v60  ;;  %v14090_v6 = vpop.f32.mrf.mxu1  ;;  %14392 = vmatprep.subr.bf16.mxu1 %v21181_v45  ;;  %14414 = vmatprep.mubr.bf16.mxu1 %v22625_v16  ;;  %v21190_v60 = vld [vmem:[%s29641_s3 + $0x23cc] ss:$52 sps:$4 sm:$0xff]   ;;  %v21215_v43 = vld [vmem:[%s29641_s3 + $0x830] ss:$52 sps:$4 sm:$0xff]   ;;  %v21221_v50 = vld [vmem:[%s29641_s3 + $0x7c8] ss:$52 sps:$4 sm:$0xff]  }
 0x466   :  { %v14051_v52 = vpop.f32.mrf.mxu0  ;;  %v21209_v45 = vld [vmem:[%s29641_s3 + $0x898] ss:$52 sps:$4 sm:$0xff]  }
 0x467   :  { %v14091_v7 = vadd.f32 %v14090_v6, %v14050_v19  ;;  %v14092_v57 = vpop.f32.mrf.mxu1  ;;  %14368 = vmatpush2.bf16.msra.mxu0 %v21176_v63  ;;  %v21212_v63 = vld [vmem:[%s29641_s3 + $0x1b0] ss:$52 sps:$4 sm:$0xff]   ;;  %v21220_v2 = vld [vmem:[%s29641_s3 + $0x14c] ss:$52 sps:$4 sm:$0xff]  }
 0x468   :  { %14393 = vmatpush1.bf16.msra.mxu1 %v21179_v46  ;;  %v14052_v1 = vpop.f32.mrf.mxu0  ;;  %14369 = vmatprep.subr.bf16.mxu0 %v21184_v48  ;;  %v21217_v46 = vld [vmem:[%s29641_s3 + $0x834] ss:$52 sps:$4 sm:$0xff]   ;;  %v21229_v6 = vld [vmem:[%s29641_s3 + $0x764] ss:$52 sps:$4 sm:$0xff]   ;;  %v21235_v57 = vld [vmem:[%s29641_s3 + $0x6fc] ss:$52 sps:$4 sm:$0xff]  }
 0x469   :  { %v14093_v62 = vpop.f32.mrf.mxu1  ;;  %14394 = vmatprep.subr.bf16.mxu1 %v21187_v59  ;;  %v21218_v48 = vld [vmem:[%s29641_s3 + $0x148] ss:$52 sps:$4 sm:$0xff]   ;;  %v21223_v59 = vld [vmem:[%s29641_s3 + $0x7cc] ss:$52 sps:$4 sm:$0xff]   ;;  %v21236_v1 = vld [vmem:[%s29641_s3 + $0x10] ss:$52 sps:$4 sm:$0xff]  }
 0x46a   :  { %v21224_v19 = vld [vmem:[%s29641_s3 + $0xe0] ss:$52 sps:$4 sm:$0xff]  }
 0x46b   :  { %14370 = vmatpush2.bf16.msra.mxu0 %v21182_v53  ;;  %v21227_v52 = vld [vmem:[%s29641_s3 + $0x760] ss:$52 sps:$4 sm:$0xff]   ;;  %v21232_v53 = vld [vmem:[%s29641_s3 + $0x7c] ss:$52 sps:$4 sm:$0xff]  }
 0x46c   :  { %14395 = vmatpush1.bf16.msra.mxu1 %v21185_v61  ;;  %14371 = vmatprep.subr.bf16.mxu0 %v21190_v60  ;;  %v21233_v61 = vld [vmem:[%s29641_s3 + $0x6f8] ss:$52 sps:$4 sm:$0xff]   ;;  %v21238_v60 = vld [vmem:[%s29641_s3 + $0x14] ss:$52 sps:$4 sm:$0xff]  }
 0x46d   :  { %14396 = vmatprep.subr.bf16.mxu1 %v21193_v35  ;;  %v21241_v62 = vld [vmem:[%s29641_s3 + $0x694] ss:$52 sps:$4 sm:$0xff]   ;;  %v21239_v35 = vld [vmem:[%s29641_s3 + $0x690] ss:$52 sps:$4 sm:$0xff]  }
 0x46f   :  { %14372 = vmatpush2.bf16.msra.mxu0 %v21188_v5  ;;  %v21244_v5 = vld [vmem:[%s29641_s3 + $0x62c] ss:$52 sps:$4 sm:$0xff]  }
 0x470   :  { %14397 = vmatpush1.bf16.msra.mxu1 %v21191_v47  ;;  %14423 = vmatprep.subr.bf16.mxu0 %v21196_v51  ;;  %v21242_v47 = vld [vmem:[%s29641_s3 + $0x628] ss:$52 sps:$4 sm:$0xff]   ;;  %v21247_v51 = vld [vmem:[%s29641_s3 + $0xcac] ss:$52 sps:$4 sm:$0xff]  }
 0x471   :  { %14464 = vmatprep.subr.bf16.mxu1 %v21199_v0  ;;  %v21245_v0 = vld [vmem:[%s29641_s3 + $0xca8] ss:$52 sps:$4 sm:$0xff]  }
 0x472   :  { %v14129_v44 = vpop.f32.mrf.mxu0  ;;  %14374 = vmatmul.mubr.bf16.vlgmr.msra.gmra.mxu0 %v25765_v17 }
 0x473   :  { %v26433_v4 = vadd.f32 %v14129_v44, %v14089_v25  ;;  %19018 = vmatmul.mubr.msk.bf16.vlgmr.msra.gmra.mxu1 %vm13845_vm1, %v25821_v18  ;;  %14424 = vmatpush1.bf16.msra.mxu0 %v21194_v27  ;;  %v21226_v25 = vld [vmem:[%s29641_s3 + $0xe4] ss:$52 sps:$4 sm:$0xff]   ;;  %v21251_v44 = vld [vmem:[%s29641_s3 + $0xc40] ss:$52 sps:$4 sm:$0xff]  }
 0x474   :  { %14455 = vmatprep.mubr.bf16.mxu0 %v25099_v30  ;;  %14465 = vmatpush1.bf16.msra.mxu1 %v21197_v10  ;;  %v14131_v12 = vpop.f32.mrf.mxu0  ;;  %v21250_v27 = vld [vmem:[%s29641_s3 + $0x5c4] ss:$52 sps:$4 sm:$0xff]   ;;  %v21248_v10 = vld [vmem:[%s29641_s3 + $0x5c0] ss:$52 sps:$4 sm:$0xff]  }
 0x475   :  { %14496 = vmatprep.mubr.bf16.mxu1 %v25101_v37  ;;  %v26445_v58 = vadd.f32 %v14131_v12, %v14091_v7  ;;  %14425 = vmatprep.subr.bf16.mxu0 %v21202_v11  ;;  %v21230_v7 = vld [vmem:[%s29641_s3 + $0x78] ss:$52 sps:$4 sm:$0xff]   ;;  %v21262_v12 = vld [vmem:[%s29641_s3 + $0x4f4] ss:$52 sps:$4 sm:$0xff]  }
 0x476   :  { %v14133_v29 = vpop.f32.mrf.mxu0  ;;  %14466 = vmatprep.subr.bf16.mxu1 %v21205_v20  ;;  %v21253_v11 = vld [vmem:[%s29641_s3 + $0xc44] ss:$52 sps:$4 sm:$0xff]  }
 0x477   :  { %14426 = vmatpush1.bf16.msra.mxu0 %v21200_v15  ;;  %v21256_v15 = vld [vmem:[%s29641_s3 + $0x55c] ss:$52 sps:$4 sm:$0xff]   ;;  %v21254_v20 = vld [vmem:[%s29641_s3 + $0x558] ss:$52 sps:$4 sm:$0xff]   ;;  %v21265_v29 = vld [vmem:[%s29641_s3 + $0xb74] ss:$52 sps:$4 sm:$0xff]  }
 0x478   :  { %14467 = vmatpush1.bf16.msra.mxu1 %v21203_v22  ;;  %v14134_v24 = vpop.f32.mrf.mxu0  ;;  %14427 = vmatprep.subr.bf16.mxu0 %v21208_v55  ;;  %v21259_v22 = vld [vmem:[%s29641_s3 + $0xbdc] ss:$52 sps:$4 sm:$0xff]   ;;  %v21257_v55 = vld [vmem:[%s29641_s3 + $0xbd8] ss:$52 sps:$4 sm:$0xff]  }
 0x479   :  { %14468 = vmatprep.subr.bf16.mxu1 %v21211_v23  ;;  %v21260_v23 = vld [vmem:[%s29641_s3 + $0x4f0] ss:$52 sps:$4 sm:$0xff]   ;;  %v21268_v24 = vld [vmem:[%s29641_s3 + $0x48c] ss:$52 sps:$4 sm:$0xff]  }
 0x47b   :  { %14428 = vmatpush1.bf16.msra.mxu0 %v21206_v56  ;;  %v21263_v56 = vld [vmem:[%s29641_s3 + $0xb70] ss:$52 sps:$4 sm:$0xff]  }
 0x47c   :  { %14469 = vmatpush1.bf16.msra.mxu1 %v21209_v45  ;;  %14429 = vmatprep.subr.bf16.mxu0 %v21214_v8  ;;  %v21271_v45 = vld [vmem:[%s29641_s3 + $0xb0c] ss:$52 sps:$4 sm:$0xff]   ;;  %v21266_v8 = vld [vmem:[%s29641_s3 + $0x488] ss:$52 sps:$4 sm:$0xff]  }
 0x47d   :  { %14470 = vmatprep.subr.bf16.mxu1 %v21217_v46  ;;  %v21274_v46 = vld [vmem:[%s29641_s3 + $0x424] ss:$52 sps:$4 sm:$0xff]  }
 0x47f   :  { %14430 = vmatpush1.bf16.msra.mxu0 %v21212_v63  ;;  %v21269_v63 = vld [vmem:[%s29641_s3 + $0xb08] ss:$52 sps:$4 sm:$0xff]  }
 0x480   :  { %14471 = vmatpush1.bf16.msra.mxu1 %v21215_v43  ;;  %14431 = vmatprep.subr.bf16.mxu0 %v21220_v2  ;;  %v21277_v43 = vld [vmem:[%s29641_s3 + $0xaa4] ss:$52 sps:$4 sm:$0xff]   ;;  %v21272_v2 = vld [vmem:[%s29641_s3 + $0x420] ss:$52 sps:$4 sm:$0xff]  }
 0x481   :  { %14472 = vmatprep.subr.bf16.mxu1 %v21223_v59 }
 0x483   :  { %14432 = vmatpush1.bf16.msra.mxu0 %v21218_v48  ;;  %v21275_v48 = vld [vmem:[%s29641_s3 + $0xaa0] ss:$52 sps:$4 sm:$0xff]  }
 0x484   :  { %14473 = vmatpush1.bf16.msra.mxu1 %v21221_v50  ;;  %14433 = vmatprep.subr.bf16.mxu0 %v21226_v25  ;;  %v21280_v50 = vld [vmem:[%s29641_s3 + $0x3bc] ss:$52 sps:$4 sm:$0xff]  }
 0x485   :  { %14474 = vmatprep.subr.bf16.mxu1 %v21229_v6  ;;  %v21283_v25 = vld [vmem:[%s29641_s3 + $0xa3c] ss:$52 sps:$4 sm:$0xff]   ;;  %v21278_v6 = vld [vmem:[%s29641_s3 + $0x3b8] ss:$52 sps:$4 sm:$0xff]  }
 0x487   :  { %14434 = vmatpush1.bf16.msra.mxu0 %v21224_v19 }
 0x488   :  { %14475 = vmatpush1.bf16.msra.mxu1 %v21227_v52  ;;  %14435 = vmatprep.subr.bf16.mxu0 %v21232_v53  ;;  %v21281_v53 = vld [vmem:[%s29641_s3 + $0xa38] ss:$52 sps:$4 sm:$0xff]  }
 0x489   :  { %14476 = vmatprep.subr.bf16.mxu1 %v21235_v57 }
 0x48b   :  { %14436 = vmatpush1.bf16.msra.mxu0 %v21230_v7  ;;  %v21286_v7 = vld [vmem:[%s29641_s3 + $0x354] ss:$52 sps:$4 sm:$0xff]  }
 0x48c   :  { %14477 = vmatpush1.bf16.msra.mxu1 %v21233_v61  ;;  %14437 = vmatprep.subr.bf16.mxu0 %v21238_v60  ;;  %v21289_v61 = vld [vmem:[%s29641_s3 + $0x9d4] ss:$52 sps:$4 sm:$0xff]   ;;  %v21284_v60 = vld [vmem:[%s29641_s3 + $0x350] ss:$52 sps:$4 sm:$0xff]  }
 0x48d   :  { %14478 = vmatprep.subr.bf16.mxu1 %v21241_v62  ;;  %v21292_v62 = vld [vmem:[%s29641_s3 + $0xfec] ss:$52 sps:$4 sm:$0xff]  }
 0x48f   :  { %14438 = vmatpush1.bf16.msra.mxu0 %v21236_v1  ;;  %v21287_v1 = vld [vmem:[%s29641_s3 + $0x9d0] ss:$52 sps:$4 sm:$0xff]  }
 0x490   :  { %14479 = vmatpush1.bf16.msra.mxu1 %v21239_v35  ;;  %14439 = vmatprep.subr.bf16.mxu0 %v21244_v5  ;;  %v21295_v35 = vld [vmem:[%s29641_s3 + $0x166c] ss:$52 sps:$4 sm:$0xff]  }
 0x491   :  { %14480 = vmatprep.subr.bf16.mxu1 %v21247_v51  ;;  %v22600_v5 = vld [vmem:[%s29642_s4] sm:$0xff]  ;;  %v21290_v51 = vld [vmem:[%s29641_s3 + $0xfe8] ss:$52 sps:$4 sm:$0xff]  }
 0x493   :  { %14440 = vmatpush2.bf16.msra.mxu0 %v21242_v47  ;;  %v7191_v47 = vrot.slane %v22600_v5, %v23909_v31 }
 0x494   :  { %14481 = vmatpush2.bf16.msra.mxu1 %v21245_v0  ;;  %14441 = vmatprep.subr.bf16.mxu0 %v21250_v27  ;;  %v21293_v0 = vld [vmem:[%s29641_s3 + $0x1668] ss:$52 sps:$4 sm:$0xff]   ;;  %v7195_v27 = vrot.slane %v22600_v5, %v23912_v32  ;;  %v21332_v5 = vld [vmem:[%s29641_s3 + $0xd10] ss:$52 sps:$4 sm:$0xff]  }
 0x495   :  { %14482 = vmatprep.subr.bf16.mxu1 %v21253_v11 }
 0x497   :  { %14442 = vmatpush2.bf16.msra.mxu0 %v21248_v10  ;;  %v21298_v10 = vld [vmem:[%s29641_s3 + $0xf84] ss:$52 sps:$4 sm:$0xff]  }
 0x498   :  { %14483 = vmatpush2.bf16.msra.mxu1 %v21251_v44  ;;  %14443 = vmatprep.subr.bf16.mxu0 %v21256_v15  ;;  %v21296_v44 = vld [vmem:[%s29641_s3 + $0xf80] ss:$52 sps:$4 sm:$0xff]  }
 0x499   :  { %14484 = vmatprep.subr.bf16.mxu1 %v21259_v22  ;;  %v21301_v22 = vld [vmem:[%s29641_s3 + $0x1604] ss:$52 sps:$4 sm:$0xff]  }
 0x49b   :  { %14444 = vmatpush2.bf16.msra.mxu0 %v21254_v20  ;;  %v21299_v20 = vld [vmem:[%s29641_s3 + $0x1600] ss:$52 sps:$4 sm:$0xff]  }
 0x49c   :  { %14485 = vmatpush2.bf16.msra.mxu1 %v21257_v55  ;;  %14445 = vmatprep.subr.bf16.mxu0 %v21262_v12 }
 0x49d   :  { %14486 = vmatprep.subr.bf16.mxu1 %v21265_v29  ;;  %v21307_v29 = vld [vmem:[%s29641_s3 + $0x159c] ss:$52 sps:$4 sm:$0xff]  }
 0x49f   :  { %14446 = vmatpush2.bf16.msra.mxu0 %v21260_v23  ;;  %v21304_v23 = vld [vmem:[%s29641_s3 + $0xf1c] ss:$52 sps:$4 sm:$0xff]  }
 0x4a0   :  { %14487 = vmatpush2.bf16.msra.mxu1 %v21263_v56  ;;  %14447 = vmatprep.subr.bf16.mxu0 %v21268_v24 }
 0x4a1   :  { %14488 = vmatprep.subr.bf16.mxu1 %v21271_v45 }
 0x4a3   :  { %v14170_v59 = vpop.f32.mrf.mxu1  ;;  %14448 = vmatpush2.bf16.msra.mxu0 %v21266_v8  ;;  %v21302_v8 = vld [vmem:[%s29641_s3 + $0xf18] ss:$52 sps:$4 sm:$0xff]  }
 0x4a4   :  { %14489 = vmatpush2.bf16.msra.mxu1 %v21269_v63  ;;  %14449 = vmatprep.subr.bf16.mxu0 %v21274_v46  ;;  %v14171_v11 = vadd.f32 %v14170_v59, %v7191_v47  ;;  %v21305_v63 = vld [vmem:[%s29641_s3 + $0x1598] ss:$52 sps:$4 sm:$0xff]   ;;  %v21310_v46 = vld [vmem:[%s29641_s3 + $0xeb4] ss:$52 sps:$4 sm:$0xff]   ;;  %v21311_v59 = vld [vmem:[%s29641_s3 + $0x1530] ss:$52 sps:$4 sm:$0xff]  }
 0x4a5   :  { %v14172_v19 = vpop.f32.mrf.mxu1  ;;  %14490 = vmatprep.subr.bf16.mxu1 %v21277_v43  ;;  %v21313_v43 = vld [vmem:[%s29641_s3 + $0x1534] ss:$52 sps:$4 sm:$0xff]  }
 0x4a6   :  { %v14173_v55 = vadd.f32 %v14172_v19, %v7195_v27  ;;  %v21319_v19 = vld [vmem:[%s29641_s3 + $0x14cc] ss:$52 sps:$4 sm:$0xff]   ;;  %v21337_v47 = vld [vmem:[%s29641_s3 + $0x1394] ss:$52 sps:$4 sm:$0xff]  }
 0x4a7   :  { %v14174_v52 = vpop.f32.mrf.mxu1  ;;  %14450 = vmatpush2.bf16.msra.mxu0 %v21272_v2  ;;  %v21338_v27 = vld [vmem:[%s29641_s3 + $0x1328] ss:$52 sps:$4 sm:$0xff]  }
 0x4a8   :  { %14491 = vmatpush2.bf16.msra.mxu1 %v21275_v48  ;;  %14451 = vmatprep.subr.bf16.mxu0 %v21280_v50  ;;  %v21308_v48 = vld [vmem:[%s29641_s3 + $0xeb0] ss:$52 sps:$4 sm:$0xff]   ;;  %v21316_v50 = vld [vmem:[%s29641_s3 + $0xe4c] ss:$52 sps:$4 sm:$0xff]  }
 0x4a9   :  { %v14175_v57 = vpop.f32.mrf.mxu1  ;;  %14492 = vmatprep.subr.bf16.mxu1 %v21283_v25  ;;  %v21314_v25 = vld [vmem:[%s29641_s3 + $0xe48] ss:$52 sps:$4 sm:$0xff]   ;;  %v21322_v52 = vld [vmem:[%s29641_s3 + $0xde4] ss:$52 sps:$4 sm:$0xff]  }
 0x4aa   :  { %v21323_v57 = vld [vmem:[%s29641_s3 + $0x1460] ss:$52 sps:$4 sm:$0xff]  }
 0x4ab   :  { %14452 = vmatpush2.bf16.msra.mxu0 %v21278_v6  ;;  %v21317_v6 = vld [vmem:[%s29641_s3 + $0x14c8] ss:$52 sps:$4 sm:$0xff]  }
 0x4ac   :  { %14493 = vmatpush2.bf16.msra.mxu1 %v21281_v53  ;;  %14453 = vmatprep.subr.bf16.mxu0 %v21286_v7  ;;  %v21325_v53 = vld [vmem:[%s29641_s3 + $0x1464] ss:$52 sps:$4 sm:$0xff]   ;;  %v21320_v7 = vld [vmem:[%s29641_s3 + $0xde0] ss:$52 sps:$4 sm:$0xff]  }
 0x4ad   :  { %14494 = vmatprep.subr.bf16.mxu1 %v21289_v61  ;;  %v21328_v61 = vld [vmem:[%s29641_s3 + $0xd7c] ss:$52 sps:$4 sm:$0xff]  }
 0x4af   :  { %14454 = vmatpush2.bf16.msra.mxu0 %v21284_v60  ;;  %v21326_v60 = vld [vmem:[%s29641_s3 + $0xd78] ss:$52 sps:$4 sm:$0xff]  }
 0x4b0   :  { %14495 = vmatpush2.bf16.msra.mxu1 %v21287_v1  ;;  %14505 = vmatprep.subr.bf16.mxu0 %v21292_v62  ;;  %v21331_v1 = vld [vmem:[%s29641_s3 + $0x13fc] ss:$52 sps:$4 sm:$0xff]   ;;  %v21329_v62 = vld [vmem:[%s29641_s3 + $0x13f8] ss:$52 sps:$4 sm:$0xff]  }
 0x4b1   :  { %14546 = vmatprep.subr.bf16.mxu1 %v21295_v35  ;;  %v21334_v35 = vld [vmem:[%s29641_s3 + $0xd14] ss:$52 sps:$4 sm:$0xff]  }
 0x4b2   :  { %v14211_v15 = vpop.f32.mrf.mxu0  ;;  %14456 = vmatmul.mubr.bf16.vlgmr.msra.gmra.mxu0 %v25312_v36 }
 0x4b3   :  { %v26642_v12 = vadd.f32 %v14211_v15, %v14171_v11  ;;  %14497 = vmatmul.mubr.bf16.vlgmr.msra.gmra.mxu1 %v25314_v49  ;;  %14506 = vmatpush1.bf16.msra.mxu0 %v21290_v51  ;;  %v21335_v51 = vld [vmem:[%s29641_s3 + $0x1390] ss:$52 sps:$4 sm:$0xff]   ;;  %v21341_v11 = vld [vmem:[%s29641_s3 + $0x19a8] ss:$52 sps:$4 sm:$0xff]   ;;  %v21344_v15 = vld [vmem:[%s29641_s3 + $0x12c0] ss:$52 sps:$4 sm:$0xff]  }
 0x4b4   :  { %14537 = vmatprep.mubr.bf16.mxu0 %v25319_v21  ;;  %14547 = vmatpush1.bf16.msra.mxu1 %v21293_v0  ;;  %v14213_v56 = vpop.f32.mrf.mxu0  ;;  %v21340_v0 = vld [vmem:[%s29641_s3 + $0x132c] ss:$52 sps:$4 sm:$0xff]  }
 0x4b5   :  { %14578 = vmatprep.mubr.bf16.mxu1 %v25330_v40  ;;  %v26653_v24 = vadd.f32 %v14213_v56, %v14173_v55  ;;  %14507 = vmatprep.subr.bf16.mxu0 %v21298_v10  ;;  %v21343_v10 = vld [vmem:[%s29641_s3 + $0x19ac] ss:$52 sps:$4 sm:$0xff]   ;;  %v21352_v55 = vld [vmem:[%s29641_s3 + $0x125c] ss:$52 sps:$4 sm:$0xff]  }
 0x4b6   :  { %v14215_v45 = vpop.f32.mrf.mxu0  ;;  %14548 = vmatprep.subr.bf16.mxu1 %v21301_v22  ;;  %v21347_v22 = vld [vmem:[%s29641_s3 + $0x1940] ss:$52 sps:$4 sm:$0xff]   ;;  %v21353_v56 = vld [vmem:[%s29641_s3 + $0x18d8] ss:$52 sps:$4 sm:$0xff]  }
 0x4b7   :  { %14508 = vmatpush1.bf16.msra.mxu0 %v21296_v44  ;;  %v21346_v44 = vld [vmem:[%s29641_s3 + $0x12c4] ss:$52 sps:$4 sm:$0xff]   ;;  %v21358_v45 = vld [vmem:[%s29641_s3 + $0x11f4] ss:$52 sps:$4 sm:$0xff]  }
 0x4b8   :  { %14549 = vmatpush1.bf16.msra.mxu1 %v21299_v20  ;;  %v14216_v2 = vpop.f32.mrf.mxu0  ;;  %14509 = vmatprep.subr.bf16.mxu0 %v21304_v23  ;;  %v21349_v20 = vld [vmem:[%s29641_s3 + $0x1944] ss:$52 sps:$4 sm:$0xff]  }
 0x4b9   :  { %14550 = vmatprep.subr.bf16.mxu1 %v21307_v29  ;;  %v21350_v23 = vld [vmem:[%s29641_s3 + $0x1258] ss:$52 sps:$4 sm:$0xff]   ;;  %v21355_v29 = vld [vmem:[%s29641_s3 + $0x18dc] ss:$52 sps:$4 sm:$0xff]  }
 0x4ba   :  { %v21362_v2 = vld [vmem:[%s29641_s3 + $0x1188] ss:$52 sps:$4 sm:$0xff]  }
 0x4bb   :  { %14510 = vmatpush1.bf16.msra.mxu0 %v21302_v8  ;;  %v21356_v8 = vld [vmem:[%s29641_s3 + $0x11f0] ss:$52 sps:$4 sm:$0xff]  }
 0x4bc   :  { %14551 = vmatpush1.bf16.msra.mxu1 %v21305_v63  ;;  %14511 = vmatprep.subr.bf16.mxu0 %v21310_v46  ;;  %v21361_v63 = vld [vmem:[%s29641_s3 + $0x1874] ss:$52 sps:$4 sm:$0xff]   ;;  %v21359_v46 = vld [vmem:[%s29641_s3 + $0x1870] ss:$52 sps:$4 sm:$0xff]  }
 0x4bd   :  { %14552 = vmatprep.subr.bf16.mxu1 %v21313_v43  ;;  %v21364_v43 = vld [vmem:[%s29641_s3 + $0x118c] ss:$52 sps:$4 sm:$0xff]  }
 0x4bf   :  { %14512 = vmatpush1.bf16.msra.mxu0 %v21308_v48  ;;  %v21367_v48 = vld [vmem:[%s29641_s3 + $0x180c] ss:$52 sps:$4 sm:$0xff]  }
 0x4c0   :  { %14553 = vmatpush1.bf16.msra.mxu1 %v21311_v59  ;;  %14513 = vmatprep.subr.bf16.mxu0 %v21316_v50  ;;  %v21365_v59 = vld [vmem:[%s29641_s3 + $0x1808] ss:$52 sps:$4 sm:$0xff]   ;;  %v21370_v50 = vld [vmem:[%s29641_s3 + $0x1124] ss:$52 sps:$4 sm:$0xff]  }
 0x4c1   :  { %14554 = vmatprep.subr.bf16.mxu1 %v21319_v19  ;;  %v21373_v19 = vld [vmem:[%s29641_s3 + $0x17a4] ss:$52 sps:$4 sm:$0xff]  }
 0x4c3   :  { %14514 = vmatpush1.bf16.msra.mxu0 %v21314_v25  ;;  %v21368_v25 = vld [vmem:[%s29641_s3 + $0x1120] ss:$52 sps:$4 sm:$0xff]  }
 0x4c4   :  { %14555 = vmatpush1.bf16.msra.mxu1 %v21317_v6  ;;  %14515 = vmatprep.subr.bf16.mxu0 %v21322_v52 }
 0x4c5   :  { %14556 = vmatprep.subr.bf16.mxu1 %v21325_v53  ;;  %v21371_v53 = vld [vmem:[%s29641_s3 + $0x17a0] ss:$52 sps:$4 sm:$0xff]  }
 0x4c7   :  { %14516 = vmatpush1.bf16.msra.mxu0 %v21320_v7  ;;  %v21376_v7 = vld [vmem:[%s29641_s3 + $0x10bc] ss:$52 sps:$4 sm:$0xff]  }
 0x4c8   :  { %14557 = vmatpush1.bf16.msra.mxu1 %v21323_v57  ;;  %14517 = vmatprep.subr.bf16.mxu0 %v21328_v61  ;;  %v21374_v61 = vld [vmem:[%s29641_s3 + $0x10b8] ss:$52 sps:$4 sm:$0xff]  }
 0x4c9   :  { %14558 = vmatprep.subr.bf16.mxu1 %v21331_v1 }
 0x4cb   :  { %14518 = vmatpush1.bf16.msra.mxu0 %v21326_v60 }
 0x4cc   :  { %14559 = vmatpush1.bf16.msra.mxu1 %v21329_v62  ;;  %14519 = vmatprep.subr.bf16.mxu0 %v21334_v35 }
 0x4cd   :  { %14560 = vmatprep.subr.bf16.mxu1 %v21337_v47 }
 0x4cf   :  { %14520 = vmatpush1.bf16.msra.mxu0 %v21332_v5 }
 0x4d0   :  { %14561 = vmatpush1.bf16.msra.mxu1 %v21335_v51  ;;  %14521 = vmatprep.subr.bf16.mxu0 %v21340_v0 }
 0x4d1   :  { %14562 = vmatprep.subr.bf16.mxu1 %v21343_v10 }
 0x4d3   :  { %14522 = vmatpush2.bf16.msra.mxu0 %v21338_v27 }
 0x4d4   :  { %14563 = vmatpush2.bf16.msra.mxu1 %v21341_v11  ;;  %14523 = vmatprep.subr.bf16.mxu0 %v21346_v44 }
 0x4d5   :  { %14564 = vmatprep.subr.bf16.mxu1 %v21349_v20 }
 0x4d7   :  { %14524 = vmatpush2.bf16.msra.mxu0 %v21344_v15 }
 0x4d8   :  { %14565 = vmatpush2.bf16.msra.mxu1 %v21347_v22  ;;  %14525 = vmatprep.subr.bf16.mxu0 %v21352_v55 }
 0x4d9   :  { %14566 = vmatprep.subr.bf16.mxu1 %v21355_v29 }
 0x4db   :  { %14526 = vmatpush2.bf16.msra.mxu0 %v21350_v23 }
 0x4dc   :  { %14567 = vmatpush2.bf16.msra.mxu1 %v21353_v56  ;;  %14527 = vmatprep.subr.bf16.mxu0 %v21358_v45 }
 0x4dd   :  { %14568 = vmatprep.subr.bf16.mxu1 %v21361_v63 }
 0x4df   :  { %14528 = vmatpush2.bf16.msra.mxu0 %v21356_v8 }
 0x4e0   :  { %14569 = vmatpush2.bf16.msra.mxu1 %v21359_v46  ;;  %14529 = vmatprep.subr.bf16.mxu0 %v21364_v43 }
 0x4e1   :  { %14570 = vmatprep.subr.bf16.mxu1 %v21367_v48 }
 0x4e3   :  { %v14252_v6 = vpop.f32.mrf.mxu1  ;;  %14530 = vmatpush2.bf16.msra.mxu0 %v21362_v2 }
 0x4e4   :  { %v14253_v52 = vadd.f32 %v14252_v6, %v26642_v12  ;;  %14571 = vmatpush2.bf16.msra.mxu1 %v21365_v59  ;;  %14531 = vmatprep.subr.bf16.mxu0 %v21370_v50  ;;  %v21379_v12 = vld [vmem:[%s29641_s3 + $0x173c] ss:$52 sps:$4 sm:$0xff]  }
 0x4e5   :  { %v14254_v57 = vpop.f32.mrf.mxu1  ;;  %14572 = vmatprep.subr.bf16.mxu1 %v21373_v19 }
 0x4e6   :  { %v14255_v60 = vadd.f32 %v14254_v57, %v26653_v24 }
 0x4e7   :  { %v14256_v1 = vpop.f32.mrf.mxu1  ;;  %14532 = vmatpush2.bf16.msra.mxu0 %v21368_v25 }
 0x4e8   :  { %12 = vsyncpa [#allocation3], 0  ;;  %14573 = vmatpush2.bf16.msra.mxu1 %v21371_v53  ;;  %14533 = vmatprep.subr.bf16.mxu0 %v21376_v7  ;;  %v21377_v62 = vld [vmem:[%s29641_s3 + $0x1738] ss:$52 sps:$4 sm:$0xff]   ;;  %v21382_v35 = vld [vmem:[%s29641_s3 + $0x1054] ss:$52 sps:$4 sm:$0xff]  }
 0x4e9   :  { %v14257_v5 = vpop.f32.mrf.mxu1  ;;  %14574 = vmatprep.subr.bf16.mxu1 %v21379_v12  ;;  %v21385_v47 = vld [vmem:[%s29641_s3 + $0x16d4] ss:$52 sps:$4 sm:$0xff]   ;;  %v21380_v24 = vld [vmem:[%s29641_s3 + $0x1050] ss:$52 sps:$4 sm:$0xff]   ;;  %v21388_v0 = vld [vmem:[%s29641_s3 + $0x1cec] ss:$52 sps:$4 sm:$0xff]  }
 0x4ea   :  { %v21383_v51 = vld [vmem:[%s29641_s3 + $0x16d0] ss:$52 sps:$4 sm:$0xff]   ;;  %v21391_v27 = vld [vmem:[%s29641_s3 + $0x236c] ss:$52 sps:$4 sm:$0xff]   ;;  %v21386_v10 = vld [vmem:[%s29641_s3 + $0x1ce8] ss:$52 sps:$4 sm:$0xff]  }
 0x4eb   :  { %14534 = vmatpush2.bf16.msra.mxu0 %v21374_v61  ;;  %v21389_v11 = vld [vmem:[%s29641_s3 + $0x2368] ss:$52 sps:$4 sm:$0xff]   ;;  %v21394_v44 = vld [vmem:[%s29641_s3 + $0x1c84] ss:$52 sps:$4 sm:$0xff]   ;;  %v21392_v55 = vld [vmem:[%s29641_s3 + $0x1c80] ss:$52 sps:$4 sm:$0xff]  }
 0x4ec   :  { %14575 = vmatpush2.bf16.msra.mxu1 %v21377_v62  ;;  %14535 = vmatprep.subr.bf16.mxu0 %v21382_v35  ;;  %v21397_v20 = vld [vmem:[%s29641_s3 + $0x2304] ss:$52 sps:$4 sm:$0xff]   ;;  %v21395_v29 = vld [vmem:[%s29641_s3 + $0x2300] ss:$52 sps:$4 sm:$0xff]   ;;  %v21400_v56 = vld [vmem:[%s29641_s3 + $0x1c1c] ss:$52 sps:$4 sm:$0xff]  }
 0x4ed   :  { %14576 = vmatprep.subr.bf16.mxu1 %v21385_v47  ;;  %v21403_v8 = vld [vmem:[%s29641_s3 + $0x229c] ss:$52 sps:$4 sm:$0xff]   ;;  %v21398_v46 = vld [vmem:[%s29641_s3 + $0x1c18] ss:$52 sps:$4 sm:$0xff]   ;;  %v21406_v48 = vld [vmem:[%s29641_s3 + $0x1bb4] ss:$52 sps:$4 sm:$0xff]  }
 0x4ee   :  { %v21401_v2 = vld [vmem:[%s29641_s3 + $0x2298] ss:$52 sps:$4 sm:$0xff]   ;;  %v21409_v59 = vld [vmem:[%s29641_s3 + $0x2234] ss:$52 sps:$4 sm:$0xff]   ;;  %v21404_v50 = vld [vmem:[%s29641_s3 + $0x1bb0] ss:$52 sps:$4 sm:$0xff]  }
 0x4ef   :  { %14536 = vmatpush2.bf16.msra.mxu0 %v21380_v24  ;;  %v21407_v25 = vld [vmem:[%s29641_s3 + $0x2230] ss:$52 sps:$4 sm:$0xff]   ;;  %v21412_v19 = vld [vmem:[%s29641_s3 + $0x1b4c] ss:$52 sps:$4 sm:$0xff]   ;;  %v21413_v53 = vld [vmem:[%s29641_s3 + $0x21c8] ss:$52 sps:$4 sm:$0xff]  }
 0x4f0   :  { %14577 = vmatpush2.bf16.msra.mxu1 %v21383_v51  ;;  %14587 = vmatprep.subr.bf16.mxu0 %v21388_v0  ;;  %v21415_v6 = vld [vmem:[%s29641_s3 + $0x21cc] ss:$52 sps:$4 sm:$0xff]   ;;  %v21418_v7 = vld [vmem:[%s29641_s3 + $0x1ae4] ss:$52 sps:$4 sm:$0xff]   ;;  %v21427_v1 = vld [vmem:[%s29641_s3 + $0x20fc] ss:$52 sps:$4 sm:$0xff]  }
 0x4f1   :  { %14628 = vmatprep.subr.bf16.mxu1 %v21391_v27  ;;  %v21421_v57 = vld [vmem:[%s29641_s3 + $0x2164] ss:$52 sps:$4 sm:$0xff]   ;;  %v21416_v61 = vld [vmem:[%s29641_s3 + $0x1ae0] ss:$52 sps:$4 sm:$0xff]  }
 0x4f2   :  { %v14293_v15 = vpop.f32.mrf.mxu0  ;;  %14538 = vmatmul.mubr.bf16.vlgmr.msra.gmra.mxu0 %v25537_v26  ;;  %v21419_v12 = vld [vmem:[%s29641_s3 + $0x2160] ss:$52 sps:$4 sm:$0xff]   ;;  %v21422_v62 = vld [vmem:[%s29641_s3 + $0x1a78] ss:$52 sps:$4 sm:$0xff]   ;;  %v21428_v24 = vld [vmem:[%s29641_s3 + $0x1a10] ss:$52 sps:$4 sm:$0xff]  }
 0x4f3   :  { %v26838_v22 = vadd.f32 %v14293_v15, %v14253_v52  ;;  %14579 = vmatmul.mubr.bf16.vlgmr.msra.gmra.mxu1 %v25542_v13  ;;  %14588 = vmatpush1.bf16.msra.mxu0 %v21386_v10  ;;  %v21410_v52 = vld [vmem:[%s29641_s3 + $0x1b48] ss:$52 sps:$4 sm:$0xff]   ;;  %v21425_v35 = vld [vmem:[%s29641_s3 + $0x20f8] ss:$52 sps:$4 sm:$0xff]   ;;  %v21431_v51 = vld [vmem:[%s29641_s3 + $0x2090] ss:$52 sps:$4 sm:$0xff]  }
 0x4f4   :  { %14619 = vmatprep.mubr.bf16.mxu0 %v25545_v14  ;;  %14629 = vmatpush1.bf16.msra.mxu1 %v21389_v11  ;;  %v14295_v23 = vpop.f32.mrf.mxu0  ;;  %v21430_v5 = vld [vmem:[%s29641_s3 + $0x1a14] ss:$52 sps:$4 sm:$0xff]   ;;  %v21436_v0 = vld [vmem:[%s29641_s3 + $0x202c] ss:$52 sps:$4 sm:$0xff]   ;;  %v21445_v15 = vld [vmem:[%s29641_s3 + $0x2644] ss:$52 sps:$4 sm:$0xff]  }
 0x4f5   :  { %14660 = vmatprep.mubr.bf16.mxu1 %v25582_v54  ;;  %v26852_v45 = vadd.f32 %v14295_v23, %v14255_v60  ;;  %14589 = vmatprep.subr.bf16.mxu0 %v21394_v44  ;;  %v21424_v60 = vld [vmem:[%s29641_s3 + $0x1a7c] ss:$52 sps:$4 sm:$0xff]   ;;  %v21433_v47 = vld [vmem:[%s29641_s3 + $0x2094] ss:$52 sps:$4 sm:$0xff]   ;;  %v21439_v27 = vld [vmem:[%s29641_s3 + $0x26ac] ss:$52 sps:$4 sm:$0xff]  }
 0x4f6   :  { %v14297_v63 = vpop.f32.mrf.mxu0  ;;  %14630 = vmatprep.subr.bf16.mxu1 %v21397_v20  ;;  %v21434_v10 = vld [vmem:[%s29641_s3 + $0x2028] ss:$52 sps:$4 sm:$0xff]   ;;  %v21442_v44 = vld [vmem:[%s29641_s3 + $0x1fc4] ss:$52 sps:$4 sm:$0xff]   ;;  %v21440_v20 = vld [vmem:[%s29641_s3 + $0x1fc0] ss:$52 sps:$4 sm:$0xff]  }
 0x4f7   :  { %14590 = vmatpush1.bf16.msra.mxu0 %v21392_v55  ;;  %v21437_v11 = vld [vmem:[%s29641_s3 + $0x26a8] ss:$52 sps:$4 sm:$0xff]   ;;  %v21443_v55 = vld [vmem:[%s29641_s3 + $0x2640] ss:$52 sps:$4 sm:$0xff]  }
 0x4f8   :  { %14631 = vmatpush1.bf16.msra.mxu1 %v21395_v29  ;;  %v14298_v43 = vpop.f32.mrf.mxu0  ;;  %14591 = vmatprep.subr.bf16.mxu0 %v21400_v56  ;;  %v21448_v23 = vld [vmem:[%s29641_s3 + $0x1f5c] ss:$52 sps:$4 sm:$0xff]   ;;  %v21446_v56 = vld [vmem:[%s29641_s3 + $0x1f58] ss:$52 sps:$4 sm:$0xff]   ;;  %v21454_v63 = vld [vmem:[%s29641_s3 + $0x1ef4] ss:$52 sps:$4 sm:$0xff]  }
 0x4f9   :  { %14632 = vmatprep.subr.bf16.mxu1 %v21403_v8  ;;  %v21451_v29 = vld [vmem:[%s29641_s3 + $0x25dc] ss:$52 sps:$4 sm:$0xff]   ;;  %v21449_v8 = vld [vmem:[%s29641_s3 + $0x25d8] ss:$52 sps:$4 sm:$0xff]  }
 0x4fa   :  { %v21452_v43 = vld [vmem:[%s29641_s3 + $0x1ef0] ss:$52 sps:$4 sm:$0xff]  }
 0x4fb   :  { %14592 = vmatpush1.bf16.msra.mxu0 %v21398_v46  ;;  %v21457_v46 = vld [vmem:[%s29641_s3 + $0x2574] ss:$52 sps:$4 sm:$0xff]  }
 0x4fc   :  { %14633 = vmatpush1.bf16.msra.mxu1 %v21401_v2  ;;  %14593 = vmatprep.subr.bf16.mxu0 %v21406_v48  ;;  %v21455_v2 = vld [vmem:[%s29641_s3 + $0x2570] ss:$52 sps:$4 sm:$0xff]   ;;  %v21460_v48 = vld [vmem:[%s29641_s3 + $0x1e8c] ss:$52 sps:$4 sm:$0xff]  }
 0x4fd   :  { %14634 = vmatprep.subr.bf16.mxu1 %v21409_v59  ;;  %v21463_v59 = vld [vmem:[%s29641_s3 + $0x250c] ss:$52 sps:$4 sm:$0xff]  }
 0x4ff   :  { %14594 = vmatpush1.bf16.msra.mxu0 %v21404_v50  ;;  %v21458_v50 = vld [vmem:[%s29641_s3 + $0x1e88] ss:$52 sps:$4 sm:$0xff]  }
 0x500   :  { %14635 = vmatpush1.bf16.msra.mxu1 %v21407_v25  ;;  %14595 = vmatprep.subr.bf16.mxu0 %v21412_v19  ;;  %v21461_v25 = vld [vmem:[%s29641_s3 + $0x2508] ss:$52 sps:$4 sm:$0xff]   ;;  %v21466_v19 = vld [vmem:[%s29641_s3 + $0x1e24] ss:$52 sps:$4 sm:$0xff]  }
 0x501   :  { %14636 = vmatprep.subr.bf16.mxu1 %v21415_v6  ;;  %v21469_v6 = vld [vmem:[%s29641_s3 + $0x24a4] ss:$52 sps:$4 sm:$0xff]  }
 0x503   :  { %14596 = vmatpush1.bf16.msra.mxu0 %v21410_v52 }
 0x504   :  { %14637 = vmatpush1.bf16.msra.mxu1 %v21413_v53  ;;  %14597 = vmatprep.subr.bf16.mxu0 %v21418_v7  ;;  %v21464_v53 = vld [vmem:[%s29641_s3 + $0x1e20] ss:$52 sps:$4 sm:$0xff]  }
 0x505   :  { %14638 = vmatprep.subr.bf16.mxu1 %v21421_v57  ;;  %v21467_v57 = vld [vmem:[%s29641_s3 + $0x24a0] ss:$52 sps:$4 sm:$0xff]  }
 0x507   :  { %14598 = vmatpush1.bf16.msra.mxu0 %v21416_v61  ;;  %v21472_v61 = vld [vmem:[%s29641_s3 + $0x1dbc] ss:$52 sps:$4 sm:$0xff]  }
 0x508   :  { %14639 = vmatpush1.bf16.msra.mxu1 %v21419_v12  ;;  %14599 = vmatprep.subr.bf16.mxu0 %v21424_v60  ;;  %v21475_v60 = vld [vmem:[%s29641_s3 + $0x243c] ss:$52 sps:$4 sm:$0xff]  }
 0x509   :  { %14640 = vmatprep.subr.bf16.mxu1 %v21427_v1 }
 0x50b   :  { %14600 = vmatpush1.bf16.msra.mxu0 %v21422_v62 }
 0x50c   :  { %14641 = vmatpush1.bf16.msra.mxu1 %v21425_v35  ;;  %14601 = vmatprep.subr.bf16.mxu0 %v21430_v5  ;;  %v21473_v35 = vld [vmem:[%s29641_s3 + $0x2438] ss:$52 sps:$4 sm:$0xff]   ;;  %v21478_v5 = vld [vmem:[%s29641_s3 + $0x1d54] ss:$52 sps:$4 sm:$0xff]  }
 0x50d   :  { %14642 = vmatprep.subr.bf16.mxu1 %v21433_v47 }
 0x50f   :  { %14602 = vmatpush1.bf16.msra.mxu0 %v21428_v24  ;;  %v21476_v24 = vld [vmem:[%s29641_s3 + $0x1d50] ss:$52 sps:$4 sm:$0xff]  }
 0x510   :  { %14643 = vmatpush1.bf16.msra.mxu1 %v21431_v51  ;;  %14603 = vmatprep.subr.bf16.mxu0 %v21436_v0  ;;  %v21479_v51 = vld [vmem:[%s29641_s3 + $0x23d0] ss:$52 sps:$4 sm:$0xff]   ;;  %v21484_v0 = vld [vmem:[%s29641_s3 + $0x284c] ss:$52 sps:$4 sm:$0xff]  }
 0x511   :  { %14644 = vmatprep.subr.bf16.mxu1 %v21439_v27  ;;  %v21487_v27 = vld [vmem:[%s29641_s3 + $0x2f4] ss:$52 sps:$4 sm:$0xff]  }
 0x513   :  { %14604 = vmatpush2.bf16.msra.mxu0 %v21434_v10  ;;  %v21482_v10 = vld [vmem:[%s29641_s3 + $0x2848] ss:$52 sps:$4 sm:$0xff]  }
 0x514   :  { %14645 = vmatpush2.bf16.msra.mxu1 %v21437_v11  ;;  %14605 = vmatprep.subr.bf16.mxu0 %v21442_v44  ;;  %v21485_v11 = vld [vmem:[%s29641_s3 + $0x2f0] ss:$52 sps:$4 sm:$0xff]  }
 0x515   :  { %14646 = vmatprep.subr.bf16.mxu1 %v21445_v15  ;;  %v21490_v44 = vld [vmem:[%s29641_s3 + $0x27e4] ss:$52 sps:$4 sm:$0xff]   ;;  %v21493_v15 = vld [vmem:[%s29641_s3 + $0x28c] ss:$52 sps:$4 sm:$0xff]  }
 0x517   :  { %14606 = vmatpush2.bf16.msra.mxu0 %v21440_v20 }
 0x518   :  { %14647 = vmatpush2.bf16.msra.mxu1 %v21443_v55  ;;  %14607 = vmatprep.subr.bf16.mxu0 %v21448_v23 }
 0x519   :  { %14648 = vmatprep.subr.bf16.mxu1 %v21451_v29  ;;  %v21488_v29 = vld [vmem:[%s29641_s3 + $0x27e0] ss:$52 sps:$4 sm:$0xff]  }
 0x51b   :  { %14608 = vmatpush2.bf16.msra.mxu0 %v21446_v56 }
 0x51c   :  { %14649 = vmatpush2.bf16.msra.mxu1 %v21449_v8  ;;  %14609 = vmatprep.subr.bf16.mxu0 %v21454_v63  ;;  %v21491_v8 = vld [vmem:[%s29641_s3 + $0x288] ss:$52 sps:$4 sm:$0xff]  }
 0x51d   :  { %14650 = vmatprep.subr.bf16.mxu1 %v21457_v46  ;;  %v21496_v63 = vld [vmem:[%s29641_s3 + $0x277c] ss:$52 sps:$4 sm:$0xff]  }
 0x51f   :  { %14610 = vmatpush2.bf16.msra.mxu0 %v21452_v43 }
 0x520   :  { %14651 = vmatpush2.bf16.msra.mxu1 %v21455_v2  ;;  %14611 = vmatprep.subr.bf16.mxu0 %v21460_v48  ;;  %v21499_v48 = vld [vmem:[%s29641_s3 + $0x224] ss:$52 sps:$4 sm:$0xff]  }
 0x521   :  { %14652 = vmatprep.subr.bf16.mxu1 %v21463_v59 }
 0x523   :  { %v14334_v52 = vpop.f32.mrf.mxu1  ;;  %14612 = vmatpush2.bf16.msra.mxu0 %v21458_v50 }
 0x524   :  { %v14335_v7 = vadd.f32 %v14334_v52, %v26838_v22  ;;  %14653 = vmatpush2.bf16.msra.mxu1 %v21461_v25  ;;  %14613 = vmatprep.subr.bf16.mxu0 %v21466_v19  ;;  %v21470_v22 = vld [vmem:[%s29641_s3 + $0x1db8] ss:$52 sps:$4 sm:$0xff]   ;;  %v21497_v52 = vld [vmem:[%s29641_s3 + $0x220] ss:$52 sps:$4 sm:$0xff]  }
 0x525   :  { %v14336_v12 = vpop.f32.mrf.mxu1  ;;  %14654 = vmatprep.subr.bf16.mxu1 %v21469_v6  ;;  %v21494_v19 = vld [vmem:[%s29641_s3 + $0x2778] ss:$52 sps:$4 sm:$0xff]  }
 0x526   :  { %v14337_v1 = vadd.f32 %v14336_v12, %v26852_v45  ;;  %v21481_v45 = vld [vmem:[%s29641_s3 + $0x23d4] ss:$52 sps:$4 sm:$0xff]   ;;  %v21503_v12 = vld [vmem:[%s29641_s3 + $0x1b8] ss:$52 sps:$4 sm:$0xff]  }
 0x527   :  { %v14338_v62 = vpop.f32.mrf.mxu1  ;;  %14614 = vmatpush2.bf16.msra.mxu0 %v21464_v53  ;;  %v21502_v53 = vld [vmem:[%s29641_s3 + $0x2714] ss:$52 sps:$4 sm:$0xff]  }
 0x528   :  { %14655 = vmatpush2.bf16.msra.mxu1 %v21467_v57  ;;  %14615 = vmatprep.subr.bf16.mxu0 %v21472_v61  ;;  %v21505_v57 = vld [vmem:[%s29641_s3 + $0x1bc] ss:$52 sps:$4 sm:$0xff]  }
 0x529   :  { %v14339_v47 = vpop.f32.mrf.mxu1  ;;  %14656 = vmatprep.subr.bf16.mxu1 %v21475_v60  ;;  %v21500_v61 = vld [vmem:[%s29641_s3 + $0x2710] ss:$52 sps:$4 sm:$0xff]   ;;  %v21511_v60 = vld [vmem:[%s29641_s3 + $0x974] ss:$52 sps:$4 sm:$0xff]  }
 0x52a   :  { %v21509_v62 = vld [vmem:[%s29641_s3 + $0x970] ss:$52 sps:$4 sm:$0xff]   ;;  %v21515_v47 = vld [vmem:[%s29641_s3 + $0x908] ss:$52 sps:$4 sm:$0xff]  }
 0x52b   :  { %14616 = vmatpush2.bf16.msra.mxu0 %v21470_v22  ;;  %v21506_v22 = vld [vmem:[%s29641_s3 + $0x150] ss:$52 sps:$4 sm:$0xff]  }
 0x52c   :  { %14657 = vmatpush2.bf16.msra.mxu1 %v21473_v35  ;;  %14617 = vmatprep.subr.bf16.mxu0 %v21478_v5  ;;  %v21517_v35 = vld [vmem:[%s29641_s3 + $0x90c] ss:$52 sps:$4 sm:$0xff]  }
 0x52d   :  { %14658 = vmatprep.subr.bf16.mxu1 %v21481_v45  ;;  %v21514_v5 = vld [vmem:[%s29641_s3 + $0xec] ss:$52 sps:$4 sm:$0xff]   ;;  %v21512_v45 = vld [vmem:[%s29641_s3 + $0xe8] ss:$52 sps:$4 sm:$0xff]  }
 0x52f   :  { %14618 = vmatpush2.bf16.msra.mxu0 %v21476_v24  ;;  %v21523_v24 = vld [vmem:[%s29641_s3 + $0x8a4] ss:$52 sps:$4 sm:$0xff]  }
 0x530   :  { %14659 = vmatpush2.bf16.msra.mxu1 %v21479_v51  ;;  %14677 = vmatprep.subr.bf16.mxu0 %v21484_v0  ;;  %v21520_v51 = vld [vmem:[%s29641_s3 + $0x84] ss:$52 sps:$4 sm:$0xff]   ;;  %v21521_v0 = vld [vmem:[%s29641_s3 + $0x8a0] ss:$52 sps:$4 sm:$0xff]  }
 0x531   :  { %14710 = vmatprep.subr.bf16.mxu1 %v21487_v27  ;;  %v21518_v27 = vld [vmem:[%s29641_s3 + $0x80] ss:$52 sps:$4 sm:$0xff]  }
 0x532   :  { %v14375_v20 = vpop.f32.mrf.mxu0  ;;  %14620 = vmatmul.mubr.bf16.vlgmr.msra.gmra.mxu0 %v25763_v39 }
 0x533   :  { %v14376_v55 = vadd.f32 %v14375_v20, %v14335_v7  ;;  %v14416_v23 = vpop.f32.mrf.mxu1  ;;  %14661 = vmatmul.mubr.bf16.vlgmr.msra.gmra.mxu1 %v25765_v17  ;;  %14678 = vmatpush1.bf16.msra.mxu0 %v21482_v10  ;;  %v21529_v10 = vld [vmem:[%s29641_s3 + $0x83c] ss:$52 sps:$4 sm:$0xff]   ;;  %v21535_v20 = vld [vmem:[%s29641_s3 + $0x7d4] ss:$52 sps:$4 sm:$0xff]  }
 0x534   :  { %14711 = vmatpush1.bf16.msra.mxu1 %v21485_v11  ;;  %14742 = vmatprep.mubr.bf16.mxu1 %v25099_v30  ;;  %v14377_v56 = vpop.f32.mrf.mxu0  ;;  %v21526_v11 = vld [vmem:[%s29641_s3 + $0x1c] ss:$52 sps:$4 sm:$0xff]  }
 0x535   :  { %v27051_v46 = vadd.f32 %v14416_v23, %v14376_v55  ;;  %v14378_v43 = vadd.f32 %v14377_v56, %v14337_v1  ;;  %v14418_v2 = vpop.f32.mrf.mxu1  ;;  %14679 = vmatprep.subr.bf16.mxu0 %v21490_v44  ;;  %14712 = vmatprep.subr.bf16.mxu1 %v21493_v15  ;;  %v21508_v1 = vld [vmem:[%s29641_s3 + $0x154] ss:$52 sps:$4 sm:$0xff]   ;;  %v21527_v44 = vld [vmem:[%s29641_s3 + $0x838] ss:$52 sps:$4 sm:$0xff]   ;;  %v21533_v23 = vld [vmem:[%s29641_s3 + $0x7d0] ss:$52 sps:$4 sm:$0xff]  }
 0x536   :  { %v14379_v59 = vpop.f32.mrf.mxu0  ;;  %14701 = vmatprep.mubr.bf16.mxu0 %v22625_v16  ;;  %v21524_v15 = vld [vmem:[%s29641_s3 + $0x18] ss:$52 sps:$4 sm:$0xff]   ;;  %v21532_v55 = vld [vmem:[%s29641_s3 + $0x634] ss:$52 sps:$4 sm:$0xff]  }
 0x537   :  { %v27057_v50 = vadd.f32 %v14418_v2, %v14378_v43  ;;  %v14420_v25 = vpop.f32.mrf.mxu1  ;;  %14680 = vmatpush1.bf16.msra.mxu0 %v21488_v29  ;;  %v21530_v29 = vld [vmem:[%s29641_s3 + $0x630] ss:$52 sps:$4 sm:$0xff]   ;;  %v21541_v56 = vld [vmem:[%s29641_s3 + $0x76c] ss:$52 sps:$4 sm:$0xff]   ;;  %v21536_v43 = vld [vmem:[%s29641_s3 + $0x5c8] ss:$52 sps:$4 sm:$0xff]  }
 0x538   :  { %14713 = vmatpush1.bf16.msra.mxu1 %v21491_v8  ;;  %v14380_v6 = vpop.f32.mrf.mxu0  ;;  %14681 = vmatprep.subr.bf16.mxu0 %v21496_v63  ;;  %v21538_v8 = vld [vmem:[%s29641_s3 + $0x5cc] ss:$52 sps:$4 sm:$0xff]   ;;  %v21539_v63 = vld [vmem:[%s29641_s3 + $0x768] ss:$52 sps:$4 sm:$0xff]   ;;  %v21547_v2 = vld [vmem:[%s29641_s3 + $0x704] ss:$52 sps:$4 sm:$0xff]  }
 0x539   :  { %v14421_v7 = vpop.f32.mrf.mxu1  ;;  %14714 = vmatprep.subr.bf16.mxu1 %v21499_v48  ;;  %v21544_v48 = vld [vmem:[%s29641_s3 + $0x564] ss:$52 sps:$4 sm:$0xff]   ;;  %v21545_v59 = vld [vmem:[%s29641_s3 + $0x700] ss:$52 sps:$4 sm:$0xff]   ;;  %v21550_v6 = vld [vmem:[%s29641_s3 + $0x4fc] ss:$52 sps:$4 sm:$0xff]  }
 0x53a   :  { %v21542_v25 = vld [vmem:[%s29641_s3 + $0x560] ss:$52 sps:$4 sm:$0xff]  }
 0x53b   :  { %14682 = vmatpush1.bf16.msra.mxu0 %v21494_v19  ;;  %v21553_v19 = vld [vmem:[%s29641_s3 + $0x69c] ss:$52 sps:$4 sm:$0xff]   ;;  %v21559_v7 = vld [vmem:[%s29641_s3 + $0xcb4] ss:$52 sps:$4 sm:$0xff]  }
 0x53c   :  { %14715 = vmatpush1.bf16.msra.mxu1 %v21497_v52  ;;  %14683 = vmatprep.subr.bf16.mxu0 %v21502_v53  ;;  %v21551_v52 = vld [vmem:[%s29641_s3 + $0x698] ss:$52 sps:$4 sm:$0xff]  }
 0x53d   :  { %14716 = vmatprep.subr.bf16.mxu1 %v21505_v57  ;;  %v21548_v53 = vld [vmem:[%s29641_s3 + $0x4f8] ss:$52 sps:$4 sm:$0xff]   ;;  %v21556_v57 = vld [vmem:[%s29641_s3 + $0x494] ss:$52 sps:$4 sm:$0xff]  }
 0x53f   :  { %14684 = vmatpush1.bf16.msra.mxu0 %v21500_v61  ;;  %v21557_v61 = vld [vmem:[%s29641_s3 + $0xcb0] ss:$52 sps:$4 sm:$0xff]  }
 0x540   :  { %14717 = vmatpush1.bf16.msra.mxu1 %v21503_v12  ;;  %14751 = vmatprep.subr.bf16.mxu0 %v21511_v60  ;;  %v21554_v12 = vld [vmem:[%s29641_s3 + $0x490] ss:$52 sps:$4 sm:$0xff]   ;;  %v21565_v60 = vld [vmem:[%s29641_s3 + $0xc4c] ss:$52 sps:$4 sm:$0xff]  }
 0x541   :  { %14718 = vmatprep.subr.bf16.mxu1 %v21508_v1  ;;  %v21562_v1 = vld [vmem:[%s29641_s3 + $0x42c] ss:$52 sps:$4 sm:$0xff]  }
 0x542   :  { %19019 = vmatmul.mubr.msk.bf16.vlgmr.msra.gmra.mxu0 %vm13845_vm1, %v25821_v18 }
 0x543   :  { %14752 = vmatpush1.bf16.msra.mxu0 %v21509_v62  ;;  %14783 = vmatprep.mubr.bf16.mxu0 %v25101_v37  ;;  %v21563_v62 = vld [vmem:[%s29641_s3 + $0xc48] ss:$52 sps:$4 sm:$0xff]  }
 0x544   :  { %14719 = vmatpush1.bf16.msra.mxu1 %v21506_v22  ;;  %14753 = vmatprep.subr.bf16.mxu0 %v21517_v35  ;;  %v21560_v22 = vld [vmem:[%s29641_s3 + $0x428] ss:$52 sps:$4 sm:$0xff]   ;;  %v21571_v35 = vld [vmem:[%s29641_s3 + $0xbe4] ss:$52 sps:$4 sm:$0xff]  }
 0x545   :  { %14720 = vmatprep.subr.bf16.mxu1 %v21514_v5  ;;  %v21568_v5 = vld [vmem:[%s29641_s3 + $0x3c4] ss:$52 sps:$4 sm:$0xff]  }
 0x547   :  { %14754 = vmatpush1.bf16.msra.mxu0 %v21515_v47  ;;  %v21569_v47 = vld [vmem:[%s29641_s3 + $0xbe0] ss:$52 sps:$4 sm:$0xff]  }
 0x548   :  { %14721 = vmatpush1.bf16.msra.mxu1 %v21512_v45  ;;  %14755 = vmatprep.subr.bf16.mxu0 %v21523_v24  ;;  %v21566_v45 = vld [vmem:[%s29641_s3 + $0x3c0] ss:$52 sps:$4 sm:$0xff]   ;;  %v21577_v24 = vld [vmem:[%s29641_s3 + $0xb7c] ss:$52 sps:$4 sm:$0xff]  }
 0x549   :  { %14722 = vmatprep.subr.bf16.mxu1 %v21520_v51  ;;  %v21574_v51 = vld [vmem:[%s29641_s3 + $0x35c] ss:$52 sps:$4 sm:$0xff]  }
 0x54b   :  { %14756 = vmatpush1.bf16.msra.mxu0 %v21521_v0  ;;  %v21575_v0 = vld [vmem:[%s29641_s3 + $0xb78] ss:$52 sps:$4 sm:$0xff]  }
 0x54c   :  { %14723 = vmatpush1.bf16.msra.mxu1 %v21518_v27  ;;  %14757 = vmatprep.subr.bf16.mxu0 %v21529_v10  ;;  %v21572_v27 = vld [vmem:[%s29641_s3 + $0x358] ss:$52 sps:$4 sm:$0xff]   ;;  %v21580_v10 = vld [vmem:[%s29641_s3 + $0xb14] ss:$52 sps:$4 sm:$0xff]  }
 0x54d   :  { %14724 = vmatprep.subr.bf16.mxu1 %v21526_v11  ;;  %v21583_v11 = vld [vmem:[%s29641_s3 + $0xff4] ss:$52 sps:$4 sm:$0xff]  }
 0x54f   :  { %14758 = vmatpush1.bf16.msra.mxu0 %v21527_v44  ;;  %v27233_v44 = vld [vmem:[%s29642_s4] sm:$0xff] }
 0x550   :  { %14725 = vmatpush1.bf16.msra.mxu1 %v21524_v15  ;;  %14759 = vmatprep.subr.bf16.mxu0 %v21535_v20  ;;  %v7199_v15 = vrot.slane %v27233_v44, %v24243_v3  ;;  %v21578_v20 = vld [vmem:[%s29641_s3 + $0xb10] ss:$52 sps:$4 sm:$0xff]  }
 0x551   :  { %14726 = vmatprep.subr.bf16.mxu1 %v21532_v55  ;;  %v21581_v55 = vld [vmem:[%s29641_s3 + $0xff0] ss:$52 sps:$4 sm:$0xff]  }
 0x553   :  { %14760 = vmatpush1.bf16.msra.mxu0 %v21533_v23  ;;  %v7203_v23 = vrot.slane %v27233_v44, %v842_v9 }
 0x554   :  { %14727 = vmatpush2.bf16.msra.mxu1 %v21530_v29  ;;  %14761 = vmatprep.subr.bf16.mxu0 %v21541_v56  ;;  %v21586_v29 = vld [vmem:[%s29641_s3 + $0xaac] ss:$52 sps:$4 sm:$0xff]  }
 0x555   :  { %14728 = vmatprep.subr.bf16.mxu1 %v21538_v8  ;;  %v21589_v56 = vld [vmem:[%s29641_s3 + $0xf8c] ss:$52 sps:$4 sm:$0xff]  }
 0x557   :  { %14762 = vmatpush1.bf16.msra.mxu0 %v21539_v63 }
 0x558   :  { %14729 = vmatpush2.bf16.msra.mxu1 %v21536_v43  ;;  %14763 = vmatprep.subr.bf16.mxu0 %v21547_v2  ;;  %v21584_v2 = vld [vmem:[%s29641_s3 + $0xaa8] ss:$52 sps:$4 sm:$0xff]  }
 0x559   :  { %14730 = vmatprep.subr.bf16.mxu1 %v21544_v48  ;;  %v21587_v48 = vld [vmem:[%s29641_s3 + $0xf88] ss:$52 sps:$4 sm:$0xff]  }
 0x55b   :  { %14764 = vmatpush1.bf16.msra.mxu0 %v21545_v59  ;;  %v21592_v59 = vld [vmem:[%s29641_s3 + $0xa44] ss:$52 sps:$4 sm:$0xff]  }
 0x55c   :  { %14731 = vmatpush2.bf16.msra.mxu1 %v21542_v25  ;;  %14765 = vmatprep.subr.bf16.mxu0 %v21553_v19 }
 0x55d   :  { %14732 = vmatprep.subr.bf16.mxu1 %v21550_v6 }
 0x55f   :  { %14766 = vmatpush1.bf16.msra.mxu0 %v21551_v52  ;;  %v21595_v52 = vld [vmem:[%s29641_s3 + $0xf24] ss:$52 sps:$4 sm:$0xff]  }
 0x560   :  { %14733 = vmatpush2.bf16.msra.mxu1 %v21548_v53  ;;  %14767 = vmatprep.subr.bf16.mxu0 %v21559_v7 }
 0x561   :  { %14734 = vmatprep.subr.bf16.mxu1 %v21556_v57 }
 0x563   :  { %14768 = vmatpush2.bf16.msra.mxu0 %v21557_v61  ;;  %v21590_v61 = vld [vmem:[%s29641_s3 + $0xa40] ss:$52 sps:$4 sm:$0xff]  }
 0x564   :  { %14735 = vmatpush2.bf16.msra.mxu1 %v21554_v12  ;;  %14769 = vmatprep.subr.bf16.mxu0 %v21565_v60  ;;  %v21593_v60 = vld [vmem:[%s29641_s3 + $0xf20] ss:$52 sps:$4 sm:$0xff]  }
 0x565   :  { %14736 = vmatprep.subr.bf16.mxu1 %v21562_v1  ;;  %v21598_v1 = vld [vmem:[%s29641_s3 + $0x9dc] ss:$52 sps:$4 sm:$0xff]  }
 0x567   :  { %14770 = vmatpush2.bf16.msra.mxu0 %v21563_v62 }
 0x568   :  { %14737 = vmatpush2.bf16.msra.mxu1 %v21560_v22  ;;  %14771 = vmatprep.subr.bf16.mxu0 %v21571_v35  ;;  %v21601_v22 = vld [vmem:[%s29641_s3 + $0xebc] ss:$52 sps:$4 sm:$0xff]   ;;  %v21596_v35 = vld [vmem:[%s29641_s3 + $0x9d8] ss:$52 sps:$4 sm:$0xff]  }
 0x569   :  { %14738 = vmatprep.subr.bf16.mxu1 %v21568_v5  ;;  %v21599_v5 = vld [vmem:[%s29641_s3 + $0xeb8] ss:$52 sps:$4 sm:$0xff]  }
 0x56b   :  { %14772 = vmatpush2.bf16.msra.mxu0 %v21569_v47  ;;  %v21607_v47 = vld [vmem:[%s29641_s3 + $0x1674] ss:$52 sps:$4 sm:$0xff]  }
 0x56c   :  { %14739 = vmatpush2.bf16.msra.mxu1 %v21566_v45  ;;  %14773 = vmatprep.subr.bf16.mxu0 %v21577_v24  ;;  %v21604_v45 = vld [vmem:[%s29641_s3 + $0xe54] ss:$52 sps:$4 sm:$0xff]   ;;  %v21605_v24 = vld [vmem:[%s29641_s3 + $0x1670] ss:$52 sps:$4 sm:$0xff]  }
 0x56d   :  { %14740 = vmatprep.subr.bf16.mxu1 %v21574_v51  ;;  %v21602_v51 = vld [vmem:[%s29641_s3 + $0xe50] ss:$52 sps:$4 sm:$0xff]  }
 0x56f   :  { %14774 = vmatpush2.bf16.msra.mxu0 %v21575_v0  ;;  %v21613_v0 = vld [vmem:[%s29641_s3 + $0x160c] ss:$52 sps:$4 sm:$0xff]  }
 0x570   :  { %14741 = vmatpush2.bf16.msra.mxu1 %v21572_v27  ;;  %14775 = vmatprep.subr.bf16.mxu0 %v21580_v10  ;;  %v21610_v27 = vld [vmem:[%s29641_s3 + $0xdec] ss:$52 sps:$4 sm:$0xff]   ;;  %v21611_v10 = vld [vmem:[%s29641_s3 + $0x1608] ss:$52 sps:$4 sm:$0xff]  }
 0x571   :  { %14792 = vmatprep.subr.bf16.mxu1 %v21583_v11  ;;  %v21608_v11 = vld [vmem:[%s29641_s3 + $0xde8] ss:$52 sps:$4 sm:$0xff]  }
 0x572   :  { %v14457_v8 = vpop.f32.mrf.mxu0 }
 0x573   :  { %v14458_v63 = vadd.f32 %v14457_v8, %v7199_v15  ;;  %v14498_v43 = vpop.f32.mrf.mxu1  ;;  %14743 = vmatmul.mubr.bf16.vlgmr.msra.gmra.mxu1 %v25312_v36  ;;  %14776 = vmatpush2.bf16.msra.mxu0 %v21578_v20  ;;  %v21619_v15 = vld [vmem:[%s29641_s3 + $0x15a4] ss:$52 sps:$4 sm:$0xff]  }
 0x574   :  { %14793 = vmatpush1.bf16.msra.mxu1 %v21581_v55  ;;  %14824 = vmatprep.mubr.bf16.mxu1 %v25319_v21  ;;  %v14459_v9 = vpop.f32.mrf.mxu0  ;;  %v21616_v20 = vld [vmem:[%s29641_s3 + $0xd84] ss:$52 sps:$4 sm:$0xff]   ;;  %v21617_v55 = vld [vmem:[%s29641_s3 + $0x15a0] ss:$52 sps:$4 sm:$0xff]  }
 0x575   :  { %v27263_v25 = vadd.f32 %v14498_v43, %v14458_v63  ;;  %v14460_v19 = vadd.f32 %v14459_v9, %v7203_v23  ;;  %v14500_v6 = vpop.f32.mrf.mxu1  ;;  %14777 = vmatprep.subr.bf16.mxu0 %v21586_v29  ;;  %14794 = vmatprep.subr.bf16.mxu1 %v21589_v56  ;;  %v21614_v23 = vld [vmem:[%s29641_s3 + $0xd80] ss:$52 sps:$4 sm:$0xff]   ;;  %v21625_v29 = vld [vmem:[%s29641_s3 + $0x153c] ss:$52 sps:$4 sm:$0xff]   ;;  %v21623_v8 = vld [vmem:[%s29641_s3 + $0x1538] ss:$52 sps:$4 sm:$0xff]  }
 0x576   :  { %v14461_v53 = vpop.f32.mrf.mxu0  ;;  %v21622_v56 = vld [vmem:[%s29641_s3 + $0xd1c] ss:$52 sps:$4 sm:$0xff]   ;;  %v21620_v63 = vld [vmem:[%s29641_s3 + $0xd18] ss:$52 sps:$4 sm:$0xff]   ;;  %v21631_v43 = vld [vmem:[%s29641_s3 + $0x14d4] ss:$52 sps:$4 sm:$0xff]  }
 0x577   :  { %v27268_v7 = vadd.f32 %v14500_v6, %v14460_v19  ;;  %v14502_v57 = vpop.f32.mrf.mxu1  ;;  %14778 = vmatpush2.bf16.msra.mxu0 %v21584_v2  ;;  %v21628_v2 = vld [vmem:[%s29641_s3 + $0x1334] ss:$52 sps:$4 sm:$0xff]   ;;  %v21629_v9 = vld [vmem:[%s29641_s3 + $0x14d0] ss:$52 sps:$4 sm:$0xff]   ;;  %v21634_v19 = vld [vmem:[%s29641_s3 + $0x12cc] ss:$52 sps:$4 sm:$0xff]  }
 0x578   :  { %14795 = vmatpush1.bf16.msra.mxu1 %v21587_v48  ;;  %v14462_v12 = vpop.f32.mrf.mxu0  ;;  %14779 = vmatprep.subr.bf16.mxu0 %v21592_v59  ;;  %v21626_v48 = vld [vmem:[%s29641_s3 + $0x1330] ss:$52 sps:$4 sm:$0xff]   ;;  %v21637_v59 = vld [vmem:[%s29641_s3 + $0x146c] ss:$52 sps:$4 sm:$0xff]   ;;  %v21635_v6 = vld [vmem:[%s29641_s3 + $0x1468] ss:$52 sps:$4 sm:$0xff]  }
 0x579   :  { %v14503_v62 = vpop.f32.mrf.mxu1  ;;  %14796 = vmatprep.subr.bf16.mxu1 %v21595_v52  ;;  %v21632_v52 = vld [vmem:[%s29641_s3 + $0x12c8] ss:$52 sps:$4 sm:$0xff]   ;;  %v21643_v53 = vld [vmem:[%s29641_s3 + $0x1404] ss:$52 sps:$4 sm:$0xff]   ;;  %v21638_v12 = vld [vmem:[%s29641_s3 + $0x1260] ss:$52 sps:$4 sm:$0xff]  }
 0x57a   :  { %v21640_v57 = vld [vmem:[%s29641_s3 + $0x1264] ss:$52 sps:$4 sm:$0xff]  }
 0x57b   :  { %14780 = vmatpush2.bf16.msra.mxu0 %v21590_v61  ;;  %v21641_v61 = vld [vmem:[%s29641_s3 + $0x1400] ss:$52 sps:$4 sm:$0xff]   ;;  %v21647_v62 = vld [vmem:[%s29641_s3 + $0x1398] ss:$52 sps:$4 sm:$0xff]  }
 0x57c   :  { %14797 = vmatpush1.bf16.msra.mxu1 %v21593_v60  ;;  %14781 = vmatprep.subr.bf16.mxu0 %v21598_v1  ;;  %v21649_v60 = vld [vmem:[%s29641_s3 + $0x139c] ss:$52 sps:$4 sm:$0xff]  }
 0x57d   :  { %14798 = vmatprep.subr.bf16.mxu1 %v21601_v22  ;;  %v21646_v1 = vld [vmem:[%s29641_s3 + $0x11fc] ss:$52 sps:$4 sm:$0xff]   ;;  %v21644_v22 = vld [vmem:[%s29641_s3 + $0x11f8] ss:$52 sps:$4 sm:$0xff]  }
 0x57f   :  { %14782 = vmatpush2.bf16.msra.mxu0 %v21596_v35  ;;  %v21655_v35 = vld [vmem:[%s29641_s3 + $0x19b4] ss:$52 sps:$4 sm:$0xff]  }
 0x580   :  { %14799 = vmatpush1.bf16.msra.mxu1 %v21599_v5  ;;  %14833 = vmatprep.subr.bf16.mxu0 %v21607_v47  ;;  %v21652_v5 = vld [vmem:[%s29641_s3 + $0x1194] ss:$52 sps:$4 sm:$0xff]   ;;  %v21653_v47 = vld [vmem:[%s29641_s3 + $0x19b0] ss:$52 sps:$4 sm:$0xff]  }
 0x581   :  { %14800 = vmatprep.subr.bf16.mxu1 %v21604_v45  ;;  %v21650_v45 = vld [vmem:[%s29641_s3 + $0x1190] ss:$52 sps:$4 sm:$0xff]  }
 0x582   :  { %14784 = vmatmul.mubr.bf16.vlgmr.msra.gmra.mxu0 %v25314_v49 }
 0x583   :  { %14834 = vmatpush1.bf16.msra.mxu0 %v21605_v24  ;;  %14865 = vmatprep.mubr.bf16.mxu0 %v25330_v40  ;;  %v21661_v24 = vld [vmem:[%s29641_s3 + $0x194c] ss:$52 sps:$4 sm:$0xff]  }
 0x584   :  { %14801 = vmatpush1.bf16.msra.mxu1 %v21602_v51  ;;  %14835 = vmatprep.subr.bf16.mxu0 %v21613_v0  ;;  %v21658_v51 = vld [vmem:[%s29641_s3 + $0x112c] ss:$52 sps:$4 sm:$0xff]   ;;  %v21659_v0 = vld [vmem:[%s29641_s3 + $0x1948] ss:$52 sps:$4 sm:$0xff]  }
 0x585   :  { %14802 = vmatprep.subr.bf16.mxu1 %v21610_v27  ;;  %v21656_v27 = vld [vmem:[%s29641_s3 + $0x1128] ss:$52 sps:$4 sm:$0xff]  }
 0x587   :  { %14836 = vmatpush1.bf16.msra.mxu0 %v21611_v10  ;;  %v21667_v10 = vld [vmem:[%s29641_s3 + $0x18e4] ss:$52 sps:$4 sm:$0xff]  }
 0x588   :  { %14803 = vmatpush1.bf16.msra.mxu1 %v21608_v11  ;;  %14837 = vmatprep.subr.bf16.mxu0 %v21619_v15  ;;  %v21664_v11 = vld [vmem:[%s29641_s3 + $0x10c4] ss:$52 sps:$4 sm:$0xff]   ;;  %v21665_v15 = vld [vmem:[%s29641_s3 + $0x18e0] ss:$52 sps:$4 sm:$0xff]  }
 0x589   :  { %14804 = vmatprep.subr.bf16.mxu1 %v21616_v20  ;;  %v21662_v20 = vld [vmem:[%s29641_s3 + $0x10c0] ss:$52 sps:$4 sm:$0xff]  }
 0x58b   :  { %14838 = vmatpush1.bf16.msra.mxu0 %v21617_v55  ;;  %v21673_v55 = vld [vmem:[%s29641_s3 + $0x187c] ss:$52 sps:$4 sm:$0xff]  }
 0x58c   :  { %14805 = vmatpush1.bf16.msra.mxu1 %v21614_v23  ;;  %14839 = vmatprep.subr.bf16.mxu0 %v21625_v29  ;;  %v21670_v23 = vld [vmem:[%s29641_s3 + $0x105c] ss:$52 sps:$4 sm:$0xff]   ;;  %v21671_v29 = vld [vmem:[%s29641_s3 + $0x1878] ss:$52 sps:$4 sm:$0xff]  }
 0x58d   :  { %14806 = vmatprep.subr.bf16.mxu1 %v21622_v56  ;;  %v21668_v56 = vld [vmem:[%s29641_s3 + $0x1058] ss:$52 sps:$4 sm:$0xff]  }
 0x58f   :  { %14840 = vmatpush1.bf16.msra.mxu0 %v21623_v8  ;;  %v21676_v8 = vld [vmem:[%s29641_s3 + $0x1814] ss:$52 sps:$4 sm:$0xff]  }
 0x590   :  { %14807 = vmatpush1.bf16.msra.mxu1 %v21620_v63  ;;  %14841 = vmatprep.subr.bf16.mxu0 %v21631_v43  ;;  %v21679_v63 = vld [vmem:[%s29641_s3 + $0x1cf4] ss:$52 sps:$4 sm:$0xff]   ;;  %v21674_v43 = vld [vmem:[%s29641_s3 + $0x1810] ss:$52 sps:$4 sm:$0xff]  }
 0x591   :  { %14808 = vmatprep.subr.bf16.mxu1 %v21628_v2  ;;  %v21677_v2 = vld [vmem:[%s29641_s3 + $0x1cf0] ss:$52 sps:$4 sm:$0xff]  }
 0x593   :  { %14842 = vmatpush1.bf16.msra.mxu0 %v21629_v9  ;;  %v21682_v9 = vld [vmem:[%s29641_s3 + $0x17ac] ss:$52 sps:$4 sm:$0xff]  }
 0x594   :  { %14809 = vmatpush2.bf16.msra.mxu1 %v21626_v48  ;;  %14843 = vmatprep.subr.bf16.mxu0 %v21637_v59  ;;  %v21685_v48 = vld [vmem:[%s29641_s3 + $0x1c8c] ss:$52 sps:$4 sm:$0xff]  }
 0x595   :  { %14810 = vmatprep.subr.bf16.mxu1 %v21634_v19 }
 0x597   :  { %14844 = vmatpush1.bf16.msra.mxu0 %v21635_v6 }
 0x598   :  { %14811 = vmatpush2.bf16.msra.mxu1 %v21632_v52  ;;  %14845 = vmatprep.subr.bf16.mxu0 %v21643_v53  ;;  %v21680_v52 = vld [vmem:[%s29641_s3 + $0x17a8] ss:$52 sps:$4 sm:$0xff]  }
 0x599   :  { %14812 = vmatprep.subr.bf16.mxu1 %v21640_v57  ;;  %v21683_v57 = vld [vmem:[%s29641_s3 + $0x1c88] ss:$52 sps:$4 sm:$0xff]  }
 0x59b   :  { %14846 = vmatpush1.bf16.msra.mxu0 %v21641_v61 }
 0x59c   :  { %14813 = vmatpush2.bf16.msra.mxu1 %v21638_v12  ;;  %14847 = vmatprep.subr.bf16.mxu0 %v21649_v60 }
 0x59d   :  { %14814 = vmatprep.subr.bf16.mxu1 %v21646_v1  ;;  %v21691_v1 = vld [vmem:[%s29641_s3 + $0x1c24] ss:$52 sps:$4 sm:$0xff]  }
 0x59f   :  { %14848 = vmatpush1.bf16.msra.mxu0 %v21647_v62 }
 0x5a0   :  { %14815 = vmatpush2.bf16.msra.mxu1 %v21644_v22  ;;  %14849 = vmatprep.subr.bf16.mxu0 %v21655_v35 }
 0x5a1   :  { %14816 = vmatprep.subr.bf16.mxu1 %v21652_v5  ;;  %v21686_v5 = vld [vmem:[%s29641_s3 + $0x1740] ss:$52 sps:$4 sm:$0xff]  }
 0x5a3   :  { %14850 = vmatpush2.bf16.msra.mxu0 %v21653_v47 }
 0x5a4   :  { %14817 = vmatpush2.bf16.msra.mxu1 %v21650_v45  ;;  %14851 = vmatprep.subr.bf16.mxu0 %v21661_v24  ;;  %v21694_v45 = vld [vmem:[%s29641_s3 + $0x16dc] ss:$52 sps:$4 sm:$0xff]  }
 0x5a5   :  { %14818 = vmatprep.subr.bf16.mxu1 %v21658_v51  ;;  %v21697_v51 = vld [vmem:[%s29641_s3 + $0x1bbc] ss:$52 sps:$4 sm:$0xff]  }
 0x5a7   :  { %14852 = vmatpush2.bf16.msra.mxu0 %v21659_v0  ;;  %v21692_v0 = vld [vmem:[%s29641_s3 + $0x16d8] ss:$52 sps:$4 sm:$0xff]  }
 0x5a8   :  { %14819 = vmatpush2.bf16.msra.mxu1 %v21656_v27  ;;  %14853 = vmatprep.subr.bf16.mxu0 %v21667_v10  ;;  %v21695_v27 = vld [vmem:[%s29641_s3 + $0x1bb8] ss:$52 sps:$4 sm:$0xff]   ;;  %v21703_v10 = vld [vmem:[%s29641_s3 + $0x2374] ss:$52 sps:$4 sm:$0xff]  }
 0x5a9   :  { %14820 = vmatprep.subr.bf16.mxu1 %v21664_v11  ;;  %v21700_v11 = vld [vmem:[%s29641_s3 + $0x1b54] ss:$52 sps:$4 sm:$0xff]  }
 0x5ab   :  { %14854 = vmatpush2.bf16.msra.mxu0 %v21665_v15  ;;  %v21701_v15 = vld [vmem:[%s29641_s3 + $0x2370] ss:$52 sps:$4 sm:$0xff]  }
 0x5ac   :  { %14821 = vmatpush2.bf16.msra.mxu1 %v21662_v20  ;;  %14855 = vmatprep.subr.bf16.mxu0 %v21673_v55  ;;  %v21698_v20 = vld [vmem:[%s29641_s3 + $0x1b50] ss:$52 sps:$4 sm:$0xff]   ;;  %v21709_v55 = vld [vmem:[%s29641_s3 + $0x230c] ss:$52 sps:$4 sm:$0xff]  }
 0x5ad   :  { %14822 = vmatprep.subr.bf16.mxu1 %v21670_v23  ;;  %v21706_v23 = vld [vmem:[%s29641_s3 + $0x1aec] ss:$52 sps:$4 sm:$0xff]  }
 0x5af   :  { %14856 = vmatpush2.bf16.msra.mxu0 %v21671_v29  ;;  %v21707_v29 = vld [vmem:[%s29641_s3 + $0x2308] ss:$52 sps:$4 sm:$0xff]  }
 0x5b0   :  { %14823 = vmatpush2.bf16.msra.mxu1 %v21668_v56  ;;  %14857 = vmatprep.subr.bf16.mxu0 %v21676_v8  ;;  %v21704_v56 = vld [vmem:[%s29641_s3 + $0x1ae8] ss:$52 sps:$4 sm:$0xff]   ;;  %v21715_v8 = vld [vmem:[%s29641_s3 + $0x22a4] ss:$52 sps:$4 sm:$0xff]  }
 0x5b1   :  { %14874 = vmatprep.subr.bf16.mxu1 %v21679_v63  ;;  %v21712_v63 = vld [vmem:[%s29641_s3 + $0x1a84] ss:$52 sps:$4 sm:$0xff]  }
 0x5b2   :  { %v14539_v59 = vpop.f32.mrf.mxu0 }
 0x5b3   :  { %v14540_v19 = vadd.f32 %v14539_v59, %v27263_v25  ;;  %v14580_v6 = vpop.f32.mrf.mxu1  ;;  %14825 = vmatmul.mubr.bf16.vlgmr.msra.gmra.mxu1 %v25537_v26  ;;  %14858 = vmatpush2.bf16.msra.mxu0 %v21674_v43  ;;  %v21688_v25 = vld [vmem:[%s29641_s3 + $0x1744] ss:$52 sps:$4 sm:$0xff]   ;;  %v21713_v43 = vld [vmem:[%s29641_s3 + $0x22a0] ss:$52 sps:$4 sm:$0xff]  }
 0x5b4   :  { %14875 = vmatpush1.bf16.msra.mxu1 %v21677_v2  ;;  %14906 = vmatprep.mubr.bf16.mxu1 %v25545_v14  ;;  %v14541_v53 = vpop.f32.mrf.mxu0  ;;  %v21710_v2 = vld [vmem:[%s29641_s3 + $0x1a80] ss:$52 sps:$4 sm:$0xff]   ;;  %v21719_v59 = vld [vmem:[%s29641_s3 + $0x2238] ss:$52 sps:$4 sm:$0xff]  }
 0x5b5   :  { %v27464_v61 = vadd.f32 %v14580_v6, %v14540_v19  ;;  %v14542_v12 = vadd.f32 %v14541_v53, %v27268_v7  ;;  %v14582_v60 = vpop.f32.mrf.mxu1  ;;  %14859 = vmatprep.subr.bf16.mxu0 %v21682_v9  ;;  %14876 = vmatprep.subr.bf16.mxu1 %v21685_v48  ;;  %v21689_v7 = vld [vmem:[%s29641_s3 + $0x1c20] ss:$52 sps:$4 sm:$0xff]   ;;  %v21721_v9 = vld [vmem:[%s29641_s3 + $0x223c] ss:$52 sps:$4 sm:$0xff]   ;;  %v21716_v19 = vld [vmem:[%s29641_s3 + $0x1a18] ss:$52 sps:$4 sm:$0xff]  }
 0x5b6   :  { %v14543_v62 = vpop.f32.mrf.mxu0  ;;  %v21718_v48 = vld [vmem:[%s29641_s3 + $0x1a1c] ss:$52 sps:$4 sm:$0xff]   ;;  %v21727_v6 = vld [vmem:[%s29641_s3 + $0x21d4] ss:$52 sps:$4 sm:$0xff]  }
 0x5b7   :  { %v27470_v22 = vadd.f32 %v14582_v60, %v14542_v12  ;;  %v14584_v35 = vpop.f32.mrf.mxu1  ;;  %14860 = vmatpush2.bf16.msra.mxu0 %v21680_v52  ;;  %v21724_v52 = vld [vmem:[%s29641_s3 + $0x2034] ss:$52 sps:$4 sm:$0xff]   ;;  %v21725_v53 = vld [vmem:[%s29641_s3 + $0x21d0] ss:$52 sps:$4 sm:$0xff]   ;;  %v21730_v12 = vld [vmem:[%s29641_s3 + $0x1fcc] ss:$52 sps:$4 sm:$0xff]  }
 0x5b8   :  { %14877 = vmatpush1.bf16.msra.mxu1 %v21683_v57  ;;  %v14544_v47 = vpop.f32.mrf.mxu0  ;;  %14861 = vmatprep.subr.bf16.mxu0 %v21688_v25  ;;  %v21722_v57 = vld [vmem:[%s29641_s3 + $0x2030] ss:$52 sps:$4 sm:$0xff]   ;;  %v21733_v25 = vld [vmem:[%s29641_s3 + $0x216c] ss:$52 sps:$4 sm:$0xff]   ;;  %v21731_v60 = vld [vmem:[%s29641_s3 + $0x2168] ss:$52 sps:$4 sm:$0xff]  }
 0x5b9   :  { %v14585_v24 = vpop.f32.mrf.mxu1  ;;  %14878 = vmatprep.subr.bf16.mxu1 %v21691_v1  ;;  %v21728_v1 = vld [vmem:[%s29641_s3 + $0x1fc8] ss:$52 sps:$4 sm:$0xff]   ;;  %v21739_v62 = vld [vmem:[%s29641_s3 + $0x2104] ss:$52 sps:$4 sm:$0xff]   ;;  %v21734_v47 = vld [vmem:[%s29641_s3 + $0x1f60] ss:$52 sps:$4 sm:$0xff]  }
 0x5ba   :  { %v21736_v35 = vld [vmem:[%s29641_s3 + $0x1f64] ss:$52 sps:$4 sm:$0xff]  }
 0x5bb   :  { %14862 = vmatpush2.bf16.msra.mxu0 %v21686_v5  ;;  %v21737_v5 = vld [vmem:[%s29641_s3 + $0x2100] ss:$52 sps:$4 sm:$0xff]   ;;  %v21743_v24 = vld [vmem:[%s29641_s3 + $0x2098] ss:$52 sps:$4 sm:$0xff]  }
 0x5bc   :  { %14879 = vmatpush1.bf16.msra.mxu1 %v21689_v7  ;;  %14863 = vmatprep.subr.bf16.mxu0 %v21694_v45  ;;  %v21745_v7 = vld [vmem:[%s29641_s3 + $0x209c] ss:$52 sps:$4 sm:$0xff]  }
 0x5bd   :  { %14880 = vmatprep.subr.bf16.mxu1 %v21697_v51  ;;  %v21742_v45 = vld [vmem:[%s29641_s3 + $0x1efc] ss:$52 sps:$4 sm:$0xff]   ;;  %v21740_v51 = vld [vmem:[%s29641_s3 + $0x1ef8] ss:$52 sps:$4 sm:$0xff]  }
 0x5bf   :  { %14864 = vmatpush2.bf16.msra.mxu0 %v21692_v0  ;;  %v21751_v0 = vld [vmem:[%s29641_s3 + $0x26b4] ss:$52 sps:$4 sm:$0xff]  }
 0x5c0   :  { %14881 = vmatpush1.bf16.msra.mxu1 %v21695_v27  ;;  %14915 = vmatprep.subr.bf16.mxu0 %v21703_v10  ;;  %v21748_v27 = vld [vmem:[%s29641_s3 + $0x1e94] ss:$52 sps:$4 sm:$0xff]   ;;  %v21749_v10 = vld [vmem:[%s29641_s3 + $0x26b0] ss:$52 sps:$4 sm:$0xff]  }
 0x5c1   :  { %14882 = vmatprep.subr.bf16.mxu1 %v21700_v11  ;;  %v21746_v11 = vld [vmem:[%s29641_s3 + $0x1e90] ss:$52 sps:$4 sm:$0xff]  }
 0x5c2   :  { %14866 = vmatmul.mubr.bf16.vlgmr.msra.gmra.mxu0 %v25542_v13 }
 0x5c3   :  { %14916 = vmatpush1.bf16.msra.mxu0 %v21701_v15  ;;  %14947 = vmatprep.mubr.bf16.mxu0 %v25582_v54  ;;  %v21757_v15 = vld [vmem:[%s29641_s3 + $0x264c] ss:$52 sps:$4 sm:$0xff]  }
 0x5c4   :  { %14883 = vmatpush1.bf16.msra.mxu1 %v21698_v20  ;;  %14917 = vmatprep.subr.bf16.mxu0 %v21709_v55  ;;  %v21754_v20 = vld [vmem:[%s29641_s3 + $0x1e2c] ss:$52 sps:$4 sm:$0xff]   ;;  %v21755_v55 = vld [vmem:[%s29641_s3 + $0x2648] ss:$52 sps:$4 sm:$0xff]  }
 0x5c5   :  { %14884 = vmatprep.subr.bf16.mxu1 %v21706_v23  ;;  %v21752_v23 = vld [vmem:[%s29641_s3 + $0x1e28] ss:$52 sps:$4 sm:$0xff]  }
 0x5c7   :  { %14918 = vmatpush1.bf16.msra.mxu0 %v21707_v29  ;;  %v21763_v29 = vld [vmem:[%s29641_s3 + $0x25e4] ss:$52 sps:$4 sm:$0xff]  }
 0x5c8   :  { %14885 = vmatpush1.bf16.msra.mxu1 %v21704_v56  ;;  %14919 = vmatprep.subr.bf16.mxu0 %v21715_v8  ;;  %v21760_v56 = vld [vmem:[%s29641_s3 + $0x1dc4] ss:$52 sps:$4 sm:$0xff]   ;;  %v21761_v8 = vld [vmem:[%s29641_s3 + $0x25e0] ss:$52 sps:$4 sm:$0xff]  }
 0x5c9   :  { %14886 = vmatprep.subr.bf16.mxu1 %v21712_v63  ;;  %v21758_v63 = vld [vmem:[%s29641_s3 + $0x1dc0] ss:$52 sps:$4 sm:$0xff]  }
 0x5cb   :  { %14920 = vmatpush1.bf16.msra.mxu0 %v21713_v43  ;;  %v21769_v43 = vld [vmem:[%s29641_s3 + $0x257c] ss:$52 sps:$4 sm:$0xff]  }
 0x5cc   :  { %14887 = vmatpush1.bf16.msra.mxu1 %v21710_v2  ;;  %14921 = vmatprep.subr.bf16.mxu0 %v21721_v9  ;;  %v21766_v2 = vld [vmem:[%s29641_s3 + $0x1d5c] ss:$52 sps:$4 sm:$0xff]   ;;  %v21767_v9 = vld [vmem:[%s29641_s3 + $0x2578] ss:$52 sps:$4 sm:$0xff]  }
 0x5cd   :  { %14888 = vmatprep.subr.bf16.mxu1 %v21718_v48  ;;  %v21764_v48 = vld [vmem:[%s29641_s3 + $0x1d58] ss:$52 sps:$4 sm:$0xff]  }
 0x5cf   :  { %14922 = vmatpush1.bf16.msra.mxu0 %v21719_v59  ;;  %v21772_v59 = vld [vmem:[%s29641_s3 + $0x2514] ss:$52 sps:$4 sm:$0xff]  }
 0x5d0   :  { %14889 = vmatpush1.bf16.msra.mxu1 %v21716_v19  ;;  %14923 = vmatprep.subr.bf16.mxu0 %v21727_v6  ;;  %v21775_v19 = vld [vmem:[%s29641_s3 + $0x2854] ss:$52 sps:$4 sm:$0xff]   ;;  %v21770_v6 = vld [vmem:[%s29641_s3 + $0x2510] ss:$52 sps:$4 sm:$0xff]  }
 0x5d1   :  { %14890 = vmatprep.subr.bf16.mxu1 %v21724_v52  ;;  %v21773_v52 = vld [vmem:[%s29641_s3 + $0x2850] ss:$52 sps:$4 sm:$0xff]  }
 0x5d3   :  { %14924 = vmatpush1.bf16.msra.mxu0 %v21725_v53  ;;  %v21778_v53 = vld [vmem:[%s29641_s3 + $0x24ac] ss:$52 sps:$4 sm:$0xff]  }
 0x5d4   :  { %14891 = vmatpush2.bf16.msra.mxu1 %v21722_v57  ;;  %14925 = vmatprep.subr.bf16.mxu0 %v21733_v25  ;;  %v21781_v57 = vld [vmem:[%s29641_s3 + $0x27ec] ss:$52 sps:$4 sm:$0xff]  }
 0x5d5   :  { %14892 = vmatprep.subr.bf16.mxu1 %v21730_v12 }
 0x5d7   :  { %14926 = vmatpush1.bf16.msra.mxu0 %v21731_v60 }
 0x5d8   :  { %14893 = vmatpush2.bf16.msra.mxu1 %v21728_v1  ;;  %14927 = vmatprep.subr.bf16.mxu0 %v21739_v62  ;;  %v21776_v1 = vld [vmem:[%s29641_s3 + $0x24a8] ss:$52 sps:$4 sm:$0xff]  }
 0x5d9   :  { %14894 = vmatprep.subr.bf16.mxu1 %v21736_v35  ;;  %v21779_v35 = vld [vmem:[%s29641_s3 + $0x27e8] ss:$52 sps:$4 sm:$0xff]  }
 0x5db   :  { %14928 = vmatpush1.bf16.msra.mxu0 %v21737_v5  ;;  %v21784_v5 = vld [vmem:[%s29641_s3 + $0x2444] ss:$52 sps:$4 sm:$0xff]  }
 0x5dc   :  { %14895 = vmatpush2.bf16.msra.mxu1 %v21734_v47  ;;  %14929 = vmatprep.subr.bf16.mxu0 %v21745_v7 }
 0x5dd   :  { %14896 = vmatprep.subr.bf16.mxu1 %v21742_v45  ;;  %v21787_v45 = vld [vmem:[%s29641_s3 + $0x2784] ss:$52 sps:$4 sm:$0xff]  }
 0x5df   :  { %14930 = vmatpush1.bf16.msra.mxu0 %v21743_v24 }
 0x5e0   :  { %14897 = vmatpush2.bf16.msra.mxu1 %v21740_v51  ;;  %14931 = vmatprep.subr.bf16.mxu0 %v21751_v0 }
 0x5e1   :  { %14898 = vmatprep.subr.bf16.mxu1 %v21748_v27  ;;  %v21782_v27 = vld [vmem:[%s29641_s3 + $0x2440] ss:$52 sps:$4 sm:$0xff]  }
 0x5e3   :  { %14932 = vmatpush2.bf16.msra.mxu0 %v21749_v10 }
 0x5e4   :  { %14899 = vmatpush2.bf16.msra.mxu1 %v21746_v11  ;;  %14933 = vmatprep.subr.bf16.mxu0 %v21757_v15  ;;  %v21790_v11 = vld [vmem:[%s29641_s3 + $0x23dc] ss:$52 sps:$4 sm:$0xff]  }
 0x5e5   :  { %14900 = vmatprep.subr.bf16.mxu1 %v21754_v20  ;;  %v21793_v20 = vld [vmem:[%s29641_s3 + $0x271c] ss:$52 sps:$4 sm:$0xff]  }
 0x5e7   :  { %14934 = vmatpush2.bf16.msra.mxu0 %v21755_v55  ;;  %v21788_v55 = vld [vmem:[%s29641_s3 + $0x23d8] ss:$52 sps:$4 sm:$0xff]  }
 0x5e8   :  { %14901 = vmatpush2.bf16.msra.mxu1 %v21752_v23  ;;  %14935 = vmatprep.subr.bf16.mxu0 %v21763_v29  ;;  %v21791_v23 = vld [vmem:[%s29641_s3 + $0x2718] ss:$52 sps:$4 sm:$0xff]   ;;  %v21796_v29 = vld [vmem:[%s29641_s3 + $0x2fc] ss:$52 sps:$4 sm:$0xff]  }
 0x5e9   :  { %14902 = vmatprep.subr.bf16.mxu1 %v21760_v56  ;;  %v21799_v56 = vld [vmem:[%s29641_s3 + $0x97c] ss:$52 sps:$4 sm:$0xff]  }
 0x5eb   :  { %14936 = vmatpush2.bf16.msra.mxu0 %v21761_v8  ;;  %v21794_v8 = vld [vmem:[%s29641_s3 + $0x2f8] ss:$52 sps:$4 sm:$0xff]  }
 0x5ec   :  { %14903 = vmatpush2.bf16.msra.mxu1 %v21758_v63  ;;  %14937 = vmatprep.subr.bf16.mxu0 %v21769_v43  ;;  %v21797_v63 = vld [vmem:[%s29641_s3 + $0x978] ss:$52 sps:$4 sm:$0xff]   ;;  %v21802_v43 = vld [vmem:[%s29641_s3 + $0x294] ss:$52 sps:$4 sm:$0xff]  }
 0x5ed   :  { %14904 = vmatprep.subr.bf16.mxu1 %v21766_v2 }
 0x5ef   :  { %14938 = vmatpush2.bf16.msra.mxu0 %v21767_v9  ;;  %v21805_v9 = vld [vmem:[%s29641_s3 + $0x914] ss:$52 sps:$4 sm:$0xff]  }
 0x5f0   :  { %14905 = vmatpush2.bf16.msra.mxu1 %v21764_v48  ;;  %14939 = vmatprep.subr.bf16.mxu0 %v21772_v59  ;;  %v21800_v59 = vld [vmem:[%s29641_s3 + $0x290] ss:$52 sps:$4 sm:$0xff]  }
 0x5f1   :  { %14964 = vmatprep.subr.bf16.mxu1 %v21775_v19 }
 0x5f2   :  { %v14621_v25 = vpop.f32.mrf.mxu0 }
 0x5f3   :  { %v14622_v12 = vadd.f32 %v14621_v25, %v27464_v61  ;;  %v14662_v60 = vpop.f32.mrf.mxu1  ;;  %14907 = vmatmul.mubr.bf16.vlgmr.msra.gmra.mxu1 %v25763_v39  ;;  %14940 = vmatpush2.bf16.msra.mxu0 %v21770_v6  ;;  %v21803_v6 = vld [vmem:[%s29641_s3 + $0x910] ss:$52 sps:$4 sm:$0xff]  }
 0x5f4   :  { %14965 = vmatpush1.bf16.msra.mxu1 %v21773_v52  ;;  %v14623_v62 = vpop.f32.mrf.mxu0  ;;  %14941 = vmatprep.subr.bf16.mxu0 %v21778_v53  ;;  %v21808_v52 = vld [vmem:[%s29641_s3 + $0x22c] ss:$52 sps:$4 sm:$0xff]  }
 0x5f5   :  { %v14663_v61 = vadd.f32 %v14662_v60, %v14622_v12  ;;  %v14624_v47 = vadd.f32 %v14623_v62, %v27470_v22  ;;  %v14664_v7 = vpop.f32.mrf.mxu1  ;;  %14966 = vmatprep.subr.bf16.mxu1 %v21781_v57  ;;  %14988 = vmatprep.mubr.bf16.mxu1 %v22625_v16  ;;  %v21785_v22 = vld [vmem:[%s29641_s3 + $0x2780] ss:$52 sps:$4 sm:$0xff]   ;;  %v21806_v12 = vld [vmem:[%s29641_s3 + $0x228] ss:$52 sps:$4 sm:$0xff]   ;;  %v21814_v62 = vld [vmem:[%s29641_s3 + $0x1c4] ss:$52 sps:$4 sm:$0xff]  }
 0x5f6   :  { %v14625_v24 = vpop.f32.mrf.mxu0  ;;  %v21811_v57 = vld [vmem:[%s29641_s3 + $0x8ac] ss:$52 sps:$4 sm:$0xff]  }
 0x5f7   :  { %v14665_v51 = vadd.f32 %v14664_v7, %v14624_v47  ;;  %v14666_v0 = vpop.f32.mrf.mxu1  ;;  %14942 = vmatpush2.bf16.msra.mxu0 %v21776_v1  ;;  %v21809_v1 = vld [vmem:[%s29641_s3 + $0x8a8] ss:$52 sps:$4 sm:$0xff]   ;;  %v21821_v24 = vld [vmem:[%s29641_s3 + $0x7d8] ss:$52 sps:$4 sm:$0xff]  }
 0x5f8   :  { %14967 = vmatpush1.bf16.msra.mxu1 %v21779_v35  ;;  %v14626_v10 = vpop.f32.mrf.mxu0  ;;  %14943 = vmatprep.subr.bf16.mxu0 %v21784_v5  ;;  %v21817_v35 = vld [vmem:[%s29641_s3 + $0x844] ss:$52 sps:$4 sm:$0xff]   ;;  %v21812_v5 = vld [vmem:[%s29641_s3 + $0x1c0] ss:$52 sps:$4 sm:$0xff]   ;;  %v21820_v47 = vld [vmem:[%s29641_s3 + $0x15c] ss:$52 sps:$4 sm:$0xff]  }
 0x5f9   :  { %v14667_v15 = vpop.f32.mrf.mxu1  ;;  %14968 = vmatprep.subr.bf16.mxu1 %v21787_v45  ;;  %v21823_v7 = vld [vmem:[%s29641_s3 + $0x7dc] ss:$52 sps:$4 sm:$0xff]   ;;  %v21818_v45 = vld [vmem:[%s29641_s3 + $0x158] ss:$52 sps:$4 sm:$0xff]   ;;  %v21829_v0 = vld [vmem:[%s29641_s3 + $0x774] ss:$52 sps:$4 sm:$0xff]  }
 0x5fa   :  { %v21827_v10 = vld [vmem:[%s29641_s3 + $0x770] ss:$52 sps:$4 sm:$0xff]   ;;  %v21830_v15 = vld [vmem:[%s29641_s3 + $0x88] ss:$52 sps:$4 sm:$0xff]  }
 0x5fb   :  { %14944 = vmatpush2.bf16.msra.mxu0 %v21782_v27  ;;  %v21824_v27 = vld [vmem:[%s29641_s3 + $0xf0] ss:$52 sps:$4 sm:$0xff]  }
 0x5fc   :  { %14969 = vmatpush1.bf16.msra.mxu1 %v21785_v22  ;;  %14945 = vmatprep.subr.bf16.mxu0 %v21790_v11  ;;  %v21832_v22 = vld [vmem:[%s29641_s3 + $0x8c] ss:$52 sps:$4 sm:$0xff]  }
 0x5fd   :  { %14970 = vmatprep.subr.bf16.mxu1 %v21793_v20  ;;  %v21835_v11 = vld [vmem:[%s29641_s3 + $0x70c] ss:$52 sps:$4 sm:$0xff]   ;;  %v21833_v20 = vld [vmem:[%s29641_s3 + $0x708] ss:$52 sps:$4 sm:$0xff]  }
 0x5ff   :  { %14946 = vmatpush2.bf16.msra.mxu0 %v21788_v55  ;;  %v21838_v55 = vld [vmem:[%s29641_s3 + $0x24] ss:$52 sps:$4 sm:$0xff]  }
 0x600   :  { %14971 = vmatpush1.bf16.msra.mxu1 %v21791_v23  ;;  %14997 = vmatprep.subr.bf16.mxu0 %v21796_v29  ;;  %v21841_v23 = vld [vmem:[%s29641_s3 + $0x6a4] ss:$52 sps:$4 sm:$0xff]   ;;  %v21836_v29 = vld [vmem:[%s29641_s3 + $0x20] ss:$52 sps:$4 sm:$0xff]  }
 0x601   :  { %15038 = vmatprep.subr.bf16.mxu1 %v21799_v56  ;;  %v21839_v56 = vld [vmem:[%s29641_s3 + $0x6a0] ss:$52 sps:$4 sm:$0xff]  }
 0x602   :  { %v14703_v2 = vpop.f32.mrf.mxu0  ;;  %14948 = vmatmul.mubr.bf16.vlgmr.msra.gmra.mxu0 %v25765_v17 }
 0x603   :  { %v27707_v48 = vadd.f32 %v14703_v2, %v14663_v61  ;;  %19020 = vmatmul.mubr.msk.bf16.vlgmr.msra.gmra.mxu1 %vm13845_vm1, %v25821_v18  ;;  %14998 = vmatpush1.bf16.msra.mxu0 %v21794_v8  ;;  %v21815_v61 = vld [vmem:[%s29641_s3 + $0x840] ss:$52 sps:$4 sm:$0xff]   ;;  %v21844_v8 = vld [vmem:[%s29641_s3 + $0x63c] ss:$52 sps:$4 sm:$0xff]   ;;  %v21845_v2 = vld [vmem:[%s29641_s3 + $0xcb8] ss:$52 sps:$4 sm:$0xff]  }
 0x604   :  { %15029 = vmatprep.mubr.bf16.mxu0 %v25099_v30  ;;  %15039 = vmatpush1.bf16.msra.mxu1 %v21797_v63  ;;  %v14705_v19 = vpop.f32.mrf.mxu0  ;;  %v21847_v63 = vld [vmem:[%s29641_s3 + $0xcbc] ss:$52 sps:$4 sm:$0xff]  }
 0x605   :  { %15070 = vmatprep.mubr.bf16.mxu1 %v25101_v37  ;;  %v27722_v53 = vadd.f32 %v14705_v19, %v14665_v51  ;;  %14999 = vmatprep.subr.bf16.mxu0 %v21802_v43  ;;  %v21826_v51 = vld [vmem:[%s29641_s3 + $0xf4] ss:$52 sps:$4 sm:$0xff]   ;;  %v21842_v43 = vld [vmem:[%s29641_s3 + $0x638] ss:$52 sps:$4 sm:$0xff]   ;;  %v21848_v19 = vld [vmem:[%s29641_s3 + $0x5d0] ss:$52 sps:$4 sm:$0xff]  }
 0x606   :  { %v14707_v25 = vpop.f32.mrf.mxu0  ;;  %15040 = vmatprep.subr.bf16.mxu1 %v21805_v9  ;;  %v21850_v9 = vld [vmem:[%s29641_s3 + $0x5d4] ss:$52 sps:$4 sm:$0xff]  }
 0x607   :  { %15000 = vmatpush1.bf16.msra.mxu0 %v21800_v59  ;;  %v21853_v59 = vld [vmem:[%s29641_s3 + $0xc54] ss:$52 sps:$4 sm:$0xff]  }
 0x608   :  { %15041 = vmatpush1.bf16.msra.mxu1 %v21803_v6  ;;  %v14708_v60 = vpop.f32.mrf.mxu0  ;;  %15001 = vmatprep.subr.bf16.mxu0 %v21808_v52  ;;  %v21851_v6 = vld [vmem:[%s29641_s3 + $0xc50] ss:$52 sps:$4 sm:$0xff]   ;;  %v21856_v52 = vld [vmem:[%s29641_s3 + $0x56c] ss:$52 sps:$4 sm:$0xff]   ;;  %v21854_v25 = vld [vmem:[%s29641_s3 + $0x568] ss:$52 sps:$4 sm:$0xff]  }
 0x609   :  { %15042 = vmatprep.subr.bf16.mxu1 %v21811_v57  ;;  %v21859_v57 = vld [vmem:[%s29641_s3 + $0xbec] ss:$52 sps:$4 sm:$0xff]   ;;  %v21862_v60 = vld [vmem:[%s29641_s3 + $0x504] ss:$52 sps:$4 sm:$0xff]  }
 0x60b   :  { %15002 = vmatpush1.bf16.msra.mxu0 %v21806_v12  ;;  %v21857_v12 = vld [vmem:[%s29641_s3 + $0xbe8] ss:$52 sps:$4 sm:$0xff]  }
 0x60c   :  { %15043 = vmatpush1.bf16.msra.mxu1 %v21809_v1  ;;  %15003 = vmatprep.subr.bf16.mxu0 %v21814_v62  ;;  %v21865_v1 = vld [vmem:[%s29641_s3 + $0xb84] ss:$52 sps:$4 sm:$0xff]   ;;  %v21860_v62 = vld [vmem:[%s29641_s3 + $0x500] ss:$52 sps:$4 sm:$0xff]  }
 0x60d   :  { %15044 = vmatprep.subr.bf16.mxu1 %v21817_v35  ;;  %v21863_v35 = vld [vmem:[%s29641_s3 + $0xb80] ss:$52 sps:$4 sm:$0xff]  }
 0x60f   :  { %15004 = vmatpush1.bf16.msra.mxu0 %v21812_v5  ;;  %v21868_v5 = vld [vmem:[%s29641_s3 + $0x49c] ss:$52 sps:$4 sm:$0xff]  }
 0x610   :  { %15045 = vmatpush1.bf16.msra.mxu1 %v21815_v61  ;;  %15005 = vmatprep.subr.bf16.mxu0 %v21820_v47  ;;  %v21871_v61 = vld [vmem:[%s29641_s3 + $0xb1c] ss:$52 sps:$4 sm:$0xff]   ;;  %v21866_v47 = vld [vmem:[%s29641_s3 + $0x498] ss:$52 sps:$4 sm:$0xff]  }
 0x611   :  { %15046 = vmatprep.subr.bf16.mxu1 %v21823_v7  ;;  %v21869_v7 = vld [vmem:[%s29641_s3 + $0xb18] ss:$52 sps:$4 sm:$0xff]  }
 0x613   :  { %15006 = vmatpush1.bf16.msra.mxu0 %v21818_v45  ;;  %v21874_v45 = vld [vmem:[%s29641_s3 + $0x434] ss:$52 sps:$4 sm:$0xff]  }
 0x614   :  { %15047 = vmatpush1.bf16.msra.mxu1 %v21821_v24  ;;  %15007 = vmatprep.subr.bf16.mxu0 %v21826_v51  ;;  %v21877_v24 = vld [vmem:[%s29641_s3 + $0xab4] ss:$52 sps:$4 sm:$0xff]  }
 0x615   :  { %15048 = vmatprep.subr.bf16.mxu1 %v21829_v0  ;;  %v21872_v0 = vld [vmem:[%s29641_s3 + $0x430] ss:$52 sps:$4 sm:$0xff]  }
 0x617   :  { %15008 = vmatpush1.bf16.msra.mxu0 %v21824_v27  ;;  %v21875_v27 = vld [vmem:[%s29641_s3 + $0xab0] ss:$52 sps:$4 sm:$0xff]  }
 0x618   :  { %15049 = vmatpush1.bf16.msra.mxu1 %v21827_v10  ;;  %15009 = vmatprep.subr.bf16.mxu0 %v21832_v22  ;;  %v21880_v10 = vld [vmem:[%s29641_s3 + $0x3cc] ss:$52 sps:$4 sm:$0xff]  }
 0x619   :  { %15050 = vmatprep.subr.bf16.mxu1 %v21835_v11  ;;  %v21883_v11 = vld [vmem:[%s29641_s3 + $0xa4c] ss:$52 sps:$4 sm:$0xff]  }
 0x61b   :  { %15010 = vmatpush1.bf16.msra.mxu0 %v21830_v15 }
 0x61c   :  { %15051 = vmatpush1.bf16.msra.mxu1 %v21833_v20  ;;  %15011 = vmatprep.subr.bf16.mxu0 %v21838_v55  ;;  %v21878_v20 = vld [vmem:[%s29641_s3 + $0x3c8] ss:$52 sps:$4 sm:$0xff]  }
 0x61d   :  { %15052 = vmatprep.subr.bf16.mxu1 %v21841_v23  ;;  %v21881_v55 = vld [vmem:[%s29641_s3 + $0xa48] ss:$52 sps:$4 sm:$0xff]   ;;  %v21886_v23 = vld [vmem:[%s29641_s3 + $0x364] ss:$52 sps:$4 sm:$0xff]  }
 0x61f   :  { %15012 = vmatpush1.bf16.msra.mxu0 %v21836_v29 }
 0x620   :  { %15053 = vmatpush1.bf16.msra.mxu1 %v21839_v56  ;;  %15013 = vmatprep.subr.bf16.mxu0 %v21844_v8  ;;  %v21889_v56 = vld [vmem:[%s29641_s3 + $0x9e4] ss:$52 sps:$4 sm:$0xff]   ;;  %v21884_v8 = vld [vmem:[%s29641_s3 + $0x360] ss:$52 sps:$4 sm:$0xff]  }
 0x621   :  { %15054 = vmatprep.subr.bf16.mxu1 %v21847_v63  ;;  %v21887_v63 = vld [vmem:[%s29641_s3 + $0x9e0] ss:$52 sps:$4 sm:$0xff]  }
 0x623   :  { %15014 = vmatpush2.bf16.msra.mxu0 %v21842_v43  ;;  %v21892_v43 = vld [vmem:[%s29641_s3 + $0xffc] ss:$52 sps:$4 sm:$0xff]  }
 0x624   :  { %15055 = vmatpush2.bf16.msra.mxu1 %v21845_v2  ;;  %15015 = vmatprep.subr.bf16.mxu0 %v21850_v9  ;;  %v7207_v2 = vrot.slane %v27233_v44, %v846_v33  ;;  %v21895_v9 = vld [vmem:[%s29641_s3 + $0x167c] ss:$52 sps:$4 sm:$0xff]   ;;  %v21893_v33 = vld [vmem:[%s29641_s3 + $0x1678] ss:$52 sps:$4 sm:$0xff]  }
 0x625   :  { %15056 = vmatprep.subr.bf16.mxu1 %v21853_v59  ;;  %v7211_v59 = vrot.slane %v27233_v44, %v850_v41  ;;  %v21901_v41 = vld [vmem:[%s29641_s3 + $0x1614] ss:$52 sps:$4 sm:$0xff]  }
 0x627   :  { %15016 = vmatpush2.bf16.msra.mxu0 %v21848_v19  ;;  %v21890_v19 = vld [vmem:[%s29641_s3 + $0xff8] ss:$52 sps:$4 sm:$0xff]  }
 0x628   :  { %15057 = vmatpush2.bf16.msra.mxu1 %v21851_v6  ;;  %15017 = vmatprep.subr.bf16.mxu0 %v21856_v52  ;;  %v21898_v52 = vld [vmem:[%s29641_s3 + $0xf94] ss:$52 sps:$4 sm:$0xff]  }
 0x629   :  { %15058 = vmatprep.subr.bf16.mxu1 %v21859_v57 }
 0x62b   :  { %15018 = vmatpush2.bf16.msra.mxu0 %v21854_v25  ;;  %v21896_v25 = vld [vmem:[%s29641_s3 + $0xf90] ss:$52 sps:$4 sm:$0xff]  }
 0x62c   :  { %15059 = vmatpush2.bf16.msra.mxu1 %v21857_v12  ;;  %15019 = vmatprep.subr.bf16.mxu0 %v21862_v60  ;;  %v21899_v60 = vld [vmem:[%s29641_s3 + $0x1610] ss:$52 sps:$4 sm:$0xff]  }
 0x62d   :  { %15060 = vmatprep.subr.bf16.mxu1 %v21865_v1  ;;  %v21904_v1 = vld [vmem:[%s29641_s3 + $0xf2c] ss:$52 sps:$4 sm:$0xff]  }
 0x62f   :  { %15020 = vmatpush2.bf16.msra.mxu0 %v21860_v62 }
 0x630   :  { %15061 = vmatpush2.bf16.msra.mxu1 %v21863_v35  ;;  %15021 = vmatprep.subr.bf16.mxu0 %v21868_v5  ;;  %v21907_v35 = vld [vmem:[%s29641_s3 + $0x15ac] ss:$52 sps:$4 sm:$0xff]  }
 0x631   :  { %15062 = vmatprep.subr.bf16.mxu1 %v21871_v61  ;;  %v21902_v61 = vld [vmem:[%s29641_s3 + $0xf28] ss:$52 sps:$4 sm:$0xff]  }
 0x633   :  { %v14744_v51 = vpop.f32.mrf.mxu1  ;;  %15022 = vmatpush2.bf16.msra.mxu0 %v21866_v47 }
 0x634   :  { %15063 = vmatpush2.bf16.msra.mxu1 %v21869_v7  ;;  %15023 = vmatprep.subr.bf16.mxu0 %v21874_v45  ;;  %v14745_v6 = vadd.f32 %v14744_v51, %v7207_v2  ;;  %v21905_v7 = vld [vmem:[%s29641_s3 + $0x15a8] ss:$52 sps:$4 sm:$0xff]   ;;  %v21910_v45 = vld [vmem:[%s29641_s3 + $0xec4] ss:$52 sps:$4 sm:$0xff]   ;;  %v21908_v51 = vld [vmem:[%s29641_s3 + $0xec0] ss:$52 sps:$4 sm:$0xff]  }
 0x635   :  { %v14746_v22 = vpop.f32.mrf.mxu1  ;;  %15064 = vmatprep.subr.bf16.mxu1 %v21877_v24  ;;  %v21913_v24 = vld [vmem:[%s29641_s3 + $0x1544] ss:$52 sps:$4 sm:$0xff]  }
 0x636   :  { %v14747_v44 = vadd.f32 %v14746_v22, %v7211_v59  ;;  %v21914_v22 = vld [vmem:[%s29641_s3 + $0xe58] ss:$52 sps:$4 sm:$0xff]   ;;  %v21935_v59 = vld [vmem:[%s29641_s3 + $0x13a0] ss:$52 sps:$4 sm:$0xff]  }
 0x637   :  { %v14748_v15 = vpop.f32.mrf.mxu1  ;;  %15024 = vmatpush2.bf16.msra.mxu0 %v21872_v0  ;;  %v21911_v0 = vld [vmem:[%s29641_s3 + $0x1540] ss:$52 sps:$4 sm:$0xff]   ;;  %v21937_v2 = vld [vmem:[%s29641_s3 + $0x13a4] ss:$52 sps:$4 sm:$0xff]  }
 0x638   :  { %15065 = vmatpush2.bf16.msra.mxu1 %v21875_v27  ;;  %15025 = vmatprep.subr.bf16.mxu0 %v21880_v10  ;;  %v21916_v27 = vld [vmem:[%s29641_s3 + $0xe5c] ss:$52 sps:$4 sm:$0xff]   ;;  %v21922_v15 = vld [vmem:[%s29641_s3 + $0xdf4] ss:$52 sps:$4 sm:$0xff]  }
 0x639   :  { %v14749_v29 = vpop.f32.mrf.mxu1  ;;  %15066 = vmatprep.subr.bf16.mxu1 %v21883_v11  ;;  %v21919_v10 = vld [vmem:[%s29641_s3 + $0x14dc] ss:$52 sps:$4 sm:$0xff]   ;;  %v21917_v11 = vld [vmem:[%s29641_s3 + $0x14d8] ss:$52 sps:$4 sm:$0xff]  }
 0x63a   :  { %v21928_v29 = vld [vmem:[%s29641_s3 + $0xd8c] ss:$52 sps:$4 sm:$0xff]  }
 0x63b   :  { %15026 = vmatpush2.bf16.msra.mxu0 %v21878_v20  ;;  %v21925_v20 = vld [vmem:[%s29641_s3 + $0x1474] ss:$52 sps:$4 sm:$0xff]  }
 0x63c   :  { %15067 = vmatpush2.bf16.msra.mxu1 %v21881_v55  ;;  %15027 = vmatprep.subr.bf16.mxu0 %v21886_v23  ;;  %v21920_v55 = vld [vmem:[%s29641_s3 + $0xdf0] ss:$52 sps:$4 sm:$0xff]  }
 0x63d   :  { %15068 = vmatprep.subr.bf16.mxu1 %v21889_v56  ;;  %v21923_v23 = vld [vmem:[%s29641_s3 + $0x1470] ss:$52 sps:$4 sm:$0xff]   ;;  %v21931_v56 = vld [vmem:[%s29641_s3 + $0x140c] ss:$52 sps:$4 sm:$0xff]  }
 0x63f   :  { %15028 = vmatpush2.bf16.msra.mxu0 %v21884_v8  ;;  %v21926_v8 = vld [vmem:[%s29641_s3 + $0xd88] ss:$52 sps:$4 sm:$0xff]  }
 0x640   :  { %15069 = vmatpush2.bf16.msra.mxu1 %v21887_v63  ;;  %15079 = vmatprep.subr.bf16.mxu0 %v21892_v43  ;;  %v21929_v63 = vld [vmem:[%s29641_s3 + $0x1408] ss:$52 sps:$4 sm:$0xff]   ;;  %v21934_v43 = vld [vmem:[%s29641_s3 + $0xd24] ss:$52 sps:$4 sm:$0xff]  }
 0x641   :  { %15120 = vmatprep.subr.bf16.mxu1 %v21895_v9  ;;  %v21932_v9 = vld [vmem:[%s29641_s3 + $0xd20] ss:$52 sps:$4 sm:$0xff]  }
 0x642   :  { %v14785_v28 = vpop.f32.mrf.mxu0  ;;  %15030 = vmatmul.mubr.bf16.vlgmr.msra.gmra.mxu0 %v25312_v36 }
 0x643   :  { %v27914_v57 = vadd.f32 %v14785_v28, %v14745_v6  ;;  %15071 = vmatmul.mubr.bf16.vlgmr.msra.gmra.mxu1 %v25314_v49  ;;  %15080 = vmatpush1.bf16.msra.mxu0 %v21890_v19  ;;  %v21940_v19 = vld [vmem:[%s29641_s3 + $0x133c] ss:$52 sps:$4 sm:$0xff]   ;;  %v21938_v6 = vld [vmem:[%s29641_s3 + $0x1338] ss:$52 sps:$4 sm:$0xff]   ;;  %v21946_v28 = vld [vmem:[%s29641_s3 + $0x12d4] ss:$52 sps:$4 sm:$0xff]  }
 0x644   :  { %15111 = vmatprep.mubr.bf16.mxu0 %v25319_v21  ;;  %15121 = vmatpush1.bf16.msra.mxu1 %v21893_v33  ;;  %v14787_v12 = vpop.f32.mrf.mxu0  ;;  %v21943_v33 = vld [vmem:[%s29641_s3 + $0x19bc] ss:$52 sps:$4 sm:$0xff]  }
 0x645   :  { %15152 = vmatprep.mubr.bf16.mxu1 %v25330_v40  ;;  %v27928_v62 = vadd.f32 %v14787_v12, %v14747_v44  ;;  %15081 = vmatprep.subr.bf16.mxu0 %v21898_v52  ;;  %v21941_v52 = vld [vmem:[%s29641_s3 + $0x19b8] ss:$52 sps:$4 sm:$0xff]   ;;  %v21944_v44 = vld [vmem:[%s29641_s3 + $0x12d0] ss:$52 sps:$4 sm:$0xff]  }
 0x646   :  { %v14789_v5 = vpop.f32.mrf.mxu0  ;;  %15122 = vmatprep.subr.bf16.mxu1 %v21901_v41  ;;  %v21949_v41 = vld [vmem:[%s29641_s3 + $0x1954] ss:$52 sps:$4 sm:$0xff]   ;;  %v21952_v12 = vld [vmem:[%s29641_s3 + $0x126c] ss:$52 sps:$4 sm:$0xff]  }
 0x647   :  { %15082 = vmatpush1.bf16.msra.mxu0 %v21896_v25  ;;  %v21947_v25 = vld [vmem:[%s29641_s3 + $0x1950] ss:$52 sps:$4 sm:$0xff]  }
 0x648   :  { %15123 = vmatpush1.bf16.msra.mxu1 %v21899_v60  ;;  %v14790_v47 = vpop.f32.mrf.mxu0  ;;  %15083 = vmatprep.subr.bf16.mxu0 %v21904_v1  ;;  %v21955_v60 = vld [vmem:[%s29641_s3 + $0x18ec] ss:$52 sps:$4 sm:$0xff]   ;;  %v21950_v1 = vld [vmem:[%s29641_s3 + $0x1268] ss:$52 sps:$4 sm:$0xff]   ;;  %v21958_v5 = vld [vmem:[%s29641_s3 + $0x1204] ss:$52 sps:$4 sm:$0xff]  }
 0x649   :  { %15124 = vmatprep.subr.bf16.mxu1 %v21907_v35  ;;  %v21953_v35 = vld [vmem:[%s29641_s3 + $0x18e8] ss:$52 sps:$4 sm:$0xff]   ;;  %v21956_v47 = vld [vmem:[%s29641_s3 + $0x1200] ss:$52 sps:$4 sm:$0xff]  }
 0x64b   :  { %15084 = vmatpush1.bf16.msra.mxu0 %v21902_v61  ;;  %v21961_v61 = vld [vmem:[%s29641_s3 + $0x1884] ss:$52 sps:$4 sm:$0xff]  }
 0x64c   :  { %15125 = vmatpush1.bf16.msra.mxu1 %v21905_v7  ;;  %15085 = vmatprep.subr.bf16.mxu0 %v21910_v45  ;;  %v21959_v7 = vld [vmem:[%s29641_s3 + $0x1880] ss:$52 sps:$4 sm:$0xff]   ;;  %v21964_v45 = vld [vmem:[%s29641_s3 + $0x119c] ss:$52 sps:$4 sm:$0xff]  }
 0x64d   :  { %15126 = vmatprep.subr.bf16.mxu1 %v21913_v24  ;;  %v21967_v24 = vld [vmem:[%s29641_s3 + $0x181c] ss:$52 sps:$4 sm:$0xff]  }
 0x64f   :  { %15086 = vmatpush1.bf16.msra.mxu0 %v21908_v51  ;;  %v21962_v51 = vld [vmem:[%s29641_s3 + $0x1198] ss:$52 sps:$4 sm:$0xff]  }
 0x650   :  { %15127 = vmatpush1.bf16.msra.mxu1 %v21911_v0  ;;  %15087 = vmatprep.subr.bf16.mxu0 %v21916_v27  ;;  %v21965_v0 = vld [vmem:[%s29641_s3 + $0x1818] ss:$52 sps:$4 sm:$0xff]   ;;  %v21970_v27 = vld [vmem:[%s29641_s3 + $0x1134] ss:$52 sps:$4 sm:$0xff]  }
 0x651   :  { %15128 = vmatprep.subr.bf16.mxu1 %v21919_v10  ;;  %v21973_v10 = vld [vmem:[%s29641_s3 + $0x17b4] ss:$52 sps:$4 sm:$0xff]  }
 0x653   :  { %15088 = vmatpush1.bf16.msra.mxu0 %v21914_v22 }
 0x654   :  { %15129 = vmatpush1.bf16.msra.mxu1 %v21917_v11  ;;  %15089 = vmatprep.subr.bf16.mxu0 %v21922_v15  ;;  %v21968_v11 = vld [vmem:[%s29641_s3 + $0x1130] ss:$52 sps:$4 sm:$0xff]  }
 0x655   :  { %15130 = vmatprep.subr.bf16.mxu1 %v21925_v20  ;;  %v21971_v20 = vld [vmem:[%s29641_s3 + $0x17b0] ss:$52 sps:$4 sm:$0xff]  }
 0x657   :  { %15090 = vmatpush1.bf16.msra.mxu0 %v21920_v55  ;;  %v21976_v55 = vld [vmem:[%s29641_s3 + $0x10cc] ss:$52 sps:$4 sm:$0xff]  }
 0x658   :  { %15131 = vmatpush1.bf16.msra.mxu1 %v21923_v23  ;;  %15091 = vmatprep.subr.bf16.mxu0 %v21928_v29  ;;  %v21979_v29 = vld [vmem:[%s29641_s3 + $0x174c] ss:$52 sps:$4 sm:$0xff]  }
 0x659   :  { %15132 = vmatprep.subr.bf16.mxu1 %v21931_v56 }
 0x65b   :  { %15092 = vmatpush1.bf16.msra.mxu0 %v21926_v8 }
 0x65c   :  { %15133 = vmatpush1.bf16.msra.mxu1 %v21929_v63  ;;  %15093 = vmatprep.subr.bf16.mxu0 %v21934_v43  ;;  %v21977_v63 = vld [vmem:[%s29641_s3 + $0x1748] ss:$52 sps:$4 sm:$0xff]   ;;  %v21982_v43 = vld [vmem:[%s29641_s3 + $0x1064] ss:$52 sps:$4 sm:$0xff]  }
 0x65d   :  { %15134 = vmatprep.subr.bf16.mxu1 %v21937_v2 }
 0x65f   :  { %15094 = vmatpush1.bf16.msra.mxu0 %v21932_v9  ;;  %v21980_v9 = vld [vmem:[%s29641_s3 + $0x1060] ss:$52 sps:$4 sm:$0xff]  }
 0x660   :  { %15135 = vmatpush1.bf16.msra.mxu1 %v21935_v59  ;;  %15095 = vmatprep.subr.bf16.mxu0 %v21940_v19  ;;  %v21983_v59 = vld [vmem:[%s29641_s3 + $0x16e0] ss:$52 sps:$4 sm:$0xff]   ;;  %v21988_v19 = vld [vmem:[%s29641_s3 + $0x1cfc] ss:$52 sps:$4 sm:$0xff]  }
 0x661   :  { %15136 = vmatprep.subr.bf16.mxu1 %v21943_v33  ;;  %v21991_v33 = vld [vmem:[%s29641_s3 + $0x237c] ss:$52 sps:$4 sm:$0xff]  }
 0x663   :  { %15096 = vmatpush2.bf16.msra.mxu0 %v21938_v6  ;;  %v21986_v6 = vld [vmem:[%s29641_s3 + $0x1cf8] ss:$52 sps:$4 sm:$0xff]  }
 0x664   :  { %15137 = vmatpush2.bf16.msra.mxu1 %v21941_v52  ;;  %15097 = vmatprep.subr.bf16.mxu0 %v21946_v28  ;;  %v21989_v52 = vld [vmem:[%s29641_s3 + $0x2378] ss:$52 sps:$4 sm:$0xff]   ;;  %v21994_v28 = vld [vmem:[%s29641_s3 + $0x1c94] ss:$52 sps:$4 sm:$0xff]  }
 0x665   :  { %15138 = vmatprep.subr.bf16.mxu1 %v21949_v41 }
 0x667   :  { %15098 = vmatpush2.bf16.msra.mxu0 %v21944_v44  ;;  %v21997_v44 = vld [vmem:[%s29641_s3 + $0x2314] ss:$52 sps:$4 sm:$0xff]  }
 0x668   :  { %15139 = vmatpush2.bf16.msra.mxu1 %v21947_v25  ;;  %15099 = vmatprep.subr.bf16.mxu0 %v21952_v12  ;;  %v21992_v12 = vld [vmem:[%s29641_s3 + $0x1c90] ss:$52 sps:$4 sm:$0xff]  }
 0x669   :  { %15140 = vmatprep.subr.bf16.mxu1 %v21955_v60 }
 0x66b   :  { %15100 = vmatpush2.bf16.msra.mxu0 %v21950_v1  ;;  %v21995_v1 = vld [vmem:[%s29641_s3 + $0x2310] ss:$52 sps:$4 sm:$0xff]  }
 0x66c   :  { %15141 = vmatpush2.bf16.msra.mxu1 %v21953_v35  ;;  %15101 = vmatprep.subr.bf16.mxu0 %v21958_v5  ;;  %v22000_v35 = vld [vmem:[%s29641_s3 + $0x1c2c] ss:$52 sps:$4 sm:$0xff]  }
 0x66d   :  { %15142 = vmatprep.subr.bf16.mxu1 %v21961_v61  ;;  %v22003_v61 = vld [vmem:[%s29641_s3 + $0x22ac] ss:$52 sps:$4 sm:$0xff]  }
 0x66f   :  { %15102 = vmatpush2.bf16.msra.mxu0 %v21956_v47 }
 0x670   :  { %15143 = vmatpush2.bf16.msra.mxu1 %v21959_v7  ;;  %15103 = vmatprep.subr.bf16.mxu0 %v21964_v45  ;;  %v21998_v7 = vld [vmem:[%s29641_s3 + $0x1c28] ss:$52 sps:$4 sm:$0xff]  }
 0x671   :  { %15144 = vmatprep.subr.bf16.mxu1 %v21967_v24  ;;  %v22001_v24 = vld [vmem:[%s29641_s3 + $0x22a8] ss:$52 sps:$4 sm:$0xff]  }
 0x673   :  { %v14826_v22 = vpop.f32.mrf.mxu1  ;;  %15104 = vmatpush2.bf16.msra.mxu0 %v21962_v51  ;;  %v22006_v51 = vld [vmem:[%s29641_s3 + $0x1bc4] ss:$52 sps:$4 sm:$0xff]  }
 0x674   :  { %v14827_v15 = vadd.f32 %v14826_v22, %v27914_v57  ;;  %15145 = vmatpush2.bf16.msra.mxu1 %v21965_v0  ;;  %15105 = vmatprep.subr.bf16.mxu0 %v21970_v27  ;;  %v21974_v57 = vld [vmem:[%s29641_s3 + $0x10c8] ss:$52 sps:$4 sm:$0xff]   ;;  %v22009_v0 = vld [vmem:[%s29641_s3 + $0x2244] ss:$52 sps:$4 sm:$0xff]   ;;  %v22004_v27 = vld [vmem:[%s29641_s3 + $0x1bc0] ss:$52 sps:$4 sm:$0xff]  }
 0x675   :  { %v14828_v23 = vpop.f32.mrf.mxu1  ;;  %15146 = vmatprep.subr.bf16.mxu1 %v21973_v10  ;;  %v22007_v10 = vld [vmem:[%s29641_s3 + $0x2240] ss:$52 sps:$4 sm:$0xff]   ;;  %v22012_v22 = vld [vmem:[%s29641_s3 + $0x1b5c] ss:$52 sps:$4 sm:$0xff]  }
 0x676   :  { %v14829_v56 = vadd.f32 %v14828_v23, %v27928_v62  ;;  %v21985_v62 = vld [vmem:[%s29641_s3 + $0x16e4] ss:$52 sps:$4 sm:$0xff]   ;;  %v22021_v23 = vld [vmem:[%s29641_s3 + $0x2174] ss:$52 sps:$4 sm:$0xff]  }
 0x677   :  { %v14830_v8 = vpop.f32.mrf.mxu1  ;;  %15106 = vmatpush2.bf16.msra.mxu0 %v21968_v11  ;;  %v22015_v11 = vld [vmem:[%s29641_s3 + $0x21dc] ss:$52 sps:$4 sm:$0xff]  }
 0x678   :  { %15147 = vmatpush2.bf16.msra.mxu1 %v21971_v20  ;;  %15107 = vmatprep.subr.bf16.mxu0 %v21976_v55  ;;  %v22013_v20 = vld [vmem:[%s29641_s3 + $0x21d8] ss:$52 sps:$4 sm:$0xff]   ;;  %v22018_v55 = vld [vmem:[%s29641_s3 + $0x1af4] ss:$52 sps:$4 sm:$0xff]  }
 0x679   :  { %v14831_v2 = vpop.f32.mrf.mxu1  ;;  %15148 = vmatprep.subr.bf16.mxu1 %v21979_v29  ;;  %v22016_v29 = vld [vmem:[%s29641_s3 + $0x1af0] ss:$52 sps:$4 sm:$0xff]   ;;  %v22024_v8 = vld [vmem:[%s29641_s3 + $0x1a8c] ss:$52 sps:$4 sm:$0xff]  }
 0x67a   :  { %v22030_v2 = vld [vmem:[%s29641_s3 + $0x1a24] ss:$52 sps:$4 sm:$0xff]  }
 0x67b   :  { %15108 = vmatpush2.bf16.msra.mxu0 %v21974_v57  ;;  %v22027_v57 = vld [vmem:[%s29641_s3 + $0x210c] ss:$52 sps:$4 sm:$0xff]  }
 0x67c   :  { %15149 = vmatpush2.bf16.msra.mxu1 %v21977_v63  ;;  %15109 = vmatprep.subr.bf16.mxu0 %v21982_v43  ;;  %v22022_v63 = vld [vmem:[%s29641_s3 + $0x1a88] ss:$52 sps:$4 sm:$0xff]  }
 0x67d   :  { %15150 = vmatprep.subr.bf16.mxu1 %v21985_v62  ;;  %v22025_v43 = vld [vmem:[%s29641_s3 + $0x2108] ss:$52 sps:$4 sm:$0xff]   ;;  %v22033_v62 = vld [vmem:[%s29641_s3 + $0x20a4] ss:$52 sps:$4 sm:$0xff]  }
 0x67f   :  { %15110 = vmatpush2.bf16.msra.mxu0 %v21980_v9  ;;  %v22028_v9 = vld [vmem:[%s29641_s3 + $0x1a20] ss:$52 sps:$4 sm:$0xff]  }
 0x680   :  { %15151 = vmatpush2.bf16.msra.mxu1 %v21983_v59  ;;  %15161 = vmatprep.subr.bf16.mxu0 %v21988_v19  ;;  %v22031_v59 = vld [vmem:[%s29641_s3 + $0x20a0] ss:$52 sps:$4 sm:$0xff]   ;;  %v22036_v19 = vld [vmem:[%s29641_s3 + $0x203c] ss:$52 sps:$4 sm:$0xff]  }
 0x681   :  { %15202 = vmatprep.subr.bf16.mxu1 %v21991_v33  ;;  %v22039_v33 = vld [vmem:[%s29641_s3 + $0x26bc] ss:$52 sps:$4 sm:$0xff]  }
 0x682   :  { %v14867_v41 = vpop.f32.mrf.mxu0  ;;  %15112 = vmatmul.mubr.bf16.vlgmr.msra.gmra.mxu0 %v25537_v26 }
 0x683   :  { %v28116_v25 = vadd.f32 %v14867_v41, %v14827_v15  ;;  %15153 = vmatmul.mubr.bf16.vlgmr.msra.gmra.mxu1 %v25542_v13  ;;  %15162 = vmatpush1.bf16.msra.mxu0 %v21986_v6  ;;  %v22010_v15 = vld [vmem:[%s29641_s3 + $0x1b58] ss:$52 sps:$4 sm:$0xff]   ;;  %v22045_v41 = vld [vmem:[%s29641_s3 + $0x2654] ss:$52 sps:$4 sm:$0xff]  }
 0x684   :  { %15193 = vmatprep.mubr.bf16.mxu0 %v25545_v14  ;;  %15203 = vmatpush1.bf16.msra.mxu1 %v21989_v52  ;;  %v14869_v60 = vpop.f32.mrf.mxu0  ;;  %v22034_v6 = vld [vmem:[%s29641_s3 + $0x2038] ss:$52 sps:$4 sm:$0xff]  }
 0x685   :  { %15234 = vmatprep.mubr.bf16.mxu1 %v25582_v54  ;;  %v28130_v5 = vadd.f32 %v14869_v60, %v14829_v56  ;;  %15163 = vmatprep.subr.bf16.mxu0 %v21994_v28  ;;  %v22019_v56 = vld [vmem:[%s29641_s3 + $0x2170] ss:$52 sps:$4 sm:$0xff]   ;;  %v22037_v52 = vld [vmem:[%s29641_s3 + $0x26b8] ss:$52 sps:$4 sm:$0xff]   ;;  %v22042_v28 = vld [vmem:[%s29641_s3 + $0x1fd4] ss:$52 sps:$4 sm:$0xff]  }
 0x686   :  { %v14871_v47 = vpop.f32.mrf.mxu0  ;;  %15204 = vmatprep.subr.bf16.mxu1 %v21997_v44  ;;  %v22040_v44 = vld [vmem:[%s29641_s3 + $0x1fd0] ss:$52 sps:$4 sm:$0xff]   ;;  %v22048_v60 = vld [vmem:[%s29641_s3 + $0x1f6c] ss:$52 sps:$4 sm:$0xff]  }
 0x687   :  { %15164 = vmatpush1.bf16.msra.mxu0 %v21992_v12  ;;  %v22043_v12 = vld [vmem:[%s29641_s3 + $0x2650] ss:$52 sps:$4 sm:$0xff]  }
 0x688   :  { %15205 = vmatpush1.bf16.msra.mxu1 %v21995_v1  ;;  %v14872_v45 = vpop.f32.mrf.mxu0  ;;  %15165 = vmatprep.subr.bf16.mxu0 %v22000_v35  ;;  %v22051_v1 = vld [vmem:[%s29641_s3 + $0x25ec] ss:$52 sps:$4 sm:$0xff]   ;;  %v22046_v35 = vld [vmem:[%s29641_s3 + $0x1f68] ss:$52 sps:$4 sm:$0xff]   ;;  %v22054_v47 = vld [vmem:[%s29641_s3 + $0x1f04] ss:$52 sps:$4 sm:$0xff]  }
 0x689   :  { %15206 = vmatprep.subr.bf16.mxu1 %v22003_v61  ;;  %v22049_v61 = vld [vmem:[%s29641_s3 + $0x25e8] ss:$52 sps:$4 sm:$0xff]   ;;  %v22052_v45 = vld [vmem:[%s29641_s3 + $0x1f00] ss:$52 sps:$4 sm:$0xff]  }
 0x68b   :  { %15166 = vmatpush1.bf16.msra.mxu0 %v21998_v7  ;;  %v22057_v7 = vld [vmem:[%s29641_s3 + $0x2584] ss:$52 sps:$4 sm:$0xff]  }
 0x68c   :  { %15207 = vmatpush1.bf16.msra.mxu1 %v22001_v24  ;;  %15167 = vmatprep.subr.bf16.mxu0 %v22006_v51  ;;  %v22055_v24 = vld [vmem:[%s29641_s3 + $0x2580] ss:$52 sps:$4 sm:$0xff]   ;;  %v22060_v51 = vld [vmem:[%s29641_s3 + $0x1e9c] ss:$52 sps:$4 sm:$0xff]  }
 0x68d   :  { %15208 = vmatprep.subr.bf16.mxu1 %v22009_v0  ;;  %v22063_v0 = vld [vmem:[%s29641_s3 + $0x251c] ss:$52 sps:$4 sm:$0xff]  }
 0x68f   :  { %15168 = vmatpush1.bf16.msra.mxu0 %v22004_v27  ;;  %v22058_v27 = vld [vmem:[%s29641_s3 + $0x1e98] ss:$52 sps:$4 sm:$0xff]  }
 0x690   :  { %15209 = vmatpush1.bf16.msra.mxu1 %v22007_v10  ;;  %15169 = vmatprep.subr.bf16.mxu0 %v22012_v22  ;;  %v22061_v10 = vld [vmem:[%s29641_s3 + $0x2518] ss:$52 sps:$4 sm:$0xff]   ;;  %v22066_v22 = vld [vmem:[%s29641_s3 + $0x1e34] ss:$52 sps:$4 sm:$0xff]  }
 0x691   :  { %15210 = vmatprep.subr.bf16.mxu1 %v22015_v11  ;;  %v22069_v11 = vld [vmem:[%s29641_s3 + $0x24b4] ss:$52 sps:$4 sm:$0xff]  }
 0x693   :  { %15170 = vmatpush1.bf16.msra.mxu0 %v22010_v15 }
 0x694   :  { %15211 = vmatpush1.bf16.msra.mxu1 %v22013_v20  ;;  %15171 = vmatprep.subr.bf16.mxu0 %v22018_v55  ;;  %v22064_v20 = vld [vmem:[%s29641_s3 + $0x1e30] ss:$52 sps:$4 sm:$0xff]  }
 0x695   :  { %15212 = vmatprep.subr.bf16.mxu1 %v22021_v23  ;;  %v22067_v23 = vld [vmem:[%s29641_s3 + $0x24b0] ss:$52 sps:$4 sm:$0xff]  }
 0x697   :  { %15172 = vmatpush1.bf16.msra.mxu0 %v22016_v29  ;;  %v22072_v29 = vld [vmem:[%s29641_s3 + $0x1dcc] ss:$52 sps:$4 sm:$0xff]  }
 0x698   :  { %15213 = vmatpush1.bf16.msra.mxu1 %v22019_v56  ;;  %15173 = vmatprep.subr.bf16.mxu0 %v22024_v8  ;;  %v22075_v8 = vld [vmem:[%s29641_s3 + $0x244c] ss:$52 sps:$4 sm:$0xff]  }
 0x699   :  { %15214 = vmatprep.subr.bf16.mxu1 %v22027_v57 }
 0x69b   :  { %15174 = vmatpush1.bf16.msra.mxu0 %v22022_v63 }
 0x69c   :  { %15215 = vmatpush1.bf16.msra.mxu1 %v22025_v43  ;;  %15175 = vmatprep.subr.bf16.mxu0 %v22030_v2  ;;  %v22073_v43 = vld [vmem:[%s29641_s3 + $0x2448] ss:$52 sps:$4 sm:$0xff]   ;;  %v22078_v2 = vld [vmem:[%s29641_s3 + $0x1d64] ss:$52 sps:$4 sm:$0xff]  }
 0x69d   :  { %15216 = vmatprep.subr.bf16.mxu1 %v22033_v62 }
 0x69f   :  { %15176 = vmatpush1.bf16.msra.mxu0 %v22028_v9  ;;  %v22076_v9 = vld [vmem:[%s29641_s3 + $0x1d60] ss:$52 sps:$4 sm:$0xff]  }
 0x6a0   :  { %15217 = vmatpush1.bf16.msra.mxu1 %v22031_v59  ;;  %15177 = vmatprep.subr.bf16.mxu0 %v22036_v19  ;;  %v22079_v59 = vld [vmem:[%s29641_s3 + $0x23e0] ss:$52 sps:$4 sm:$0xff]   ;;  %v22084_v19 = vld [vmem:[%s29641_s3 + $0x285c] ss:$52 sps:$4 sm:$0xff]  }
 0x6a1   :  { %15218 = vmatprep.subr.bf16.mxu1 %v22039_v33  ;;  %v22087_v33 = vld [vmem:[%s29641_s3 + $0x304] ss:$52 sps:$4 sm:$0xff]  }
 0x6a3   :  { %15178 = vmatpush2.bf16.msra.mxu0 %v22034_v6  ;;  %v22082_v6 = vld [vmem:[%s29641_s3 + $0x2858] ss:$52 sps:$4 sm:$0xff]  }
 0x6a4   :  { %15219 = vmatpush2.bf16.msra.mxu1 %v22037_v52  ;;  %15179 = vmatprep.subr.bf16.mxu0 %v22042_v28  ;;  %v22085_v52 = vld [vmem:[%s29641_s3 + $0x300] ss:$52 sps:$4 sm:$0xff]  }
 0x6a5   :  { %15220 = vmatprep.subr.bf16.mxu1 %v22045_v41  ;;  %v22090_v28 = vld [vmem:[%s29641_s3 + $0x27f4] ss:$52 sps:$4 sm:$0xff]   ;;  %v22093_v41 = vld [vmem:[%s29641_s3 + $0x29c] ss:$52 sps:$4 sm:$0xff]  }
 0x6a7   :  { %15180 = vmatpush2.bf16.msra.mxu0 %v22040_v44 }
 0x6a8   :  { %15221 = vmatpush2.bf16.msra.mxu1 %v22043_v12  ;;  %15181 = vmatprep.subr.bf16.mxu0 %v22048_v60 }
 0x6a9   :  { %15222 = vmatprep.subr.bf16.mxu1 %v22051_v1  ;;  %v22088_v1 = vld [vmem:[%s29641_s3 + $0x27f0] ss:$52 sps:$4 sm:$0xff]  }
 0x6ab   :  { %15182 = vmatpush2.bf16.msra.mxu0 %v22046_v35 }
 0x6ac   :  { %15223 = vmatpush2.bf16.msra.mxu1 %v22049_v61  ;;  %15183 = vmatprep.subr.bf16.mxu0 %v22054_v47  ;;  %v22091_v61 = vld [vmem:[%s29641_s3 + $0x298] ss:$52 sps:$4 sm:$0xff]  }
 0x6ad   :  { %15224 = vmatprep.subr.bf16.mxu1 %v22057_v7  ;;  %v22096_v47 = vld [vmem:[%s29641_s3 + $0x278c] ss:$52 sps:$4 sm:$0xff]  }
 0x6af   :  { %15184 = vmatpush2.bf16.msra.mxu0 %v22052_v45 }
 0x6b0   :  { %15225 = vmatpush2.bf16.msra.mxu1 %v22055_v24  ;;  %15185 = vmatprep.subr.bf16.mxu0 %v22060_v51  ;;  %v22099_v51 = vld [vmem:[%s29641_s3 + $0x234] ss:$52 sps:$4 sm:$0xff]  }
 0x6b1   :  { %15226 = vmatprep.subr.bf16.mxu1 %v22063_v0 }
 0x6b3   :  { %v14908_v15 = vpop.f32.mrf.mxu1  ;;  %15186 = vmatpush2.bf16.msra.mxu0 %v22058_v27 }
 0x6b4   :  { %v14909_v55 = vadd.f32 %v14908_v15, %v28116_v25  ;;  %15227 = vmatpush2.bf16.msra.mxu1 %v22061_v10  ;;  %15187 = vmatprep.subr.bf16.mxu0 %v22066_v22  ;;  %v22070_v25 = vld [vmem:[%s29641_s3 + $0x1dc8] ss:$52 sps:$4 sm:$0xff]   ;;  %v22097_v15 = vld [vmem:[%s29641_s3 + $0x230] ss:$52 sps:$4 sm:$0xff]  }
 0x6b5   :  { %v14910_v56 = vpop.f32.mrf.mxu1  ;;  %15228 = vmatprep.subr.bf16.mxu1 %v22069_v11  ;;  %v22094_v22 = vld [vmem:[%s29641_s3 + $0x2788] ss:$52 sps:$4 sm:$0xff]  }
 0x6b6   :  { %v14911_v57 = vadd.f32 %v14910_v56, %v28130_v5  ;;  %v22081_v5 = vld [vmem:[%s29641_s3 + $0x23e4] ss:$52 sps:$4 sm:$0xff]   ;;  %v22103_v56 = vld [vmem:[%s29641_s3 + $0x1c8] ss:$52 sps:$4 sm:$0xff]  }
 0x6b7   :  { %v14912_v63 = vpop.f32.mrf.mxu1  ;;  %15188 = vmatpush2.bf16.msra.mxu0 %v22064_v20  ;;  %v22102_v20 = vld [vmem:[%s29641_s3 + $0x2724] ss:$52 sps:$4 sm:$0xff]  }
 0x6b8   :  { %15229 = vmatpush2.bf16.msra.mxu1 %v22067_v23  ;;  %15189 = vmatprep.subr.bf16.mxu0 %v22072_v29  ;;  %v22105_v23 = vld [vmem:[%s29641_s3 + $0x1cc] ss:$52 sps:$4 sm:$0xff]  }
 0x6b9   :  { %v14913_v62 = vpop.f32.mrf.mxu1  ;;  %15230 = vmatprep.subr.bf16.mxu1 %v22075_v8  ;;  %v22100_v29 = vld [vmem:[%s29641_s3 + $0x2720] ss:$52 sps:$4 sm:$0xff]   ;;  %v22111_v8 = vld [vmem:[%s29641_s3 + $0x984] ss:$52 sps:$4 sm:$0xff]  }
 0x6ba   :  { %v22109_v63 = vld [vmem:[%s29641_s3 + $0x980] ss:$52 sps:$4 sm:$0xff]   ;;  %v22115_v62 = vld [vmem:[%s29641_s3 + $0x918] ss:$52 sps:$4 sm:$0xff]  }
 0x6bb   :  { %15190 = vmatpush2.bf16.msra.mxu0 %v22070_v25  ;;  %v22106_v25 = vld [vmem:[%s29641_s3 + $0x160] ss:$52 sps:$4 sm:$0xff]  }
 0x6bc   :  { %15231 = vmatpush2.bf16.msra.mxu1 %v22073_v43  ;;  %15191 = vmatprep.subr.bf16.mxu0 %v22078_v2  ;;  %v22117_v43 = vld [vmem:[%s29641_s3 + $0x91c] ss:$52 sps:$4 sm:$0xff]  }
 0x6bd   :  { %15232 = vmatprep.subr.bf16.mxu1 %v22081_v5  ;;  %v22114_v2 = vld [vmem:[%s29641_s3 + $0xfc] ss:$52 sps:$4 sm:$0xff]   ;;  %v22112_v5 = vld [vmem:[%s29641_s3 + $0xf8] ss:$52 sps:$4 sm:$0xff]  }
 0x6bf   :  { %15192 = vmatpush2.bf16.msra.mxu0 %v22076_v9  ;;  %v22123_v9 = vld [vmem:[%s29641_s3 + $0x8b4] ss:$52 sps:$4 sm:$0xff]  }
 0x6c0   :  { %15233 = vmatpush2.bf16.msra.mxu1 %v22079_v59  ;;  %15251 = vmatprep.subr.bf16.mxu0 %v22084_v19  ;;  %v22120_v59 = vld [vmem:[%s29641_s3 + $0x94] ss:$52 sps:$4 sm:$0xff]   ;;  %v22121_v19 = vld [vmem:[%s29641_s3 + $0x8b0] ss:$52 sps:$4 sm:$0xff]  }
 0x6c1   :  { %15284 = vmatprep.subr.bf16.mxu1 %v22087_v33  ;;  %v22118_v33 = vld [vmem:[%s29641_s3 + $0x90] ss:$52 sps:$4 sm:$0xff]  }
 0x6c2   :  { %v14949_v44 = vpop.f32.mrf.mxu0  ;;  %15194 = vmatmul.mubr.bf16.vlgmr.msra.gmra.mxu0 %v25763_v39 }
 0x6c3   :  { %v14950_v12 = vadd.f32 %v14949_v44, %v14909_v55  ;;  %v14990_v60 = vpop.f32.mrf.mxu1  ;;  %15235 = vmatmul.mubr.bf16.vlgmr.msra.gmra.mxu1 %v25765_v17  ;;  %15252 = vmatpush1.bf16.msra.mxu0 %v22082_v6  ;;  %v22129_v6 = vld [vmem:[%s29641_s3 + $0x84c] ss:$52 sps:$4 sm:$0xff]   ;;  %v22135_v44 = vld [vmem:[%s29641_s3 + $0x7e4] ss:$52 sps:$4 sm:$0xff]  }
 0x6c4   :  { %15285 = vmatpush1.bf16.msra.mxu1 %v22085_v52  ;;  %15316 = vmatprep.mubr.bf16.mxu1 %v25099_v30  ;;  %v14951_v35 = vpop.f32.mrf.mxu0  ;;  %v22126_v52 = vld [vmem:[%s29641_s3 + $0x2c] ss:$52 sps:$4 sm:$0xff]  }
 0x6c5   :  { %v28329_v7 = vadd.f32 %v14990_v60, %v14950_v12  ;;  %v14952_v45 = vadd.f32 %v14951_v35, %v14911_v57  ;;  %v14992_v24 = vpop.f32.mrf.mxu1  ;;  %15253 = vmatprep.subr.bf16.mxu0 %v22090_v28  ;;  %15286 = vmatprep.subr.bf16.mxu1 %v22093_v41  ;;  %v22108_v57 = vld [vmem:[%s29641_s3 + $0x164] ss:$52 sps:$4 sm:$0xff]   ;;  %v22127_v28 = vld [vmem:[%s29641_s3 + $0x848] ss:$52 sps:$4 sm:$0xff]   ;;  %v22133_v60 = vld [vmem:[%s29641_s3 + $0x7e0] ss:$52 sps:$4 sm:$0xff]  }
 0x6c6   :  { %v14953_v0 = vpop.f32.mrf.mxu0  ;;  %15275 = vmatprep.mubr.bf16.mxu0 %v22625_v16  ;;  %v22124_v41 = vld [vmem:[%s29641_s3 + $0x28] ss:$52 sps:$4 sm:$0xff]   ;;  %v22132_v12 = vld [vmem:[%s29641_s3 + $0x644] ss:$52 sps:$4 sm:$0xff]  }
 0x6c7   :  { %v28335_v27 = vadd.f32 %v14992_v24, %v14952_v45  ;;  %v14994_v10 = vpop.f32.mrf.mxu1  ;;  %15254 = vmatpush1.bf16.msra.mxu0 %v22088_v1  ;;  %v22130_v1 = vld [vmem:[%s29641_s3 + $0x640] ss:$52 sps:$4 sm:$0xff]   ;;  %v22141_v35 = vld [vmem:[%s29641_s3 + $0x77c] ss:$52 sps:$4 sm:$0xff]   ;;  %v22136_v45 = vld [vmem:[%s29641_s3 + $0x5d8] ss:$52 sps:$4 sm:$0xff]  }
 0x6c8   :  { %15287 = vmatpush1.bf16.msra.mxu1 %v22091_v61  ;;  %v14954_v11 = vpop.f32.mrf.mxu0  ;;  %15255 = vmatprep.subr.bf16.mxu0 %v22096_v47  ;;  %v22138_v61 = vld [vmem:[%s29641_s3 + $0x5dc] ss:$52 sps:$4 sm:$0xff]   ;;  %v22139_v47 = vld [vmem:[%s29641_s3 + $0x778] ss:$52 sps:$4 sm:$0xff]   ;;  %v22147_v24 = vld [vmem:[%s29641_s3 + $0x714] ss:$52 sps:$4 sm:$0xff]  }
 0x6c9   :  { %v14995_v55 = vpop.f32.mrf.mxu1  ;;  %15288 = vmatprep.subr.bf16.mxu1 %v22099_v51  ;;  %v22144_v51 = vld [vmem:[%s29641_s3 + $0x574] ss:$52 sps:$4 sm:$0xff]   ;;  %v22145_v0 = vld [vmem:[%s29641_s3 + $0x710] ss:$52 sps:$4 sm:$0xff]   ;;  %v22150_v11 = vld [vmem:[%s29641_s3 + $0x50c] ss:$52 sps:$4 sm:$0xff]  }
 0x6ca   :  { %v22142_v10 = vld [vmem:[%s29641_s3 + $0x570] ss:$52 sps:$4 sm:$0xff]  }
 0x6cb   :  { %15256 = vmatpush1.bf16.msra.mxu0 %v22094_v22  ;;  %v22153_v22 = vld [vmem:[%s29641_s3 + $0x6ac] ss:$52 sps:$4 sm:$0xff]   ;;  %v22159_v55 = vld [vmem:[%s29641_s3 + $0xcc4] ss:$52 sps:$4 sm:$0xff]  }
 0x6cc   :  { %15289 = vmatpush1.bf16.msra.mxu1 %v22097_v15  ;;  %15257 = vmatprep.subr.bf16.mxu0 %v22102_v20  ;;  %v22151_v15 = vld [vmem:[%s29641_s3 + $0x6a8] ss:$52 sps:$4 sm:$0xff]  }
 0x6cd   :  { %15290 = vmatprep.subr.bf16.mxu1 %v22105_v23  ;;  %v22148_v20 = vld [vmem:[%s29641_s3 + $0x508] ss:$52 sps:$4 sm:$0xff]   ;;  %v22156_v23 = vld [vmem:[%s29641_s3 + $0x4a4] ss:$52 sps:$4 sm:$0xff]  }
 0x6cf   :  { %15258 = vmatpush1.bf16.msra.mxu0 %v22100_v29  ;;  %v22157_v29 = vld [vmem:[%s29641_s3 + $0xcc0] ss:$52 sps:$4 sm:$0xff]  }
 0x6d0   :  { %15291 = vmatpush1.bf16.msra.mxu1 %v22103_v56  ;;  %15325 = vmatprep.subr.bf16.mxu0 %v22111_v8  ;;  %v22154_v56 = vld [vmem:[%s29641_s3 + $0x4a0] ss:$52 sps:$4 sm:$0xff]   ;;  %v22165_v8 = vld [vmem:[%s29641_s3 + $0xc5c] ss:$52 sps:$4 sm:$0xff]  }
 0x6d1   :  { %15292 = vmatprep.subr.bf16.mxu1 %v22108_v57  ;;  %v22162_v57 = vld [vmem:[%s29641_s3 + $0x43c] ss:$52 sps:$4 sm:$0xff]  }
 0x6d2   :  { %19021 = vmatmul.mubr.msk.bf16.vlgmr.msra.gmra.mxu0 %vm13845_vm1, %v25821_v18 }
 0x6d3   :  { %15326 = vmatpush1.bf16.msra.mxu0 %v22109_v63  ;;  %15357 = vmatprep.mubr.bf16.mxu0 %v25101_v37  ;;  %v22163_v63 = vld [vmem:[%s29641_s3 + $0xc58] ss:$52 sps:$4 sm:$0xff]  }
 0x6d4   :  { %15293 = vmatpush1.bf16.msra.mxu1 %v22106_v25  ;;  %15327 = vmatprep.subr.bf16.mxu0 %v22117_v43  ;;  %v22160_v25 = vld [vmem:[%s29641_s3 + $0x438] ss:$52 sps:$4 sm:$0xff]   ;;  %v22171_v43 = vld [vmem:[%s29641_s3 + $0xbf4] ss:$52 sps:$4 sm:$0xff]  }
 0x6d5   :  { %15294 = vmatprep.subr.bf16.mxu1 %v22114_v2  ;;  %v22168_v2 = vld [vmem:[%s29641_s3 + $0x3d4] ss:$52 sps:$4 sm:$0xff]  }
 0x6d7   :  { %15328 = vmatpush1.bf16.msra.mxu0 %v22115_v62  ;;  %v22169_v62 = vld [vmem:[%s29641_s3 + $0xbf0] ss:$52 sps:$4 sm:$0xff]  }
 0x6d8   :  { %15295 = vmatpush1.bf16.msra.mxu1 %v22112_v5  ;;  %15329 = vmatprep.subr.bf16.mxu0 %v22123_v9  ;;  %v22166_v5 = vld [vmem:[%s29641_s3 + $0x3d0] ss:$52 sps:$4 sm:$0xff]   ;;  %v22177_v9 = vld [vmem:[%s29641_s3 + $0xb8c] ss:$52 sps:$4 sm:$0xff]  }
 0x6d9   :  { %15296 = vmatprep.subr.bf16.mxu1 %v22120_v59  ;;  %v22174_v59 = vld [vmem:[%s29641_s3 + $0x36c] ss:$52 sps:$4 sm:$0xff]  }
 0x6db   :  { %15330 = vmatpush1.bf16.msra.mxu0 %v22121_v19  ;;  %v22175_v19 = vld [vmem:[%s29641_s3 + $0xb88] ss:$52 sps:$4 sm:$0xff]  }
 0x6dc   :  { %15297 = vmatpush1.bf16.msra.mxu1 %v22118_v33  ;;  %15331 = vmatprep.subr.bf16.mxu0 %v22129_v6  ;;  %v22172_v33 = vld [vmem:[%s29641_s3 + $0x368] ss:$52 sps:$4 sm:$0xff]  }
 0x6dd   :  { %15298 = vmatprep.subr.bf16.mxu1 %v22126_v52  ;;  %v28505_v6 = vld [vmem:[%s29642_s4 + $0x8] sm:$0x1f]  ;;  %v22180_v52 = vld [vmem:[%s29641_s3 + $0xb24] ss:$52 sps:$4 sm:$0xff]  }
 0x6df   :  { %15332 = vmatpush1.bf16.msra.mxu0 %v22127_v28  ;;  %v22183_v28 = vld [vmem:[%s29641_s3 + $0x1004] ss:$52 sps:$4 sm:$0xff]  }
 0x6e0   :  { %15299 = vmatpush1.bf16.msra.mxu1 %v22124_v41  ;;  %15333 = vmatprep.subr.bf16.mxu0 %v22135_v44  ;;  %v7215_v41 = vrot.slane %v28505_v6, %v23493_v34  ;;  %v22178_v44 = vld [vmem:[%s29641_s3 + $0xb20] ss:$52 sps:$4 sm:$0xff]   ;;  %v22189_v34 = vld [vmem:[%s29641_s3 + $0xf9c] ss:$52 sps:$4 sm:$0xff]  }
 0x6e1   :  { %15300 = vmatprep.subr.bf16.mxu1 %v22132_v12  ;;  %v22181_v12 = vld [vmem:[%s29641_s3 + $0x1000] ss:$52 sps:$4 sm:$0xff]  }
 0x6e3   :  { %15334 = vmatpush1.bf16.msra.mxu0 %v22133_v60  ;;  %v7219_v60 = vrot.slane %v28505_v6, %v23502_v38 }
 0x6e4   :  { %15301 = vmatpush2.bf16.msra.mxu1 %v22130_v1  ;;  %15335 = vmatprep.subr.bf16.mxu0 %v22141_v35  ;;  %v22186_v1 = vld [vmem:[%s29641_s3 + $0xabc] ss:$52 sps:$4 sm:$0xff]  }
 0x6e5   :  { %15302 = vmatprep.subr.bf16.mxu1 %v22138_v61 }
 0x6e7   :  { %15336 = vmatpush1.bf16.msra.mxu0 %v22139_v47 }
 0x6e8   :  { %15303 = vmatpush2.bf16.msra.mxu1 %v22136_v45  ;;  %15337 = vmatprep.subr.bf16.mxu0 %v22147_v24  ;;  %v22184_v45 = vld [vmem:[%s29641_s3 + $0xab8] ss:$52 sps:$4 sm:$0xff]  }
 0x6e9   :  { %15304 = vmatprep.subr.bf16.mxu1 %v22144_v51  ;;  %v22187_v24 = vld [vmem:[%s29641_s3 + $0xf98] ss:$52 sps:$4 sm:$0xff]   ;;  %v22192_v51 = vld [vmem:[%s29641_s3 + $0xa54] ss:$52 sps:$4 sm:$0xff]  }
 0x6eb   :  { %15338 = vmatpush1.bf16.msra.mxu0 %v22145_v0 }
 0x6ec   :  { %15305 = vmatpush2.bf16.msra.mxu1 %v22142_v10  ;;  %15339 = vmatprep.subr.bf16.mxu0 %v22153_v22 }
 0x6ed   :  { %15306 = vmatprep.subr.bf16.mxu1 %v22150_v11  ;;  %v22195_v11 = vld [vmem:[%s29641_s3 + $0xf34] ss:$52 sps:$4 sm:$0xff]  }
 0x6ef   :  { %15340 = vmatpush1.bf16.msra.mxu0 %v22151_v15 }
 0x6f0   :  { %15307 = vmatpush2.bf16.msra.mxu1 %v22148_v20  ;;  %15341 = vmatprep.subr.bf16.mxu0 %v22159_v55 }
 0x6f1   :  { %15308 = vmatprep.subr.bf16.mxu1 %v22156_v23  ;;  %v22190_v23 = vld [vmem:[%s29641_s3 + $0xa50] ss:$52 sps:$4 sm:$0xff]  }
 0x6f3   :  { %15342 = vmatpush2.bf16.msra.mxu0 %v22157_v29 }
 0x6f4   :  { %15309 = vmatpush2.bf16.msra.mxu1 %v22154_v56  ;;  %15343 = vmatprep.subr.bf16.mxu0 %v22165_v8  ;;  %v22193_v56 = vld [vmem:[%s29641_s3 + $0xf30] ss:$52 sps:$4 sm:$0xff]   ;;  %v22198_v8 = vld [vmem:[%s29641_s3 + $0x9ec] ss:$52 sps:$4 sm:$0xff]  }
 0x6f5   :  { %15310 = vmatprep.subr.bf16.mxu1 %v22162_v57 }
 0x6f7   :  { %15344 = vmatpush2.bf16.msra.mxu0 %v22163_v63  ;;  %v22201_v63 = vld [vmem:[%s29641_s3 + $0xecc] ss:$52 sps:$4 sm:$0xff]  }
 0x6f8   :  { %15311 = vmatpush2.bf16.msra.mxu1 %v22160_v25  ;;  %15345 = vmatprep.subr.bf16.mxu0 %v22171_v43  ;;  %v22196_v25 = vld [vmem:[%s29641_s3 + $0x9e8] ss:$52 sps:$4 sm:$0xff]  }
 0x6f9   :  { %15312 = vmatprep.subr.bf16.mxu1 %v22168_v2  ;;  %v22199_v43 = vld [vmem:[%s29641_s3 + $0xec8] ss:$52 sps:$4 sm:$0xff]   ;;  %v22207_v2 = vld [vmem:[%s29641_s3 + $0x1684] ss:$52 sps:$4 sm:$0xff]  }
 0x6fb   :  { %15346 = vmatpush2.bf16.msra.mxu0 %v22169_v62  ;;  %v22204_v62 = vld [vmem:[%s29641_s3 + $0xe64] ss:$52 sps:$4 sm:$0xff]  }
 0x6fc   :  { %15313 = vmatpush2.bf16.msra.mxu1 %v22166_v5  ;;  %15347 = vmatprep.subr.bf16.mxu0 %v22177_v9  ;;  %v22205_v5 = vld [vmem:[%s29641_s3 + $0x1680] ss:$52 sps:$4 sm:$0xff]  }
 0x6fd   :  { %15314 = vmatprep.subr.bf16.mxu1 %v22174_v59  ;;  %v22202_v9 = vld [vmem:[%s29641_s3 + $0xe60] ss:$52 sps:$4 sm:$0xff]   ;;  %v22213_v59 = vld [vmem:[%s29641_s3 + $0x161c] ss:$52 sps:$4 sm:$0xff]  }
 0x6ff   :  { %15348 = vmatpush2.bf16.msra.mxu0 %v22175_v19  ;;  %v22210_v19 = vld [vmem:[%s29641_s3 + $0xdfc] ss:$52 sps:$4 sm:$0xff]  }
 0x700   :  { %15315 = vmatpush2.bf16.msra.mxu1 %v22172_v33  ;;  %15349 = vmatprep.subr.bf16.mxu0 %v22180_v52  ;;  %v22211_v33 = vld [vmem:[%s29641_s3 + $0x1618] ss:$52 sps:$4 sm:$0xff]  }
 0x701   :  { %15366 = vmatprep.subr.bf16.mxu1 %v22183_v28  ;;  %v22208_v52 = vld [vmem:[%s29641_s3 + $0xdf8] ss:$52 sps:$4 sm:$0xff]   ;;  %v22219_v28 = vld [vmem:[%s29641_s3 + $0x15b4] ss:$52 sps:$4 sm:$0xff]  }
 0x702   :  { %v15031_v35 = vpop.f32.mrf.mxu0 }
 0x703   :  { %v15032_v61 = vadd.f32 %v15031_v35, %v7215_v41  ;;  %v15072_v47 = vpop.f32.mrf.mxu1  ;;  %15317 = vmatmul.mubr.bf16.vlgmr.msra.gmra.mxu1 %v25312_v36  ;;  %15350 = vmatpush2.bf16.msra.mxu0 %v22178_v44  ;;  %v22216_v41 = vld [vmem:[%s29641_s3 + $0xd94] ss:$52 sps:$4 sm:$0xff]   ;;  %v22217_v44 = vld [vmem:[%s29641_s3 + $0x15b0] ss:$52 sps:$4 sm:$0xff]  }
 0x704   :  { %15367 = vmatpush1.bf16.msra.mxu1 %v22181_v12  ;;  %15398 = vmatprep.mubr.bf16.mxu1 %v25319_v21  ;;  %v15033_v38 = vpop.f32.mrf.mxu0  ;;  %v22214_v12 = vld [vmem:[%s29641_s3 + $0xd90] ss:$52 sps:$4 sm:$0xff]   ;;  %v22220_v35 = vld [vmem:[%s29641_s3 + $0xd28] ss:$52 sps:$4 sm:$0xff]  }
 0x705   :  { %v28540_v0 = vadd.f32 %v15072_v47, %v15032_v61  ;;  %v15034_v10 = vadd.f32 %v15033_v38, %v7219_v60  ;;  %v15074_v22 = vpop.f32.mrf.mxu1  ;;  %15351 = vmatprep.subr.bf16.mxu0 %v22186_v1  ;;  %15368 = vmatprep.subr.bf16.mxu1 %v22189_v34  ;;  %v22225_v60 = vld [vmem:[%s29641_s3 + $0x154c] ss:$52 sps:$4 sm:$0xff]   ;;  %v22223_v34 = vld [vmem:[%s29641_s3 + $0x1548] ss:$52 sps:$4 sm:$0xff]   ;;  %v22231_v61 = vld [vmem:[%s29641_s3 + $0x14e4] ss:$52 sps:$4 sm:$0xff]  }
 0x706   :  { %v15035_v15 = vpop.f32.mrf.mxu0  ;;  %v22222_v1 = vld [vmem:[%s29641_s3 + $0xd2c] ss:$52 sps:$4 sm:$0xff]   ;;  %v22228_v47 = vld [vmem:[%s29641_s3 + $0x1344] ss:$52 sps:$4 sm:$0xff]  }
 0x707   :  { %v28545_v20 = vadd.f32 %v15074_v22, %v15034_v10  ;;  %v15076_v55 = vpop.f32.mrf.mxu1  ;;  %15352 = vmatpush2.bf16.msra.mxu0 %v22184_v45  ;;  %v22229_v45 = vld [vmem:[%s29641_s3 + $0x14e0] ss:$52 sps:$4 sm:$0xff]   ;;  %v22235_v10 = vld [vmem:[%s29641_s3 + $0x1478] ss:$52 sps:$4 sm:$0xff]  }
 0x708   :  { %15369 = vmatpush1.bf16.msra.mxu1 %v22187_v24  ;;  %v15036_v29 = vpop.f32.mrf.mxu0  ;;  %15353 = vmatprep.subr.bf16.mxu0 %v22192_v51  ;;  %v22226_v38 = vld [vmem:[%s29641_s3 + $0x1340] ss:$52 sps:$4 sm:$0xff]   ;;  %v22237_v24 = vld [vmem:[%s29641_s3 + $0x147c] ss:$52 sps:$4 sm:$0xff]   ;;  %v22232_v22 = vld [vmem:[%s29641_s3 + $0x12d8] ss:$52 sps:$4 sm:$0xff]  }
 0x709   :  { %v15077_v57 = vpop.f32.mrf.mxu1  ;;  %15370 = vmatprep.subr.bf16.mxu1 %v22195_v11  ;;  %v22234_v51 = vld [vmem:[%s29641_s3 + $0x12dc] ss:$52 sps:$4 sm:$0xff]   ;;  %v22243_v11 = vld [vmem:[%s29641_s3 + $0x1414] ss:$52 sps:$4 sm:$0xff]   ;;  %v22249_v29 = vld [vmem:[%s29641_s3 + $0x13ac] ss:$52 sps:$4 sm:$0xff]  }
 0x70a   :  { %v22240_v15 = vld [vmem:[%s29641_s3 + $0x1274] ss:$52 sps:$4 sm:$0xff]   ;;  %v22241_v55 = vld [vmem:[%s29641_s3 + $0x1410] ss:$52 sps:$4 sm:$0xff]  }
 0x70b   :  { %15354 = vmatpush2.bf16.msra.mxu0 %v22190_v23  ;;  %v22238_v23 = vld [vmem:[%s29641_s3 + $0x1270] ss:$52 sps:$4 sm:$0xff]   ;;  %v22244_v57 = vld [vmem:[%s29641_s3 + $0x1208] ss:$52 sps:$4 sm:$0xff]  }
 0x70c   :  { %15371 = vmatpush1.bf16.msra.mxu1 %v22193_v56  ;;  %15355 = vmatprep.subr.bf16.mxu0 %v22198_v8  ;;  %v22246_v56 = vld [vmem:[%s29641_s3 + $0x120c] ss:$52 sps:$4 sm:$0xff]   ;;  %v22247_v8 = vld [vmem:[%s29641_s3 + $0x13a8] ss:$52 sps:$4 sm:$0xff]  }
 0x70d   :  { %15372 = vmatprep.subr.bf16.mxu1 %v22201_v63  ;;  %v22255_v63 = vld [vmem:[%s29641_s3 + $0x19c4] ss:$52 sps:$4 sm:$0xff]  }
 0x70f   :  { %15356 = vmatpush2.bf16.msra.mxu0 %v22196_v25  ;;  %v22252_v25 = vld [vmem:[%s29641_s3 + $0x11a4] ss:$52 sps:$4 sm:$0xff]  }
 0x710   :  { %15373 = vmatpush1.bf16.msra.mxu1 %v22199_v43  ;;  %15407 = vmatprep.subr.bf16.mxu0 %v22207_v2  ;;  %v22253_v43 = vld [vmem:[%s29641_s3 + $0x19c0] ss:$52 sps:$4 sm:$0xff]  }
 0x711   :  { %15374 = vmatprep.subr.bf16.mxu1 %v22204_v62  ;;  %v22250_v2 = vld [vmem:[%s29641_s3 + $0x11a0] ss:$52 sps:$4 sm:$0xff]   ;;  %v22261_v62 = vld [vmem:[%s29641_s3 + $0x195c] ss:$52 sps:$4 sm:$0xff]  }
 0x712   :  { %15358 = vmatmul.mubr.bf16.vlgmr.msra.gmra.mxu0 %v25314_v49 }
 0x713   :  { %15408 = vmatpush1.bf16.msra.mxu0 %v22205_v5  ;;  %15439 = vmatprep.mubr.bf16.mxu0 %v25330_v40  ;;  %v22258_v5 = vld [vmem:[%s29641_s3 + $0x113c] ss:$52 sps:$4 sm:$0xff]  }
 0x714   :  { %15375 = vmatpush1.bf16.msra.mxu1 %v22202_v9  ;;  %15409 = vmatprep.subr.bf16.mxu0 %v22213_v59  ;;  %v22259_v9 = vld [vmem:[%s29641_s3 + $0x1958] ss:$52 sps:$4 sm:$0xff]  }
 0x715   :  { %15376 = vmatprep.subr.bf16.mxu1 %v22210_v19  ;;  %v22256_v59 = vld [vmem:[%s29641_s3 + $0x1138] ss:$52 sps:$4 sm:$0xff]   ;;  %v22267_v19 = vld [vmem:[%s29641_s3 + $0x18f4] ss:$52 sps:$4 sm:$0xff]  }
 0x717   :  { %15410 = vmatpush1.bf16.msra.mxu0 %v22211_v33  ;;  %v22264_v33 = vld [vmem:[%s29641_s3 + $0x10d4] ss:$52 sps:$4 sm:$0xff]  }
 0x718   :  { %15377 = vmatpush1.bf16.msra.mxu1 %v22208_v52  ;;  %15411 = vmatprep.subr.bf16.mxu0 %v22219_v28  ;;  %v22265_v52 = vld [vmem:[%s29641_s3 + $0x18f0] ss:$52 sps:$4 sm:$0xff]  }
 0x719   :  { %15378 = vmatprep.subr.bf16.mxu1 %v22216_v41  ;;  %v22262_v28 = vld [vmem:[%s29641_s3 + $0x10d0] ss:$52 sps:$4 sm:$0xff]   ;;  %v22273_v41 = vld [vmem:[%s29641_s3 + $0x188c] ss:$52 sps:$4 sm:$0xff]  }
 0x71b   :  { %15412 = vmatpush1.bf16.msra.mxu0 %v22217_v44  ;;  %v22270_v44 = vld [vmem:[%s29641_s3 + $0x106c] ss:$52 sps:$4 sm:$0xff]  }
 0x71c   :  { %15379 = vmatpush1.bf16.msra.mxu1 %v22214_v12  ;;  %15413 = vmatprep.subr.bf16.mxu0 %v22225_v60  ;;  %v22271_v12 = vld [vmem:[%s29641_s3 + $0x1888] ss:$52 sps:$4 sm:$0xff]  }
 0x71d   :  { %15380 = vmatprep.subr.bf16.mxu1 %v22222_v1  ;;  %v22268_v60 = vld [vmem:[%s29641_s3 + $0x1068] ss:$52 sps:$4 sm:$0xff]   ;;  %v22276_v1 = vld [vmem:[%s29641_s3 + $0x1824] ss:$52 sps:$4 sm:$0xff]  }
 0x71f   :  { %15414 = vmatpush1.bf16.msra.mxu0 %v22223_v34  ;;  %v22279_v34 = vld [vmem:[%s29641_s3 + $0x1d04] ss:$52 sps:$4 sm:$0xff]  }
 0x720   :  { %15381 = vmatpush1.bf16.msra.mxu1 %v22220_v35  ;;  %15415 = vmatprep.subr.bf16.mxu0 %v22231_v61  ;;  %v22274_v35 = vld [vmem:[%s29641_s3 + $0x1820] ss:$52 sps:$4 sm:$0xff]  }
 0x721   :  { %15382 = vmatprep.subr.bf16.mxu1 %v22228_v47  ;;  %v22277_v61 = vld [vmem:[%s29641_s3 + $0x1d00] ss:$52 sps:$4 sm:$0xff]   ;;  %v22282_v47 = vld [vmem:[%s29641_s3 + $0x17bc] ss:$52 sps:$4 sm:$0xff]  }
 0x723   :  { %15416 = vmatpush1.bf16.msra.mxu0 %v22229_v45  ;;  %v22285_v45 = vld [vmem:[%s29641_s3 + $0x1c9c] ss:$52 sps:$4 sm:$0xff]  }
 0x724   :  { %15383 = vmatpush2.bf16.msra.mxu1 %v22226_v38  ;;  %15417 = vmatprep.subr.bf16.mxu0 %v22237_v24 }
 0x725   :  { %15384 = vmatprep.subr.bf16.mxu1 %v22234_v51 }
 0x727   :  { %15418 = vmatpush1.bf16.msra.mxu0 %v22235_v10  ;;  %v22280_v10 = vld [vmem:[%s29641_s3 + $0x17b8] ss:$52 sps:$4 sm:$0xff]  }
 0x728   :  { %15385 = vmatpush2.bf16.msra.mxu1 %v22232_v22  ;;  %15419 = vmatprep.subr.bf16.mxu0 %v22243_v11  ;;  %v22283_v11 = vld [vmem:[%s29641_s3 + $0x1c98] ss:$52 sps:$4 sm:$0xff]  }
 0x729   :  { %15386 = vmatprep.subr.bf16.mxu1 %v22240_v15 }
 0x72b   :  { %15420 = vmatpush1.bf16.msra.mxu0 %v22241_v55 }
 0x72c   :  { %15387 = vmatpush2.bf16.msra.mxu1 %v22238_v23  ;;  %15421 = vmatprep.subr.bf16.mxu0 %v22249_v29  ;;  %v22291_v29 = vld [vmem:[%s29641_s3 + $0x1c34] ss:$52 sps:$4 sm:$0xff]  }
 0x72d   :  { %15388 = vmatprep.subr.bf16.mxu1 %v22246_v56 }
 0x72f   :  { %15422 = vmatpush1.bf16.msra.mxu0 %v22247_v8 }
 0x730   :  { %15389 = vmatpush2.bf16.msra.mxu1 %v22244_v57  ;;  %15423 = vmatprep.subr.bf16.mxu0 %v22255_v63  ;;  %v22286_v63 = vld [vmem:[%s29641_s3 + $0x1750] ss:$52 sps:$4 sm:$0xff]  }
 0x731   :  { %15390 = vmatprep.subr.bf16.mxu1 %v22252_v25 }
 0x733   :  { %15424 = vmatpush2.bf16.msra.mxu0 %v22253_v43  ;;  %v22294_v43 = vld [vmem:[%s29641_s3 + $0x16ec] ss:$52 sps:$4 sm:$0xff]  }
 0x734   :  { %15391 = vmatpush2.bf16.msra.mxu1 %v22250_v2  ;;  %15425 = vmatprep.subr.bf16.mxu0 %v22261_v62  ;;  %v22297_v62 = vld [vmem:[%s29641_s3 + $0x1bcc] ss:$52 sps:$4 sm:$0xff]  }
 0x735   :  { %15392 = vmatprep.subr.bf16.mxu1 %v22258_v5  ;;  %v22292_v5 = vld [vmem:[%s29641_s3 + $0x16e8] ss:$52 sps:$4 sm:$0xff]  }
 0x737   :  { %15426 = vmatpush2.bf16.msra.mxu0 %v22259_v9  ;;  %v22295_v9 = vld [vmem:[%s29641_s3 + $0x1bc8] ss:$52 sps:$4 sm:$0xff]  }
 0x738   :  { %15393 = vmatpush2.bf16.msra.mxu1 %v22256_v59  ;;  %15427 = vmatprep.subr.bf16.mxu0 %v22267_v19  ;;  %v22303_v59 = vld [vmem:[%s29641_s3 + $0x2384] ss:$52 sps:$4 sm:$0xff]  }
 0x739   :  { %15394 = vmatprep.subr.bf16.mxu1 %v22264_v33  ;;  %v22300_v19 = vld [vmem:[%s29641_s3 + $0x1b64] ss:$52 sps:$4 sm:$0xff]   ;;  %v22301_v33 = vld [vmem:[%s29641_s3 + $0x2380] ss:$52 sps:$4 sm:$0xff]  }
 0x73b   :  { %15428 = vmatpush2.bf16.msra.mxu0 %v22265_v52  ;;  %v22298_v52 = vld [vmem:[%s29641_s3 + $0x1b60] ss:$52 sps:$4 sm:$0xff]  }
 0x73c   :  { %15395 = vmatpush2.bf16.msra.mxu1 %v22262_v28  ;;  %15429 = vmatprep.subr.bf16.mxu0 %v22273_v41  ;;  %v22309_v28 = vld [vmem:[%s29641_s3 + $0x231c] ss:$52 sps:$4 sm:$0xff]  }
 0x73d   :  { %15396 = vmatprep.subr.bf16.mxu1 %v22270_v44  ;;  %v22306_v41 = vld [vmem:[%s29641_s3 + $0x1afc] ss:$52 sps:$4 sm:$0xff]   ;;  %v22307_v44 = vld [vmem:[%s29641_s3 + $0x2318] ss:$52 sps:$4 sm:$0xff]  }
 0x73f   :  { %15430 = vmatpush2.bf16.msra.mxu0 %v22271_v12  ;;  %v22304_v12 = vld [vmem:[%s29641_s3 + $0x1af8] ss:$52 sps:$4 sm:$0xff]  }
 0x740   :  { %15397 = vmatpush2.bf16.msra.mxu1 %v22268_v60  ;;  %15431 = vmatprep.subr.bf16.mxu0 %v22276_v1  ;;  %v22315_v60 = vld [vmem:[%s29641_s3 + $0x22b4] ss:$52 sps:$4 sm:$0xff]  }
 0x741   :  { %15448 = vmatprep.subr.bf16.mxu1 %v22279_v34  ;;  %v22312_v1 = vld [vmem:[%s29641_s3 + $0x1a94] ss:$52 sps:$4 sm:$0xff]   ;;  %v22313_v34 = vld [vmem:[%s29641_s3 + $0x22b0] ss:$52 sps:$4 sm:$0xff]  }
 0x742   :  { %v15113_v38 = vpop.f32.mrf.mxu0 }
 0x743   :  { %v15114_v24 = vadd.f32 %v15113_v38, %v28540_v0  ;;  %v15154_v51 = vpop.f32.mrf.mxu1  ;;  %15399 = vmatmul.mubr.bf16.vlgmr.msra.gmra.mxu1 %v25537_v26  ;;  %15432 = vmatpush2.bf16.msra.mxu0 %v22274_v35  ;;  %v22288_v0 = vld [vmem:[%s29641_s3 + $0x1754] ss:$52 sps:$4 sm:$0xff]   ;;  %v22310_v35 = vld [vmem:[%s29641_s3 + $0x1a90] ss:$52 sps:$4 sm:$0xff]  }
 0x744   :  { %15449 = vmatpush1.bf16.msra.mxu1 %v22277_v61  ;;  %15480 = vmatprep.mubr.bf16.mxu1 %v25545_v14  ;;  %v15115_v22 = vpop.f32.mrf.mxu0  ;;  %v22321_v61 = vld [vmem:[%s29641_s3 + $0x224c] ss:$52 sps:$4 sm:$0xff]   ;;  %v22316_v38 = vld [vmem:[%s29641_s3 + $0x1a28] ss:$52 sps:$4 sm:$0xff]  }
 0x745   :  { %v28741_v15 = vadd.f32 %v15154_v51, %v15114_v24  ;;  %v15116_v55 = vadd.f32 %v15115_v22, %v28545_v20  ;;  %v15156_v23 = vpop.f32.mrf.mxu1  ;;  %15433 = vmatprep.subr.bf16.mxu0 %v22282_v47  ;;  %15450 = vmatprep.subr.bf16.mxu1 %v22285_v45  ;;  %v22289_v20 = vld [vmem:[%s29641_s3 + $0x1c30] ss:$52 sps:$4 sm:$0xff]   ;;  %v22318_v47 = vld [vmem:[%s29641_s3 + $0x1a2c] ss:$52 sps:$4 sm:$0xff]   ;;  %v22319_v45 = vld [vmem:[%s29641_s3 + $0x2248] ss:$52 sps:$4 sm:$0xff]  }
 0x746   :  { %v15117_v56 = vpop.f32.mrf.mxu0  ;;  %v22327_v24 = vld [vmem:[%s29641_s3 + $0x21e4] ss:$52 sps:$4 sm:$0xff]   ;;  %v22322_v22 = vld [vmem:[%s29641_s3 + $0x2040] ss:$52 sps:$4 sm:$0xff]  }
 0x747   :  { %v28747_v8 = vadd.f32 %v15156_v23, %v15116_v55  ;;  %v15158_v57 = vpop.f32.mrf.mxu1  ;;  %15434 = vmatpush2.bf16.msra.mxu0 %v22280_v10  ;;  %v22324_v51 = vld [vmem:[%s29641_s3 + $0x2044] ss:$52 sps:$4 sm:$0xff]   ;;  %v22325_v10 = vld [vmem:[%s29641_s3 + $0x21e0] ss:$52 sps:$4 sm:$0xff]  }
 0x748   :  { %15451 = vmatpush1.bf16.msra.mxu1 %v22283_v11  ;;  %v15118_v25 = vpop.f32.mrf.mxu0  ;;  %15435 = vmatprep.subr.bf16.mxu0 %v22288_v0  ;;  %v22333_v11 = vld [vmem:[%s29641_s3 + $0x217c] ss:$52 sps:$4 sm:$0xff]   ;;  %v22331_v55 = vld [vmem:[%s29641_s3 + $0x2178] ss:$52 sps:$4 sm:$0xff]   ;;  %v22336_v56 = vld [vmem:[%s29641_s3 + $0x1f74] ss:$52 sps:$4 sm:$0xff]  }
 0x749   :  { %v15159_v2 = vpop.f32.mrf.mxu1  ;;  %15452 = vmatprep.subr.bf16.mxu1 %v22291_v29  ;;  %v22330_v0 = vld [vmem:[%s29641_s3 + $0x1fdc] ss:$52 sps:$4 sm:$0xff]   ;;  %v22328_v23 = vld [vmem:[%s29641_s3 + $0x1fd8] ss:$52 sps:$4 sm:$0xff]   ;;  %v22339_v29 = vld [vmem:[%s29641_s3 + $0x2114] ss:$52 sps:$4 sm:$0xff]  }
 0x74a   :  { %v22337_v57 = vld [vmem:[%s29641_s3 + $0x2110] ss:$52 sps:$4 sm:$0xff]   ;;  %v22345_v25 = vld [vmem:[%s29641_s3 + $0x20ac] ss:$52 sps:$4 sm:$0xff]   ;;  %v22340_v2 = vld [vmem:[%s29641_s3 + $0x1f08] ss:$52 sps:$4 sm:$0xff]  }
 0x74b   :  { %15436 = vmatpush2.bf16.msra.mxu0 %v22286_v63  ;;  %v22334_v63 = vld [vmem:[%s29641_s3 + $0x1f70] ss:$52 sps:$4 sm:$0xff]  }
 0x74c   :  { %15453 = vmatpush1.bf16.msra.mxu1 %v22289_v20  ;;  %15437 = vmatprep.subr.bf16.mxu0 %v22294_v43  ;;  %v22342_v20 = vld [vmem:[%s29641_s3 + $0x1f0c] ss:$52 sps:$4 sm:$0xff]   ;;  %v22343_v43 = vld [vmem:[%s29641_s3 + $0x20a8] ss:$52 sps:$4 sm:$0xff]  }
 0x74d   :  { %15454 = vmatprep.subr.bf16.mxu1 %v22297_v62  ;;  %v22351_v62 = vld [vmem:[%s29641_s3 + $0x26c4] ss:$52 sps:$4 sm:$0xff]  }
 0x74f   :  { %15438 = vmatpush2.bf16.msra.mxu0 %v22292_v5  ;;  %v22348_v5 = vld [vmem:[%s29641_s3 + $0x1ea4] ss:$52 sps:$4 sm:$0xff]  }
 0x750   :  { %15455 = vmatpush1.bf16.msra.mxu1 %v22295_v9  ;;  %15489 = vmatprep.subr.bf16.mxu0 %v22303_v59  ;;  %v22349_v9 = vld [vmem:[%s29641_s3 + $0x26c0] ss:$52 sps:$4 sm:$0xff]  }
 0x751   :  { %15456 = vmatprep.subr.bf16.mxu1 %v22300_v19  ;;  %v22346_v59 = vld [vmem:[%s29641_s3 + $0x1ea0] ss:$52 sps:$4 sm:$0xff]   ;;  %v22357_v19 = vld [vmem:[%s29641_s3 + $0x265c] ss:$52 sps:$4 sm:$0xff]  }
 0x752   :  { %15440 = vmatmul.mubr.bf16.vlgmr.msra.gmra.mxu0 %v25542_v13 }
 0x753   :  { %15490 = vmatpush1.bf16.msra.mxu0 %v22301_v33  ;;  %15521 = vmatprep.mubr.bf16.mxu0 %v25582_v54  ;;  %v22354_v33 = vld [vmem:[%s29641_s3 + $0x1e3c] ss:$52 sps:$4 sm:$0xff]  }
 0x754   :  { %15457 = vmatpush1.bf16.msra.mxu1 %v22298_v52  ;;  %15491 = vmatprep.subr.bf16.mxu0 %v22309_v28  ;;  %v22355_v52 = vld [vmem:[%s29641_s3 + $0x2658] ss:$52 sps:$4 sm:$0xff]  }
 0x755   :  { %15458 = vmatprep.subr.bf16.mxu1 %v22306_v41  ;;  %v22352_v28 = vld [vmem:[%s29641_s3 + $0x1e38] ss:$52 sps:$4 sm:$0xff]   ;;  %v22363_v41 = vld [vmem:[%s29641_s3 + $0x25f4] ss:$52 sps:$4 sm:$0xff]  }
 0x757   :  { %15492 = vmatpush1.bf16.msra.mxu0 %v22307_v44  ;;  %v22360_v44 = vld [vmem:[%s29641_s3 + $0x1dd4] ss:$52 sps:$4 sm:$0xff]  }
 0x758   :  { %15459 = vmatpush1.bf16.msra.mxu1 %v22304_v12  ;;  %15493 = vmatprep.subr.bf16.mxu0 %v22315_v60  ;;  %v22361_v12 = vld [vmem:[%s29641_s3 + $0x25f0] ss:$52 sps:$4 sm:$0xff]  }
 0x759   :  { %15460 = vmatprep.subr.bf16.mxu1 %v22312_v1  ;;  %v22358_v60 = vld [vmem:[%s29641_s3 + $0x1dd0] ss:$52 sps:$4 sm:$0xff]   ;;  %v22369_v1 = vld [vmem:[%s29641_s3 + $0x258c] ss:$52 sps:$4 sm:$0xff]  }
 0x75b   :  { %15494 = vmatpush1.bf16.msra.mxu0 %v22313_v34  ;;  %v22366_v34 = vld [vmem:[%s29641_s3 + $0x1d6c] ss:$52 sps:$4 sm:$0xff]  }
 0x75c   :  { %15461 = vmatpush1.bf16.msra.mxu1 %v22310_v35  ;;  %15495 = vmatprep.subr.bf16.mxu0 %v22321_v61  ;;  %v22367_v35 = vld [vmem:[%s29641_s3 + $0x2588] ss:$52 sps:$4 sm:$0xff]  }
 0x75d   :  { %15462 = vmatprep.subr.bf16.mxu1 %v22318_v47  ;;  %v22364_v61 = vld [vmem:[%s29641_s3 + $0x1d68] ss:$52 sps:$4 sm:$0xff]   ;;  %v22372_v47 = vld [vmem:[%s29641_s3 + $0x2524] ss:$52 sps:$4 sm:$0xff]  }
 0x75f   :  { %15496 = vmatpush1.bf16.msra.mxu0 %v22319_v45  ;;  %v22375_v45 = vld [vmem:[%s29641_s3 + $0x2864] ss:$52 sps:$4 sm:$0xff]  }
 0x760   :  { %15463 = vmatpush1.bf16.msra.mxu1 %v22316_v38  ;;  %15497 = vmatprep.subr.bf16.mxu0 %v22327_v24  ;;  %v22370_v38 = vld [vmem:[%s29641_s3 + $0x2520] ss:$52 sps:$4 sm:$0xff]  }
 0x761   :  { %15464 = vmatprep.subr.bf16.mxu1 %v22324_v51  ;;  %v22373_v24 = vld [vmem:[%s29641_s3 + $0x2860] ss:$52 sps:$4 sm:$0xff]   ;;  %v22378_v51 = vld [vmem:[%s29641_s3 + $0x24bc] ss:$52 sps:$4 sm:$0xff]  }
 0x763   :  { %15498 = vmatpush1.bf16.msra.mxu0 %v22325_v10  ;;  %v22381_v10 = vld [vmem:[%s29641_s3 + $0x27fc] ss:$52 sps:$4 sm:$0xff]  }
 0x764   :  { %15465 = vmatpush2.bf16.msra.mxu1 %v22322_v22  ;;  %15499 = vmatprep.subr.bf16.mxu0 %v22333_v11 }
 0x765   :  { %15466 = vmatprep.subr.bf16.mxu1 %v22330_v0 }
 0x767   :  { %15500 = vmatpush1.bf16.msra.mxu0 %v22331_v55  ;;  %v22376_v55 = vld [vmem:[%s29641_s3 + $0x24b8] ss:$52 sps:$4 sm:$0xff]  }
 0x768   :  { %15467 = vmatpush2.bf16.msra.mxu1 %v22328_v23  ;;  %15501 = vmatprep.subr.bf16.mxu0 %v22339_v29  ;;  %v22379_v29 = vld [vmem:[%s29641_s3 + $0x27f8] ss:$52 sps:$4 sm:$0xff]  }
 0x769   :  { %15468 = vmatprep.subr.bf16.mxu1 %v22336_v56  ;;  %v22384_v56 = vld [vmem:[%s29641_s3 + $0x2454] ss:$52 sps:$4 sm:$0xff]  }
 0x76b   :  { %15502 = vmatpush1.bf16.msra.mxu0 %v22337_v57 }
 0x76c   :  { %15469 = vmatpush2.bf16.msra.mxu1 %v22334_v63  ;;  %15503 = vmatprep.subr.bf16.mxu0 %v22345_v25  ;;  %v22387_v25 = vld [vmem:[%s29641_s3 + $0x2794] ss:$52 sps:$4 sm:$0xff]  }
 0x76d   :  { %15470 = vmatprep.subr.bf16.mxu1 %v22342_v20 }
 0x76f   :  { %15504 = vmatpush1.bf16.msra.mxu0 %v22343_v43 }
 0x770   :  { %15471 = vmatpush2.bf16.msra.mxu1 %v22340_v2  ;;  %15505 = vmatprep.subr.bf16.mxu0 %v22351_v62  ;;  %v22382_v62 = vld [vmem:[%s29641_s3 + $0x2450] ss:$52 sps:$4 sm:$0xff]  }
 0x771   :  { %15472 = vmatprep.subr.bf16.mxu1 %v22348_v5 }
 0x773   :  { %15506 = vmatpush2.bf16.msra.mxu0 %v22349_v9  ;;  %v22390_v9 = vld [vmem:[%s29641_s3 + $0x23ec] ss:$52 sps:$4 sm:$0xff]  }
 0x774   :  { %15473 = vmatpush2.bf16.msra.mxu1 %v22346_v59  ;;  %15507 = vmatprep.subr.bf16.mxu0 %v22357_v19  ;;  %v22393_v59 = vld [vmem:[%s29641_s3 + $0x272c] ss:$52 sps:$4 sm:$0xff]   ;;  %v22388_v19 = vld [vmem:[%s29641_s3 + $0x23e8] ss:$52 sps:$4 sm:$0xff]  }
 0x775   :  { %15474 = vmatprep.subr.bf16.mxu1 %v22354_v33  ;;  %v22391_v33 = vld [vmem:[%s29641_s3 + $0x2728] ss:$52 sps:$4 sm:$0xff]  }
 0x777   :  { %15508 = vmatpush2.bf16.msra.mxu0 %v22355_v52  ;;  %v22394_v52 = vld [vmem:[%s29641_s3 + $0x648] ss:$52 sps:$4 sm:$0xff]  }
 0x778   :  { %15475 = vmatpush2.bf16.msra.mxu1 %v22352_v28  ;;  %15509 = vmatprep.subr.bf16.mxu0 %v22363_v41  ;;  %v22395_v28 = vld [vmem:[%s29641_s3 + $0xcc8] ss:$52 sps:$4 sm:$0xff]  }
 0x779   :  { %15476 = vmatprep.subr.bf16.mxu1 %v22360_v44  ;;  %v22396_v41 = vld [vmem:[%s29641_s3 + $0x308] ss:$52 sps:$4 sm:$0xff]  }
 0x77a   :  { %v22397_v44 = vld [vmem:[%s29641_s3 + $0x988] ss:$52 sps:$4 sm:$0xff]  }
 0x77b   :  { %15510 = vmatpush2.bf16.msra.mxu0 %v22361_v12  ;;  %v22398_v12 = vld [vmem:[%s29641_s3 + $0x5e0] ss:$52 sps:$4 sm:$0xff]  }
 0x77c   :  { %15477 = vmatpush2.bf16.msra.mxu1 %v22358_v60  ;;  %15511 = vmatprep.subr.bf16.mxu0 %v22369_v1  ;;  %v22399_v1 = vld [vmem:[%s29641_s3 + $0xc60] ss:$52 sps:$4 sm:$0xff]  }
 0x77d   :  { %15478 = vmatprep.subr.bf16.mxu1 %v22366_v34 }
 0x77f   :  { %15512 = vmatpush2.bf16.msra.mxu0 %v22367_v35  ;;  %v22400_v35 = vld [vmem:[%s29641_s3 + $0x2a0] ss:$52 sps:$4 sm:$0xff]  }
 0x780   :  { %15479 = vmatpush2.bf16.msra.mxu1 %v22364_v61  ;;  %15513 = vmatprep.subr.bf16.mxu0 %v22372_v47  ;;  %v22401_v47 = vld [vmem:[%s29641_s3 + $0x920] ss:$52 sps:$4 sm:$0xff]  }
 0x781   :  { %15538 = vmatprep.subr.bf16.mxu1 %v22375_v45  ;;  %v22402_v45 = vld [vmem:[%s29641_s3 + $0x578] ss:$52 sps:$4 sm:$0xff]  }
 0x782   :  { %v15195_v22 = vpop.f32.mrf.mxu0 }
 0x783   :  { %v15196_v11 = vadd.f32 %v15195_v22, %v28741_v15  ;;  %v15236_v0 = vpop.f32.mrf.mxu1  ;;  %15481 = vmatmul.mubr.bf16.vlgmr.msra.gmra.mxu1 %v25763_v39  ;;  %15514 = vmatpush2.bf16.msra.mxu0 %v22370_v38  ;;  %v22406_v22 = vld [vmem:[%s29641_s3 + $0x510] ss:$52 sps:$4 sm:$0xff]  }
 0x784   :  { %15539 = vmatpush1.bf16.msra.mxu1 %v22373_v24  ;;  %v15197_v23 = vpop.f32.mrf.mxu0  ;;  %15515 = vmatprep.subr.bf16.mxu0 %v22378_v51  ;;  %v22403_v24 = vld [vmem:[%s29641_s3 + $0xbf8] ss:$52 sps:$4 sm:$0xff]  }
 0x785   :  { %v15237_v15 = vadd.f32 %v15236_v0, %v15196_v11  ;;  %v15198_v57 = vadd.f32 %v15197_v23, %v28747_v8  ;;  %v15238_v63 = vpop.f32.mrf.mxu1  ;;  %15540 = vmatprep.subr.bf16.mxu1 %v22381_v10  ;;  %15562 = vmatprep.mubr.bf16.mxu1 %v22625_v16  ;;  %v22385_v8 = vld [vmem:[%s29641_s3 + $0x2790] ss:$52 sps:$4 sm:$0xff]   ;;  %v22404_v51 = vld [vmem:[%s29641_s3 + $0x238] ss:$52 sps:$4 sm:$0xff]   ;;  %v22410_v23 = vld [vmem:[%s29641_s3 + $0x4a8] ss:$52 sps:$4 sm:$0xff]  }
 0x786   :  { %v15199_v20 = vpop.f32.mrf.mxu0  ;;  %v22407_v11 = vld [vmem:[%s29641_s3 + $0xb90] ss:$52 sps:$4 sm:$0xff]  }
 0x787   :  { %v15239_v43 = vadd.f32 %v15238_v63, %v15198_v57  ;;  %v15240_v2 = vpop.f32.mrf.mxu1  ;;  %15516 = vmatpush2.bf16.msra.mxu0 %v22376_v55  ;;  %v22408_v0 = vld [vmem:[%s29641_s3 + $0x1d0] ss:$52 sps:$4 sm:$0xff]   ;;  %v22414_v57 = vld [vmem:[%s29641_s3 + $0x440] ss:$52 sps:$4 sm:$0xff]  }
 0x788   :  { %15541 = vmatpush1.bf16.msra.mxu1 %v22379_v29  ;;  %v15200_v5 = vpop.f32.mrf.mxu0  ;;  %15517 = vmatprep.subr.bf16.mxu0 %v22384_v56  ;;  %v22409_v55 = vld [vmem:[%s29641_s3 + $0x850] ss:$52 sps:$4 sm:$0xff]   ;;  %v22411_v29 = vld [vmem:[%s29641_s3 + $0xb28] ss:$52 sps:$4 sm:$0xff]   ;;  %v22415_v63 = vld [vmem:[%s29641_s3 + $0xac0] ss:$52 sps:$4 sm:$0xff]  }
 0x789   :  { %v15241_v16 = vpop.f32.mrf.mxu1  ;;  %15542 = vmatprep.subr.bf16.mxu1 %v22387_v25  ;;  %v22412_v56 = vld [vmem:[%s29641_s3 + $0x168] ss:$52 sps:$4 sm:$0xff]   ;;  %v22416_v25 = vld [vmem:[%s29641_s3 + $0x100] ss:$52 sps:$4 sm:$0xff]   ;;  %v22419_v2 = vld [vmem:[%s29641_s3 + $0xa58] ss:$52 sps:$4 sm:$0xff]  }
 0x78a   :  { %v22417_v20 = vld [vmem:[%s29641_s3 + $0x780] ss:$52 sps:$4 sm:$0xff]   ;;  %v22421_v5 = vld [vmem:[%s29641_s3 + $0x718] ss:$52 sps:$4 sm:$0xff]   ;;  %v22424_v16 = vld [vmem:[%s29641_s3 + $0x30] ss:$52 sps:$4 sm:$0xff]  }
 0x78b   :  { %15518 = vmatpush2.bf16.msra.mxu0 %v22382_v62  ;;  %v22420_v62 = vld [vmem:[%s29641_s3 + $0x98] ss:$52 sps:$4 sm:$0xff]  }
 0x78c   :  { %15543 = vmatpush1.bf16.msra.mxu1 %v22385_v8  ;;  %15519 = vmatprep.subr.bf16.mxu0 %v22390_v9  ;;  %v22422_v8 = vld [vmem:[%s29641_s3 + $0x370] ss:$52 sps:$4 sm:$0xff]  }
 0x78d   :  { %15544 = vmatprep.subr.bf16.mxu1 %v22393_v59  ;;  %v22423_v9 = vld [vmem:[%s29641_s3 + $0x9f0] ss:$52 sps:$4 sm:$0xff]  }
 0x78e   :  { %v22425_v59 = vld [vmem:[%s29641_s3 + $0x6b0] ss:$52 sps:$4 sm:$0xff]  }
 0x78f   :  { %15520 = vmatpush2.bf16.msra.mxu0 %v22388_v19  ;;  %v22426_v19 = vld [vmem:[%s29641_s3 + $0x1348] ss:$52 sps:$4 sm:$0xff]  }
 0x790   :  { %15545 = vmatpush1.bf16.msra.mxu1 %v22391_v33  ;;  %19201 = vmatprep.subr.bf16.mxu0 %v22394_v52  ;;  %v22427_v33 = vld [vmem:[%s29641_s3 + $0x19c8] ss:$52 sps:$4 sm:$0xff]  }
 0x791   :  { %19223 = vmatprep.subr.bf16.mxu1 %v22395_v28  ;;  %v22428_v52 = vld [vmem:[%s29641_s3 + $0x1008] ss:$52 sps:$4 sm:$0xff]  }
 0x792   :  { %v15277_v60 = vpop.f32.mrf.mxu0  ;;  %15522 = vmatmul.mubr.bf16.vlgmr.msra.gmra.mxu0 %v25765_v17  ;;  %v22429_v28 = vld [vmem:[%s29641_s3 + $0x1688] ss:$52 sps:$4 sm:$0xff]  }
 0x793   :  { %v28984_v34 = vadd.f32 %v15277_v60, %v15237_v15  ;;  %19022 = vmatmul.mubr.msk.bf16.vlgmr.msra.gmra.mxu1 %vm13845_vm1, %v25821_v18  ;;  %19202 = vmatpush3.bf16.msra.mxu0 %v22396_v41  ;;  %v22413_v15 = vld [vmem:[%s29641_s3 + $0x7e8] ss:$52 sps:$4 sm:$0xff]   ;;  %v22430_v41 = vld [vmem:[%s29641_s3 + $0x12e0] ss:$52 sps:$4 sm:$0xff]  }
 0x794   :  { %15603 = vmatprep.mubr.bf16.mxu0 %v25099_v30  ;;  %19224 = vmatpush3.bf16.msra.mxu1 %v22397_v44  ;;  %v15279_v61 = vpop.f32.mrf.mxu0  ;;  %v22431_v44 = vld [vmem:[%s29641_s3 + $0x1960] ss:$52 sps:$4 sm:$0xff]  }
 0x795   :  { %15643 = vmatprep.mubr.bf16.mxu1 %v25101_v37  ;;  %v28999_v38 = vadd.f32 %v15279_v61, %v15239_v43  ;;  %19203 = vmatprep.subr.bf16.mxu0 %v22398_v12  ;;  %v22405_v37 = vld [vmem:[%s29641_s3 + $0x8b8] ss:$52 sps:$4 sm:$0xff]   ;;  %v22432_v12 = vld [vmem:[%s29641_s3 + $0xfa0] ss:$52 sps:$4 sm:$0xff]   ;;  %v22440_v61 = vld [vmem:[%s29641_s3 + $0xed0] ss:$52 sps:$4 sm:$0xff]  }
 0x796   :  { %v15281_v30 = vpop.f32.mrf.mxu0  ;;  %19225 = vmatprep.subr.bf16.mxu1 %v22399_v1  ;;  %v22418_v43 = vld [vmem:[%s29641_s3 + $0x3d8] ss:$52 sps:$4 sm:$0xff]   ;;  %v22433_v60 = vld [vmem:[%s29641_s3 + $0x1620] ss:$52 sps:$4 sm:$0xff]  }
 0x797   :  { %19204 = vmatpush3.bf16.msra.mxu0 %v22400_v35  ;;  %v22437_v1 = vld [vmem:[%s29641_s3 + $0x15b8] ss:$52 sps:$4 sm:$0xff]   ;;  %v22439_v35 = vld [vmem:[%s29641_s3 + $0x1890] ss:$52 sps:$4 sm:$0xff]   ;;  %v22444_v30 = vld [vmem:[%s29641_s3 + $0xe68] ss:$52 sps:$4 sm:$0xff]  }
 0x798   :  { %19226 = vmatpush3.bf16.msra.mxu1 %v22401_v47  ;;  %v15282_v10 = vpop.f32.mrf.mxu0  ;;  %19205 = vmatprep.subr.bf16.mxu0 %v22402_v45  ;;  %v22441_v47 = vld [vmem:[%s29641_s3 + $0x1550] ss:$52 sps:$4 sm:$0xff]   ;;  %v22442_v45 = vld [vmem:[%s29641_s3 + $0x11a8] ss:$52 sps:$4 sm:$0xff]  }
 0x799   :  { %19227 = vmatprep.subr.bf16.mxu1 %v22403_v24  ;;  %v22443_v24 = vld [vmem:[%s29641_s3 + $0x1828] ss:$52 sps:$4 sm:$0xff]   ;;  %v22446_v10 = vld [vmem:[%s29641_s3 + $0x1140] ss:$52 sps:$4 sm:$0xff]  }
 0x79b   :  { %19206 = vmatpush3.bf16.msra.mxu0 %v22404_v51  ;;  %v22445_v51 = vld [vmem:[%s29641_s3 + $0x14e8] ss:$52 sps:$4 sm:$0xff]  }
 0x79c   :  { %19228 = vmatpush3.bf16.msra.mxu1 %v22405_v37  ;;  %19207 = vmatprep.subr.bf16.mxu0 %v22406_v22  ;;  %v22447_v37 = vld [vmem:[%s29641_s3 + $0x17c0] ss:$52 sps:$4 sm:$0xff]  }
 0x79d   :  { %19229 = vmatprep.subr.bf16.mxu1 %v22407_v11  ;;  %v22448_v11 = vld [vmem:[%s29641_s3 + $0xe00] ss:$52 sps:$4 sm:$0xff]  }
 0x79f   :  { %19208 = vmatpush3.bf16.msra.mxu0 %v22408_v0  ;;  %v22449_v0 = vld [vmem:[%s29641_s3 + $0x1480] ss:$52 sps:$4 sm:$0xff]  }
 0x7a0   :  { %19230 = vmatpush3.bf16.msra.mxu1 %v22409_v55  ;;  %19209 = vmatprep.subr.bf16.mxu0 %v22410_v23  ;;  %v22450_v55 = vld [vmem:[%s29641_s3 + $0x10d8] ss:$52 sps:$4 sm:$0xff]  }
 0x7a1   :  { %19231 = vmatprep.subr.bf16.mxu1 %v22411_v29  ;;  %v22451_v29 = vld [vmem:[%s29641_s3 + $0x1758] ss:$52 sps:$4 sm:$0xff]  }
 0x7a3   :  { %19210 = vmatpush3.bf16.msra.mxu0 %v22412_v56 }
 0x7a4   :  { %19232 = vmatpush3.bf16.msra.mxu1 %v22413_v15  ;;  %19211 = vmatprep.subr.bf16.mxu0 %v22414_v57  ;;  %v22452_v15 = vld [vmem:[%s29641_s3 + $0xd98] ss:$52 sps:$4 sm:$0xff]  }
 0x7a5   :  { %19233 = vmatprep.subr.bf16.mxu1 %v22415_v63  ;;  %v22453_v57 = vld [vmem:[%s29641_s3 + $0x1418] ss:$52 sps:$4 sm:$0xff]   ;;  %v22454_v63 = vld [vmem:[%s29641_s3 + $0x1070] ss:$52 sps:$4 sm:$0xff]  }
 0x7a7   :  { %19212 = vmatpush3.bf16.msra.mxu0 %v22416_v25 }
 0x7a8   :  { %19234 = vmatpush3.bf16.msra.mxu1 %v22417_v20  ;;  %19213 = vmatprep.subr.bf16.mxu0 %v22418_v43  ;;  %v22455_v20 = vld [vmem:[%s29641_s3 + $0x16f0] ss:$52 sps:$4 sm:$0xff]  }
 0x7a9   :  { %19235 = vmatprep.subr.bf16.mxu1 %v22419_v2  ;;  %v22456_v43 = vld [vmem:[%s29641_s3 + $0xd30] ss:$52 sps:$4 sm:$0xff]  }
 0x7aa   :  { %v22457_v2 = vld [vmem:[%s29641_s3 + $0x13b0] ss:$52 sps:$4 sm:$0xff]  }
 0x7ab   :  { %19214 = vmatpush3.bf16.msra.mxu0 %v22420_v62  ;;  %v22458_v62 = vld [vmem:[%s29641_s3 + $0x2048] ss:$52 sps:$4 sm:$0xff]  }
 0x7ac   :  { %19236 = vmatpush3.bf16.msra.mxu1 %v22421_v5  ;;  %19215 = vmatprep.subr.bf16.mxu0 %v22422_v8  ;;  %v7223_v5 = vrot.slane %v28505_v6, %v23909_v31  ;;  %v22459_v8 = vld [vmem:[%s29641_s3 + $0x26c8] ss:$52 sps:$4 sm:$0xff]  }
 0x7ad   :  { %19237 = vmatprep.subr.bf16.mxu1 %v22423_v9  ;;  %v7227_v9 = vrot.slane %v28505_v6, %v23912_v32  ;;  %v22463_v32 = vld [vmem:[%s29641_s3 + $0x2660] ss:$52 sps:$4 sm:$0xff]  }
 0x7af   :  { %19216 = vmatpush3.bf16.msra.mxu0 %v22424_v16  ;;  %v22460_v16 = vld [vmem:[%s29641_s3 + $0x1d08] ss:$52 sps:$4 sm:$0xff]  }
 0x7b0   :  { %19238 = vmatpush3.bf16.msra.mxu1 %v22425_v59  ;;  %19245 = vmatprep.subr.bf16.mxu0 %v22426_v19  ;;  %v22461_v59 = vld [vmem:[%s29641_s3 + $0x2388] ss:$52 sps:$4 sm:$0xff]   ;;  %v22462_v19 = vld [vmem:[%s29641_s3 + $0x1fe0] ss:$52 sps:$4 sm:$0xff]  }
 0x7b1   :  { %19267 = vmatprep.subr.bf16.mxu1 %v22427_v33 }
 0x7b2   :  { %15604 = vmatmul.mubr.bf16.vlgmr.msra.gmra.mxu0 %v25312_v36  ;;  %v22434_v36 = vld [vmem:[%s29641_s3 + $0x1278] ss:$52 sps:$4 sm:$0xff]  }
 0x7b3   :  { %15644 = vmatmul.mubr.bf16.vlgmr.msra.gmra.mxu1 %v25314_v49  ;;  %19246 = vmatpush3.bf16.msra.mxu0 %v22428_v52  ;;  %v22435_v49 = vld [vmem:[%s29641_s3 + $0x18f8] ss:$52 sps:$4 sm:$0xff]  }
 0x7b4   :  { %15683 = vmatprep.mubr.bf16.mxu0 %v25319_v21  ;;  %19268 = vmatpush3.bf16.msra.mxu1 %v22429_v28  ;;  %v22436_v21 = vld [vmem:[%s29641_s3 + $0xf38] ss:$52 sps:$4 sm:$0xff]   ;;  %v22464_v28 = vld [vmem:[%s29641_s3 + $0x1ca0] ss:$52 sps:$4 sm:$0xff]  }
 0x7b5   :  { %15723 = vmatprep.mubr.bf16.mxu1 %v25330_v40  ;;  %19247 = vmatprep.subr.bf16.mxu0 %v22430_v41  ;;  %v22438_v40 = vld [vmem:[%s29641_s3 + $0x1210] ss:$52 sps:$4 sm:$0xff]  }
 0x7b6   :  { %19269 = vmatprep.subr.bf16.mxu1 %v22431_v44  ;;  %v22466_v44 = vld [vmem:[%s29641_s3 + $0x1f78] ss:$52 sps:$4 sm:$0xff]  }
 0x7b7   :  { %19248 = vmatpush3.bf16.msra.mxu0 %v22432_v12  ;;  %v22467_v12 = vld [vmem:[%s29641_s3 + $0x25f8] ss:$52 sps:$4 sm:$0xff]  }
 0x7b8   :  { %19270 = vmatpush3.bf16.msra.mxu1 %v22433_v60  ;;  %19249 = vmatprep.subr.bf16.mxu0 %v22434_v36  ;;  %v22468_v60 = vld [vmem:[%s29641_s3 + $0x1c38] ss:$52 sps:$4 sm:$0xff]  }
 0x7b9   :  { %19271 = vmatprep.subr.bf16.mxu1 %v22435_v49  ;;  %v22470_v49 = vld [vmem:[%s29641_s3 + $0x1f10] ss:$52 sps:$4 sm:$0xff]  }
 0x7bb   :  { %19250 = vmatpush3.bf16.msra.mxu0 %v22436_v21  ;;  %v22471_v21 = vld [vmem:[%s29641_s3 + $0x2590] ss:$52 sps:$4 sm:$0xff]  }
 0x7bc   :  { %19272 = vmatpush3.bf16.msra.mxu1 %v22437_v1  ;;  %19251 = vmatprep.subr.bf16.mxu0 %v22438_v40  ;;  %v22472_v1 = vld [vmem:[%s29641_s3 + $0x1bd0] ss:$52 sps:$4 sm:$0xff]  }
 0x7bd   :  { %19273 = vmatprep.subr.bf16.mxu1 %v22439_v35  ;;  %v22473_v40 = vld [vmem:[%s29641_s3 + $0x2250] ss:$52 sps:$4 sm:$0xff]   ;;  %v22474_v35 = vld [vmem:[%s29641_s3 + $0x1ea8] ss:$52 sps:$4 sm:$0xff]  }
 0x7bf   :  { %19252 = vmatpush3.bf16.msra.mxu0 %v22440_v61  ;;  %v22475_v61 = vld [vmem:[%s29641_s3 + $0x2528] ss:$52 sps:$4 sm:$0xff]  }
 0x7c0   :  { %19274 = vmatpush3.bf16.msra.mxu1 %v22441_v47  ;;  %19253 = vmatprep.subr.bf16.mxu0 %v22442_v45  ;;  %v22476_v47 = vld [vmem:[%s29641_s3 + $0x1b68] ss:$52 sps:$4 sm:$0xff]  }
 0x7c1   :  { %19275 = vmatprep.subr.bf16.mxu1 %v22443_v24  ;;  %v22477_v45 = vld [vmem:[%s29641_s3 + $0x21e8] ss:$52 sps:$4 sm:$0xff]   ;;  %v22478_v24 = vld [vmem:[%s29641_s3 + $0x1e40] ss:$52 sps:$4 sm:$0xff]  }
 0x7c3   :  { %v15318_v22 = vpop.f32.mrf.mxu1  ;;  %19254 = vmatpush3.bf16.msra.mxu0 %v22444_v30  ;;  %v22479_v30 = vld [vmem:[%s29641_s3 + $0x24c0] ss:$52 sps:$4 sm:$0xff]  }
 0x7c4   :  { %19276 = vmatpush3.bf16.msra.mxu1 %v22445_v51  ;;  %19255 = vmatprep.subr.bf16.mxu0 %v22446_v10  ;;  %v15319_v31 = vadd.f32 %v15318_v22, %v7223_v5  ;;  %v22480_v51 = vld [vmem:[%s29641_s3 + $0x1b00] ss:$52 sps:$4 sm:$0xff]   ;;  %v22483_v22 = vld [vmem:[%s29641_s3 + $0x2458] ss:$52 sps:$4 sm:$0xff]  }
 0x7c5   :  { %v15320_v23 = vpop.f32.mrf.mxu1  ;;  %19277 = vmatprep.subr.bf16.mxu1 %v22447_v37  ;;  %v22481_v10 = vld [vmem:[%s29641_s3 + $0x2180] ss:$52 sps:$4 sm:$0xff]   ;;  %v22482_v37 = vld [vmem:[%s29641_s3 + $0x1dd8] ss:$52 sps:$4 sm:$0xff]  }
 0x7c6   :  { %v15321_v6 = vadd.f32 %v15320_v23, %v7227_v9  ;;  %v22487_v23 = vld [vmem:[%s29641_s3 + $0x23f0] ss:$52 sps:$4 sm:$0xff]  }
 0x7c7   :  { %v15322_v56 = vpop.f32.mrf.mxu1  ;;  %19256 = vmatpush3.bf16.msra.mxu0 %v22448_v11  ;;  %v22484_v11 = vld [vmem:[%s29641_s3 + $0x1a98] ss:$52 sps:$4 sm:$0xff]   ;;  %v22499_v5 = vld [vmem:[%s29643_s5 + $0x60] sm:$0xff]  }
 0x7c8   :  { %19278 = vmatpush3.bf16.msra.mxu1 %v22449_v0  ;;  %19257 = vmatprep.subr.bf16.mxu0 %v22450_v55  ;;  %v22485_v0 = vld [vmem:[%s29641_s3 + $0x2118] ss:$52 sps:$4 sm:$0xff]   ;;  %v22486_v55 = vld [vmem:[%s29641_s3 + $0x1d70] ss:$52 sps:$4 sm:$0xff]  }
 0x7c9   :  { %v15323_v25 = vpop.f32.mrf.mxu1  ;;  %19279 = vmatprep.subr.bf16.mxu1 %v22451_v29  ;;  %v22488_v29 = vld [vmem:[%s29641_s3 + $0x1a30] ss:$52 sps:$4 sm:$0xff]  }
 0x7ca   :  { %v22489_v56 = vld [vmem:[%s29641_s3 + $0x20b0] ss:$52 sps:$4 sm:$0xff]   ;;  %v22492_v25 = vld [vmem:[%s29643_s5 + $0x38] sm:$0xff]  }
 0x7cb   :  { %19258 = vmatpush3.bf16.msra.mxu0 %v22452_v15  ;;  %v22490_v15 = vld [vmem:[%s29643_s5 + $0x78] sm:$0xff]   ;;  %v22501_v9 = vld [vmem:[%s29643_s5 + $0x20] sm:$0xff]  }
 0x7cc   :  { %19280 = vmatpush3.bf16.msra.mxu1 %v22453_v57  ;;  %19259 = vmatprep.subr.bf16.mxu0 %v22454_v63  ;;  %v15852_v57 = vmax.f32 %v26445_v58, 0.0  ;;  %v22491_v63 = vld [vmem:[%s29641_s3 + $0x2868] ss:$52 sps:$4 sm:$0xff]   ;;  %v22494_v58 = vld [vmem:[%s29641_s3 + $0x2800] ss:$52 sps:$4 sm:$0xff]  }
 0x7cd   :  { %19281 = vmatprep.subr.bf16.mxu1 %v22455_v20  ;;  %v22493_v20 = vld [vmem:[%s29643_s5 + $0x70] sm:$0xff]  }
 0x7cf   :  { %19260 = vmatpush3.bf16.msra.mxu0 %v22456_v43  ;;  %v15865_v43 = vpack.c.bf16 %v15852_v57, %v15852_v57 }
 0x7d0   :  { %19282 = vmatpush3.bf16.msra.mxu1 %v22457_v2  ;;  %19289 = vmatprep.subr.bf16.mxu0 %v22458_v62  ;;  %v22495_v2 = vld [vmem:[%s29643_s5 + $0x30] sm:$0xff]   ;;  %v22498_v62 = vld [vmem:[%s29643_s5 + $0x28] sm:$0xff]  }
 0x7d1   :  { %19311 = vmatprep.subr.bf16.mxu1 %v22459_v8  ;;  %v22500_v8 = vld [vmem:[%s29641_s3 + $0x2730] ss:$52 sps:$4 sm:$0xff]  }
 0x7d2   :  { %v15359_v33 = vpop.f32.mrf.mxu0  ;;  %15684 = vmatmul.mubr.bf16.vlgmr.msra.gmra.mxu0 %v25537_v26  ;;  %v22465_v26 = vld [vmem:[%s29641_s3 + $0x2320] ss:$52 sps:$4 sm:$0xff]  }
 0x7d3   :  { %v29193_v52 = vadd.f32 %v15359_v33, %v15319_v31  ;;  %15724 = vmatmul.mubr.bf16.vlgmr.msra.gmra.mxu1 %v25542_v13  ;;  %19290 = vmatpush3.bf16.msra.mxu0 %v22460_v16  ;;  %v22503_v16 = vld [vmem:[%s29643_s5 + $0xf8] sm:$0xff]  }
 0x7d4   :  { %15763 = vmatprep.mubr.bf16.mxu0 %v25545_v14  ;;  %19312 = vmatpush3.bf16.msra.mxu1 %v22461_v59  ;;  %v15361_v41 = vpop.f32.mrf.mxu0  ;;  %v15854_v59 = vmax.f32 %v27057_v50, 0.0  ;;  %v22502_v31 = vld [vmem:[%s29643_s5 + $0x58] sm:$0xff]   ;;  %v22507_v50 = vld [vmem:[%s29643_s5 + $0xf0] sm:$0xff]  }
 0x7d5   :  { %15803 = vmatprep.mubr.bf16.mxu1 %v25582_v54  ;;  %v29207_v13 = vadd.f32 %v15361_v41, %v15321_v6  ;;  %19291 = vmatprep.subr.bf16.mxu0 %v22462_v19  ;;  %v22469_v54 = vld [vmem:[%s29641_s3 + $0x22b8] ss:$52 sps:$4 sm:$0xff]   ;;  %v22506_v6 = vld [vmem:[%s29643_s5 + $0x50] sm:$0xff]  }
 0x7d6   :  { %v15363_v14 = vpop.f32.mrf.mxu0  ;;  %19313 = vmatprep.subr.bf16.mxu1 %v22463_v32  ;;  %v22505_v19 = vld [vmem:[%s29643_s5 + $0xb8] sm:$0xff]   ;;  %v15867_v32 = vpack.c.bf16 %v15854_v59, %v15854_v59  ;;  %v22509_v41 = vld [vmem:[%s29643_s5 + $0xb0] sm:$0xff]  }
 0x7d7   :  { %19292 = vmatpush3.bf16.msra.mxu0 %v22464_v28  ;;  %v22504_v33 = vld [vmem:[%s29643_s5 + $0x18] sm:$0xff]   ;;  %v22510_v14 = vld [vmem:[%s29643_s5 + $0x48] sm:$0xff]   ;;  %v22541_v59 = vld [vmem:[%s29643_s5 + $0x1b0] sm:$0xff]  }
 0x7d8   :  { %19314 = vmatpush3.bf16.msra.mxu1 %v22465_v26  ;;  %v15364_v36 = vpop.f32.mrf.mxu0  ;;  %19293 = vmatprep.subr.bf16.mxu0 %v22466_v44  ;;  %v22508_v44 = vld [vmem:[%s29643_s5 + $0x10] sm:$0xff]  }
 0x7d9   :  { %19315 = vmatprep.subr.bf16.mxu1 %v22467_v12  ;;  %v22511_v12 = vld [vmem:[%s29643_s5 + $0xe8] sm:$0xff]  }
 0x7da   :  { %v22513_v36 = vld [vmem:[%s29643_s5 + $0xa8] sm:$0xff]  }
 0x7db   :  { %19294 = vmatpush3.bf16.msra.mxu0 %v22468_v60 }
 0x7dc   :  { %19316 = vmatpush3.bf16.msra.mxu1 %v22469_v54  ;;  %19295 = vmatprep.subr.bf16.mxu0 %v22470_v49  ;;  %v22512_v54 = vld [vmem:[%s29643_s5 + $0x8] sm:$0xff]   ;;  %v22515_v49 = vld [vmem:[%s29643_s5 + $0xe0] sm:$0xff]  }
 0x7dd   :  { %19317 = vmatprep.subr.bf16.mxu1 %v22471_v21 }
 0x7df   :  { %19296 = vmatpush3.bf16.msra.mxu0 %v22472_v1  ;;  %v22517_v1 = vld [vmem:[%s29643_s5 + $0xa0] sm:$0xff]  }
 0x7e0   :  { %19318 = vmatpush3.bf16.msra.mxu1 %v22473_v40  ;;  %19297 = vmatprep.subr.bf16.mxu0 %v22474_v35  ;;  %v22516_v40 = vld [vmem:[%s29643_s5] sm:$0xff]   ;;  %v22518_v35 = vld [vmem:[%s29643_s5 + $0xd8] sm:$0xff]  }
 0x7e1   :  { %19319 = vmatprep.subr.bf16.mxu1 %v22475_v61  ;;  %v15851_v61 = vmax.f32 %v26433_v4, 0.0  ;;  %v22522_v4 = vld [vmem:[%s29643_s5 + $0xd0] sm:$0xff]  }
 0x7e3   :  { %19298 = vmatpush3.bf16.msra.mxu0 %v22476_v47  ;;  %v22519_v47 = vld [vmem:[%s29643_s5 + $0x178] sm:$0xff]  }
 0x7e4   :  { %19320 = vmatpush3.bf16.msra.mxu1 %v22477_v45  ;;  %19299 = vmatprep.subr.bf16.mxu0 %v22478_v24  ;;  %v15856_v45 = vmax.f32 %v27722_v53, 0.0  ;;  %v22520_v24 = vld [vmem:[%s29643_s5 + $0x98] sm:$0xff]   ;;  %v22523_v53 = vld [vmem:[%s29643_s5 + $0x170] sm:$0xff]  }
 0x7e5   :  { %19321 = vmatprep.subr.bf16.mxu1 %v22479_v30  ;;  %v22521_v30 = vld [vmem:[%s29643_s5 + $0x138] sm:$0xff]  }
 0x7e7   :  { %19300 = vmatpush3.bf16.msra.mxu0 %v22480_v51  ;;  %v15864_v51 = vpack.c.bf16 %v15851_v61, %v15851_v61  ;;  %v22561_v61 = vld [vmem:[%s29643_s5 + $0x228] sm:$0xff]  }
 0x7e8   :  { %19322 = vmatpush3.bf16.msra.mxu1 %v22481_v10  ;;  %19301 = vmatprep.subr.bf16.mxu0 %v22482_v37  ;;  %v15869_v10 = vpack.c.bf16 %v15856_v45, %v15856_v45  ;;  %v22563_v45 = vld [vmem:[%s29643_s5 + $0x260] sm:$0xff]  }
 0x7e9   :  { %19323 = vmatprep.subr.bf16.mxu1 %v22483_v22 }
 0x7eb   :  { %19302 = vmatpush3.bf16.msra.mxu0 %v22484_v11  ;;  %v22524_v11 = vld [vmem:[%s29643_s5 + $0x90] sm:$0xff]  }
 0x7ec   :  { %19324 = vmatpush3.bf16.msra.mxu1 %v22485_v0  ;;  %19303 = vmatprep.subr.bf16.mxu0 %v22486_v55  ;;  %v22525_v55 = vld [vmem:[%s29643_s5 + $0x130] sm:$0xff]  }
 0x7ed   :  { %19325 = vmatprep.subr.bf16.mxu1 %v22487_v23  ;;  %v22526_v23 = vld [vmem:[%s29643_s5 + $0xc8] sm:$0xff]  }
 0x7ef   :  { %19304 = vmatpush3.bf16.msra.mxu0 %v22488_v29  ;;  %v22527_v29 = vld [vmem:[%s29643_s5 + $0x168] sm:$0xff]  }
 0x7f0   :  { %19326 = vmatpush3.bf16.msra.mxu1 %v22489_v56  ;;  %19495 = vmatprep.subr.bf16.mxu0 %v22626_v42 }
 0x7f1   :  { %19338 = vmatprep.subr.bf16.mxu1 %v22490_v15  ;;  %v22528_v15 = vld [vmem:[%s29643_s5 + $0x88] sm:$0xff]  }
 0x7f2   :  { %15764 = vmatmul.mubr.bf16.vlgmr.msra.gmra.mxu0 %v25763_v39  ;;  %v22496_v39 = vld [vmem:[%s29643_s5 + $0x68] sm:$0xff]  }
 0x7f3   :  { %15804 = vmatmul.mubr.bf16.vlgmr.msra.gmra.mxu1 %v25765_v17  ;;  %19496 = vmatpush3.bf16.msra.mxu0 %v22491_v63  ;;  %v22497_v17 = vld [vmem:[%s29641_s3 + $0x2798] ss:$52 sps:$4 sm:$0xff]  }
 0x7f4   :  { %19339 = vmatpush3.bf16.msra.mxu1 %v22492_v25  ;;  %16719 = vmatprep.mubr.bf16.mxu1 %v15865_v43  ;;  %v22529_v63 = vld [vmem:[%s29643_s5 + $0x128] sm:$0xff]   ;;  %v22530_v25 = vld [vmem:[%s29643_s5 + $0xc0] sm:$0xff]  }
 0x7f5   :  { %19497 = vmatprep.subr.bf16.mxu0 %v22626_v42  ;;  %19340 = vmatprep.subr.bf16.mxu1 %v22493_v20  ;;  %v22531_v20 = vld [vmem:[%s29643_s5 + $0x160] sm:$0xff]  }
 0x7f6   :  { %19503 = vmatprep.mubr.msk.bf16.mxu0 %vm22627_vm0, %v22626_v42  ;;  %v22532_v43 = vld [vmem:[%s29643_s5 + $0x80] sm:$0xff]  }
 0x7f7   :  { %19498 = vmatpush3.bf16.msra.mxu0 %v22494_v58  ;;  %v15853_v58 = vmax.f32 %v27051_v46, 0.0  ;;  %v22537_v46 = vld [vmem:[%s29643_s5 + $0x1b8] sm:$0xff]  }
 0x7f8   :  { %19341 = vmatpush3.bf16.msra.mxu1 %v22495_v2  ;;  %19499 = vmatprep.subr.bf16.mxu0 %v22626_v42  ;;  %v22533_v2 = vld [vmem:[%s29643_s5 + $0x120] sm:$0xff]  }
 0x7f9   :  { %19342 = vmatprep.subr.bf16.mxu1 %v22496_v39  ;;  %v22535_v39 = vld [vmem:[%s29643_s5 + $0x1f8] sm:$0xff]  }
 0x7fb   :  { %19500 = vmatpush3.bf16.msra.mxu0 %v22497_v17  ;;  %v15858_v17 = vmax.f32 %v28335_v27, 0.0  ;;  %v22539_v27 = vld [vmem:[%s29643_s5 + $0x1f0] sm:$0xff]  }
 0x7fc   :  { %19343 = vmatpush3.bf16.msra.mxu1 %v22498_v62  ;;  %19501 = vmatprep.subr.bf16.mxu0 %v22626_v42  ;;  %v22534_v62 = vld [vmem:[%s29643_s5 + $0x158] sm:$0xff]  }
 0x7fd   :  { %19344 = vmatprep.subr.bf16.mxu1 %v22499_v5  ;;  %v15866_v5 = vpack.c.bf16 %v15853_v58, %v15853_v58  ;;  %v22579_v58 = vld [vmem:[%s29643_s5 + $0x2e0] sm:$0xff]  }
 0x7ff   :  { %19502 = vmatpush3.bf16.msra.mxu0 %v22500_v8  ;;  %v22536_v8 = vld [vmem:[%s29643_s5 + $0x118] sm:$0xff]  }
 0x800   :  { %19345 = vmatpush3.bf16.msra.mxu1 %v22501_v9  ;;  %19360 = vmatprep.subr.bf16.mxu0 %v22503_v16  ;;  %v15871_v9 = vpack.c.bf16 %v15858_v17, %v15858_v17  ;;  %v22538_v16 = vld [vmem:[%s29643_s5 + $0x150] sm:$0xff]   ;;  %v22581_v17 = vld [vmem:[%s29643_s5 + $0x2a0] sm:$0xff]  }
 0x801   :  { %19346 = vmatprep.subr.bf16.mxu1 %v22502_v31  ;;  %v22540_v31 = vld [vmem:[%s29643_s5 + $0x110] sm:$0xff]  }
 0x802   :  { %19504 = vmatmul.mubr.msk.bf16.vlgmr.msra.gmra.mxu0 %vm13845_vm1, %v25821_v18 }
 0x803   :  { %v15400_v28 = vpop.f32.mrf.mxu1  ;;  %19361 = vmatpush3.bf16.msra.mxu0 %v22505_v19  ;;  %16759 = vmatprep.mubr.bf16.mxu0 %v15867_v32  ;;  %v22543_v19 = vld [vmem:[%s29643_s5 + $0x1e8] sm:$0xff]  }
 0x804   :  { %v15401_v26 = vadd.f32 %v15400_v28, %v29193_v52  ;;  %19347 = vmatpush3.bf16.msra.mxu1 %v22504_v33  ;;  %19362 = vmatprep.subr.bf16.mxu0 %v22507_v50  ;;  %v22542_v33 = vld [vmem:[%s29643_s5 + $0x148] sm:$0xff]   ;;  %v22546_v28 = vld [vmem:[%s29643_s5 + $0x140] sm:$0xff]  }
 0x805   :  { %v15402_v18 = vpop.f32.mrf.mxu1  ;;  %19348 = vmatprep.subr.bf16.mxu1 %v22506_v6  ;;  %v22545_v50 = vld [vmem:[%s29643_s5 + $0x1a8] sm:$0xff]   ;;  %v22547_v6 = vld [vmem:[%s29643_s5 + $0x1e0] sm:$0xff]  }
 0x806   :  { %v29358_v60 = vadd.f32 %v15402_v18, %v29207_v13  ;;  %v22514_v13 = vld [vmem:[%s29643_s5 + $0x40] sm:$0xff]   ;;  %v22544_v32 = vld [vmem:[%s29643_s5 + $0x108] sm:$0xff]   ;;  %v22551_v18 = vld [vmem:[%s29643_s5 + $0x278] sm:$0xff]  }
 0x807   :  { %v15404_v52 = vpop.f32.mrf.mxu1  ;;  %19363 = vmatpush3.bf16.msra.mxu0 %v22509_v41  ;;  %v22549_v41 = vld [vmem:[%s29643_s5 + $0x1a0] sm:$0xff]  }
 0x808   :  { %19349 = vmatpush3.bf16.msra.mxu1 %v22508_v44  ;;  %19364 = vmatprep.subr.bf16.mxu0 %v22511_v12  ;;  %v22550_v44 = vld [vmem:[%s29643_s5 + $0x1d8] sm:$0xff]   ;;  %v15855_v12 = vmax.f32 %v27707_v48, 0.0  ;;  %v22554_v48 = vld [vmem:[%s29643_s5 + $0x1d0] sm:$0xff]  }
 0x809   :  { %v15405_v21 = vpop.f32.mrf.mxu1  ;;  %19350 = vmatprep.subr.bf16.mxu1 %v22510_v14  ;;  %v15860_v14 = vmax.f32 %v28999_v38, 0.0  ;;  %v22552_v52 = vld [vmem:[%s29643_s5 + $0x198] sm:$0xff]   ;;  %v22555_v38 = vld [vmem:[%s29643_s5 + $0x270] sm:$0xff]  }
 0x80a   :  { %v22556_v21 = vld [vmem:[%s29643_s5 + $0x190] sm:$0xff]  }
 0x80b   :  { %19365 = vmatpush3.bf16.msra.mxu0 %v22513_v36  ;;  %v22553_v36 = vld [vmem:[%s29643_s5 + $0x238] sm:$0xff]  }
 0x80c   :  { %19351 = vmatpush3.bf16.msra.mxu1 %v22512_v54  ;;  %19366 = vmatprep.subr.bf16.mxu0 %v22515_v49  ;;  %v15868_v54 = vpack.c.bf16 %v15855_v12, %v15855_v12  ;;  %v15873_v49 = vpack.c.bf16 %v15860_v14, %v15860_v14  ;;  %v22587_v12 = vld [vmem:[%s29643_s5 + $0x288] sm:$0xff]  }
 0x80d   :  { %19352 = vmatprep.subr.bf16.mxu1 %v22514_v13  ;;  %v22557_v13 = vld [vmem:[%s29643_s5 + $0x230] sm:$0xff]  }
 0x80f   :  { %19367 = vmatpush3.bf16.msra.mxu0 %v22517_v1  ;;  %v22558_v1 = vld [vmem:[%s29643_s5 + $0x1c8] sm:$0xff]  }
 0x810   :  { %19353 = vmatpush3.bf16.msra.mxu1 %v22516_v40  ;;  %19368 = vmatprep.subr.bf16.mxu0 %v22518_v35  ;;  %v22559_v40 = vld [vmem:[%s29643_s5 + $0x268] sm:$0xff]  }
 0x811   :  { %19382 = vmatprep.subr.bf16.mxu1 %v22519_v47  ;;  %v22560_v35 = vld [vmem:[%s29643_s5 + $0x188] sm:$0xff]   ;;  %v22562_v47 = vld [vmem:[%s29643_s5 + $0x1c0] sm:$0xff]  }
 0x812   :  { %v15441_v37 = vpop.f32.mrf.mxu0 }
 0x813   :  { %v29398_v22 = vadd.f32 %v15441_v37, %v15401_v26  ;;  %16720 = vmatmul.mubr.bf16.vlgmr.msra.gmra.mxu1 %v15864_v51  ;;  %19369 = vmatpush3.bf16.msra.mxu0 %v22520_v24  ;;  %v22548_v26 = vld [vmem:[%s29643_s5 + $0x100] sm:$0xff]   ;;  %v22568_v37 = vld [vmem:[%s29643_s5 + $0x218] sm:$0xff]  }
 0x814   :  { %19383 = vmatpush3.bf16.msra.mxu1 %v22521_v30  ;;  %16799 = vmatprep.mubr.bf16.mxu1 %v15869_v10  ;;  %v29403_v0 = vpop.f32.mrf.mxu0  ;;  %v22564_v24 = vld [vmem:[%s29643_s5 + $0x180] sm:$0xff]   ;;  %v15857_v30 = vmax.f32 %v28329_v7, 0.0  ;;  %v22569_v7 = vld [vmem:[%s29643_s5 + $0x2b8] sm:$0xff]  }
 0x815   :  { %19370 = vmatprep.subr.bf16.mxu0 %v22522_v4  ;;  %19384 = vmatprep.subr.bf16.mxu1 %v22523_v53  ;;  %v22565_v51 = vld [vmem:[%s29643_s5 + $0x220] sm:$0xff]   ;;  %v22567_v4 = vld [vmem:[%s29643_s5 + $0x2f8] sm:$0xff]  }
 0x816   :  { %v15445_v56 = vpop.f32.mrf.mxu0  ;;  %v22566_v53 = vld [vmem:[%s29643_s5 + $0x258] sm:$0xff]   ;;  %v15870_v10 = vpack.c.bf16 %v15857_v30, %v15857_v30 }
 0x817   :  { %19371 = vmatpush3.bf16.msra.mxu0 %v22524_v11  ;;  %v22571_v11 = vld [vmem:[%s29643_s5 + $0x2f0] sm:$0xff]  }
 0x818   :  { %19385 = vmatpush3.bf16.msra.mxu1 %v22525_v55  ;;  %v15446_v57 = vpop.f32.mrf.mxu0  ;;  %19372 = vmatprep.subr.bf16.mxu0 %v22526_v23  ;;  %v22570_v55 = vld [vmem:[%s29643_s5 + $0x250] sm:$0xff]  }
 0x819   :  { %19386 = vmatprep.subr.bf16.mxu1 %v22527_v29  ;;  %v22573_v29 = vld [vmem:[%s29643_s5 + $0x2b0] sm:$0xff]  }
 0x81a   :  { %v22572_v56 = vld [vmem:[%s29643_s5 + $0x210] sm:$0xff]  }
 0x81b   :  { %19373 = vmatpush3.bf16.msra.mxu0 %v22528_v15  ;;  %v22575_v15 = vld [vmem:[%s29643_s5 + $0x2e8] sm:$0xff]  }
 0x81c   :  { %19387 = vmatpush3.bf16.msra.mxu1 %v22529_v63  ;;  %19374 = vmatprep.subr.bf16.mxu0 %v22530_v25  ;;  %v22574_v63 = vld [vmem:[%s29643_s5 + $0x248] sm:$0xff]  }
 0x81d   :  { %19388 = vmatprep.subr.bf16.mxu1 %v22531_v20  ;;  %v22577_v20 = vld [vmem:[%s29643_s5 + $0x2a8] sm:$0xff]  }
 0x81f   :  { %19375 = vmatpush3.bf16.msra.mxu0 %v22532_v43  ;;  %v22576_v43 = vld [vmem:[%s29643_s5 + $0x208] sm:$0xff]  }
 0x820   :  { %19389 = vmatpush3.bf16.msra.mxu1 %v22533_v2  ;;  %19404 = vmatprep.subr.bf16.mxu0 %v22535_v39  ;;  %v22578_v39 = vld [vmem:[%s29643_s5 + $0x240] sm:$0xff]  }
 0x821   :  { %19390 = vmatprep.subr.bf16.mxu1 %v22534_v62  ;;  %v22580_v62 = vld [vmem:[%s29643_s5 + $0x200] sm:$0xff]  }
 0x822   :  { %16760 = vmatmul.mubr.bf16.vlgmr.msra.gmra.mxu0 %v15866_v5  ;;  %v15859_v5 = vmax.f32 %v28984_v34, 0.0  ;;  %v15444_v34 = vadd.f32 %v29403_v0, %v29358_v60  ;;  %v22586_v60 = vld [vmem:[%s29643_s5 + $0x2c8] sm:$0xff]  }
 0x823   :  { %19405 = vmatpush3.bf16.msra.mxu0 %v22537_v46  ;;  %16839 = vmatprep.mubr.bf16.mxu0 %v15871_v9  ;;  %v22582_v46 = vld [vmem:[%s29643_s5 + $0x2d8] sm:$0xff]  }
 0x824   :  { %19391 = vmatpush3.bf16.msra.mxu1 %v22536_v8  ;;  %19406 = vmatprep.subr.bf16.mxu0 %v22539_v27  ;;  %v22583_v8 = vld [vmem:[%s29643_s5 + $0x298] sm:$0xff]   ;;  %v22584_v27 = vld [vmem:[%s29643_s5 + $0x2d0] sm:$0xff]  }
 0x825   :  { %19392 = vmatprep.subr.bf16.mxu1 %v22538_v16  ;;  %v22590_v9 = vld [vmem:[%s29643_s5 + $0x318] sm:$0xff]   ;;  %v15872_v16 = vpack.c.bf16 %v15859_v5, %v15859_v5 }
 0x827   :  { %19407 = vmatpush3.bf16.msra.mxu0 %v22541_v59 }
 0x828   :  { %19393 = vmatpush3.bf16.msra.mxu1 %v22540_v31  ;;  %19408 = vmatprep.subr.bf16.mxu0 %v22543_v19 }
 0x829   :  { %19394 = vmatprep.subr.bf16.mxu1 %v22542_v33 }
 0x82b   :  { %19409 = vmatpush3.bf16.msra.mxu0 %v22545_v50  ;;  %v22585_v50 = vld [vmem:[%s29643_s5 + $0x290] sm:$0xff]  }
 0x82c   :  { %19395 = vmatpush3.bf16.msra.mxu1 %v22544_v32  ;;  %19410 = vmatprep.subr.bf16.mxu0 %v22547_v6 }
 0x82d   :  { %19396 = vmatprep.subr.bf16.mxu1 %v22546_v28 }
 0x82f   :  { %19411 = vmatpush3.bf16.msra.mxu0 %v22549_v41 }
 0x830   :  { %19397 = vmatpush3.bf16.msra.mxu1 %v22548_v26  ;;  %19412 = vmatprep.subr.bf16.mxu0 %v22550_v44 }
 0x831   :  { %19426 = vmatprep.subr.bf16.mxu1 %v22551_v18 }
 0x833   :  { %16800 = vmatmul.mubr.bf16.vlgmr.msra.gmra.mxu1 %v15868_v54  ;;  %19413 = vmatpush3.bf16.msra.mxu0 %v22552_v52  ;;  %v22588_v52 = vld [vmem:[%s29643_s5 + $0x2c0] sm:$0xff]  }
 0x834   :  { %19427 = vmatpush3.bf16.msra.mxu1 %v22553_v36  ;;  %16879 = vmatprep.mubr.bf16.mxu1 %v15873_v49  ;;  %v22592_v36 = vld [vmem:[%s29643_s5 + $0x308] sm:$0xff]   ;;  %v22589_v49 = vld [vmem:[%s29643_s5 + $0x280] sm:$0xff]  }
 0x835   :  { %19414 = vmatprep.subr.bf16.mxu0 %v22554_v48  ;;  %19428 = vmatprep.subr.bf16.mxu1 %v22555_v38 }
 0x837   :  { %19415 = vmatpush3.bf16.msra.mxu0 %v22556_v21 }
 0x838   :  { %19429 = vmatpush3.bf16.msra.mxu1 %v22557_v13  ;;  %19416 = vmatprep.subr.bf16.mxu0 %v22558_v1  ;;  %v22593_v13 = vld [vmem:[%s29643_s5 + $0x300] sm:$0xff]  }
 0x839   :  { %19430 = vmatprep.subr.bf16.mxu1 %v22559_v40 }
 0x83b   :  { %19417 = vmatpush3.bf16.msra.mxu0 %v22560_v35 }
 0x83c   :  { %19431 = vmatpush3.bf16.msra.mxu1 %v22561_v61  ;;  %19418 = vmatprep.subr.bf16.mxu0 %v22562_v47  ;;  %v22602_v61 = vld [vmem:[%s29642_s4 + $0x8] sm:$0x1f] }
 0x83d   :  { %19432 = vmatprep.subr.bf16.mxu1 %v22563_v45  ;;  %v7231_v47 = vrot.slane %v22602_v61, %v24243_v3 }
 0x83f   :  { %19419 = vmatpush3.bf16.msra.mxu0 %v22564_v24 }
 0x840   :  { %19433 = vmatpush3.bf16.msra.mxu1 %v22565_v51  ;;  %19448 = vmatprep.subr.bf16.mxu0 %v22567_v4 }
 0x841   :  { %19434 = vmatprep.subr.bf16.mxu1 %v22566_v53 }
 0x842   :  { %16840 = vmatmul.mubr.bf16.vlgmr.msra.gmra.mxu0 %v15870_v10 }
 0x843   :  { %v15482_v23 = vpop.f32.mrf.mxu1  ;;  %19449 = vmatpush3.bf16.msra.mxu0 %v22569_v7 }
 0x844   :  { %19435 = vmatpush3.bf16.msra.mxu1 %v22568_v37  ;;  %19450 = vmatprep.subr.bf16.mxu0 %v22571_v11  ;;  %v15483_v59 = vadd.f32 %v15482_v23, %v29398_v22  ;;  %v22591_v22 = vld [vmem:[%s29643_s5 + $0x310] sm:$0xff]  }
 0x845   :  { %v15484_v57 = vpop.f32.mrf.mxu1  ;;  %19436 = vmatprep.subr.bf16.mxu1 %v22570_v55 }
 0x846   :  { %v15485_v19 = vadd.f32 %v15484_v57, %v15444_v34 }
 0x847   :  { %v15486_v25 = vpop.f32.mrf.mxu1  ;;  %19451 = vmatpush3.bf16.msra.mxu0 %v22573_v29 }
 0x848   :  { %19437 = vmatpush3.bf16.msra.mxu1 %v22572_v56  ;;  %19452 = vmatprep.subr.bf16.mxu0 %v22575_v15 }
 0x849   :  { %v15487_v2 = vpop.f32.mrf.mxu1  ;;  %19438 = vmatprep.subr.bf16.mxu1 %v22574_v63 }
 0x84b   :  { %19453 = vmatpush3.bf16.msra.mxu0 %v22577_v20 }
 0x84c   :  { %19439 = vmatpush3.bf16.msra.mxu1 %v22576_v43  ;;  %19454 = vmatprep.subr.bf16.mxu0 %v22579_v58 }
 0x84d   :  { %19440 = vmatprep.subr.bf16.mxu1 %v22578_v39 }
 0x84f   :  { %19455 = vmatpush3.bf16.msra.mxu0 %v22581_v17 }
 0x850   :  { %19441 = vmatpush3.bf16.msra.mxu1 %v22580_v62  ;;  %19456 = vmatprep.subr.bf16.mxu0 %v22582_v46 }
 0x851   :  { %19507 = vmatprep.subr.bf16.mxu1 %v22626_v42 }
 0x852   :  { %v15523_v31 = vpop.f32.mrf.mxu0 }
 0x853   :  { %v15564_v33 = vpop.f32.mrf.mxu1  ;;  %16880 = vmatmul.mubr.bf16.vlgmr.msra.gmra.mxu1 %v15872_v16  ;;  %19457 = vmatpush3.bf16.msra.mxu0 %v22583_v8  ;;  %v15524_v32 = vadd.f32 %v15523_v31, %v15483_v59 }
 0x854   :  { %v15525_v6 = vpop.f32.mrf.mxu0  ;;  %19458 = vmatprep.subr.bf16.mxu0 %v22584_v27  ;;  %19508 = vmatpush3.bf16.msra.mxu1 %v22590_v9 }
 0x855   :  { %v15526_v0 = vadd.f32 %v15525_v6, %v15485_v19  ;;  %v15566_v28 = vpop.f32.mrf.mxu1  ;;  %19509 = vmatprep.subr.bf16.mxu1 %v22626_v42  ;;  %19515 = vmatprep.mubr.msk.bf16.mxu1 %vm22627_vm0, %v22626_v42  ;;  %v15565_v18 = vadd.f32 %v15564_v33, %v15524_v32 }
 0x856   :  { %v15527_v41 = vpop.f32.mrf.mxu0 }
 0x857   :  { %v15567_v26 = vadd.f32 %v15566_v28, %v15526_v0  ;;  %v15568_v44 = vpop.f32.mrf.mxu1  ;;  %19459 = vmatpush3.bf16.msra.mxu0 %v22585_v50  ;;  %v15861_v21 = vmax.f32 %v15565_v18, 0.0 }
 0x858   :  { %v15528_v14 = vpop.f32.mrf.mxu0  ;;  %19460 = vmatprep.subr.bf16.mxu0 %v22586_v60  ;;  %19510 = vmatpush3.bf16.msra.mxu1 %v22591_v22 }
 0x859   :  { %v15862_v54 = vmax.f32 %v15567_v26, 0.0  ;;  %v15569_v48 = vpop.f32.mrf.mxu1  ;;  %19511 = vmatprep.subr.bf16.mxu1 %v22626_v42  ;;  %v15874_v1 = vpack.c.bf16 %v15861_v21, %v15861_v21  ;;  %v19024_v26 = vld [vmem:[%s29644_s6] ss:$0 sm:$0xff]  ;;  %s22628_s6 = smov [#allocation2]  }
 0x85a   :  { %s16974_s0 = sshll.u32 %s22628_s6, 4  ;;  %s16975_s0 = int_to_ptr.vmem [resolvable:$true] %s16974_s0 }
 0x85b   :  { %v15875_v38 = vpack.c.bf16 %v15862_v54, %v15862_v54  ;;  %19461 = vmatpush3.bf16.msra.mxu0 %v22587_v12  ;;  %s22603_s30 = scalar_lea.vmem %s16975_s0, 128  ;;  %p22608_p1 = scmp.lt.s32.totalorder %s16975_s0, %s16975_s0 }
 0x85c   :  { %19462 = vmatprep.subr.bf16.mxu0 %v22588_v52  ;;  %19512 = vmatpush3.bf16.msra.mxu1 %v22592_v36  ;;  %p22604_p0 = scmp.ne.s32.totalorder %s16975_s0, %s22603_s30  ;;  %p22609_p2 = scmp.lt.s32.totalorder %s22603_s30, %s22603_s30 }
 0x85d   :  { %16919 = vmatprep.mubr.bf16.mxu0 %v15875_v38  ;;  %19513 = vmatprep.subr.bf16.mxu1 %v22626_v42 }
 0x85e   :  { %p22610_p3 = por %p22609_p2, %p22608_p1 }
 0x85f   :  { %19463 = vmatpush3.bf16.msra.mxu0 %v22589_v49 }
 0x860   :  { %19514 = vmatpush3.bf16.msra.mxu1 %v22593_v13  ;;  %p22611_p4 = pnand %p22610_p3, %p22604_p0 }
 0x862   :  { %16920 = vmatmul.mubr.bf16.vlgmr.msra.gmra.mxu0 %v15874_v1 }
 0x872   :  { %v19217_v40 = vpop.f32.mrf.mxu0 }
 0x873   :  { %v19239_v35 = vpop.f32.mrf.mxu1 }
 0x874   :  { %v19218_v45 = vpop.f32.mrf.mxu0 }
 0x875   :  { %v19219_v24 = vadd.f32 %v19218_v45, %v19217_v40  ;;  %v19240_v30 = vpop.f32.mrf.mxu1 }
 0x876   :  { %v19241_v51 = vadd.f32 %v19240_v30, %v19239_v35  ;;  %v19220_v4 = vpop.f32.mrf.mxu0 }
 0x877   :  { %v15606_v53 = vadd.f32 %v19219_v24, %v7231_v47  ;;  %v19242_v7 = vpop.f32.mrf.mxu1 }
 0x878   :  { %v19221_v42 = vpop.f32.mrf.mxu0 }
 0x879   :  { %v15646_v10 = vadd.f32 %v19241_v51, %v15606_v53  ;;  %v19243_v37 = vpop.f32.mrf.mxu1 }
 0x892   :  { %v19261_v11 = vpop.f32.mrf.mxu0 }
 0x893   :  { %v19283_v55 = vpop.f32.mrf.mxu1 }
 0x894   :  { %v19262_v23 = vpop.f32.mrf.mxu0 }
 0x895   :  { %v19284_v29 = vpop.f32.mrf.mxu1  ;;  %v19263_v3 = vadd.f32 %v19262_v23, %v19261_v11 }
 0x896   :  { %v19264_v56 = vpop.f32.mrf.mxu0  ;;  %v19285_v46 = vadd.f32 %v19284_v29, %v19283_v55 }
 0x897   :  { %v19286_v15 = vpop.f32.mrf.mxu1  ;;  %v15686_v39 = vadd.f32 %v19263_v3, %v15646_v10 }
 0x898   :  { %v19265_v57 = vpop.f32.mrf.mxu0 }
 0x899   :  { %v19287_v63 = vpop.f32.mrf.mxu1  ;;  %v15726_v27 = vadd.f32 %v19285_v46, %v15686_v39 }
 0x8b2   :  { %v19305_v25 = vpop.f32.mrf.mxu0 }
 0x8b3   :  { %v19327_v20 = vpop.f32.mrf.mxu1 }
 0x8b4   :  { %v19306_v43 = vpop.f32.mrf.mxu0 }
 0x8b5   :  { %v19328_v58 = vpop.f32.mrf.mxu1  ;;  %v19307_v5 = vadd.f32 %v19306_v43, %v19305_v25 }
 0x8b6   :  { %v19308_v2 = vpop.f32.mrf.mxu0  ;;  %v19329_v16 = vadd.f32 %v19328_v58, %v19327_v20 }
 0x8b7   :  { %v19330_v17 = vpop.f32.mrf.mxu1  ;;  %v15766_v9 = vadd.f32 %v19307_v5, %v15726_v27 }
 0x8b8   :  { %v19309_v62 = vpop.f32.mrf.mxu0 }
 0x8b9   :  { %v19331_v8 = vpop.f32.mrf.mxu1  ;;  %v15806_v34 = vadd.f32 %v19329_v16, %v15766_v9 }
 0x8c2   :  { %v15845_v59 = vpop.f32.mrf.mxu0 }
 0x8c3   :  { %v15846_v31 = vadd.f32 %v15845_v59, %v15806_v34 }
 0x8c4   :  { %v19505_v19 = vpop.f32.mrf.mxu0 }
 0x8c5   :  { %v15863_v33 = vmax.f32 %v15846_v31, 0.0 }
 0x8c6   :  { %v15848_v50 = vpop.f32.mrf.mxu0 }
 0x8c7   :  { %v15876_v32 = vpack.c.bf16 %v15863_v33, %v15863_v33 }
 0x8c8   :  { %v19506_v6 = vpop.f32.mrf.mxu0 }
 0x8c9   :  { %19516 = vmatmul.mubr.msk.bf16.vlgmr.msra.gmra.mxu1 %vm13845_vm1, %v15876_v32 }
 0x8d3   :  { %v19354_v60 = vpop.f32.mrf.mxu1 }
 0x8d5   :  { %v19355_v22 = vpop.f32.mrf.mxu1 }
 0x8d6   :  { %v19356_v0 = vadd.f32 %v19355_v22, %v19354_v60 }
 0x8d7   :  { %v19357_v28 = vpop.f32.mrf.mxu1 }
 0x8d8   :  { %v16722_v18 = vadd.f32 %v19356_v0, %v19024_v26 }
 0x8d9   :  { %v19358_v41 = vpop.f32.mrf.mxu1 }
 0x8e2   :  { %v19376_v44 = vpop.f32.mrf.mxu0 }
 0x8e4   :  { %v19377_v12 = vpop.f32.mrf.mxu0 }
 0x8e5   :  { %v19378_v14 = vadd.f32 %v19377_v12, %v19376_v44 }
 0x8e6   :  { %v19379_v52 = vpop.f32.mrf.mxu0 }
 0x8e7   :  { %v16762_v36 = vadd.f32 %v19378_v14, %v16722_v18 }
 0x8e8   :  { %v19380_v54 = vpop.f32.mrf.mxu0 }
 0x8f3   :  { %v19398_v48 = vpop.f32.mrf.mxu1 }
 0x8f5   :  { %v19399_v38 = vpop.f32.mrf.mxu1 }
 0x8f6   :  { %v19400_v49 = vadd.f32 %v19399_v38, %v19398_v48 }
 0x8f7   :  { %v19401_v21 = vpop.f32.mrf.mxu1 }
 0x8f8   :  { %v16802_v13 = vadd.f32 %v19400_v49, %v16762_v36 }
 0x8f9   :  { %v19402_v1 = vpop.f32.mrf.mxu1 }
 0x902   :  { %v19420_v40 = vpop.f32.mrf.mxu0 }
 0x904   :  { %v19421_v35 = vpop.f32.mrf.mxu0 }
 0x905   :  { %v19422_v61 = vadd.f32 %v19421_v35, %v19420_v40 }
 0x906   :  { %v19423_v47 = vpop.f32.mrf.mxu0 }
 0x907   :  { %v16842_v45 = vadd.f32 %v19422_v61, %v16802_v13 }
 0x908   :  { %v19424_v24 = vpop.f32.mrf.mxu0 }
 0x913   :  { %v19442_v30 = vpop.f32.mrf.mxu1 }
 0x915   :  { %v19443_v51 = vpop.f32.mrf.mxu1 }
 0x916   :  { %v19444_v4 = vadd.f32 %v19443_v51, %v19442_v30 }
 0x917   :  { %v19445_v53 = vpop.f32.mrf.mxu1 }
 0x918   :  { %v16882_v7 = vadd.f32 %v19444_v4, %v16842_v45 }
 0x919   :  { %v19446_v42 = vpop.f32.mrf.mxu1 }
 0x922   :  { %v19464_v10 = vpop.f32.mrf.mxu0 }
 0x924   :  { %v19465_v37 = vpop.f32.mrf.mxu0 }
 0x925   :  { %v19466_v11 = vadd.f32 %v19465_v37, %v19464_v10 }
 0x926   :  { %v19467_v55 = vpop.f32.mrf.mxu0 }
 0x927   :  { %v16922_v23 = vadd.f32 %v19466_v11, %v16882_v7 }
 0x928   :  { %v19468_v29 = vpop.f32.mrf.mxu0 }
 0x989   :  { %v16961_v56 = vpop.f32.mrf.mxu1 }
 0x98a   :  { %v16962_v15 = vadd.f32 %v16961_v56, %v16922_v23 }
 0x98b   :  { %v19517_v57 = vpop.f32.mrf.mxu1 }
 0x98c   :  { %16967 = vst [vmem:[#allocation2] sm:$0xff] %v16962_v15 }
 0x98d   :  { %v16964_v63 = vpop.f32.mrf.mxu1 }
 0x98e   :  { %22614 = shalt.err (!%p22611_p4)
}
 0x98f   :  { %16977 = dma.vmem_to_hbm [thread:$0]  %s16975_s0, 128, %s29645_s7, [#allocation3]   ;;  %v19518_v25 = vpop.f32.mrf.mxu1 }
 0x990   :  { %22623 = dma.done.wait [#allocation3], 128  }
 0x991   :  { %22624 = vsyncadd [#allocation3], 4294967168 }
 0x992   :  { %16981 = vsyncpa [#allocation3], 1 }

</bundles_post_ra>
